<compile_context>
chip_gen: v7x
topology: tpu7x:2x2x1
jax: 0.10.0
libtpu: 0.0.40
codegen_flags: <defaults>
</compile_context>

<pallas_src>
import jax
import jax.numpy as jnp
from jax import lax
from jax.experimental import pallas as pl
from jax.experimental.pallas import tpu as pltpu

LANE = 128
_VMEM_TILE_BUDGET = 24 * 1024 * 1024   # sized so tiles also fit v7x's 64 MiB VMEM


def _round_up(x, m):
    return (x + m - 1) // m * m


# ---------------------------------------------------------------------------
# Kernel bodies
# ---------------------------------------------------------------------------
def _bigru_attention(x_ref, wi_ref, bi_ref, wh_ref, bh_ref, awf_ref, awb_ref,
                     gif_scr, gib_scr, fwd_scr, bwd_scr):
    """Fused bidirectional GRU over time + additive attention pooling.

    x_ref   : (T, N, D) bf16 time-major input tile
    wi_ref  : (D, 6*Hp) bf16   [fwd r|z|n | bwd r|z|n], each gate Hp wide
    bi_ref  : (1, 6*Hp) f32
    wh_ref  : (2*Hp, 6*Hp) bf16 block-diagonal hidden weights
    bh_ref  : (1, 6*Hp) f32
    awf/awb : (1, Hp) f32 attention vector halves (zero padded past H)
    gif/gib : (T, N, 3*Hp) f32 precomputed input-side gates (fwd / bwd)
    fwd/bwd : (T, N, Hp) f32 per-step hidden states
    returns : (ctx_f, ctx_b) each (N, Hp) f32 attention-pooled context halves
    """
    T, N, D = x_ref.shape
    Hp = fwd_scr.shape[-1]
    G = 3 * Hp

    # --- hoisted input projection: one big MXU matmul, bias folded ---------
    x_all = x_ref[...].reshape(T * N, D).astype(jnp.bfloat16)
    gi = jnp.dot(x_all, wi_ref[...], preferred_element_type=jnp.float32)
    gi = (gi + bi_ref[...]).reshape(T, N, 2 * G)
    gif_scr[...] = gi[:, :, :G]
    gib_scr[...] = gi[:, :, G:]

    # loop-invariant weight loads hoisted out of the recurrence
    wh = wh_ref[...]
    bh = bh_ref[...]

    def gates(gi_d, gh_d, h_d):
        # all slices are Hp (multiple-of-128) aligned -> no cross-lane shuffles
        r = jax.nn.sigmoid(gi_d[:, :Hp] + gh_d[:, :Hp])
        z = jax.nn.sigmoid(gi_d[:, Hp:2 * Hp] + gh_d[:, Hp:2 * Hp])
        n = jnp.tanh(gi_d[:, 2 * Hp:] + r * gh_d[:, 2 * Hp:])
        return (1.0 - z) * n + z * h_d

    def step(i, h_cat):
        tb = T - 1 - i
        # one block-diagonal hidden matmul for both directions
        gh = jnp.dot(h_cat.astype(jnp.bfloat16), wh,
                     preferred_element_type=jnp.float32) + bh       # (N, 6Hp)
        h_f = gates(gif_scr[i], gh[:, :G], h_cat[:, :Hp])
        h_b = gates(gib_scr[tb], gh[:, G:], h_cat[:, Hp:])
        fwd_scr[i] = h_f
        bwd_scr[tb] = h_b
        return jnp.concatenate([h_f, h_b], axis=-1)

    h0 = jnp.zeros((N, 2 * Hp), jnp.float32)
    if T <= 32:                      # fully unroll the short recurrence
        h = h0
        for i in range(T):
            h = step(i, h)
    else:
        lax.fori_loop(0, T, step, h0, unroll=4)

    # --- additive attention over time (softmax over T) ---------------------
    # No concat([fwd, bwd]); the attention bias is dropped (cancels in softmax).
    hf = fwd_scr[...]                                    # (T, N, Hp) f32
    hb = bwd_scr[...]
    aw_f = awf_ref[...].reshape(1, 1, Hp)
    aw_b = awb_ref[...].reshape(1, 1, Hp)
    logits = (jnp.sum(hf * aw_f, axis=-1, keepdims=True)
              + jnp.sum(hb * aw_b, axis=-1, keepdims=True))         # (T, N, 1)
    m = jnp.max(logits, axis=0, keepdims=True)
    e = jnp.exp(logits - m)
    w = e * pl.reciprocal(jnp.sum(e, axis=0, keepdims=True), approx=True)
    ctx_f = jnp.sum(w * hf, axis=0)                      # (N, Hp)
    ctx_b = jnp.sum(w * hb, axis=0)
    return ctx_f, ctx_b


def _word_kernel(x_ref, wi, bi, wh, bh, awf, awb, out_ref,
                 gif_scr, gib_scr, fwd_scr, bwd_scr):
    Hp = fwd_scr.shape[-1]
    ctx_f, ctx_b = _bigru_attention(x_ref, wi, bi, wh, bh, awf, awb,
                                    gif_scr, gib_scr, fwd_scr, bwd_scr)
    # write the two halves separately (lane-aligned) -> no (N, 2Hp) relayout
    out_ref[:, :Hp] = ctx_f.astype(out_ref.dtype)
    out_ref[:, Hp:] = ctx_b.astype(out_ref.dtype)


def _sentence_kernel(x_ref, wi, bi, wh, bh, awf, awb, fcwf, fcwb, fcb, out_ref,
                     gif_scr, gib_scr, fwd_scr, bwd_scr):
    ctx_f, ctx_b = _bigru_attention(x_ref, wi, bi, wh, bh, awf, awb,
                                    gif_scr, gib_scr, fwd_scr, bwd_scr)
    out = (jnp.dot(ctx_f.astype(jnp.bfloat16), fcwf[...],
                   preferred_element_type=jnp.float32)
           + jnp.dot(ctx_b.astype(jnp.bfloat16), fcwb[...],
                     preferred_element_type=jnp.float32)
           + fcb[...])
    out_ref[...] = out.astype(out_ref.dtype)


# ---------------------------------------------------------------------------
# pallas_call wrappers (grid over the N = batch*sentence axis)
# ---------------------------------------------------------------------------
def _const_spec(shape):
    nd = len(shape)
    return pl.BlockSpec(shape, lambda i: (0,) * nd)


def _pick_n_tile(n, t, d, hp, max_tile=256):
    g = 3 * hp
    per_row = t * (2 * 2 * d        # x tile (bf16), double-buffered
                   + 2 * g * 4      # gi scratch (both directions, f32)
                   + 2 * hp * 4)    # fwd/bwd hidden-state scratch (f32)
    tile = _VMEM_TILE_BUDGET // max(per_row, 1)
    tile = max(8, min(max_tile, (tile // 8) * 8))
    return n if n <= tile else tile


def _run_level(kernel, x_tnd, p, extra_weights, out_dim, out_dtype):
    T, N, D = x_tnd.shape
    Hp = p["awf"].shape[-1]
    G = 3 * Hp
    tile = _pick_n_tile(N, T, D, Hp)
    grid = (pl.cdiv(N, tile),)
    weights = (p["wi"], p["bi"], p["wh"], p["bh"], p["awf"], p["awb"]) \
        + tuple(extra_weights)
    in_specs = ([pl.BlockSpec((T, tile, D), lambda i: (0, i, 0))]
                + [_const_spec(w.shape) for w in weights])
    return pl.pallas_call(
        kernel,
        out_shape=jax.ShapeDtypeStruct((N, out_dim), out_dtype),
        grid=grid,
        in_specs=in_specs,
        out_specs=pl.BlockSpec((tile, out_dim), lambda i: (i, 0)),
        scratch_shapes=[pltpu.VMEM((T, tile, G), jnp.float32),
                        pltpu.VMEM((T, tile, G), jnp.float32),
                        pltpu.VMEM((T, tile, Hp), jnp.float32),
                        pltpu.VMEM((T, tile, Hp), jnp.float32)],
        compiler_params=pltpu.CompilerParams(
            dimension_semantics=("parallel",),
            vmem_limit_bytes=48 * 1024 * 1024),
    )(x_tnd, *weights)


def word_attention(x_tnd, p):
    """x_tnd: (T=max_sent_len, N=batch*sent_num, D) bf16 -> (N, 2*Hp) bf16."""
    Hp = p["awf"].shape[-1]
    return _run_level(_word_kernel, x_tnd, p, (), 2 * Hp, jnp.bfloat16)


def sentence_attention(x_tnd, p):
    """x_tnd: (T=max_sent_num, N=batch, 2*Hp_w) bf16 -> (N, num_classes) f32."""
    C = p["fcb"].shape[-1]
    return _run_level(_sentence_kernel, x_tnd, p,
                      (p["fcwf"], p["fcwb"], p["fcb"]), C, jnp.float32)


# ---------------------------------------------------------------------------
# Parameter construction (PyTorch layout) and packing into the kernel layout
# ---------------------------------------------------------------------------
def _uniform(key, shape, scale=0.1):
    return jax.random.uniform(key, shape, jnp.float32, -scale, scale)


def make_raw_gru_dir(key, in_dim, h):
    k = jax.random.split(key, 4)
    # PyTorch GRU layout: weight_ih (3H, in), weight_hh (3H, H), gates r|z|n.
    return {"wih": _uniform(k[0], (3 * h, in_dim)),
            "whh": _uniform(k[1], (3 * h, h)),
            "bih": _uniform(k[2], (3 * h,)),
            "bhh": _uniform(k[3], (3 * h,))}


def make_raw_level(key, in_dim, h, num_classes=None):
    k = jax.random.split(key, 6)
    raw = {"f": make_raw_gru_dir(k[0], in_dim, h),
           "b": make_raw_gru_dir(k[1], in_dim, h),
           "aw": _uniform(k[2], (1, 2 * h)),     # nn.Linear(2H, 1).weight
           "ab": _uniform(k[3], (1, 1)),         # nn.Linear(2H, 1).bias
           "hidden": h, "in_dim": in_dim}
    if num_classes is not None:
        raw["fcw"] = _uniform(k[4], (num_classes, 2 * h))
        raw["fcb"] = _uniform(k[5], (num_classes,))
    return raw


def make_raw_han(key, vocab, embed_dim, word_h, sent_h, num_classes):
    k = jax.random.split(key, 3)
    return {"embedding": _uniform(k[0], (vocab, embed_dim), scale=1.0),
            "word": make_raw_level(k[1], embed_dim, word_h),
            "sent": make_raw_level(k[2], 2 * word_h, sent_h, num_classes)}


def _pack_gru_level(raw, in_blocks, in_pad):
    """Pack one BiGRU+attention level into the padded / fused kernel layout.

    in_blocks: list of (src_start, dst_start, length) mapping real input
               feature rows to (possibly padded) kernel input rows.
    """
    H = raw["hidden"]
    Hp = _round_up(H, LANE)
    G = 3 * Hp

    wi = jnp.zeros((in_pad, 2 * G), jnp.float32)
    bi = jnp.zeros((1, 2 * G), jnp.float32)
    wh = jnp.zeros((2 * Hp, 2 * G), jnp.float32)
    bh = jnp.zeros((1, 2 * G), jnp.float32)
    for d, dirp in enumerate((raw["f"], raw["b"])):
        col0 = d * G          # direction-major columns
        row0 = d * Hp         # block-diagonal hidden rows
        for g in range(3):    # gate order r, z, n
            cs = col0 + g * Hp
            w_g = dirp["wih"][g * H:(g + 1) * H, :]              # (H, in_dim)
            for (src, dst, ln) in in_blocks:
                wi = wi.at[dst:dst + ln, cs:cs + H].set(w_g[:, src:src + ln].T)
            bi = bi.at[0, cs:cs + H].set(dirp["bih"][g * H:(g + 1) * H])
            wh = wh.at[row0:row0 + H, cs:cs + H].set(
                dirp["whh"][g * H:(g + 1) * H, :].T)
            bh = bh.at[0, cs:cs + H].set(dirp["bhh"][g * H:(g + 1) * H])

    awf = jnp.zeros((1, Hp), jnp.float32).at[0, :H].set(raw["aw"][0, :H])
    awb = jnp.zeros((1, Hp), jnp.float32).at[0, :H].set(raw["aw"][0, H:])
    # Attention bias raw["ab"] intentionally dropped: constant shift cancels
    # inside the softmax over the time axis.
    packed = {"wi": wi.astype(jnp.bfloat16), "bi": bi,
              "wh": wh.astype(jnp.bfloat16), "bh": bh,
              "awf": awf, "awb": awb}
    if "fcw" in raw:
        C = raw["fcw"].shape[0]
        fcwf = jnp.zeros((Hp, C), jnp.float32).at[:H, :].set(raw["fcw"][:, :H].T)
        fcwb = jnp.zeros((Hp, C), jnp.float32).at[:H, :].set(raw["fcw"][:, H:].T)
        packed["fcwf"] = fcwf.astype(jnp.bfloat16)
        packed["fcwb"] = fcwb.astype(jnp.bfloat16)
        packed["fcb"] = raw["fcb"].reshape(1, C)
    return packed


def pack_han_params(raw):
    word_h = raw["word"]["hidden"]
    word_hp = _round_up(word_h, LANE)
    embed_dim = raw["word"]["in_dim"]
    word = _pack_gru_level(raw["word"], [(0, 0, embed_dim)], embed_dim)
    # the sentence level consumes the word level's padded [ctx_f | ctx_b] layout
    sent = _pack_gru_level(raw["sent"],
                           [(0, 0, word_h), (word_h, word_hp, word_h)],
                           2 * word_hp)
    return {"embedding": raw["embedding"], "word": word, "sent": sent}


# ---------------------------------------------------------------------------
# HAN forward (glue in plain JAX, heavy compute inside the kernels)
# ---------------------------------------------------------------------------
@jax.jit
def han_forward(x_tokens, params):
    B, S_num, S_len = x_tokens.shape
    x_flat = x_tokens.reshape(B * S_num, S_len)

    # Embedding gather + (N,T,D)->(T,N,D) layout change kept as XLA glue.
    # TODO(synk): fold the embedding gather + transpose into the word kernel
    # (scalar-prefetch token ids + DMA gather) to avoid the HBM round trip.
    emb = jnp.take(params["embedding"], x_flat, axis=0)          # (N, T, D) f32
    x_tnd = jnp.transpose(emb, (1, 0, 2)).astype(jnp.bfloat16)   # (T, N, D)
    # nn.Dropout after embedding: identity in eval mode.

    sv = word_attention(x_tnd, params["word"])                   # (N, 2Hp_w) bf16
    hp2 = sv.shape[-1]
    sv = sv.reshape(B, S_num, hp2).transpose(1, 0, 2)            # (S_num, B, 2Hp_w)

    # nn.Dropout before fc: identity in eval mode.
    return sentence_attention(sv, params["sent"])                # (B, num_classes)


# ---------------------------------------------------------------------------
# Pure-JAX f32 reference (mirrors the PyTorch module) for a sanity check
# ---------------------------------------------------------------------------
def _gru_dir_ref(x, prm, reverse):
    H = prm["whh"].shape[1]

    def step(h, xt):
        gi = xt @ prm["wih"].T + prm["bih"]
        gh = h @ prm["whh"].T + prm["bhh"]
        r = jax.nn.sigmoid(gi[:, :H] + gh[:, :H])
        z = jax.nn.sigmoid(gi[:, H:2 * H] + gh[:, H:2 * H])
        n = jnp.tanh(gi[:, 2 * H:] + r * gh[:, 2 * H:])
        h = (1.0 - z) * n + z * h
        return h, h

    xs = jnp.transpose(x, (1, 0, 2))
    if reverse:
        xs = xs[::-1]
    _, hs = lax.scan(step, jnp.zeros((x.shape[0], H), jnp.float32), xs)
    if reverse:
        hs = hs[::-1]
    return jnp.transpose(hs, (1, 0, 2))


def _bigru_attn_ref(x, raw):
    hf = _gru_dir_ref(x, raw["f"], False)
    hb = _gru_dir_ref(x, raw["b"], True)
    g = jnp.concatenate([hf, hb], axis=-1)
    w = jax.nn.softmax(g @ raw["aw"].T + raw["ab"], axis=1)
    return jnp.sum(w * g, axis=1)


def han_ref(x_tokens, raw):
    B, S, L = x_tokens.shape
    emb = raw["embedding"][x_tokens.reshape(B * S, L)]
    sv = _bigru_attn_ref(emb, raw["word"]).reshape(B, S, -1)
    ctx = _bigru_attn_ref(sv, raw["sent"])
    return ctx @ raw["sent"]["fcw"].T + raw["sent"]["fcb"]


# ---------------------------------------------------------------------------
if __name__ == "__main__":
    VOCAB = 64
    NUM_CLASSES = 8
    EMBED_DIM = 64
    WORD_HIDDEN = 64
    SENT_HIDDEN = 64
    MAX_SENT_LEN = 8
    MAX_SENT_NUM = 4
    BATCH = 2

    root = jax.random.PRNGKey(0)
    k_params, k_x = jax.random.split(root)

    raw = make_raw_han(k_params, VOCAB, EMBED_DIM, WORD_HIDDEN, SENT_HIDDEN,
                       NUM_CLASSES)
    params = pack_han_params(raw)

    x = jax.random.randint(k_x, (BATCH, MAX_SENT_NUM, MAX_SENT_LEN),
                           0, VOCAB, dtype=jnp.int32)

    out = jax.block_until_ready(han_forward(x, params))
    ref = jax.block_until_ready(han_ref(x, raw))

    assert out.shape == (BATCH, NUM_CLASSES), out.shape
    assert bool(jnp.all(jnp.isfinite(out)))
    err = float(jnp.max(jnp.abs(out - ref)))
    assert err < 5e-2, f"max abs error vs f32 reference: {err}"
    print("KERNEL_OK")
</pallas_src>

<mosaic_0001>
module attributes {stable_mosaic.version = 11 : i64} {
  func.func @_word_kernel(%arg0: i32, %arg1: memref<8x8x64xbf16, #tpu.memory_space<vmem>>, %arg2: memref<64x768xbf16, #tpu.memory_space<vmem>>, %arg3: memref<1x768xf32, #tpu.memory_space<vmem>>, %arg4: memref<256x768xbf16, #tpu.memory_space<vmem>>, %arg5: memref<1x768xf32, #tpu.memory_space<vmem>>, %arg6: memref<1x128xf32, #tpu.memory_space<vmem>>, %arg7: memref<1x128xf32, #tpu.memory_space<vmem>>, %arg8: memref<8x256xbf16, #tpu.memory_space<vmem>>, %arg9: memref<8x8x384xf32, #tpu.memory_space<vmem>>, %arg10: memref<8x8x384xf32, #tpu.memory_space<vmem>>, %arg11: memref<8x8x128xf32, #tpu.memory_space<vmem>>, %arg12: memref<8x8x128xf32, #tpu.memory_space<vmem>>) attributes {dimension_semantics = [#tpu.dimension_semantics<parallel>], iteration_bounds = array<i64: 1>, scalar_prefetch = 0 : i64, scratch_operands = 4 : i64, tpu.core_type = #tpu.core_type<tc>, window_params = [{transform_indices = @transform_0, window_bounds = array<i64: 8, 8, 64>}, {pipeline_mode = #tpu.pipeline_mode<synchronous>, transform_indices = @transform_1, window_bounds = array<i64: 64, 768>}, {pipeline_mode = #tpu.pipeline_mode<synchronous>, transform_indices = @transform_2, window_bounds = array<i64: 1, 768>}, {pipeline_mode = #tpu.pipeline_mode<synchronous>, transform_indices = @transform_3, window_bounds = array<i64: 256, 768>}, {pipeline_mode = #tpu.pipeline_mode<synchronous>, transform_indices = @transform_4, window_bounds = array<i64: 1, 768>}, {pipeline_mode = #tpu.pipeline_mode<synchronous>, transform_indices = @transform_5, window_bounds = array<i64: 1, 128>}, {pipeline_mode = #tpu.pipeline_mode<synchronous>, transform_indices = @transform_6, window_bounds = array<i64: 1, 128>}, {transform_indices = @transform_7, window_bounds = array<i64: 8, 256>}]} {
    %c0 = arith.constant 0 : index
    %c0_0 = arith.constant 0 : index
    %c0_1 = arith.constant 0 : index
    %0 = vector.load %arg1[%c0, %c0_0, %c0_1] : memref<8x8x64xbf16, #tpu.memory_space<vmem>>, vector<8x8x64xbf16>
    %1 = vector.shape_cast %0 : vector<8x8x64xbf16> to vector<64x64xbf16>
    %c0_2 = arith.constant 0 : index
    %c0_3 = arith.constant 0 : index
    %2 = vector.load %arg2[%c0_2, %c0_3] : memref<64x768xbf16, #tpu.memory_space<vmem>>, vector<64x768xbf16>
    %cst = arith.constant dense<0.000000e+00> : vector<64x768xf32>
    %3 = tpu.matmul %1, %2, %cst {dimension_numbers = #tpu.dot_dimension_numbers<[1], [0], [0], [1], [0, 0, 1, 1], [], []>} : vector<64x64xbf16>, vector<64x768xbf16>, vector<64x768xf32> -> vector<64x768xf32>
    %c0_4 = arith.constant 0 : index
    %c0_5 = arith.constant 0 : index
    %4 = vector.load %arg3[%c0_4, %c0_5] : memref<1x768xf32, #tpu.memory_space<vmem>>, vector<1x768xf32>
    %5 = vector.broadcast %4 : vector<1x768xf32> to vector<64x768xf32>
    %6 = arith.addf %3, %5 : vector<64x768xf32>
    %7 = vector.shape_cast %6 : vector<64x768xf32> to vector<8x8x768xf32>
    %8 = vector.extract_strided_slice %7 {offsets = [0, 0, 0], sizes = [8, 8, 384], strides = [1, 1, 1]} : vector<8x8x768xf32> to vector<8x8x384xf32>
    %c0_6 = arith.constant 0 : index
    %c0_7 = arith.constant 0 : index
    %c0_8 = arith.constant 0 : index
    %9 = vector.load %arg9[%c0_6, %c0_7, %c0_8] : memref<8x8x384xf32, #tpu.memory_space<vmem>>, vector<8x8x384xf32>
    tpu.vector_store %arg9[%c0_6, %c0_7, %c0_8], %8 {strides = array<i32>} : memref<8x8x384xf32, #tpu.memory_space<vmem>>, vector<8x8x384xf32>,
    %10 = vector.extract_strided_slice %7 {offsets = [0, 0, 384], sizes = [8, 8, 384], strides = [1, 1, 1]} : vector<8x8x768xf32> to vector<8x8x384xf32>
    %c0_9 = arith.constant 0 : index
    %c0_10 = arith.constant 0 : index
    %c0_11 = arith.constant 0 : index
    %11 = vector.load %arg10[%c0_9, %c0_10, %c0_11] : memref<8x8x384xf32, #tpu.memory_space<vmem>>, vector<8x8x384xf32>
    tpu.vector_store %arg10[%c0_9, %c0_10, %c0_11], %10 {strides = array<i32>} : memref<8x8x384xf32, #tpu.memory_space<vmem>>, vector<8x8x384xf32>,
    %c0_12 = arith.constant 0 : index
    %c0_13 = arith.constant 0 : index
    %12 = vector.load %arg4[%c0_12, %c0_13] : memref<256x768xbf16, #tpu.memory_space<vmem>>, vector<256x768xbf16>
    %c0_14 = arith.constant 0 : index
    %c0_15 = arith.constant 0 : index
    %13 = vector.load %arg5[%c0_14, %c0_15] : memref<1x768xf32, #tpu.memory_space<vmem>>, vector<1x768xf32>
    %cst_16 = arith.constant 0.000000e+00 : f32
    %14 = vector.broadcast %cst_16 : f32 to vector<8x256xf32>
    %15 = arith.truncf %14 : vector<8x256xf32> to vector<8x256xbf16>
    %cst_17 = arith.constant dense<0.000000e+00> : vector<8x768xf32>
    %16 = tpu.matmul %15, %12, %cst_17 {dimension_numbers = #tpu.dot_dimension_numbers<[1], [0], [0], [1], [0, 0, 1, 1], [], []>} : vector<8x256xbf16>, vector<256x768xbf16>, vector<8x768xf32> -> vector<8x768xf32>
    %17 = vector.broadcast %13 : vector<1x768xf32> to vector<8x768xf32>
    %18 = arith.addf %16, %17 : vector<8x768xf32>
    %c0_18 = arith.constant 0 : index
    %c0_19 = arith.constant 0 : index
    %c0_20 = arith.constant 0 : index
    %19 = vector.load %arg9[%c0_18, %c0_19, %c0_20] : memref<8x8x384xf32, #tpu.memory_space<vmem>>, vector<1x8x384xf32>
    %20 = vector.shape_cast %19 : vector<1x8x384xf32> to vector<8x384xf32>
    %21 = vector.extract_strided_slice %18 {offsets = [0, 0], sizes = [8, 384], strides = [1, 1]} : vector<8x768xf32> to vector<8x384xf32>
    %22 = vector.extract_strided_slice %14 {offsets = [0, 0], sizes = [8, 128], strides = [1, 1]} : vector<8x256xf32> to vector<8x128xf32>
    %23 = vector.extract_strided_slice %20 {offsets = [0, 0], sizes = [8, 128], strides = [1, 1]} : vector<8x384xf32> to vector<8x128xf32>
    %24 = vector.extract_strided_slice %21 {offsets = [0, 0], sizes = [8, 128], strides = [1, 1]} : vector<8x384xf32> to vector<8x128xf32>
    %25 = arith.addf %23, %24 : vector<8x128xf32>
    %26 = arith.negf %25 : vector<8x128xf32>
    %27 = math.exp %26 : vector<8x128xf32>
    %cst_21 = arith.constant 1.000000e+00 : f32
    %28 = vector.broadcast %cst_21 : f32 to vector<8x128xf32>
    %29 = arith.addf %28, %27 : vector<8x128xf32>
    %30 = arith.divf %28, %29 : vector<8x128xf32>
    %31 = vector.extract_strided_slice %20 {offsets = [0, 128], sizes = [8, 128], strides = [1, 1]} : vector<8x384xf32> to vector<8x128xf32>
    %32 = vector.extract_strided_slice %21 {offsets = [0, 128], sizes = [8, 128], strides = [1, 1]} : vector<8x384xf32> to vector<8x128xf32>
    %33 = arith.addf %31, %32 : vector<8x128xf32>
    %34 = arith.negf %33 : vector<8x128xf32>
    %35 = math.exp %34 : vector<8x128xf32>
    %cst_22 = arith.constant 1.000000e+00 : f32
    %36 = vector.broadcast %cst_22 : f32 to vector<8x128xf32>
    %37 = arith.addf %36, %35 : vector<8x128xf32>
    %38 = arith.divf %36, %37 : vector<8x128xf32>
    %39 = vector.extract_strided_slice %20 {offsets = [0, 256], sizes = [8, 128], strides = [1, 1]} : vector<8x384xf32> to vector<8x128xf32>
    %40 = vector.extract_strided_slice %21 {offsets = [0, 256], sizes = [8, 128], strides = [1, 1]} : vector<8x384xf32> to vector<8x128xf32>
    %41 = arith.mulf %30, %40 : vector<8x128xf32>
    %42 = arith.addf %39, %41 : vector<8x128xf32>
    %43 = math.tanh %42 : vector<8x128xf32>
    %cst_23 = arith.constant 1.000000e+00 : f32
    %44 = vector.broadcast %cst_23 : f32 to vector<8x128xf32>
    %45 = arith.subf %44, %38 : vector<8x128xf32>
    %46 = arith.mulf %45, %43 : vector<8x128xf32>
    %47 = arith.mulf %38, %22 : vector<8x128xf32>
    %48 = arith.addf %46, %47 : vector<8x128xf32>
    %c7 = arith.constant 7 : index
    %c0_24 = arith.constant 0 : index
    %c0_25 = arith.constant 0 : index
    %49 = vector.load %arg10[%c7, %c0_24, %c0_25] : memref<8x8x384xf32, #tpu.memory_space<vmem>>, vector<1x8x384xf32>
    %50 = vector.shape_cast %49 : vector<1x8x384xf32> to vector<8x384xf32>
    %51 = vector.extract_strided_slice %18 {offsets = [0, 384], sizes = [8, 384], strides = [1, 1]} : vector<8x768xf32> to vector<8x384xf32>
    %52 = vector.extract_strided_slice %14 {offsets = [0, 128], sizes = [8, 128], strides = [1, 1]} : vector<8x256xf32> to vector<8x128xf32>
    %53 = vector.extract_strided_slice %50 {offsets = [0, 0], sizes = [8, 128], strides = [1, 1]} : vector<8x384xf32> to vector<8x128xf32>
    %54 = vector.extract_strided_slice %51 {offsets = [0, 0], sizes = [8, 128], strides = [1, 1]} : vector<8x384xf32> to vector<8x128xf32>
    %55 = arith.addf %53, %54 : vector<8x128xf32>
    %56 = arith.negf %55 : vector<8x128xf32>
    %57 = math.exp %56 : vector<8x128xf32>
    %cst_26 = arith.constant 1.000000e+00 : f32
    %58 = vector.broadcast %cst_26 : f32 to vector<8x128xf32>
    %59 = arith.addf %58, %57 : vector<8x128xf32>
    %60 = arith.divf %58, %59 : vector<8x128xf32>
    %61 = vector.extract_strided_slice %50 {offsets = [0, 128], sizes = [8, 128], strides = [1, 1]} : vector<8x384xf32> to vector<8x128xf32>
    %62 = vector.extract_strided_slice %51 {offsets = [0, 128], sizes = [8, 128], strides = [1, 1]} : vector<8x384xf32> to vector<8x128xf32>
    %63 = arith.addf %61, %62 : vector<8x128xf32>
    %64 = arith.negf %63 : vector<8x128xf32>
    %65 = math.exp %64 : vector<8x128xf32>
    %cst_27 = arith.constant 1.000000e+00 : f32
    %66 = vector.broadcast %cst_27 : f32 to vector<8x128xf32>
    %67 = arith.addf %66, %65 : vector<8x128xf32>
    %68 = arith.divf %66, %67 : vector<8x128xf32>
    %69 = vector.extract_strided_slice %50 {offsets = [0, 256], sizes = [8, 128], strides = [1, 1]} : vector<8x384xf32> to vector<8x128xf32>
    %70 = vector.extract_strided_slice %51 {offsets = [0, 256], sizes = [8, 128], strides = [1, 1]} : vector<8x384xf32> to vector<8x128xf32>
    %71 = arith.mulf %60, %70 : vector<8x128xf32>
    %72 = arith.addf %69, %71 : vector<8x128xf32>
    %73 = math.tanh %72 : vector<8x128xf32>
    %cst_28 = arith.constant 1.000000e+00 : f32
    %74 = vector.broadcast %cst_28 : f32 to vector<8x128xf32>
    %75 = arith.subf %74, %68 : vector<8x128xf32>
    %76 = arith.mulf %75, %73 : vector<8x128xf32>
    %77 = arith.mulf %68, %52 : vector<8x128xf32>
    %78 = arith.addf %76, %77 : vector<8x128xf32>
    %c0_29 = arith.constant 0 : index
    %c0_30 = arith.constant 0 : index
    %c0_31 = arith.constant 0 : index
    %79 = vector.load %arg11[%c0_29, %c0_30, %c0_31] : memref<8x8x128xf32, #tpu.memory_space<vmem>>, vector<1x8x128xf32>
    %80 = vector.shape_cast %79 : vector<1x8x128xf32> to vector<8x128xf32>
    %81 = vector.shape_cast %48 : vector<8x128xf32> to vector<1x8x128xf32>
    tpu.vector_store %arg11[%c0_29, %c0_30, %c0_31], %81 {strides = array<i32>} : memref<8x8x128xf32, #tpu.memory_space<vmem>>, vector<1x8x128xf32>,
    %c7_32 = arith.constant 7 : index
    %c0_33 = arith.constant 0 : index
    %c0_34 = arith.constant 0 : index
    %82 = vector.load %arg12[%c7_32, %c0_33, %c0_34] : memref<8x8x128xf32, #tpu.memory_space<vmem>>, vector<1x8x128xf32>
    %83 = vector.shape_cast %82 : vector<1x8x128xf32> to vector<8x128xf32>
    %84 = vector.shape_cast %78 : vector<8x128xf32> to vector<1x8x128xf32>
    tpu.vector_store %arg12[%c7_32, %c0_33, %c0_34], %84 {strides = array<i32>} : memref<8x8x128xf32, #tpu.memory_space<vmem>>, vector<1x8x128xf32>,
    %85 = tpu.concatenate %48, %78 in 1 : vector<8x128xf32>, vector<8x128xf32> -> vector<8x256xf32>
    %86 = arith.truncf %85 : vector<8x256xf32> to vector<8x256xbf16>
    %cst_35 = arith.constant dense<0.000000e+00> : vector<8x768xf32>
    %87 = tpu.matmul %86, %12, %cst_35 {dimension_numbers = #tpu.dot_dimension_numbers<[1], [0], [0], [1], [0, 0, 1, 1], [], []>} : vector<8x256xbf16>, vector<256x768xbf16>, vector<8x768xf32> -> vector<8x768xf32>
    %88 = vector.broadcast %13 : vector<1x768xf32> to vector<8x768xf32>
    %89 = arith.addf %87, %88 : vector<8x768xf32>
    %c1 = arith.constant 1 : index
    %c0_36 = arith.constant 0 : index
    %c0_37 = arith.constant 0 : index
    %90 = vector.load %arg9[%c1, %c0_36, %c0_37] : memref<8x8x384xf32, #tpu.memory_space<vmem>>, vector<1x8x384xf32>
    %91 = vector.shape_cast %90 : vector<1x8x384xf32> to vector<8x384xf32>
    %92 = vector.extract_strided_slice %89 {offsets = [0, 0], sizes = [8, 384], strides = [1, 1]} : vector<8x768xf32> to vector<8x384xf32>
    %93 = vector.extract_strided_slice %85 {offsets = [0, 0], sizes = [8, 128], strides = [1, 1]} : vector<8x256xf32> to vector<8x128xf32>
    %94 = vector.extract_strided_slice %91 {offsets = [0, 0], sizes = [8, 128], strides = [1, 1]} : vector<8x384xf32> to vector<8x128xf32>
    %95 = vector.extract_strided_slice %92 {offsets = [0, 0], sizes = [8, 128], strides = [1, 1]} : vector<8x384xf32> to vector<8x128xf32>
    %96 = arith.addf %94, %95 : vector<8x128xf32>
    %97 = arith.negf %96 : vector<8x128xf32>
    %98 = math.exp %97 : vector<8x128xf32>
    %cst_38 = arith.constant 1.000000e+00 : f32
    %99 = vector.broadcast %cst_38 : f32 to vector<8x128xf32>
    %100 = arith.addf %99, %98 : vector<8x128xf32>
    %101 = arith.divf %99, %100 : vector<8x128xf32>
    %102 = vector.extract_strided_slice %91 {offsets = [0, 128], sizes = [8, 128], strides = [1, 1]} : vector<8x384xf32> to vector<8x128xf32>
    %103 = vector.extract_strided_slice %92 {offsets = [0, 128], sizes = [8, 128], strides = [1, 1]} : vector<8x384xf32> to vector<8x128xf32>
    %104 = arith.addf %102, %103 : vector<8x128xf32>
    %105 = arith.negf %104 : vector<8x128xf32>
    %106 = math.exp %105 : vector<8x128xf32>
    %cst_39 = arith.constant 1.000000e+00 : f32
    %107 = vector.broadcast %cst_39 : f32 to vector<8x128xf32>
    %108 = arith.addf %107, %106 : vector<8x128xf32>
    %109 = arith.divf %107, %108 : vector<8x128xf32>
    %110 = vector.extract_strided_slice %91 {offsets = [0, 256], sizes = [8, 128], strides = [1, 1]} : vector<8x384xf32> to vector<8x128xf32>
    %111 = vector.extract_strided_slice %92 {offsets = [0, 256], sizes = [8, 128], strides = [1, 1]} : vector<8x384xf32> to vector<8x128xf32>
    %112 = arith.mulf %101, %111 : vector<8x128xf32>
    %113 = arith.addf %110, %112 : vector<8x128xf32>
    %114 = math.tanh %113 : vector<8x128xf32>
    %cst_40 = arith.constant 1.000000e+00 : f32
    %115 = vector.broadcast %cst_40 : f32 to vector<8x128xf32>
    %116 = arith.subf %115, %109 : vector<8x128xf32>
    %117 = arith.mulf %116, %114 : vector<8x128xf32>
    %118 = arith.mulf %109, %93 : vector<8x128xf32>
    %119 = arith.addf %117, %118 : vector<8x128xf32>
    %c6 = arith.constant 6 : index
    %c0_41 = arith.constant 0 : index
    %c0_42 = arith.constant 0 : index
    %120 = vector.load %arg10[%c6, %c0_41, %c0_42] : memref<8x8x384xf32, #tpu.memory_space<vmem>>, vector<1x8x384xf32>
    %121 = vector.shape_cast %120 : vector<1x8x384xf32> to vector<8x384xf32>
    %122 = vector.extract_strided_slice %89 {offsets = [0, 384], sizes = [8, 384], strides = [1, 1]} : vector<8x768xf32> to vector<8x384xf32>
    %123 = vector.extract_strided_slice %85 {offsets = [0, 128], sizes = [8, 128], strides = [1, 1]} : vector<8x256xf32> to vector<8x128xf32>
    %124 = vector.extract_strided_slice %121 {offsets = [0, 0], sizes = [8, 128], strides = [1, 1]} : vector<8x384xf32> to vector<8x128xf32>
    %125 = vector.extract_strided_slice %122 {offsets = [0, 0], sizes = [8, 128], strides = [1, 1]} : vector<8x384xf32> to vector<8x128xf32>
    %126 = arith.addf %124, %125 : vector<8x128xf32>
    %127 = arith.negf %126 : vector<8x128xf32>
    %128 = math.exp %127 : vector<8x128xf32>
    %cst_43 = arith.constant 1.000000e+00 : f32
    %129 = vector.broadcast %cst_43 : f32 to vector<8x128xf32>
    %130 = arith.addf %129, %128 : vector<8x128xf32>
    %131 = arith.divf %129, %130 : vector<8x128xf32>
    %132 = vector.extract_strided_slice %121 {offsets = [0, 128], sizes = [8, 128], strides = [1, 1]} : vector<8x384xf32> to vector<8x128xf32>
    %133 = vector.extract_strided_slice %122 {offsets = [0, 128], sizes = [8, 128], strides = [1, 1]} : vector<8x384xf32> to vector<8x128xf32>
    %134 = arith.addf %132, %133 : vector<8x128xf32>
    %135 = arith.negf %134 : vector<8x128xf32>
    %136 = math.exp %135 : vector<8x128xf32>
    %cst_44 = arith.constant 1.000000e+00 : f32
    %137 = vector.broadcast %cst_44 : f32 to vector<8x128xf32>
    %138 = arith.addf %137, %136 : vector<8x128xf32>
    %139 = arith.divf %137, %138 : vector<8x128xf32>
    %140 = vector.extract_strided_slice %121 {offsets = [0, 256], sizes = [8, 128], strides = [1, 1]} : vector<8x384xf32> to vector<8x128xf32>
    %141 = vector.extract_strided_slice %122 {offsets = [0, 256], sizes = [8, 128], strides = [1, 1]} : vector<8x384xf32> to vector<8x128xf32>
    %142 = arith.mulf %131, %141 : vector<8x128xf32>
    %143 = arith.addf %140, %142 : vector<8x128xf32>
    %144 = math.tanh %143 : vector<8x128xf32>
    %cst_45 = arith.constant 1.000000e+00 : f32
    %145 = vector.broadcast %cst_45 : f32 to vector<8x128xf32>
    %146 = arith.subf %145, %139 : vector<8x128xf32>
    %147 = arith.mulf %146, %144 : vector<8x128xf32>
    %148 = arith.mulf %139, %123 : vector<8x128xf32>
    %149 = arith.addf %147, %148 : vector<8x128xf32>
    %c1_46 = arith.constant 1 : index
    %c0_47 = arith.constant 0 : index
    %c0_48 = arith.constant 0 : index
    %150 = vector.load %arg11[%c1_46, %c0_47, %c0_48] : memref<8x8x128xf32, #tpu.memory_space<vmem>>, vector<1x8x128xf32>
    %151 = vector.shape_cast %150 : vector<1x8x128xf32> to vector<8x128xf32>
    %152 = vector.shape_cast %119 : vector<8x128xf32> to vector<1x8x128xf32>
    tpu.vector_store %arg11[%c1_46, %c0_47, %c0_48], %152 {strides = array<i32>} : memref<8x8x128xf32, #tpu.memory_space<vmem>>, vector<1x8x128xf32>,
    %c6_49 = arith.constant 6 : index
    %c0_50 = arith.constant 0 : index
    %c0_51 = arith.constant 0 : index
    %153 = vector.load %arg12[%c6_49, %c0_50, %c0_51] : memref<8x8x128xf32, #tpu.memory_space<vmem>>, vector<1x8x128xf32>
    %154 = vector.shape_cast %153 : vector<1x8x128xf32> to vector<8x128xf32>
    %155 = vector.shape_cast %149 : vector<8x128xf32> to vector<1x8x128xf32>
    tpu.vector_store %arg12[%c6_49, %c0_50, %c0_51], %155 {strides = array<i32>} : memref<8x8x128xf32, #tpu.memory_space<vmem>>, vector<1x8x128xf32>,
    %156 = tpu.concatenate %119, %149 in 1 : vector<8x128xf32>, vector<8x128xf32> -> vector<8x256xf32>
    %157 = arith.truncf %156 : vector<8x256xf32> to vector<8x256xbf16>
    %cst_52 = arith.constant dense<0.000000e+00> : vector<8x768xf32>
    %158 = tpu.matmul %157, %12, %cst_52 {dimension_numbers = #tpu.dot_dimension_numbers<[1], [0], [0], [1], [0, 0, 1, 1], [], []>} : vector<8x256xbf16>, vector<256x768xbf16>, vector<8x768xf32> -> vector<8x768xf32>
    %159 = vector.broadcast %13 : vector<1x768xf32> to vector<8x768xf32>
    %160 = arith.addf %158, %159 : vector<8x768xf32>
    %c2 = arith.constant 2 : index
    %c0_53 = arith.constant 0 : index
    %c0_54 = arith.constant 0 : index
    %161 = vector.load %arg9[%c2, %c0_53, %c0_54] : memref<8x8x384xf32, #tpu.memory_space<vmem>>, vector<1x8x384xf32>
    %162 = vector.shape_cast %161 : vector<1x8x384xf32> to vector<8x384xf32>
    %163 = vector.extract_strided_slice %160 {offsets = [0, 0], sizes = [8, 384], strides = [1, 1]} : vector<8x768xf32> to vector<8x384xf32>
    %164 = vector.extract_strided_slice %156 {offsets = [0, 0], sizes = [8, 128], strides = [1, 1]} : vector<8x256xf32> to vector<8x128xf32>
    %165 = vector.extract_strided_slice %162 {offsets = [0, 0], sizes = [8, 128], strides = [1, 1]} : vector<8x384xf32> to vector<8x128xf32>
    %166 = vector.extract_strided_slice %163 {offsets = [0, 0], sizes = [8, 128], strides = [1, 1]} : vector<8x384xf32> to vector<8x128xf32>
    %167 = arith.addf %165, %166 : vector<8x128xf32>
    %168 = arith.negf %167 : vector<8x128xf32>
    %169 = math.exp %168 : vector<8x128xf32>
    %cst_55 = arith.constant 1.000000e+00 : f32
    %170 = vector.broadcast %cst_55 : f32 to vector<8x128xf32>
    %171 = arith.addf %170, %169 : vector<8x128xf32>
    %172 = arith.divf %170, %171 : vector<8x128xf32>
    %173 = vector.extract_strided_slice %162 {offsets = [0, 128], sizes = [8, 128], strides = [1, 1]} : vector<8x384xf32> to vector<8x128xf32>
    %174 = vector.extract_strided_slice %163 {offsets = [0, 128], sizes = [8, 128], strides = [1, 1]} : vector<8x384xf32> to vector<8x128xf32>
    %175 = arith.addf %173, %174 : vector<8x128xf32>
    %176 = arith.negf %175 : vector<8x128xf32>
    %177 = math.exp %176 : vector<8x128xf32>
    %cst_56 = arith.constant 1.000000e+00 : f32
    %178 = vector.broadcast %cst_56 : f32 to vector<8x128xf32>
    %179 = arith.addf %178, %177 : vector<8x128xf32>
    %180 = arith.divf %178, %179 : vector<8x128xf32>
    %181 = vector.extract_strided_slice %162 {offsets = [0, 256], sizes = [8, 128], strides = [1, 1]} : vector<8x384xf32> to vector<8x128xf32>
    %182 = vector.extract_strided_slice %163 {offsets = [0, 256], sizes = [8, 128], strides = [1, 1]} : vector<8x384xf32> to vector<8x128xf32>
    %183 = arith.mulf %172, %182 : vector<8x128xf32>
    %184 = arith.addf %181, %183 : vector<8x128xf32>
    %185 = math.tanh %184 : vector<8x128xf32>
    %cst_57 = arith.constant 1.000000e+00 : f32
    %186 = vector.broadcast %cst_57 : f32 to vector<8x128xf32>
    %187 = arith.subf %186, %180 : vector<8x128xf32>
    %188 = arith.mulf %187, %185 : vector<8x128xf32>
    %189 = arith.mulf %180, %164 : vector<8x128xf32>
    %190 = arith.addf %188, %189 : vector<8x128xf32>
    %c5 = arith.constant 5 : index
    %c0_58 = arith.constant 0 : index
    %c0_59 = arith.constant 0 : index
    %191 = vector.load %arg10[%c5, %c0_58, %c0_59] : memref<8x8x384xf32, #tpu.memory_space<vmem>>, vector<1x8x384xf32>
    %192 = vector.shape_cast %191 : vector<1x8x384xf32> to vector<8x384xf32>
    %193 = vector.extract_strided_slice %160 {offsets = [0, 384], sizes = [8, 384], strides = [1, 1]} : vector<8x768xf32> to vector<8x384xf32>
    %194 = vector.extract_strided_slice %156 {offsets = [0, 128], sizes = [8, 128], strides = [1, 1]} : vector<8x256xf32> to vector<8x128xf32>
    %195 = vector.extract_strided_slice %192 {offsets = [0, 0], sizes = [8, 128], strides = [1, 1]} : vector<8x384xf32> to vector<8x128xf32>
    %196 = vector.extract_strided_slice %193 {offsets = [0, 0], sizes = [8, 128], strides = [1, 1]} : vector<8x384xf32> to vector<8x128xf32>
    %197 = arith.addf %195, %196 : vector<8x128xf32>
    %198 = arith.negf %197 : vector<8x128xf32>
    %199 = math.exp %198 : vector<8x128xf32>
    %cst_60 = arith.constant 1.000000e+00 : f32
    %200 = vector.broadcast %cst_60 : f32 to vector<8x128xf32>
    %201 = arith.addf %200, %199 : vector<8x128xf32>
    %202 = arith.divf %200, %201 : vector<8x128xf32>
    %203 = vector.extract_strided_slice %192 {offsets = [0, 128], sizes = [8, 128], strides = [1, 1]} : vector<8x384xf32> to vector<8x128xf32>
    %204 = vector.extract_strided_slice %193 {offsets = [0, 128], sizes = [8, 128], strides = [1, 1]} : vector<8x384xf32> to vector<8x128xf32>
    %205 = arith.addf %203, %204 : vector<8x128xf32>
    %206 = arith.negf %205 : vector<8x128xf32>
    %207 = math.exp %206 : vector<8x128xf32>
    %cst_61 = arith.constant 1.000000e+00 : f32
    %208 = vector.broadcast %cst_61 : f32 to vector<8x128xf32>
    %209 = arith.addf %208, %207 : vector<8x128xf32>
    %210 = arith.divf %208, %209 : vector<8x128xf32>
    %211 = vector.extract_strided_slice %192 {offsets = [0, 256], sizes = [8, 128], strides = [1, 1]} : vector<8x384xf32> to vector<8x128xf32>
    %212 = vector.extract_strided_slice %193 {offsets = [0, 256], sizes = [8, 128], strides = [1, 1]} : vector<8x384xf32> to vector<8x128xf32>
    %213 = arith.mulf %202, %212 : vector<8x128xf32>
    %214 = arith.addf %211, %213 : vector<8x128xf32>
    %215 = math.tanh %214 : vector<8x128xf32>
    %cst_62 = arith.constant 1.000000e+00 : f32
    %216 = vector.broadcast %cst_62 : f32 to vector<8x128xf32>
    %217 = arith.subf %216, %210 : vector<8x128xf32>
    %218 = arith.mulf %217, %215 : vector<8x128xf32>
    %219 = arith.mulf %210, %194 : vector<8x128xf32>
    %220 = arith.addf %218, %219 : vector<8x128xf32>
    %c2_63 = arith.constant 2 : index
    %c0_64 = arith.constant 0 : index
    %c0_65 = arith.constant 0 : index
    %221 = vector.load %arg11[%c2_63, %c0_64, %c0_65] : memref<8x8x128xf32, #tpu.memory_space<vmem>>, vector<1x8x128xf32>
    %222 = vector.shape_cast %221 : vector<1x8x128xf32> to vector<8x128xf32>
    %223 = vector.shape_cast %190 : vector<8x128xf32> to vector<1x8x128xf32>
    tpu.vector_store %arg11[%c2_63, %c0_64, %c0_65], %223 {strides = array<i32>} : memref<8x8x128xf32, #tpu.memory_space<vmem>>, vector<1x8x128xf32>,
    %c5_66 = arith.constant 5 : index
    %c0_67 = arith.constant 0 : index
    %c0_68 = arith.constant 0 : index
    %224 = vector.load %arg12[%c5_66, %c0_67, %c0_68] : memref<8x8x128xf32, #tpu.memory_space<vmem>>, vector<1x8x128xf32>
    %225 = vector.shape_cast %224 : vector<1x8x128xf32> to vector<8x128xf32>
    %226 = vector.shape_cast %220 : vector<8x128xf32> to vector<1x8x128xf32>
    tpu.vector_store %arg12[%c5_66, %c0_67, %c0_68], %226 {strides = array<i32>} : memref<8x8x128xf32, #tpu.memory_space<vmem>>, vector<1x8x128xf32>,
    %227 = tpu.concatenate %190, %220 in 1 : vector<8x128xf32>, vector<8x128xf32> -> vector<8x256xf32>
    %228 = arith.truncf %227 : vector<8x256xf32> to vector<8x256xbf16>
    %cst_69 = arith.constant dense<0.000000e+00> : vector<8x768xf32>
    %229 = tpu.matmul %228, %12, %cst_69 {dimension_numbers = #tpu.dot_dimension_numbers<[1], [0], [0], [1], [0, 0, 1, 1], [], []>} : vector<8x256xbf16>, vector<256x768xbf16>, vector<8x768xf32> -> vector<8x768xf32>
    %230 = vector.broadcast %13 : vector<1x768xf32> to vector<8x768xf32>
    %231 = arith.addf %229, %230 : vector<8x768xf32>
    %c3 = arith.constant 3 : index
    %c0_70 = arith.constant 0 : index
    %c0_71 = arith.constant 0 : index
    %232 = vector.load %arg9[%c3, %c0_70, %c0_71] : memref<8x8x384xf32, #tpu.memory_space<vmem>>, vector<1x8x384xf32>
    %233 = vector.shape_cast %232 : vector<1x8x384xf32> to vector<8x384xf32>
    %234 = vector.extract_strided_slice %231 {offsets = [0, 0], sizes = [8, 384], strides = [1, 1]} : vector<8x768xf32> to vector<8x384xf32>
    %235 = vector.extract_strided_slice %227 {offsets = [0, 0], sizes = [8, 128], strides = [1, 1]} : vector<8x256xf32> to vector<8x128xf32>
    %236 = vector.extract_strided_slice %233 {offsets = [0, 0], sizes = [8, 128], strides = [1, 1]} : vector<8x384xf32> to vector<8x128xf32>
    %237 = vector.extract_strided_slice %234 {offsets = [0, 0], sizes = [8, 128], strides = [1, 1]} : vector<8x384xf32> to vector<8x128xf32>
    %238 = arith.addf %236, %237 : vector<8x128xf32>
    %239 = arith.negf %238 : vector<8x128xf32>
    %240 = math.exp %239 : vector<8x128xf32>
    %cst_72 = arith.constant 1.000000e+00 : f32
    %241 = vector.broadcast %cst_72 : f32 to vector<8x128xf32>
    %242 = arith.addf %241, %240 : vector<8x128xf32>
    %243 = arith.divf %241, %242 : vector<8x128xf32>
    %244 = vector.extract_strided_slice %233 {offsets = [0, 128], sizes = [8, 128], strides = [1, 1]} : vector<8x384xf32> to vector<8x128xf32>
    %245 = vector.extract_strided_slice %234 {offsets = [0, 128], sizes = [8, 128], strides = [1, 1]} : vector<8x384xf32> to vector<8x128xf32>
    %246 = arith.addf %244, %245 : vector<8x128xf32>
    %247 = arith.negf %246 : vector<8x128xf32>
    %248 = math.exp %247 : vector<8x128xf32>
    %cst_73 = arith.constant 1.000000e+00 : f32
    %249 = vector.broadcast %cst_73 : f32 to vector<8x128xf32>
    %250 = arith.addf %249, %248 : vector<8x128xf32>
    %251 = arith.divf %249, %250 : vector<8x128xf32>
    %252 = vector.extract_strided_slice %233 {offsets = [0, 256], sizes = [8, 128], strides = [1, 1]} : vector<8x384xf32> to vector<8x128xf32>
    %253 = vector.extract_strided_slice %234 {offsets = [0, 256], sizes = [8, 128], strides = [1, 1]} : vector<8x384xf32> to vector<8x128xf32>
    %254 = arith.mulf %243, %253 : vector<8x128xf32>
    %255 = arith.addf %252, %254 : vector<8x128xf32>
    %256 = math.tanh %255 : vector<8x128xf32>
    %cst_74 = arith.constant 1.000000e+00 : f32
    %257 = vector.broadcast %cst_74 : f32 to vector<8x128xf32>
    %258 = arith.subf %257, %251 : vector<8x128xf32>
    %259 = arith.mulf %258, %256 : vector<8x128xf32>
    %260 = arith.mulf %251, %235 : vector<8x128xf32>
    %261 = arith.addf %259, %260 : vector<8x128xf32>
    %c4 = arith.constant 4 : index
    %c0_75 = arith.constant 0 : index
    %c0_76 = arith.constant 0 : index
    %262 = vector.load %arg10[%c4, %c0_75, %c0_76] : memref<8x8x384xf32, #tpu.memory_space<vmem>>, vector<1x8x384xf32>
    %263 = vector.shape_cast %262 : vector<1x8x384xf32> to vector<8x384xf32>
    %264 = vector.extract_strided_slice %231 {offsets = [0, 384], sizes = [8, 384], strides = [1, 1]} : vector<8x768xf32> to vector<8x384xf32>
    %265 = vector.extract_strided_slice %227 {offsets = [0, 128], sizes = [8, 128], strides = [1, 1]} : vector<8x256xf32> to vector<8x128xf32>
    %266 = vector.extract_strided_slice %263 {offsets = [0, 0], sizes = [8, 128], strides = [1, 1]} : vector<8x384xf32> to vector<8x128xf32>
    %267 = vector.extract_strided_slice %264 {offsets = [0, 0], sizes = [8, 128], strides = [1, 1]} : vector<8x384xf32> to vector<8x128xf32>
    %268 = arith.addf %266, %267 : vector<8x128xf32>
    %269 = arith.negf %268 : vector<8x128xf32>
    %270 = math.exp %269 : vector<8x128xf32>
    %cst_77 = arith.constant 1.000000e+00 : f32
    %271 = vector.broadcast %cst_77 : f32 to vector<8x128xf32>
    %272 = arith.addf %271, %270 : vector<8x128xf32>
    %273 = arith.divf %271, %272 : vector<8x128xf32>
    %274 = vector.extract_strided_slice %263 {offsets = [0, 128], sizes = [8, 128], strides = [1, 1]} : vector<8x384xf32> to vector<8x128xf32>
    %275 = vector.extract_strided_slice %264 {offsets = [0, 128], sizes = [8, 128], strides = [1, 1]} : vector<8x384xf32> to vector<8x128xf32>
    %276 = arith.addf %274, %275 : vector<8x128xf32>
    %277 = arith.negf %276 : vector<8x128xf32>
    %278 = math.exp %277 : vector<8x128xf32>
    %cst_78 = arith.constant 1.000000e+00 : f32
    %279 = vector.broadcast %cst_78 : f32 to vector<8x128xf32>
    %280 = arith.addf %279, %278 : vector<8x128xf32>
    %281 = arith.divf %279, %280 : vector<8x128xf32>
    %282 = vector.extract_strided_slice %263 {offsets = [0, 256], sizes = [8, 128], strides = [1, 1]} : vector<8x384xf32> to vector<8x128xf32>
    %283 = vector.extract_strided_slice %264 {offsets = [0, 256], sizes = [8, 128], strides = [1, 1]} : vector<8x384xf32> to vector<8x128xf32>
    %284 = arith.mulf %273, %283 : vector<8x128xf32>
    %285 = arith.addf %282, %284 : vector<8x128xf32>
    %286 = math.tanh %285 : vector<8x128xf32>
    %cst_79 = arith.constant 1.000000e+00 : f32
    %287 = vector.broadcast %cst_79 : f32 to vector<8x128xf32>
    %288 = arith.subf %287, %281 : vector<8x128xf32>
    %289 = arith.mulf %288, %286 : vector<8x128xf32>
    %290 = arith.mulf %281, %265 : vector<8x128xf32>
    %291 = arith.addf %289, %290 : vector<8x128xf32>
    %c3_80 = arith.constant 3 : index
    %c0_81 = arith.constant 0 : index
    %c0_82 = arith.constant 0 : index
    %292 = vector.load %arg11[%c3_80, %c0_81, %c0_82] : memref<8x8x128xf32, #tpu.memory_space<vmem>>, vector<1x8x128xf32>
    %293 = vector.shape_cast %292 : vector<1x8x128xf32> to vector<8x128xf32>
    %294 = vector.shape_cast %261 : vector<8x128xf32> to vector<1x8x128xf32>
    tpu.vector_store %arg11[%c3_80, %c0_81, %c0_82], %294 {strides = array<i32>} : memref<8x8x128xf32, #tpu.memory_space<vmem>>, vector<1x8x128xf32>,
    %c4_83 = arith.constant 4 : index
    %c0_84 = arith.constant 0 : index
    %c0_85 = arith.constant 0 : index
    %295 = vector.load %arg12[%c4_83, %c0_84, %c0_85] : memref<8x8x128xf32, #tpu.memory_space<vmem>>, vector<1x8x128xf32>
    %296 = vector.shape_cast %295 : vector<1x8x128xf32> to vector<8x128xf32>
    %297 = vector.shape_cast %291 : vector<8x128xf32> to vector<1x8x128xf32>
    tpu.vector_store %arg12[%c4_83, %c0_84, %c0_85], %297 {strides = array<i32>} : memref<8x8x128xf32, #tpu.memory_space<vmem>>, vector<1x8x128xf32>,
    %298 = tpu.concatenate %261, %291 in 1 : vector<8x128xf32>, vector<8x128xf32> -> vector<8x256xf32>
    %299 = arith.truncf %298 : vector<8x256xf32> to vector<8x256xbf16>
    %cst_86 = arith.constant dense<0.000000e+00> : vector<8x768xf32>
    %300 = tpu.matmul %299, %12, %cst_86 {dimension_numbers = #tpu.dot_dimension_numbers<[1], [0], [0], [1], [0, 0, 1, 1], [], []>} : vector<8x256xbf16>, vector<256x768xbf16>, vector<8x768xf32> -> vector<8x768xf32>
    %301 = vector.broadcast %13 : vector<1x768xf32> to vector<8x768xf32>
    %302 = arith.addf %300, %301 : vector<8x768xf32>
    %c4_87 = arith.constant 4 : index
    %c0_88 = arith.constant 0 : index
    %c0_89 = arith.constant 0 : index
    %303 = vector.load %arg9[%c4_87, %c0_88, %c0_89] : memref<8x8x384xf32, #tpu.memory_space<vmem>>, vector<1x8x384xf32>
    %304 = vector.shape_cast %303 : vector<1x8x384xf32> to vector<8x384xf32>
    %305 = vector.extract_strided_slice %302 {offsets = [0, 0], sizes = [8, 384], strides = [1, 1]} : vector<8x768xf32> to vector<8x384xf32>
    %306 = vector.extract_strided_slice %298 {offsets = [0, 0], sizes = [8, 128], strides = [1, 1]} : vector<8x256xf32> to vector<8x128xf32>
    %307 = vector.extract_strided_slice %304 {offsets = [0, 0], sizes = [8, 128], strides = [1, 1]} : vector<8x384xf32> to vector<8x128xf32>
    %308 = vector.extract_strided_slice %305 {offsets = [0, 0], sizes = [8, 128], strides = [1, 1]} : vector<8x384xf32> to vector<8x128xf32>
    %309 = arith.addf %307, %308 : vector<8x128xf32>
    %310 = arith.negf %309 : vector<8x128xf32>
    %311 = math.exp %310 : vector<8x128xf32>
    %cst_90 = arith.constant 1.000000e+00 : f32
    %312 = vector.broadcast %cst_90 : f32 to vector<8x128xf32>
    %313 = arith.addf %312, %311 : vector<8x128xf32>
    %314 = arith.divf %312, %313 : vector<8x128xf32>
    %315 = vector.extract_strided_slice %304 {offsets = [0, 128], sizes = [8, 128], strides = [1, 1]} : vector<8x384xf32> to vector<8x128xf32>
    %316 = vector.extract_strided_slice %305 {offsets = [0, 128], sizes = [8, 128], strides = [1, 1]} : vector<8x384xf32> to vector<8x128xf32>
    %317 = arith.addf %315, %316 : vector<8x128xf32>
    %318 = arith.negf %317 : vector<8x128xf32>
    %319 = math.exp %318 : vector<8x128xf32>
    %cst_91 = arith.constant 1.000000e+00 : f32
    %320 = vector.broadcast %cst_91 : f32 to vector<8x128xf32>
    %321 = arith.addf %320, %319 : vector<8x128xf32>
    %322 = arith.divf %320, %321 : vector<8x128xf32>
    %323 = vector.extract_strided_slice %304 {offsets = [0, 256], sizes = [8, 128], strides = [1, 1]} : vector<8x384xf32> to vector<8x128xf32>
    %324 = vector.extract_strided_slice %305 {offsets = [0, 256], sizes = [8, 128], strides = [1, 1]} : vector<8x384xf32> to vector<8x128xf32>
    %325 = arith.mulf %314, %324 : vector<8x128xf32>
    %326 = arith.addf %323, %325 : vector<8x128xf32>
    %327 = math.tanh %326 : vector<8x128xf32>
    %cst_92 = arith.constant 1.000000e+00 : f32
    %328 = vector.broadcast %cst_92 : f32 to vector<8x128xf32>
    %329 = arith.subf %328, %322 : vector<8x128xf32>
    %330 = arith.mulf %329, %327 : vector<8x128xf32>
    %331 = arith.mulf %322, %306 : vector<8x128xf32>
    %332 = arith.addf %330, %331 : vector<8x128xf32>
    %c3_93 = arith.constant 3 : index
    %c0_94 = arith.constant 0 : index
    %c0_95 = arith.constant 0 : index
    %333 = vector.load %arg10[%c3_93, %c0_94, %c0_95] : memref<8x8x384xf32, #tpu.memory_space<vmem>>, vector<1x8x384xf32>
    %334 = vector.shape_cast %333 : vector<1x8x384xf32> to vector<8x384xf32>
    %335 = vector.extract_strided_slice %302 {offsets = [0, 384], sizes = [8, 384], strides = [1, 1]} : vector<8x768xf32> to vector<8x384xf32>
    %336 = vector.extract_strided_slice %298 {offsets = [0, 128], sizes = [8, 128], strides = [1, 1]} : vector<8x256xf32> to vector<8x128xf32>
    %337 = vector.extract_strided_slice %334 {offsets = [0, 0], sizes = [8, 128], strides = [1, 1]} : vector<8x384xf32> to vector<8x128xf32>
    %338 = vector.extract_strided_slice %335 {offsets = [0, 0], sizes = [8, 128], strides = [1, 1]} : vector<8x384xf32> to vector<8x128xf32>
    %339 = arith.addf %337, %338 : vector<8x128xf32>
    %340 = arith.negf %339 : vector<8x128xf32>
    %341 = math.exp %340 : vector<8x128xf32>
    %cst_96 = arith.constant 1.000000e+00 : f32
    %342 = vector.broadcast %cst_96 : f32 to vector<8x128xf32>
    %343 = arith.addf %342, %341 : vector<8x128xf32>
    %344 = arith.divf %342, %343 : vector<8x128xf32>
    %345 = vector.extract_strided_slice %334 {offsets = [0, 128], sizes = [8, 128], strides = [1, 1]} : vector<8x384xf32> to vector<8x128xf32>
    %346 = vector.extract_strided_slice %335 {offsets = [0, 128], sizes = [8, 128], strides = [1, 1]} : vector<8x384xf32> to vector<8x128xf32>
    %347 = arith.addf %345, %346 : vector<8x128xf32>
    %348 = arith.negf %347 : vector<8x128xf32>
    %349 = math.exp %348 : vector<8x128xf32>
    %cst_97 = arith.constant 1.000000e+00 : f32
    %350 = vector.broadcast %cst_97 : f32 to vector<8x128xf32>
    %351 = arith.addf %350, %349 : vector<8x128xf32>
    %352 = arith.divf %350, %351 : vector<8x128xf32>
    %353 = vector.extract_strided_slice %334 {offsets = [0, 256], sizes = [8, 128], strides = [1, 1]} : vector<8x384xf32> to vector<8x128xf32>
    %354 = vector.extract_strided_slice %335 {offsets = [0, 256], sizes = [8, 128], strides = [1, 1]} : vector<8x384xf32> to vector<8x128xf32>
    %355 = arith.mulf %344, %354 : vector<8x128xf32>
    %356 = arith.addf %353, %355 : vector<8x128xf32>
    %357 = math.tanh %356 : vector<8x128xf32>
    %cst_98 = arith.constant 1.000000e+00 : f32
    %358 = vector.broadcast %cst_98 : f32 to vector<8x128xf32>
    %359 = arith.subf %358, %352 : vector<8x128xf32>
    %360 = arith.mulf %359, %357 : vector<8x128xf32>
    %361 = arith.mulf %352, %336 : vector<8x128xf32>
    %362 = arith.addf %360, %361 : vector<8x128xf32>
    %c4_99 = arith.constant 4 : index
    %c0_100 = arith.constant 0 : index
    %c0_101 = arith.constant 0 : index
    %363 = vector.load %arg11[%c4_99, %c0_100, %c0_101] : memref<8x8x128xf32, #tpu.memory_space<vmem>>, vector<1x8x128xf32>
    %364 = vector.shape_cast %363 : vector<1x8x128xf32> to vector<8x128xf32>
    %365 = vector.shape_cast %332 : vector<8x128xf32> to vector<1x8x128xf32>
    tpu.vector_store %arg11[%c4_99, %c0_100, %c0_101], %365 {strides = array<i32>} : memref<8x8x128xf32, #tpu.memory_space<vmem>>, vector<1x8x128xf32>,
    %c3_102 = arith.constant 3 : index
    %c0_103 = arith.constant 0 : index
    %c0_104 = arith.constant 0 : index
    %366 = vector.load %arg12[%c3_102, %c0_103, %c0_104] : memref<8x8x128xf32, #tpu.memory_space<vmem>>, vector<1x8x128xf32>
    %367 = vector.shape_cast %366 : vector<1x8x128xf32> to vector<8x128xf32>
    %368 = vector.shape_cast %362 : vector<8x128xf32> to vector<1x8x128xf32>
    tpu.vector_store %arg12[%c3_102, %c0_103, %c0_104], %368 {strides = array<i32>} : memref<8x8x128xf32, #tpu.memory_space<vmem>>, vector<1x8x128xf32>,
    %369 = tpu.concatenate %332, %362 in 1 : vector<8x128xf32>, vector<8x128xf32> -> vector<8x256xf32>
    %370 = arith.truncf %369 : vector<8x256xf32> to vector<8x256xbf16>
    %cst_105 = arith.constant dense<0.000000e+00> : vector<8x768xf32>
    %371 = tpu.matmul %370, %12, %cst_105 {dimension_numbers = #tpu.dot_dimension_numbers<[1], [0], [0], [1], [0, 0, 1, 1], [], []>} : vector<8x256xbf16>, vector<256x768xbf16>, vector<8x768xf32> -> vector<8x768xf32>
    %372 = vector.broadcast %13 : vector<1x768xf32> to vector<8x768xf32>
    %373 = arith.addf %371, %372 : vector<8x768xf32>
    %c5_106 = arith.constant 5 : index
    %c0_107 = arith.constant 0 : index
    %c0_108 = arith.constant 0 : index
    %374 = vector.load %arg9[%c5_106, %c0_107, %c0_108] : memref<8x8x384xf32, #tpu.memory_space<vmem>>, vector<1x8x384xf32>
    %375 = vector.shape_cast %374 : vector<1x8x384xf32> to vector<8x384xf32>
    %376 = vector.extract_strided_slice %373 {offsets = [0, 0], sizes = [8, 384], strides = [1, 1]} : vector<8x768xf32> to vector<8x384xf32>
    %377 = vector.extract_strided_slice %369 {offsets = [0, 0], sizes = [8, 128], strides = [1, 1]} : vector<8x256xf32> to vector<8x128xf32>
    %378 = vector.extract_strided_slice %375 {offsets = [0, 0], sizes = [8, 128], strides = [1, 1]} : vector<8x384xf32> to vector<8x128xf32>
    %379 = vector.extract_strided_slice %376 {offsets = [0, 0], sizes = [8, 128], strides = [1, 1]} : vector<8x384xf32> to vector<8x128xf32>
    %380 = arith.addf %378, %379 : vector<8x128xf32>
    %381 = arith.negf %380 : vector<8x128xf32>
    %382 = math.exp %381 : vector<8x128xf32>
    %cst_109 = arith.constant 1.000000e+00 : f32
    %383 = vector.broadcast %cst_109 : f32 to vector<8x128xf32>
    %384 = arith.addf %383, %382 : vector<8x128xf32>
    %385 = arith.divf %383, %384 : vector<8x128xf32>
    %386 = vector.extract_strided_slice %375 {offsets = [0, 128], sizes = [8, 128], strides = [1, 1]} : vector<8x384xf32> to vector<8x128xf32>
    %387 = vector.extract_strided_slice %376 {offsets = [0, 128], sizes = [8, 128], strides = [1, 1]} : vector<8x384xf32> to vector<8x128xf32>
    %388 = arith.addf %386, %387 : vector<8x128xf32>
    %389 = arith.negf %388 : vector<8x128xf32>
    %390 = math.exp %389 : vector<8x128xf32>
    %cst_110 = arith.constant 1.000000e+00 : f32
    %391 = vector.broadcast %cst_110 : f32 to vector<8x128xf32>
    %392 = arith.addf %391, %390 : vector<8x128xf32>
    %393 = arith.divf %391, %392 : vector<8x128xf32>
    %394 = vector.extract_strided_slice %375 {offsets = [0, 256], sizes = [8, 128], strides = [1, 1]} : vector<8x384xf32> to vector<8x128xf32>
    %395 = vector.extract_strided_slice %376 {offsets = [0, 256], sizes = [8, 128], strides = [1, 1]} : vector<8x384xf32> to vector<8x128xf32>
    %396 = arith.mulf %385, %395 : vector<8x128xf32>
    %397 = arith.addf %394, %396 : vector<8x128xf32>
    %398 = math.tanh %397 : vector<8x128xf32>
    %cst_111 = arith.constant 1.000000e+00 : f32
    %399 = vector.broadcast %cst_111 : f32 to vector<8x128xf32>
    %400 = arith.subf %399, %393 : vector<8x128xf32>
    %401 = arith.mulf %400, %398 : vector<8x128xf32>
    %402 = arith.mulf %393, %377 : vector<8x128xf32>
    %403 = arith.addf %401, %402 : vector<8x128xf32>
    %c2_112 = arith.constant 2 : index
    %c0_113 = arith.constant 0 : index
    %c0_114 = arith.constant 0 : index
    %404 = vector.load %arg10[%c2_112, %c0_113, %c0_114] : memref<8x8x384xf32, #tpu.memory_space<vmem>>, vector<1x8x384xf32>
    %405 = vector.shape_cast %404 : vector<1x8x384xf32> to vector<8x384xf32>
    %406 = vector.extract_strided_slice %373 {offsets = [0, 384], sizes = [8, 384], strides = [1, 1]} : vector<8x768xf32> to vector<8x384xf32>
    %407 = vector.extract_strided_slice %369 {offsets = [0, 128], sizes = [8, 128], strides = [1, 1]} : vector<8x256xf32> to vector<8x128xf32>
    %408 = vector.extract_strided_slice %405 {offsets = [0, 0], sizes = [8, 128], strides = [1, 1]} : vector<8x384xf32> to vector<8x128xf32>
    %409 = vector.extract_strided_slice %406 {offsets = [0, 0], sizes = [8, 128], strides = [1, 1]} : vector<8x384xf32> to vector<8x128xf32>
    %410 = arith.addf %408, %409 : vector<8x128xf32>
    %411 = arith.negf %410 : vector<8x128xf32>
    %412 = math.exp %411 : vector<8x128xf32>
    %cst_115 = arith.constant 1.000000e+00 : f32
    %413 = vector.broadcast %cst_115 : f32 to vector<8x128xf32>
    %414 = arith.addf %413, %412 : vector<8x128xf32>
    %415 = arith.divf %413, %414 : vector<8x128xf32>
    %416 = vector.extract_strided_slice %405 {offsets = [0, 128], sizes = [8, 128], strides = [1, 1]} : vector<8x384xf32> to vector<8x128xf32>
    %417 = vector.extract_strided_slice %406 {offsets = [0, 128], sizes = [8, 128], strides = [1, 1]} : vector<8x384xf32> to vector<8x128xf32>
    %418 = arith.addf %416, %417 : vector<8x128xf32>
    %419 = arith.negf %418 : vector<8x128xf32>
    %420 = math.exp %419 : vector<8x128xf32>
    %cst_116 = arith.constant 1.000000e+00 : f32
    %421 = vector.broadcast %cst_116 : f32 to vector<8x128xf32>
    %422 = arith.addf %421, %420 : vector<8x128xf32>
    %423 = arith.divf %421, %422 : vector<8x128xf32>
    %424 = vector.extract_strided_slice %405 {offsets = [0, 256], sizes = [8, 128], strides = [1, 1]} : vector<8x384xf32> to vector<8x128xf32>
    %425 = vector.extract_strided_slice %406 {offsets = [0, 256], sizes = [8, 128], strides = [1, 1]} : vector<8x384xf32> to vector<8x128xf32>
    %426 = arith.mulf %415, %425 : vector<8x128xf32>
    %427 = arith.addf %424, %426 : vector<8x128xf32>
    %428 = math.tanh %427 : vector<8x128xf32>
    %cst_117 = arith.constant 1.000000e+00 : f32
    %429 = vector.broadcast %cst_117 : f32 to vector<8x128xf32>
    %430 = arith.subf %429, %423 : vector<8x128xf32>
    %431 = arith.mulf %430, %428 : vector<8x128xf32>
    %432 = arith.mulf %423, %407 : vector<8x128xf32>
    %433 = arith.addf %431, %432 : vector<8x128xf32>
    %c5_118 = arith.constant 5 : index
    %c0_119 = arith.constant 0 : index
    %c0_120 = arith.constant 0 : index
    %434 = vector.load %arg11[%c5_118, %c0_119, %c0_120] : memref<8x8x128xf32, #tpu.memory_space<vmem>>, vector<1x8x128xf32>
    %435 = vector.shape_cast %434 : vector<1x8x128xf32> to vector<8x128xf32>
    %436 = vector.shape_cast %403 : vector<8x128xf32> to vector<1x8x128xf32>
    tpu.vector_store %arg11[%c5_118, %c0_119, %c0_120], %436 {strides = array<i32>} : memref<8x8x128xf32, #tpu.memory_space<vmem>>, vector<1x8x128xf32>,
    %c2_121 = arith.constant 2 : index
    %c0_122 = arith.constant 0 : index
    %c0_123 = arith.constant 0 : index
    %437 = vector.load %arg12[%c2_121, %c0_122, %c0_123] : memref<8x8x128xf32, #tpu.memory_space<vmem>>, vector<1x8x128xf32>
    %438 = vector.shape_cast %437 : vector<1x8x128xf32> to vector<8x128xf32>
    %439 = vector.shape_cast %433 : vector<8x128xf32> to vector<1x8x128xf32>
    tpu.vector_store %arg12[%c2_121, %c0_122, %c0_123], %439 {strides = array<i32>} : memref<8x8x128xf32, #tpu.memory_space<vmem>>, vector<1x8x128xf32>,
    %440 = tpu.concatenate %403, %433 in 1 : vector<8x128xf32>, vector<8x128xf32> -> vector<8x256xf32>
    %441 = arith.truncf %440 : vector<8x256xf32> to vector<8x256xbf16>
    %cst_124 = arith.constant dense<0.000000e+00> : vector<8x768xf32>
    %442 = tpu.matmul %441, %12, %cst_124 {dimension_numbers = #tpu.dot_dimension_numbers<[1], [0], [0], [1], [0, 0, 1, 1], [], []>} : vector<8x256xbf16>, vector<256x768xbf16>, vector<8x768xf32> -> vector<8x768xf32>
    %443 = vector.broadcast %13 : vector<1x768xf32> to vector<8x768xf32>
    %444 = arith.addf %442, %443 : vector<8x768xf32>
    %c6_125 = arith.constant 6 : index
    %c0_126 = arith.constant 0 : index
    %c0_127 = arith.constant 0 : index
    %445 = vector.load %arg9[%c6_125, %c0_126, %c0_127] : memref<8x8x384xf32, #tpu.memory_space<vmem>>, vector<1x8x384xf32>
    %446 = vector.shape_cast %445 : vector<1x8x384xf32> to vector<8x384xf32>
    %447 = vector.extract_strided_slice %444 {offsets = [0, 0], sizes = [8, 384], strides = [1, 1]} : vector<8x768xf32> to vector<8x384xf32>
    %448 = vector.extract_strided_slice %440 {offsets = [0, 0], sizes = [8, 128], strides = [1, 1]} : vector<8x256xf32> to vector<8x128xf32>
    %449 = vector.extract_strided_slice %446 {offsets = [0, 0], sizes = [8, 128], strides = [1, 1]} : vector<8x384xf32> to vector<8x128xf32>
    %450 = vector.extract_strided_slice %447 {offsets = [0, 0], sizes = [8, 128], strides = [1, 1]} : vector<8x384xf32> to vector<8x128xf32>
    %451 = arith.addf %449, %450 : vector<8x128xf32>
    %452 = arith.negf %451 : vector<8x128xf32>
    %453 = math.exp %452 : vector<8x128xf32>
    %cst_128 = arith.constant 1.000000e+00 : f32
    %454 = vector.broadcast %cst_128 : f32 to vector<8x128xf32>
    %455 = arith.addf %454, %453 : vector<8x128xf32>
    %456 = arith.divf %454, %455 : vector<8x128xf32>
    %457 = vector.extract_strided_slice %446 {offsets = [0, 128], sizes = [8, 128], strides = [1, 1]} : vector<8x384xf32> to vector<8x128xf32>
    %458 = vector.extract_strided_slice %447 {offsets = [0, 128], sizes = [8, 128], strides = [1, 1]} : vector<8x384xf32> to vector<8x128xf32>
    %459 = arith.addf %457, %458 : vector<8x128xf32>
    %460 = arith.negf %459 : vector<8x128xf32>
    %461 = math.exp %460 : vector<8x128xf32>
    %cst_129 = arith.constant 1.000000e+00 : f32
    %462 = vector.broadcast %cst_129 : f32 to vector<8x128xf32>
    %463 = arith.addf %462, %461 : vector<8x128xf32>
    %464 = arith.divf %462, %463 : vector<8x128xf32>
    %465 = vector.extract_strided_slice %446 {offsets = [0, 256], sizes = [8, 128], strides = [1, 1]} : vector<8x384xf32> to vector<8x128xf32>
    %466 = vector.extract_strided_slice %447 {offsets = [0, 256], sizes = [8, 128], strides = [1, 1]} : vector<8x384xf32> to vector<8x128xf32>
    %467 = arith.mulf %456, %466 : vector<8x128xf32>
    %468 = arith.addf %465, %467 : vector<8x128xf32>
    %469 = math.tanh %468 : vector<8x128xf32>
    %cst_130 = arith.constant 1.000000e+00 : f32
    %470 = vector.broadcast %cst_130 : f32 to vector<8x128xf32>
    %471 = arith.subf %470, %464 : vector<8x128xf32>
    %472 = arith.mulf %471, %469 : vector<8x128xf32>
    %473 = arith.mulf %464, %448 : vector<8x128xf32>
    %474 = arith.addf %472, %473 : vector<8x128xf32>
    %c1_131 = arith.constant 1 : index
    %c0_132 = arith.constant 0 : index
    %c0_133 = arith.constant 0 : index
    %475 = vector.load %arg10[%c1_131, %c0_132, %c0_133] : memref<8x8x384xf32, #tpu.memory_space<vmem>>, vector<1x8x384xf32>
    %476 = vector.shape_cast %475 : vector<1x8x384xf32> to vector<8x384xf32>
    %477 = vector.extract_strided_slice %444 {offsets = [0, 384], sizes = [8, 384], strides = [1, 1]} : vector<8x768xf32> to vector<8x384xf32>
    %478 = vector.extract_strided_slice %440 {offsets = [0, 128], sizes = [8, 128], strides = [1, 1]} : vector<8x256xf32> to vector<8x128xf32>
    %479 = vector.extract_strided_slice %476 {offsets = [0, 0], sizes = [8, 128], strides = [1, 1]} : vector<8x384xf32> to vector<8x128xf32>
    %480 = vector.extract_strided_slice %477 {offsets = [0, 0], sizes = [8, 128], strides = [1, 1]} : vector<8x384xf32> to vector<8x128xf32>
    %481 = arith.addf %479, %480 : vector<8x128xf32>
    %482 = arith.negf %481 : vector<8x128xf32>
    %483 = math.exp %482 : vector<8x128xf32>
    %cst_134 = arith.constant 1.000000e+00 : f32
    %484 = vector.broadcast %cst_134 : f32 to vector<8x128xf32>
    %485 = arith.addf %484, %483 : vector<8x128xf32>
    %486 = arith.divf %484, %485 : vector<8x128xf32>
    %487 = vector.extract_strided_slice %476 {offsets = [0, 128], sizes = [8, 128], strides = [1, 1]} : vector<8x384xf32> to vector<8x128xf32>
    %488 = vector.extract_strided_slice %477 {offsets = [0, 128], sizes = [8, 128], strides = [1, 1]} : vector<8x384xf32> to vector<8x128xf32>
    %489 = arith.addf %487, %488 : vector<8x128xf32>
    %490 = arith.negf %489 : vector<8x128xf32>
    %491 = math.exp %490 : vector<8x128xf32>
    %cst_135 = arith.constant 1.000000e+00 : f32
    %492 = vector.broadcast %cst_135 : f32 to vector<8x128xf32>
    %493 = arith.addf %492, %491 : vector<8x128xf32>
    %494 = arith.divf %492, %493 : vector<8x128xf32>
    %495 = vector.extract_strided_slice %476 {offsets = [0, 256], sizes = [8, 128], strides = [1, 1]} : vector<8x384xf32> to vector<8x128xf32>
    %496 = vector.extract_strided_slice %477 {offsets = [0, 256], sizes = [8, 128], strides = [1, 1]} : vector<8x384xf32> to vector<8x128xf32>
    %497 = arith.mulf %486, %496 : vector<8x128xf32>
    %498 = arith.addf %495, %497 : vector<8x128xf32>
    %499 = math.tanh %498 : vector<8x128xf32>
    %cst_136 = arith.constant 1.000000e+00 : f32
    %500 = vector.broadcast %cst_136 : f32 to vector<8x128xf32>
    %501 = arith.subf %500, %494 : vector<8x128xf32>
    %502 = arith.mulf %501, %499 : vector<8x128xf32>
    %503 = arith.mulf %494, %478 : vector<8x128xf32>
    %504 = arith.addf %502, %503 : vector<8x128xf32>
    %c6_137 = arith.constant 6 : index
    %c0_138 = arith.constant 0 : index
    %c0_139 = arith.constant 0 : index
    %505 = vector.load %arg11[%c6_137, %c0_138, %c0_139] : memref<8x8x128xf32, #tpu.memory_space<vmem>>, vector<1x8x128xf32>
    %506 = vector.shape_cast %505 : vector<1x8x128xf32> to vector<8x128xf32>
    %507 = vector.shape_cast %474 : vector<8x128xf32> to vector<1x8x128xf32>
    tpu.vector_store %arg11[%c6_137, %c0_138, %c0_139], %507 {strides = array<i32>} : memref<8x8x128xf32, #tpu.memory_space<vmem>>, vector<1x8x128xf32>,
    %c1_140 = arith.constant 1 : index
    %c0_141 = arith.constant 0 : index
    %c0_142 = arith.constant 0 : index
    %508 = vector.load %arg12[%c1_140, %c0_141, %c0_142] : memref<8x8x128xf32, #tpu.memory_space<vmem>>, vector<1x8x128xf32>
    %509 = vector.shape_cast %508 : vector<1x8x128xf32> to vector<8x128xf32>
    %510 = vector.shape_cast %504 : vector<8x128xf32> to vector<1x8x128xf32>
    tpu.vector_store %arg12[%c1_140, %c0_141, %c0_142], %510 {strides = array<i32>} : memref<8x8x128xf32, #tpu.memory_space<vmem>>, vector<1x8x128xf32>,
    %511 = tpu.concatenate %474, %504 in 1 : vector<8x128xf32>, vector<8x128xf32> -> vector<8x256xf32>
    %512 = arith.truncf %511 : vector<8x256xf32> to vector<8x256xbf16>
    %cst_143 = arith.constant dense<0.000000e+00> : vector<8x768xf32>
    %513 = tpu.matmul %512, %12, %cst_143 {dimension_numbers = #tpu.dot_dimension_numbers<[1], [0], [0], [1], [0, 0, 1, 1], [], []>} : vector<8x256xbf16>, vector<256x768xbf16>, vector<8x768xf32> -> vector<8x768xf32>
    %514 = vector.broadcast %13 : vector<1x768xf32> to vector<8x768xf32>
    %515 = arith.addf %513, %514 : vector<8x768xf32>
    %c7_144 = arith.constant 7 : index
    %c0_145 = arith.constant 0 : index
    %c0_146 = arith.constant 0 : index
    %516 = vector.load %arg9[%c7_144, %c0_145, %c0_146] : memref<8x8x384xf32, #tpu.memory_space<vmem>>, vector<1x8x384xf32>
    %517 = vector.shape_cast %516 : vector<1x8x384xf32> to vector<8x384xf32>
    %518 = vector.extract_strided_slice %515 {offsets = [0, 0], sizes = [8, 384], strides = [1, 1]} : vector<8x768xf32> to vector<8x384xf32>
    %519 = vector.extract_strided_slice %511 {offsets = [0, 0], sizes = [8, 128], strides = [1, 1]} : vector<8x256xf32> to vector<8x128xf32>
    %520 = vector.extract_strided_slice %517 {offsets = [0, 0], sizes = [8, 128], strides = [1, 1]} : vector<8x384xf32> to vector<8x128xf32>
    %521 = vector.extract_strided_slice %518 {offsets = [0, 0], sizes = [8, 128], strides = [1, 1]} : vector<8x384xf32> to vector<8x128xf32>
    %522 = arith.addf %520, %521 : vector<8x128xf32>
    %523 = arith.negf %522 : vector<8x128xf32>
    %524 = math.exp %523 : vector<8x128xf32>
    %cst_147 = arith.constant 1.000000e+00 : f32
    %525 = vector.broadcast %cst_147 : f32 to vector<8x128xf32>
    %526 = arith.addf %525, %524 : vector<8x128xf32>
    %527 = arith.divf %525, %526 : vector<8x128xf32>
    %528 = vector.extract_strided_slice %517 {offsets = [0, 128], sizes = [8, 128], strides = [1, 1]} : vector<8x384xf32> to vector<8x128xf32>
    %529 = vector.extract_strided_slice %518 {offsets = [0, 128], sizes = [8, 128], strides = [1, 1]} : vector<8x384xf32> to vector<8x128xf32>
    %530 = arith.addf %528, %529 : vector<8x128xf32>
    %531 = arith.negf %530 : vector<8x128xf32>
    %532 = math.exp %531 : vector<8x128xf32>
    %cst_148 = arith.constant 1.000000e+00 : f32
    %533 = vector.broadcast %cst_148 : f32 to vector<8x128xf32>
    %534 = arith.addf %533, %532 : vector<8x128xf32>
    %535 = arith.divf %533, %534 : vector<8x128xf32>
    %536 = vector.extract_strided_slice %517 {offsets = [0, 256], sizes = [8, 128], strides = [1, 1]} : vector<8x384xf32> to vector<8x128xf32>
    %537 = vector.extract_strided_slice %518 {offsets = [0, 256], sizes = [8, 128], strides = [1, 1]} : vector<8x384xf32> to vector<8x128xf32>
    %538 = arith.mulf %527, %537 : vector<8x128xf32>
    %539 = arith.addf %536, %538 : vector<8x128xf32>
    %540 = math.tanh %539 : vector<8x128xf32>
    %cst_149 = arith.constant 1.000000e+00 : f32
    %541 = vector.broadcast %cst_149 : f32 to vector<8x128xf32>
    %542 = arith.subf %541, %535 : vector<8x128xf32>
    %543 = arith.mulf %542, %540 : vector<8x128xf32>
    %544 = arith.mulf %535, %519 : vector<8x128xf32>
    %545 = arith.addf %543, %544 : vector<8x128xf32>
    %c0_150 = arith.constant 0 : index
    %c0_151 = arith.constant 0 : index
    %c0_152 = arith.constant 0 : index
    %546 = vector.load %arg10[%c0_150, %c0_151, %c0_152] : memref<8x8x384xf32, #tpu.memory_space<vmem>>, vector<1x8x384xf32>
    %547 = vector.shape_cast %546 : vector<1x8x384xf32> to vector<8x384xf32>
    %548 = vector.extract_strided_slice %515 {offsets = [0, 384], sizes = [8, 384], strides = [1, 1]} : vector<8x768xf32> to vector<8x384xf32>
    %549 = vector.extract_strided_slice %511 {offsets = [0, 128], sizes = [8, 128], strides = [1, 1]} : vector<8x256xf32> to vector<8x128xf32>
    %550 = vector.extract_strided_slice %547 {offsets = [0, 0], sizes = [8, 128], strides = [1, 1]} : vector<8x384xf32> to vector<8x128xf32>
    %551 = vector.extract_strided_slice %548 {offsets = [0, 0], sizes = [8, 128], strides = [1, 1]} : vector<8x384xf32> to vector<8x128xf32>
    %552 = arith.addf %550, %551 : vector<8x128xf32>
    %553 = arith.negf %552 : vector<8x128xf32>
    %554 = math.exp %553 : vector<8x128xf32>
    %cst_153 = arith.constant 1.000000e+00 : f32
    %555 = vector.broadcast %cst_153 : f32 to vector<8x128xf32>
    %556 = arith.addf %555, %554 : vector<8x128xf32>
    %557 = arith.divf %555, %556 : vector<8x128xf32>
    %558 = vector.extract_strided_slice %547 {offsets = [0, 128], sizes = [8, 128], strides = [1, 1]} : vector<8x384xf32> to vector<8x128xf32>
    %559 = vector.extract_strided_slice %548 {offsets = [0, 128], sizes = [8, 128], strides = [1, 1]} : vector<8x384xf32> to vector<8x128xf32>
    %560 = arith.addf %558, %559 : vector<8x128xf32>
    %561 = arith.negf %560 : vector<8x128xf32>
    %562 = math.exp %561 : vector<8x128xf32>
    %cst_154 = arith.constant 1.000000e+00 : f32
    %563 = vector.broadcast %cst_154 : f32 to vector<8x128xf32>
    %564 = arith.addf %563, %562 : vector<8x128xf32>
    %565 = arith.divf %563, %564 : vector<8x128xf32>
    %566 = vector.extract_strided_slice %547 {offsets = [0, 256], sizes = [8, 128], strides = [1, 1]} : vector<8x384xf32> to vector<8x128xf32>
    %567 = vector.extract_strided_slice %548 {offsets = [0, 256], sizes = [8, 128], strides = [1, 1]} : vector<8x384xf32> to vector<8x128xf32>
    %568 = arith.mulf %557, %567 : vector<8x128xf32>
    %569 = arith.addf %566, %568 : vector<8x128xf32>
    %570 = math.tanh %569 : vector<8x128xf32>
    %cst_155 = arith.constant 1.000000e+00 : f32
    %571 = vector.broadcast %cst_155 : f32 to vector<8x128xf32>
    %572 = arith.subf %571, %565 : vector<8x128xf32>
    %573 = arith.mulf %572, %570 : vector<8x128xf32>
    %574 = arith.mulf %565, %549 : vector<8x128xf32>
    %575 = arith.addf %573, %574 : vector<8x128xf32>
    %c7_156 = arith.constant 7 : index
    %c0_157 = arith.constant 0 : index
    %c0_158 = arith.constant 0 : index
    %576 = vector.load %arg11[%c7_156, %c0_157, %c0_158] : memref<8x8x128xf32, #tpu.memory_space<vmem>>, vector<1x8x128xf32>
    %577 = vector.shape_cast %576 : vector<1x8x128xf32> to vector<8x128xf32>
    %578 = vector.shape_cast %545 : vector<8x128xf32> to vector<1x8x128xf32>
    tpu.vector_store %arg11[%c7_156, %c0_157, %c0_158], %578 {strides = array<i32>} : memref<8x8x128xf32, #tpu.memory_space<vmem>>, vector<1x8x128xf32>,
    %c0_159 = arith.constant 0 : index
    %c0_160 = arith.constant 0 : index
    %c0_161 = arith.constant 0 : index
    %579 = vector.load %arg12[%c0_159, %c0_160, %c0_161] : memref<8x8x128xf32, #tpu.memory_space<vmem>>, vector<1x8x128xf32>
    %580 = vector.shape_cast %579 : vector<1x8x128xf32> to vector<8x128xf32>
    %581 = vector.shape_cast %575 : vector<8x128xf32> to vector<1x8x128xf32>
    tpu.vector_store %arg12[%c0_159, %c0_160, %c0_161], %581 {strides = array<i32>} : memref<8x8x128xf32, #tpu.memory_space<vmem>>, vector<1x8x128xf32>,
    %c0_162 = arith.constant 0 : index
    %c0_163 = arith.constant 0 : index
    %c0_164 = arith.constant 0 : index
    %582 = vector.load %arg11[%c0_162, %c0_163, %c0_164] : memref<8x8x128xf32, #tpu.memory_space<vmem>>, vector<8x8x128xf32>
    %c0_165 = arith.constant 0 : index
    %c0_166 = arith.constant 0 : index
    %c0_167 = arith.constant 0 : index
    %583 = vector.load %arg12[%c0_165, %c0_166, %c0_167] : memref<8x8x128xf32, #tpu.memory_space<vmem>>, vector<8x8x128xf32>
    %c0_168 = arith.constant 0 : index
    %c0_169 = arith.constant 0 : index
    %584 = vector.load %arg6[%c0_168, %c0_169] : memref<1x128xf32, #tpu.memory_space<vmem>>, vector<1x128xf32>
    %585 = vector.shape_cast %584 : vector<1x128xf32> to vector<1x1x128xf32>
    %c0_170 = arith.constant 0 : index
    %c0_171 = arith.constant 0 : index
    %586 = vector.load %arg7[%c0_170, %c0_171] : memref<1x128xf32, #tpu.memory_space<vmem>>, vector<1x128xf32>
    %587 = vector.shape_cast %586 : vector<1x128xf32> to vector<1x1x128xf32>
    %588 = vector.broadcast %585 : vector<1x1x128xf32> to vector<8x8x128xf32>
    %589 = arith.mulf %582, %588 : vector<8x8x128xf32>
    %cst_172 = arith.constant dense<0.000000e+00> : vector<8x8xf32>
    %590 = vector.multi_reduction <add>, %589, %cst_172 [2] : vector<8x8x128xf32> to vector<8x8xf32>
    %591 = vector.shape_cast %590 : vector<8x8xf32> to vector<8x8x1xf32>
    %592 = vector.broadcast %587 : vector<1x1x128xf32> to vector<8x8x128xf32>
    %593 = arith.mulf %583, %592 : vector<8x8x128xf32>
    %cst_173 = arith.constant dense<0.000000e+00> : vector<8x8xf32>
    %594 = vector.multi_reduction <add>, %593, %cst_173 [2] : vector<8x8x128xf32> to vector<8x8xf32>
    %595 = vector.shape_cast %594 : vector<8x8xf32> to vector<8x8x1xf32>
    %596 = arith.addf %591, %595 : vector<8x8x1xf32>
    %cst_174 = arith.constant dense<0xFF800000> : vector<8x1xf32>
    %597 = vector.multi_reduction <maximumf>, %596, %cst_174 [0] : vector<8x8x1xf32> to vector<8x1xf32>
    %598 = vector.shape_cast %597 : vector<8x1xf32> to vector<1x8x1xf32>
    %599 = vector.broadcast %598 : vector<1x8x1xf32> to vector<8x8x1xf32>
    %600 = arith.subf %596, %599 : vector<8x8x1xf32>
    %601 = math.exp %600 : vector<8x8x1xf32>
    %cst_175 = arith.constant dense<0.000000e+00> : vector<8x1xf32>
    %602 = vector.multi_reduction <add>, %601, %cst_175 [0] : vector<8x8x1xf32> to vector<8x1xf32>
    %603 = vector.shape_cast %602 : vector<8x1xf32> to vector<1x8x1xf32>
    %604 = tpu.reciprocal %603 {approx = true} : vector<1x8x1xf32> -> vector<1x8x1xf32>
    %605 = vector.broadcast %604 : vector<1x8x1xf32> to vector<8x8x1xf32>
    %606 = arith.mulf %601, %605 : vector<8x8x1xf32>
    %607 = vector.broadcast %606 : vector<8x8x1xf32> to vector<8x8x128xf32>
    %608 = arith.mulf %607, %582 : vector<8x8x128xf32>
    %cst_176 = arith.constant dense<0.000000e+00> : vector<8x128xf32>
    %609 = vector.multi_reduction <add>, %608, %cst_176 [0] : vector<8x8x128xf32> to vector<8x128xf32>
    %610 = vector.broadcast %606 : vector<8x8x1xf32> to vector<8x8x128xf32>
    %611 = arith.mulf %610, %583 : vector<8x8x128xf32>
    %cst_177 = arith.constant dense<0.000000e+00> : vector<8x128xf32>
    %612 = vector.multi_reduction <add>, %611, %cst_177 [0] : vector<8x8x128xf32> to vector<8x128xf32>
    %613 = arith.truncf %609 : vector<8x128xf32> to vector<8x128xbf16>
    %c0_178 = arith.constant 0 : index
    %c0_179 = arith.constant 0 : index
    %614 = vector.load %arg8[%c0_178, %c0_179] : memref<8x256xbf16, #tpu.memory_space<vmem>>, vector<8x128xbf16>
    tpu.vector_store %arg8[%c0_178, %c0_179], %613 {strides = array<i32>} : memref<8x256xbf16, #tpu.memory_space<vmem>>, vector<8x128xbf16>,
    %615 = arith.truncf %612 : vector<8x128xf32> to vector<8x128xbf16>
    %c0_180 = arith.constant 0 : index
    %c128 = arith.constant 128 : index
    %616 = vector.load %arg8[%c0_180, %c128] : memref<8x256xbf16, #tpu.memory_space<vmem>>, vector<8x128xbf16>
    tpu.vector_store %arg8[%c0_180, %c128], %615 {strides = array<i32>} : memref<8x256xbf16, #tpu.memory_space<vmem>>, vector<8x128xbf16>,
    return
  }
  func.func @transform_0(%arg0: i32) -> (i32, i32, i32) {
    %c0_i32 = arith.constant 0 : i32
    %c0_i32_0 = arith.constant 0 : i32
    %c0_i32_1 = arith.constant 0 : i32
    return %c0_i32, %arg0, %c0_i32_0 : i32, i32, i32
  }
  func.func @transform_1(%arg0: i32) -> (i32, i32) {
    %c0_i32 = arith.constant 0 : i32
    %c0_i32_0 = arith.constant 0 : i32
    %c0_i32_1 = arith.constant 0 : i32
    return %c0_i32, %c0_i32_0 : i32, i32
  }
  func.func @transform_2(%arg0: i32) -> (i32, i32) {
    %c0_i32 = arith.constant 0 : i32
    %c0_i32_0 = arith.constant 0 : i32
    %c0_i32_1 = arith.constant 0 : i32
    return %c0_i32, %c0_i32_0 : i32, i32
  }
  func.func @transform_3(%arg0: i32) -> (i32, i32) {
    %c0_i32 = arith.constant 0 : i32
    %c0_i32_0 = arith.constant 0 : i32
    %c0_i32_1 = arith.constant 0 : i32
    return %c0_i32, %c0_i32_0 : i32, i32
  }
  func.func @transform_4(%arg0: i32) -> (i32, i32) {
    %c0_i32 = arith.constant 0 : i32
    %c0_i32_0 = arith.constant 0 : i32
    %c0_i32_1 = arith.constant 0 : i32
    return %c0_i32, %c0_i32_0 : i32, i32
  }
  func.func @transform_5(%arg0: i32) -> (i32, i32) {
    %c0_i32 = arith.constant 0 : i32
    %c0_i32_0 = arith.constant 0 : i32
    %c0_i32_1 = arith.constant 0 : i32
    return %c0_i32, %c0_i32_0 : i32, i32
  }
  func.func @transform_6(%arg0: i32) -> (i32, i32) {
    %c0_i32 = arith.constant 0 : i32
    %c0_i32_0 = arith.constant 0 : i32
    %c0_i32_1 = arith.constant 0 : i32
    return %c0_i32, %c0_i32_0 : i32, i32
  }
  func.func @transform_7(%arg0: i32) -> (i32, i32) {
    %c0_i32 = arith.constant 0 : i32
    %c0_i32_0 = arith.constant 0 : i32
    return %arg0, %c0_i32 : i32, i32
  }
}

module attributes {stable_mosaic.version = 11 : i64} {
  func.func @_sentence_kernel(%arg0: i32, %arg1: memref<4x2x256xbf16, #tpu.memory_space<vmem>>, %arg2: memref<256x768xbf16, #tpu.memory_space<vmem>>, %arg3: memref<1x768xf32, #tpu.memory_space<vmem>>, %arg4: memref<256x768xbf16, #tpu.memory_space<vmem>>, %arg5: memref<1x768xf32, #tpu.memory_space<vmem>>, %arg6: memref<1x128xf32, #tpu.memory_space<vmem>>, %arg7: memref<1x128xf32, #tpu.memory_space<vmem>>, %arg8: memref<128x8xbf16, #tpu.memory_space<vmem>>, %arg9: memref<128x8xbf16, #tpu.memory_space<vmem>>, %arg10: memref<1x8xf32, #tpu.memory_space<vmem>>, %arg11: memref<2x8xf32, #tpu.memory_space<vmem>>, %arg12: memref<4x2x384xf32, #tpu.memory_space<vmem>>, %arg13: memref<4x2x384xf32, #tpu.memory_space<vmem>>, %arg14: memref<4x2x128xf32, #tpu.memory_space<vmem>>, %arg15: memref<4x2x128xf32, #tpu.memory_space<vmem>>) attributes {dimension_semantics = [#tpu.dimension_semantics<parallel>], iteration_bounds = array<i64: 1>, scalar_prefetch = 0 : i64, scratch_operands = 4 : i64, tpu.core_type = #tpu.core_type<tc>, window_params = [{transform_indices = @transform_0, window_bounds = array<i64: 4, 2, 256>}, {pipeline_mode = #tpu.pipeline_mode<synchronous>, transform_indices = @transform_1, window_bounds = array<i64: 256, 768>}, {pipeline_mode = #tpu.pipeline_mode<synchronous>, transform_indices = @transform_2, window_bounds = array<i64: 1, 768>}, {pipeline_mode = #tpu.pipeline_mode<synchronous>, transform_indices = @transform_3, window_bounds = array<i64: 256, 768>}, {pipeline_mode = #tpu.pipeline_mode<synchronous>, transform_indices = @transform_4, window_bounds = array<i64: 1, 768>}, {pipeline_mode = #tpu.pipeline_mode<synchronous>, transform_indices = @transform_5, window_bounds = array<i64: 1, 128>}, {pipeline_mode = #tpu.pipeline_mode<synchronous>, transform_indices = @transform_6, window_bounds = array<i64: 1, 128>}, {pipeline_mode = #tpu.pipeline_mode<synchronous>, transform_indices = @transform_7, window_bounds = array<i64: 128, 8>}, {pipeline_mode = #tpu.pipeline_mode<synchronous>, transform_indices = @transform_8, window_bounds = array<i64: 128, 8>}, {pipeline_mode = #tpu.pipeline_mode<synchronous>, transform_indices = @transform_9, window_bounds = array<i64: 1, 8>}, {transform_indices = @transform_10, window_bounds = array<i64: 2, 8>}]} {
    %c0 = arith.constant 0 : index
    %c0_0 = arith.constant 0 : index
    %c0_1 = arith.constant 0 : index
    %0 = vector.load %arg1[%c0, %c0_0, %c0_1] : memref<4x2x256xbf16, #tpu.memory_space<vmem>>, vector<4x2x256xbf16>
    %1 = vector.shape_cast %0 : vector<4x2x256xbf16> to vector<8x256xbf16>
    %c0_2 = arith.constant 0 : index
    %c0_3 = arith.constant 0 : index
    %2 = vector.load %arg2[%c0_2, %c0_3] : memref<256x768xbf16, #tpu.memory_space<vmem>>, vector<256x768xbf16>
    %cst = arith.constant dense<0.000000e+00> : vector<8x768xf32>
    %3 = tpu.matmul %1, %2, %cst {dimension_numbers = #tpu.dot_dimension_numbers<[1], [0], [0], [1], [0, 0, 1, 1], [], []>} : vector<8x256xbf16>, vector<256x768xbf16>, vector<8x768xf32> -> vector<8x768xf32>
    %c0_4 = arith.constant 0 : index
    %c0_5 = arith.constant 0 : index
    %4 = vector.load %arg3[%c0_4, %c0_5] : memref<1x768xf32, #tpu.memory_space<vmem>>, vector<1x768xf32>
    %5 = vector.broadcast %4 : vector<1x768xf32> to vector<8x768xf32>
    %6 = arith.addf %3, %5 : vector<8x768xf32>
    %7 = vector.shape_cast %6 : vector<8x768xf32> to vector<4x2x768xf32>
    %8 = vector.extract_strided_slice %7 {offsets = [0, 0, 0], sizes = [4, 2, 384], strides = [1, 1, 1]} : vector<4x2x768xf32> to vector<4x2x384xf32>
    %c0_6 = arith.constant 0 : index
    %c0_7 = arith.constant 0 : index
    %c0_8 = arith.constant 0 : index
    %9 = vector.load %arg12[%c0_6, %c0_7, %c0_8] : memref<4x2x384xf32, #tpu.memory_space<vmem>>, vector<4x2x384xf32>
    tpu.vector_store %arg12[%c0_6, %c0_7, %c0_8], %8 {strides = array<i32>} : memref<4x2x384xf32, #tpu.memory_space<vmem>>, vector<4x2x384xf32>,
    %10 = vector.extract_strided_slice %7 {offsets = [0, 0, 384], sizes = [4, 2, 384], strides = [1, 1, 1]} : vector<4x2x768xf32> to vector<4x2x384xf32>
    %c0_9 = arith.constant 0 : index
    %c0_10 = arith.constant 0 : index
    %c0_11 = arith.constant 0 : index
    %11 = vector.load %arg13[%c0_9, %c0_10, %c0_11] : memref<4x2x384xf32, #tpu.memory_space<vmem>>, vector<4x2x384xf32>
    tpu.vector_store %arg13[%c0_9, %c0_10, %c0_11], %10 {strides = array<i32>} : memref<4x2x384xf32, #tpu.memory_space<vmem>>, vector<4x2x384xf32>,
    %c0_12 = arith.constant 0 : index
    %c0_13 = arith.constant 0 : index
    %12 = vector.load %arg4[%c0_12, %c0_13] : memref<256x768xbf16, #tpu.memory_space<vmem>>, vector<256x768xbf16>
    %c0_14 = arith.constant 0 : index
    %c0_15 = arith.constant 0 : index
    %13 = vector.load %arg5[%c0_14, %c0_15] : memref<1x768xf32, #tpu.memory_space<vmem>>, vector<1x768xf32>
    %cst_16 = arith.constant 0.000000e+00 : f32
    %14 = vector.broadcast %cst_16 : f32 to vector<2x256xf32>
    %15 = arith.truncf %14 : vector<2x256xf32> to vector<2x256xbf16>
    %cst_17 = arith.constant dense<0.000000e+00> : vector<2x768xf32>
    %16 = tpu.matmul %15, %12, %cst_17 {dimension_numbers = #tpu.dot_dimension_numbers<[1], [0], [0], [1], [0, 0, 1, 1], [], []>} : vector<2x256xbf16>, vector<256x768xbf16>, vector<2x768xf32> -> vector<2x768xf32>
    %17 = vector.broadcast %13 : vector<1x768xf32> to vector<2x768xf32>
    %18 = arith.addf %16, %17 : vector<2x768xf32>
    %c0_18 = arith.constant 0 : index
    %c0_19 = arith.constant 0 : index
    %c0_20 = arith.constant 0 : index
    %19 = vector.load %arg12[%c0_18, %c0_19, %c0_20] : memref<4x2x384xf32, #tpu.memory_space<vmem>>, vector<1x2x384xf32>
    %20 = vector.shape_cast %19 : vector<1x2x384xf32> to vector<2x384xf32>
    %21 = vector.extract_strided_slice %18 {offsets = [0, 0], sizes = [2, 384], strides = [1, 1]} : vector<2x768xf32> to vector<2x384xf32>
    %22 = vector.extract_strided_slice %14 {offsets = [0, 0], sizes = [2, 128], strides = [1, 1]} : vector<2x256xf32> to vector<2x128xf32>
    %23 = vector.extract_strided_slice %20 {offsets = [0, 0], sizes = [2, 128], strides = [1, 1]} : vector<2x384xf32> to vector<2x128xf32>
    %24 = vector.extract_strided_slice %21 {offsets = [0, 0], sizes = [2, 128], strides = [1, 1]} : vector<2x384xf32> to vector<2x128xf32>
    %25 = arith.addf %23, %24 : vector<2x128xf32>
    %26 = arith.negf %25 : vector<2x128xf32>
    %27 = math.exp %26 : vector<2x128xf32>
    %cst_21 = arith.constant 1.000000e+00 : f32
    %28 = vector.broadcast %cst_21 : f32 to vector<2x128xf32>
    %29 = arith.addf %28, %27 : vector<2x128xf32>
    %30 = arith.divf %28, %29 : vector<2x128xf32>
    %31 = vector.extract_strided_slice %20 {offsets = [0, 128], sizes = [2, 128], strides = [1, 1]} : vector<2x384xf32> to vector<2x128xf32>
    %32 = vector.extract_strided_slice %21 {offsets = [0, 128], sizes = [2, 128], strides = [1, 1]} : vector<2x384xf32> to vector<2x128xf32>
    %33 = arith.addf %31, %32 : vector<2x128xf32>
    %34 = arith.negf %33 : vector<2x128xf32>
    %35 = math.exp %34 : vector<2x128xf32>
    %cst_22 = arith.constant 1.000000e+00 : f32
    %36 = vector.broadcast %cst_22 : f32 to vector<2x128xf32>
    %37 = arith.addf %36, %35 : vector<2x128xf32>
    %38 = arith.divf %36, %37 : vector<2x128xf32>
    %39 = vector.extract_strided_slice %20 {offsets = [0, 256], sizes = [2, 128], strides = [1, 1]} : vector<2x384xf32> to vector<2x128xf32>
    %40 = vector.extract_strided_slice %21 {offsets = [0, 256], sizes = [2, 128], strides = [1, 1]} : vector<2x384xf32> to vector<2x128xf32>
    %41 = arith.mulf %30, %40 : vector<2x128xf32>
    %42 = arith.addf %39, %41 : vector<2x128xf32>
    %43 = math.tanh %42 : vector<2x128xf32>
    %cst_23 = arith.constant 1.000000e+00 : f32
    %44 = vector.broadcast %cst_23 : f32 to vector<2x128xf32>
    %45 = arith.subf %44, %38 : vector<2x128xf32>
    %46 = arith.mulf %45, %43 : vector<2x128xf32>
    %47 = arith.mulf %38, %22 : vector<2x128xf32>
    %48 = arith.addf %46, %47 : vector<2x128xf32>
    %c3 = arith.constant 3 : index
    %c0_24 = arith.constant 0 : index
    %c0_25 = arith.constant 0 : index
    %49 = vector.load %arg13[%c3, %c0_24, %c0_25] : memref<4x2x384xf32, #tpu.memory_space<vmem>>, vector<1x2x384xf32>
    %50 = vector.shape_cast %49 : vector<1x2x384xf32> to vector<2x384xf32>
    %51 = vector.extract_strided_slice %18 {offsets = [0, 384], sizes = [2, 384], strides = [1, 1]} : vector<2x768xf32> to vector<2x384xf32>
    %52 = vector.extract_strided_slice %14 {offsets = [0, 128], sizes = [2, 128], strides = [1, 1]} : vector<2x256xf32> to vector<2x128xf32>
    %53 = vector.extract_strided_slice %50 {offsets = [0, 0], sizes = [2, 128], strides = [1, 1]} : vector<2x384xf32> to vector<2x128xf32>
    %54 = vector.extract_strided_slice %51 {offsets = [0, 0], sizes = [2, 128], strides = [1, 1]} : vector<2x384xf32> to vector<2x128xf32>
    %55 = arith.addf %53, %54 : vector<2x128xf32>
    %56 = arith.negf %55 : vector<2x128xf32>
    %57 = math.exp %56 : vector<2x128xf32>
    %cst_26 = arith.constant 1.000000e+00 : f32
    %58 = vector.broadcast %cst_26 : f32 to vector<2x128xf32>
    %59 = arith.addf %58, %57 : vector<2x128xf32>
    %60 = arith.divf %58, %59 : vector<2x128xf32>
    %61 = vector.extract_strided_slice %50 {offsets = [0, 128], sizes = [2, 128], strides = [1, 1]} : vector<2x384xf32> to vector<2x128xf32>
    %62 = vector.extract_strided_slice %51 {offsets = [0, 128], sizes = [2, 128], strides = [1, 1]} : vector<2x384xf32> to vector<2x128xf32>
    %63 = arith.addf %61, %62 : vector<2x128xf32>
    %64 = arith.negf %63 : vector<2x128xf32>
    %65 = math.exp %64 : vector<2x128xf32>
    %cst_27 = arith.constant 1.000000e+00 : f32
    %66 = vector.broadcast %cst_27 : f32 to vector<2x128xf32>
    %67 = arith.addf %66, %65 : vector<2x128xf32>
    %68 = arith.divf %66, %67 : vector<2x128xf32>
    %69 = vector.extract_strided_slice %50 {offsets = [0, 256], sizes = [2, 128], strides = [1, 1]} : vector<2x384xf32> to vector<2x128xf32>
    %70 = vector.extract_strided_slice %51 {offsets = [0, 256], sizes = [2, 128], strides = [1, 1]} : vector<2x384xf32> to vector<2x128xf32>
    %71 = arith.mulf %60, %70 : vector<2x128xf32>
    %72 = arith.addf %69, %71 : vector<2x128xf32>
    %73 = math.tanh %72 : vector<2x128xf32>
    %cst_28 = arith.constant 1.000000e+00 : f32
    %74 = vector.broadcast %cst_28 : f32 to vector<2x128xf32>
    %75 = arith.subf %74, %68 : vector<2x128xf32>
    %76 = arith.mulf %75, %73 : vector<2x128xf32>
    %77 = arith.mulf %68, %52 : vector<2x128xf32>
    %78 = arith.addf %76, %77 : vector<2x128xf32>
    %c0_29 = arith.constant 0 : index
    %c0_30 = arith.constant 0 : index
    %c0_31 = arith.constant 0 : index
    %79 = vector.load %arg14[%c0_29, %c0_30, %c0_31] : memref<4x2x128xf32, #tpu.memory_space<vmem>>, vector<1x2x128xf32>
    %80 = vector.shape_cast %79 : vector<1x2x128xf32> to vector<2x128xf32>
    %81 = vector.shape_cast %48 : vector<2x128xf32> to vector<1x2x128xf32>
    tpu.vector_store %arg14[%c0_29, %c0_30, %c0_31], %81 {strides = array<i32>} : memref<4x2x128xf32, #tpu.memory_space<vmem>>, vector<1x2x128xf32>,
    %c3_32 = arith.constant 3 : index
    %c0_33 = arith.constant 0 : index
    %c0_34 = arith.constant 0 : index
    %82 = vector.load %arg15[%c3_32, %c0_33, %c0_34] : memref<4x2x128xf32, #tpu.memory_space<vmem>>, vector<1x2x128xf32>
    %83 = vector.shape_cast %82 : vector<1x2x128xf32> to vector<2x128xf32>
    %84 = vector.shape_cast %78 : vector<2x128xf32> to vector<1x2x128xf32>
    tpu.vector_store %arg15[%c3_32, %c0_33, %c0_34], %84 {strides = array<i32>} : memref<4x2x128xf32, #tpu.memory_space<vmem>>, vector<1x2x128xf32>,
    %85 = tpu.concatenate %48, %78 in 1 : vector<2x128xf32>, vector<2x128xf32> -> vector<2x256xf32>
    %86 = arith.truncf %85 : vector<2x256xf32> to vector<2x256xbf16>
    %cst_35 = arith.constant dense<0.000000e+00> : vector<2x768xf32>
    %87 = tpu.matmul %86, %12, %cst_35 {dimension_numbers = #tpu.dot_dimension_numbers<[1], [0], [0], [1], [0, 0, 1, 1], [], []>} : vector<2x256xbf16>, vector<256x768xbf16>, vector<2x768xf32> -> vector<2x768xf32>
    %88 = vector.broadcast %13 : vector<1x768xf32> to vector<2x768xf32>
    %89 = arith.addf %87, %88 : vector<2x768xf32>
    %c1 = arith.constant 1 : index
    %c0_36 = arith.constant 0 : index
    %c0_37 = arith.constant 0 : index
    %90 = vector.load %arg12[%c1, %c0_36, %c0_37] : memref<4x2x384xf32, #tpu.memory_space<vmem>>, vector<1x2x384xf32>
    %91 = vector.shape_cast %90 : vector<1x2x384xf32> to vector<2x384xf32>
    %92 = vector.extract_strided_slice %89 {offsets = [0, 0], sizes = [2, 384], strides = [1, 1]} : vector<2x768xf32> to vector<2x384xf32>
    %93 = vector.extract_strided_slice %85 {offsets = [0, 0], sizes = [2, 128], strides = [1, 1]} : vector<2x256xf32> to vector<2x128xf32>
    %94 = vector.extract_strided_slice %91 {offsets = [0, 0], sizes = [2, 128], strides = [1, 1]} : vector<2x384xf32> to vector<2x128xf32>
    %95 = vector.extract_strided_slice %92 {offsets = [0, 0], sizes = [2, 128], strides = [1, 1]} : vector<2x384xf32> to vector<2x128xf32>
    %96 = arith.addf %94, %95 : vector<2x128xf32>
    %97 = arith.negf %96 : vector<2x128xf32>
    %98 = math.exp %97 : vector<2x128xf32>
    %cst_38 = arith.constant 1.000000e+00 : f32
    %99 = vector.broadcast %cst_38 : f32 to vector<2x128xf32>
    %100 = arith.addf %99, %98 : vector<2x128xf32>
    %101 = arith.divf %99, %100 : vector<2x128xf32>
    %102 = vector.extract_strided_slice %91 {offsets = [0, 128], sizes = [2, 128], strides = [1, 1]} : vector<2x384xf32> to vector<2x128xf32>
    %103 = vector.extract_strided_slice %92 {offsets = [0, 128], sizes = [2, 128], strides = [1, 1]} : vector<2x384xf32> to vector<2x128xf32>
    %104 = arith.addf %102, %103 : vector<2x128xf32>
    %105 = arith.negf %104 : vector<2x128xf32>
    %106 = math.exp %105 : vector<2x128xf32>
    %cst_39 = arith.constant 1.000000e+00 : f32
    %107 = vector.broadcast %cst_39 : f32 to vector<2x128xf32>
    %108 = arith.addf %107, %106 : vector<2x128xf32>
    %109 = arith.divf %107, %108 : vector<2x128xf32>
    %110 = vector.extract_strided_slice %91 {offsets = [0, 256], sizes = [2, 128], strides = [1, 1]} : vector<2x384xf32> to vector<2x128xf32>
    %111 = vector.extract_strided_slice %92 {offsets = [0, 256], sizes = [2, 128], strides = [1, 1]} : vector<2x384xf32> to vector<2x128xf32>
    %112 = arith.mulf %101, %111 : vector<2x128xf32>
    %113 = arith.addf %110, %112 : vector<2x128xf32>
    %114 = math.tanh %113 : vector<2x128xf32>
    %cst_40 = arith.constant 1.000000e+00 : f32
    %115 = vector.broadcast %cst_40 : f32 to vector<2x128xf32>
    %116 = arith.subf %115, %109 : vector<2x128xf32>
    %117 = arith.mulf %116, %114 : vector<2x128xf32>
    %118 = arith.mulf %109, %93 : vector<2x128xf32>
    %119 = arith.addf %117, %118 : vector<2x128xf32>
    %c2 = arith.constant 2 : index
    %c0_41 = arith.constant 0 : index
    %c0_42 = arith.constant 0 : index
    %120 = vector.load %arg13[%c2, %c0_41, %c0_42] : memref<4x2x384xf32, #tpu.memory_space<vmem>>, vector<1x2x384xf32>
    %121 = vector.shape_cast %120 : vector<1x2x384xf32> to vector<2x384xf32>
    %122 = vector.extract_strided_slice %89 {offsets = [0, 384], sizes = [2, 384], strides = [1, 1]} : vector<2x768xf32> to vector<2x384xf32>
    %123 = vector.extract_strided_slice %85 {offsets = [0, 128], sizes = [2, 128], strides = [1, 1]} : vector<2x256xf32> to vector<2x128xf32>
    %124 = vector.extract_strided_slice %121 {offsets = [0, 0], sizes = [2, 128], strides = [1, 1]} : vector<2x384xf32> to vector<2x128xf32>
    %125 = vector.extract_strided_slice %122 {offsets = [0, 0], sizes = [2, 128], strides = [1, 1]} : vector<2x384xf32> to vector<2x128xf32>
    %126 = arith.addf %124, %125 : vector<2x128xf32>
    %127 = arith.negf %126 : vector<2x128xf32>
    %128 = math.exp %127 : vector<2x128xf32>
    %cst_43 = arith.constant 1.000000e+00 : f32
    %129 = vector.broadcast %cst_43 : f32 to vector<2x128xf32>
    %130 = arith.addf %129, %128 : vector<2x128xf32>
    %131 = arith.divf %129, %130 : vector<2x128xf32>
    %132 = vector.extract_strided_slice %121 {offsets = [0, 128], sizes = [2, 128], strides = [1, 1]} : vector<2x384xf32> to vector<2x128xf32>
    %133 = vector.extract_strided_slice %122 {offsets = [0, 128], sizes = [2, 128], strides = [1, 1]} : vector<2x384xf32> to vector<2x128xf32>
    %134 = arith.addf %132, %133 : vector<2x128xf32>
    %135 = arith.negf %134 : vector<2x128xf32>
    %136 = math.exp %135 : vector<2x128xf32>
    %cst_44 = arith.constant 1.000000e+00 : f32
    %137 = vector.broadcast %cst_44 : f32 to vector<2x128xf32>
    %138 = arith.addf %137, %136 : vector<2x128xf32>
    %139 = arith.divf %137, %138 : vector<2x128xf32>
    %140 = vector.extract_strided_slice %121 {offsets = [0, 256], sizes = [2, 128], strides = [1, 1]} : vector<2x384xf32> to vector<2x128xf32>
    %141 = vector.extract_strided_slice %122 {offsets = [0, 256], sizes = [2, 128], strides = [1, 1]} : vector<2x384xf32> to vector<2x128xf32>
    %142 = arith.mulf %131, %141 : vector<2x128xf32>
    %143 = arith.addf %140, %142 : vector<2x128xf32>
    %144 = math.tanh %143 : vector<2x128xf32>
    %cst_45 = arith.constant 1.000000e+00 : f32
    %145 = vector.broadcast %cst_45 : f32 to vector<2x128xf32>
    %146 = arith.subf %145, %139 : vector<2x128xf32>
    %147 = arith.mulf %146, %144 : vector<2x128xf32>
    %148 = arith.mulf %139, %123 : vector<2x128xf32>
    %149 = arith.addf %147, %148 : vector<2x128xf32>
    %c1_46 = arith.constant 1 : index
    %c0_47 = arith.constant 0 : index
    %c0_48 = arith.constant 0 : index
    %150 = vector.load %arg14[%c1_46, %c0_47, %c0_48] : memref<4x2x128xf32, #tpu.memory_space<vmem>>, vector<1x2x128xf32>
    %151 = vector.shape_cast %150 : vector<1x2x128xf32> to vector<2x128xf32>
    %152 = vector.shape_cast %119 : vector<2x128xf32> to vector<1x2x128xf32>
    tpu.vector_store %arg14[%c1_46, %c0_47, %c0_48], %152 {strides = array<i32>} : memref<4x2x128xf32, #tpu.memory_space<vmem>>, vector<1x2x128xf32>,
    %c2_49 = arith.constant 2 : index
    %c0_50 = arith.constant 0 : index
    %c0_51 = arith.constant 0 : index
    %153 = vector.load %arg15[%c2_49, %c0_50, %c0_51] : memref<4x2x128xf32, #tpu.memory_space<vmem>>, vector<1x2x128xf32>
    %154 = vector.shape_cast %153 : vector<1x2x128xf32> to vector<2x128xf32>
    %155 = vector.shape_cast %149 : vector<2x128xf32> to vector<1x2x128xf32>
    tpu.vector_store %arg15[%c2_49, %c0_50, %c0_51], %155 {strides = array<i32>} : memref<4x2x128xf32, #tpu.memory_space<vmem>>, vector<1x2x128xf32>,
    %156 = tpu.concatenate %119, %149 in 1 : vector<2x128xf32>, vector<2x128xf32> -> vector<2x256xf32>
    %157 = arith.truncf %156 : vector<2x256xf32> to vector<2x256xbf16>
    %cst_52 = arith.constant dense<0.000000e+00> : vector<2x768xf32>
    %158 = tpu.matmul %157, %12, %cst_52 {dimension_numbers = #tpu.dot_dimension_numbers<[1], [0], [0], [1], [0, 0, 1, 1], [], []>} : vector<2x256xbf16>, vector<256x768xbf16>, vector<2x768xf32> -> vector<2x768xf32>
    %159 = vector.broadcast %13 : vector<1x768xf32> to vector<2x768xf32>
    %160 = arith.addf %158, %159 : vector<2x768xf32>
    %c2_53 = arith.constant 2 : index
    %c0_54 = arith.constant 0 : index
    %c0_55 = arith.constant 0 : index
    %161 = vector.load %arg12[%c2_53, %c0_54, %c0_55] : memref<4x2x384xf32, #tpu.memory_space<vmem>>, vector<1x2x384xf32>
    %162 = vector.shape_cast %161 : vector<1x2x384xf32> to vector<2x384xf32>
    %163 = vector.extract_strided_slice %160 {offsets = [0, 0], sizes = [2, 384], strides = [1, 1]} : vector<2x768xf32> to vector<2x384xf32>
    %164 = vector.extract_strided_slice %156 {offsets = [0, 0], sizes = [2, 128], strides = [1, 1]} : vector<2x256xf32> to vector<2x128xf32>
    %165 = vector.extract_strided_slice %162 {offsets = [0, 0], sizes = [2, 128], strides = [1, 1]} : vector<2x384xf32> to vector<2x128xf32>
    %166 = vector.extract_strided_slice %163 {offsets = [0, 0], sizes = [2, 128], strides = [1, 1]} : vector<2x384xf32> to vector<2x128xf32>
    %167 = arith.addf %165, %166 : vector<2x128xf32>
    %168 = arith.negf %167 : vector<2x128xf32>
    %169 = math.exp %168 : vector<2x128xf32>
    %cst_56 = arith.constant 1.000000e+00 : f32
    %170 = vector.broadcast %cst_56 : f32 to vector<2x128xf32>
    %171 = arith.addf %170, %169 : vector<2x128xf32>
    %172 = arith.divf %170, %171 : vector<2x128xf32>
    %173 = vector.extract_strided_slice %162 {offsets = [0, 128], sizes = [2, 128], strides = [1, 1]} : vector<2x384xf32> to vector<2x128xf32>
    %174 = vector.extract_strided_slice %163 {offsets = [0, 128], sizes = [2, 128], strides = [1, 1]} : vector<2x384xf32> to vector<2x128xf32>
    %175 = arith.addf %173, %174 : vector<2x128xf32>
    %176 = arith.negf %175 : vector<2x128xf32>
    %177 = math.exp %176 : vector<2x128xf32>
    %cst_57 = arith.constant 1.000000e+00 : f32
    %178 = vector.broadcast %cst_57 : f32 to vector<2x128xf32>
    %179 = arith.addf %178, %177 : vector<2x128xf32>
    %180 = arith.divf %178, %179 : vector<2x128xf32>
    %181 = vector.extract_strided_slice %162 {offsets = [0, 256], sizes = [2, 128], strides = [1, 1]} : vector<2x384xf32> to vector<2x128xf32>
    %182 = vector.extract_strided_slice %163 {offsets = [0, 256], sizes = [2, 128], strides = [1, 1]} : vector<2x384xf32> to vector<2x128xf32>
    %183 = arith.mulf %172, %182 : vector<2x128xf32>
    %184 = arith.addf %181, %183 : vector<2x128xf32>
    %185 = math.tanh %184 : vector<2x128xf32>
    %cst_58 = arith.constant 1.000000e+00 : f32
    %186 = vector.broadcast %cst_58 : f32 to vector<2x128xf32>
    %187 = arith.subf %186, %180 : vector<2x128xf32>
    %188 = arith.mulf %187, %185 : vector<2x128xf32>
    %189 = arith.mulf %180, %164 : vector<2x128xf32>
    %190 = arith.addf %188, %189 : vector<2x128xf32>
    %c1_59 = arith.constant 1 : index
    %c0_60 = arith.constant 0 : index
    %c0_61 = arith.constant 0 : index
    %191 = vector.load %arg13[%c1_59, %c0_60, %c0_61] : memref<4x2x384xf32, #tpu.memory_space<vmem>>, vector<1x2x384xf32>
    %192 = vector.shape_cast %191 : vector<1x2x384xf32> to vector<2x384xf32>
    %193 = vector.extract_strided_slice %160 {offsets = [0, 384], sizes = [2, 384], strides = [1, 1]} : vector<2x768xf32> to vector<2x384xf32>
    %194 = vector.extract_strided_slice %156 {offsets = [0, 128], sizes = [2, 128], strides = [1, 1]} : vector<2x256xf32> to vector<2x128xf32>
    %195 = vector.extract_strided_slice %192 {offsets = [0, 0], sizes = [2, 128], strides = [1, 1]} : vector<2x384xf32> to vector<2x128xf32>
    %196 = vector.extract_strided_slice %193 {offsets = [0, 0], sizes = [2, 128], strides = [1, 1]} : vector<2x384xf32> to vector<2x128xf32>
    %197 = arith.addf %195, %196 : vector<2x128xf32>
    %198 = arith.negf %197 : vector<2x128xf32>
    %199 = math.exp %198 : vector<2x128xf32>
    %cst_62 = arith.constant 1.000000e+00 : f32
    %200 = vector.broadcast %cst_62 : f32 to vector<2x128xf32>
    %201 = arith.addf %200, %199 : vector<2x128xf32>
    %202 = arith.divf %200, %201 : vector<2x128xf32>
    %203 = vector.extract_strided_slice %192 {offsets = [0, 128], sizes = [2, 128], strides = [1, 1]} : vector<2x384xf32> to vector<2x128xf32>
    %204 = vector.extract_strided_slice %193 {offsets = [0, 128], sizes = [2, 128], strides = [1, 1]} : vector<2x384xf32> to vector<2x128xf32>
    %205 = arith.addf %203, %204 : vector<2x128xf32>
    %206 = arith.negf %205 : vector<2x128xf32>
    %207 = math.exp %206 : vector<2x128xf32>
    %cst_63 = arith.constant 1.000000e+00 : f32
    %208 = vector.broadcast %cst_63 : f32 to vector<2x128xf32>
    %209 = arith.addf %208, %207 : vector<2x128xf32>
    %210 = arith.divf %208, %209 : vector<2x128xf32>
    %211 = vector.extract_strided_slice %192 {offsets = [0, 256], sizes = [2, 128], strides = [1, 1]} : vector<2x384xf32> to vector<2x128xf32>
    %212 = vector.extract_strided_slice %193 {offsets = [0, 256], sizes = [2, 128], strides = [1, 1]} : vector<2x384xf32> to vector<2x128xf32>
    %213 = arith.mulf %202, %212 : vector<2x128xf32>
    %214 = arith.addf %211, %213 : vector<2x128xf32>
    %215 = math.tanh %214 : vector<2x128xf32>
    %cst_64 = arith.constant 1.000000e+00 : f32
    %216 = vector.broadcast %cst_64 : f32 to vector<2x128xf32>
    %217 = arith.subf %216, %210 : vector<2x128xf32>
    %218 = arith.mulf %217, %215 : vector<2x128xf32>
    %219 = arith.mulf %210, %194 : vector<2x128xf32>
    %220 = arith.addf %218, %219 : vector<2x128xf32>
    %c2_65 = arith.constant 2 : index
    %c0_66 = arith.constant 0 : index
    %c0_67 = arith.constant 0 : index
    %221 = vector.load %arg14[%c2_65, %c0_66, %c0_67] : memref<4x2x128xf32, #tpu.memory_space<vmem>>, vector<1x2x128xf32>
    %222 = vector.shape_cast %221 : vector<1x2x128xf32> to vector<2x128xf32>
    %223 = vector.shape_cast %190 : vector<2x128xf32> to vector<1x2x128xf32>
    tpu.vector_store %arg14[%c2_65, %c0_66, %c0_67], %223 {strides = array<i32>} : memref<4x2x128xf32, #tpu.memory_space<vmem>>, vector<1x2x128xf32>,
    %c1_68 = arith.constant 1 : index
    %c0_69 = arith.constant 0 : index
    %c0_70 = arith.constant 0 : index
    %224 = vector.load %arg15[%c1_68, %c0_69, %c0_70] : memref<4x2x128xf32, #tpu.memory_space<vmem>>, vector<1x2x128xf32>
    %225 = vector.shape_cast %224 : vector<1x2x128xf32> to vector<2x128xf32>
    %226 = vector.shape_cast %220 : vector<2x128xf32> to vector<1x2x128xf32>
    tpu.vector_store %arg15[%c1_68, %c0_69, %c0_70], %226 {strides = array<i32>} : memref<4x2x128xf32, #tpu.memory_space<vmem>>, vector<1x2x128xf32>,
    %227 = tpu.concatenate %190, %220 in 1 : vector<2x128xf32>, vector<2x128xf32> -> vector<2x256xf32>
    %228 = arith.truncf %227 : vector<2x256xf32> to vector<2x256xbf16>
    %cst_71 = arith.constant dense<0.000000e+00> : vector<2x768xf32>
    %229 = tpu.matmul %228, %12, %cst_71 {dimension_numbers = #tpu.dot_dimension_numbers<[1], [0], [0], [1], [0, 0, 1, 1], [], []>} : vector<2x256xbf16>, vector<256x768xbf16>, vector<2x768xf32> -> vector<2x768xf32>
    %230 = vector.broadcast %13 : vector<1x768xf32> to vector<2x768xf32>
    %231 = arith.addf %229, %230 : vector<2x768xf32>
    %c3_72 = arith.constant 3 : index
    %c0_73 = arith.constant 0 : index
    %c0_74 = arith.constant 0 : index
    %232 = vector.load %arg12[%c3_72, %c0_73, %c0_74] : memref<4x2x384xf32, #tpu.memory_space<vmem>>, vector<1x2x384xf32>
    %233 = vector.shape_cast %232 : vector<1x2x384xf32> to vector<2x384xf32>
    %234 = vector.extract_strided_slice %231 {offsets = [0, 0], sizes = [2, 384], strides = [1, 1]} : vector<2x768xf32> to vector<2x384xf32>
    %235 = vector.extract_strided_slice %227 {offsets = [0, 0], sizes = [2, 128], strides = [1, 1]} : vector<2x256xf32> to vector<2x128xf32>
    %236 = vector.extract_strided_slice %233 {offsets = [0, 0], sizes = [2, 128], strides = [1, 1]} : vector<2x384xf32> to vector<2x128xf32>
    %237 = vector.extract_strided_slice %234 {offsets = [0, 0], sizes = [2, 128], strides = [1, 1]} : vector<2x384xf32> to vector<2x128xf32>
    %238 = arith.addf %236, %237 : vector<2x128xf32>
    %239 = arith.negf %238 : vector<2x128xf32>
    %240 = math.exp %239 : vector<2x128xf32>
    %cst_75 = arith.constant 1.000000e+00 : f32
    %241 = vector.broadcast %cst_75 : f32 to vector<2x128xf32>
    %242 = arith.addf %241, %240 : vector<2x128xf32>
    %243 = arith.divf %241, %242 : vector<2x128xf32>
    %244 = vector.extract_strided_slice %233 {offsets = [0, 128], sizes = [2, 128], strides = [1, 1]} : vector<2x384xf32> to vector<2x128xf32>
    %245 = vector.extract_strided_slice %234 {offsets = [0, 128], sizes = [2, 128], strides = [1, 1]} : vector<2x384xf32> to vector<2x128xf32>
    %246 = arith.addf %244, %245 : vector<2x128xf32>
    %247 = arith.negf %246 : vector<2x128xf32>
    %248 = math.exp %247 : vector<2x128xf32>
    %cst_76 = arith.constant 1.000000e+00 : f32
    %249 = vector.broadcast %cst_76 : f32 to vector<2x128xf32>
    %250 = arith.addf %249, %248 : vector<2x128xf32>
    %251 = arith.divf %249, %250 : vector<2x128xf32>
    %252 = vector.extract_strided_slice %233 {offsets = [0, 256], sizes = [2, 128], strides = [1, 1]} : vector<2x384xf32> to vector<2x128xf32>
    %253 = vector.extract_strided_slice %234 {offsets = [0, 256], sizes = [2, 128], strides = [1, 1]} : vector<2x384xf32> to vector<2x128xf32>
    %254 = arith.mulf %243, %253 : vector<2x128xf32>
    %255 = arith.addf %252, %254 : vector<2x128xf32>
    %256 = math.tanh %255 : vector<2x128xf32>
    %cst_77 = arith.constant 1.000000e+00 : f32
    %257 = vector.broadcast %cst_77 : f32 to vector<2x128xf32>
    %258 = arith.subf %257, %251 : vector<2x128xf32>
    %259 = arith.mulf %258, %256 : vector<2x128xf32>
    %260 = arith.mulf %251, %235 : vector<2x128xf32>
    %261 = arith.addf %259, %260 : vector<2x128xf32>
    %c0_78 = arith.constant 0 : index
    %c0_79 = arith.constant 0 : index
    %c0_80 = arith.constant 0 : index
    %262 = vector.load %arg13[%c0_78, %c0_79, %c0_80] : memref<4x2x384xf32, #tpu.memory_space<vmem>>, vector<1x2x384xf32>
    %263 = vector.shape_cast %262 : vector<1x2x384xf32> to vector<2x384xf32>
    %264 = vector.extract_strided_slice %231 {offsets = [0, 384], sizes = [2, 384], strides = [1, 1]} : vector<2x768xf32> to vector<2x384xf32>
    %265 = vector.extract_strided_slice %227 {offsets = [0, 128], sizes = [2, 128], strides = [1, 1]} : vector<2x256xf32> to vector<2x128xf32>
    %266 = vector.extract_strided_slice %263 {offsets = [0, 0], sizes = [2, 128], strides = [1, 1]} : vector<2x384xf32> to vector<2x128xf32>
    %267 = vector.extract_strided_slice %264 {offsets = [0, 0], sizes = [2, 128], strides = [1, 1]} : vector<2x384xf32> to vector<2x128xf32>
    %268 = arith.addf %266, %267 : vector<2x128xf32>
    %269 = arith.negf %268 : vector<2x128xf32>
    %270 = math.exp %269 : vector<2x128xf32>
    %cst_81 = arith.constant 1.000000e+00 : f32
    %271 = vector.broadcast %cst_81 : f32 to vector<2x128xf32>
    %272 = arith.addf %271, %270 : vector<2x128xf32>
    %273 = arith.divf %271, %272 : vector<2x128xf32>
    %274 = vector.extract_strided_slice %263 {offsets = [0, 128], sizes = [2, 128], strides = [1, 1]} : vector<2x384xf32> to vector<2x128xf32>
    %275 = vector.extract_strided_slice %264 {offsets = [0, 128], sizes = [2, 128], strides = [1, 1]} : vector<2x384xf32> to vector<2x128xf32>
    %276 = arith.addf %274, %275 : vector<2x128xf32>
    %277 = arith.negf %276 : vector<2x128xf32>
    %278 = math.exp %277 : vector<2x128xf32>
    %cst_82 = arith.constant 1.000000e+00 : f32
    %279 = vector.broadcast %cst_82 : f32 to vector<2x128xf32>
    %280 = arith.addf %279, %278 : vector<2x128xf32>
    %281 = arith.divf %279, %280 : vector<2x128xf32>
    %282 = vector.extract_strided_slice %263 {offsets = [0, 256], sizes = [2, 128], strides = [1, 1]} : vector<2x384xf32> to vector<2x128xf32>
    %283 = vector.extract_strided_slice %264 {offsets = [0, 256], sizes = [2, 128], strides = [1, 1]} : vector<2x384xf32> to vector<2x128xf32>
    %284 = arith.mulf %273, %283 : vector<2x128xf32>
    %285 = arith.addf %282, %284 : vector<2x128xf32>
    %286 = math.tanh %285 : vector<2x128xf32>
    %cst_83 = arith.constant 1.000000e+00 : f32
    %287 = vector.broadcast %cst_83 : f32 to vector<2x128xf32>
    %288 = arith.subf %287, %281 : vector<2x128xf32>
    %289 = arith.mulf %288, %286 : vector<2x128xf32>
    %290 = arith.mulf %281, %265 : vector<2x128xf32>
    %291 = arith.addf %289, %290 : vector<2x128xf32>
    %c3_84 = arith.constant 3 : index
    %c0_85 = arith.constant 0 : index
    %c0_86 = arith.constant 0 : index
    %292 = vector.load %arg14[%c3_84, %c0_85, %c0_86] : memref<4x2x128xf32, #tpu.memory_space<vmem>>, vector<1x2x128xf32>
    %293 = vector.shape_cast %292 : vector<1x2x128xf32> to vector<2x128xf32>
    %294 = vector.shape_cast %261 : vector<2x128xf32> to vector<1x2x128xf32>
    tpu.vector_store %arg14[%c3_84, %c0_85, %c0_86], %294 {strides = array<i32>} : memref<4x2x128xf32, #tpu.memory_space<vmem>>, vector<1x2x128xf32>,
    %c0_87 = arith.constant 0 : index
    %c0_88 = arith.constant 0 : index
    %c0_89 = arith.constant 0 : index
    %295 = vector.load %arg15[%c0_87, %c0_88, %c0_89] : memref<4x2x128xf32, #tpu.memory_space<vmem>>, vector<1x2x128xf32>
    %296 = vector.shape_cast %295 : vector<1x2x128xf32> to vector<2x128xf32>
    %297 = vector.shape_cast %291 : vector<2x128xf32> to vector<1x2x128xf32>
    tpu.vector_store %arg15[%c0_87, %c0_88, %c0_89], %297 {strides = array<i32>} : memref<4x2x128xf32, #tpu.memory_space<vmem>>, vector<1x2x128xf32>,
    %c0_90 = arith.constant 0 : index
    %c0_91 = arith.constant 0 : index
    %c0_92 = arith.constant 0 : index
    %298 = vector.load %arg14[%c0_90, %c0_91, %c0_92] : memref<4x2x128xf32, #tpu.memory_space<vmem>>, vector<4x2x128xf32>
    %c0_93 = arith.constant 0 : index
    %c0_94 = arith.constant 0 : index
    %c0_95 = arith.constant 0 : index
    %299 = vector.load %arg15[%c0_93, %c0_94, %c0_95] : memref<4x2x128xf32, #tpu.memory_space<vmem>>, vector<4x2x128xf32>
    %c0_96 = arith.constant 0 : index
    %c0_97 = arith.constant 0 : index
    %300 = vector.load %arg6[%c0_96, %c0_97] : memref<1x128xf32, #tpu.memory_space<vmem>>, vector<1x128xf32>
    %301 = vector.shape_cast %300 : vector<1x128xf32> to vector<1x1x128xf32>
    %c0_98 = arith.constant 0 : index
    %c0_99 = arith.constant 0 : index
    %302 = vector.load %arg7[%c0_98, %c0_99] : memref<1x128xf32, #tpu.memory_space<vmem>>, vector<1x128xf32>
    %303 = vector.shape_cast %302 : vector<1x128xf32> to vector<1x1x128xf32>
    %304 = vector.broadcast %301 : vector<1x1x128xf32> to vector<4x2x128xf32>
    %305 = arith.mulf %298, %304 : vector<4x2x128xf32>
    %cst_100 = arith.constant dense<0.000000e+00> : vector<4x2xf32>
    %306 = vector.multi_reduction <add>, %305, %cst_100 [2] : vector<4x2x128xf32> to vector<4x2xf32>
    %307 = vector.shape_cast %306 : vector<4x2xf32> to vector<4x2x1xf32>
    %308 = vector.broadcast %303 : vector<1x1x128xf32> to vector<4x2x128xf32>
    %309 = arith.mulf %299, %308 : vector<4x2x128xf32>
    %cst_101 = arith.constant dense<0.000000e+00> : vector<4x2xf32>
    %310 = vector.multi_reduction <add>, %309, %cst_101 [2] : vector<4x2x128xf32> to vector<4x2xf32>
    %311 = vector.shape_cast %310 : vector<4x2xf32> to vector<4x2x1xf32>
    %312 = arith.addf %307, %311 : vector<4x2x1xf32>
    %cst_102 = arith.constant dense<0xFF800000> : vector<2x1xf32>
    %313 = vector.multi_reduction <maximumf>, %312, %cst_102 [0] : vector<4x2x1xf32> to vector<2x1xf32>
    %314 = vector.shape_cast %313 : vector<2x1xf32> to vector<1x2x1xf32>
    %315 = vector.broadcast %314 : vector<1x2x1xf32> to vector<4x2x1xf32>
    %316 = arith.subf %312, %315 : vector<4x2x1xf32>
    %317 = math.exp %316 : vector<4x2x1xf32>
    %cst_103 = arith.constant dense<0.000000e+00> : vector<2x1xf32>
    %318 = vector.multi_reduction <add>, %317, %cst_103 [0] : vector<4x2x1xf32> to vector<2x1xf32>
    %319 = vector.shape_cast %318 : vector<2x1xf32> to vector<1x2x1xf32>
    %320 = tpu.reciprocal %319 {approx = true} : vector<1x2x1xf32> -> vector<1x2x1xf32>
    %321 = vector.broadcast %320 : vector<1x2x1xf32> to vector<4x2x1xf32>
    %322 = arith.mulf %317, %321 : vector<4x2x1xf32>
    %323 = vector.broadcast %322 : vector<4x2x1xf32> to vector<4x2x128xf32>
    %324 = arith.mulf %323, %298 : vector<4x2x128xf32>
    %cst_104 = arith.constant dense<0.000000e+00> : vector<2x128xf32>
    %325 = vector.multi_reduction <add>, %324, %cst_104 [0] : vector<4x2x128xf32> to vector<2x128xf32>
    %326 = vector.broadcast %322 : vector<4x2x1xf32> to vector<4x2x128xf32>
    %327 = arith.mulf %326, %299 : vector<4x2x128xf32>
    %cst_105 = arith.constant dense<0.000000e+00> : vector<2x128xf32>
    %328 = vector.multi_reduction <add>, %327, %cst_105 [0] : vector<4x2x128xf32> to vector<2x128xf32>
    %329 = arith.truncf %325 : vector<2x128xf32> to vector<2x128xbf16>
    %c0_106 = arith.constant 0 : index
    %c0_107 = arith.constant 0 : index
    %330 = vector.load %arg8[%c0_106, %c0_107] : memref<128x8xbf16, #tpu.memory_space<vmem>>, vector<128x8xbf16>
    %cst_108 = arith.constant dense<0.000000e+00> : vector<2x8xf32>
    %331 = tpu.matmul %329, %330, %cst_108 {dimension_numbers = #tpu.dot_dimension_numbers<[1], [0], [0], [1], [0, 0, 1, 1], [], []>} : vector<2x128xbf16>, vector<128x8xbf16>, vector<2x8xf32> -> vector<2x8xf32>
    %332 = arith.truncf %328 : vector<2x128xf32> to vector<2x128xbf16>
    %c0_109 = arith.constant 0 : index
    %c0_110 = arith.constant 0 : index
    %333 = vector.load %arg9[%c0_109, %c0_110] : memref<128x8xbf16, #tpu.memory_space<vmem>>, vector<128x8xbf16>
    %cst_111 = arith.constant dense<0.000000e+00> : vector<2x8xf32>
    %334 = tpu.matmul %332, %333, %cst_111 {dimension_numbers = #tpu.dot_dimension_numbers<[1], [0], [0], [1], [0, 0, 1, 1], [], []>} : vector<2x128xbf16>, vector<128x8xbf16>, vector<2x8xf32> -> vector<2x8xf32>
    %335 = arith.addf %331, %334 : vector<2x8xf32>
    %c0_112 = arith.constant 0 : index
    %c0_113 = arith.constant 0 : index
    %336 = vector.load %arg10[%c0_112, %c0_113] : memref<1x8xf32, #tpu.memory_space<vmem>>, vector<1x8xf32>
    %337 = vector.broadcast %336 : vector<1x8xf32> to vector<2x8xf32>
    %338 = arith.addf %335, %337 : vector<2x8xf32>
    %c0_114 = arith.constant 0 : index
    %c0_115 = arith.constant 0 : index
    %339 = vector.load %arg11[%c0_114, %c0_115] : memref<2x8xf32, #tpu.memory_space<vmem>>, vector<2x8xf32>
    tpu.vector_store %arg11[%c0_114, %c0_115], %338 {strides = array<i32>} : memref<2x8xf32, #tpu.memory_space<vmem>>, vector<2x8xf32>,
    return
  }
  func.func @transform_0(%arg0: i32) -> (i32, i32, i32) {
    %c0_i32 = arith.constant 0 : i32
    %c0_i32_0 = arith.constant 0 : i32
    %c0_i32_1 = arith.constant 0 : i32
    return %c0_i32, %arg0, %c0_i32_0 : i32, i32, i32
  }
  func.func @transform_1(%arg0: i32) -> (i32, i32) {
    %c0_i32 = arith.constant 0 : i32
    %c0_i32_0 = arith.constant 0 : i32
    %c0_i32_1 = arith.constant 0 : i32
    return %c0_i32, %c0_i32_0 : i32, i32
  }
  func.func @transform_2(%arg0: i32) -> (i32, i32) {
    %c0_i32 = arith.constant 0 : i32
    %c0_i32_0 = arith.constant 0 : i32
    %c0_i32_1 = arith.constant 0 : i32
    return %c0_i32, %c0_i32_0 : i32, i32
  }
  func.func @transform_3(%arg0: i32) -> (i32, i32) {
    %c0_i32 = arith.constant 0 : i32
    %c0_i32_0 = arith.constant 0 : i32
    %c0_i32_1 = arith.constant 0 : i32
    return %c0_i32, %c0_i32_0 : i32, i32
  }
  func.func @transform_4(%arg0: i32) -> (i32, i32) {
    %c0_i32 = arith.constant 0 : i32
    %c0_i32_0 = arith.constant 0 : i32
    %c0_i32_1 = arith.constant 0 : i32
    return %c0_i32, %c0_i32_0 : i32, i32
  }
  func.func @transform_5(%arg0: i32) -> (i32, i32) {
    %c0_i32 = arith.constant 0 : i32
    %c0_i32_0 = arith.constant 0 : i32
    %c0_i32_1 = arith.constant 0 : i32
    return %c0_i32, %c0_i32_0 : i32, i32
  }
  func.func @transform_6(%arg0: i32) -> (i32, i32) {
    %c0_i32 = arith.constant 0 : i32
    %c0_i32_0 = arith.constant 0 : i32
    %c0_i32_1 = arith.constant 0 : i32
    return %c0_i32, %c0_i32_0 : i32, i32
  }
  func.func @transform_7(%arg0: i32) -> (i32, i32) {
    %c0_i32 = arith.constant 0 : i32
    %c0_i32_0 = arith.constant 0 : i32
    %c0_i32_1 = arith.constant 0 : i32
    return %c0_i32, %c0_i32_0 : i32, i32
  }
  func.func @transform_8(%arg0: i32) -> (i32, i32) {
    %c0_i32 = arith.constant 0 : i32
    %c0_i32_0 = arith.constant 0 : i32
    %c0_i32_1 = arith.constant 0 : i32
    return %c0_i32, %c0_i32_0 : i32, i32
  }
  func.func @transform_9(%arg0: i32) -> (i32, i32) {
    %c0_i32 = arith.constant 0 : i32
    %c0_i32_0 = arith.constant 0 : i32
    %c0_i32_1 = arith.constant 0 : i32
    return %c0_i32, %c0_i32_0 : i32, i32
  }
  func.func @transform_10(%arg0: i32) -> (i32, i32) {
    %c0_i32 = arith.constant 0 : i32
    %c0_i32_0 = arith.constant 0 : i32
    return %arg0, %c0_i32 : i32, i32
  }
}

</mosaic_0001>

<bundles_post_ra>
// kernel: han_forward.2
= control target key start
LH: loop header
LB: loop body
LE: loop exit
PB: predicated region body
PF: predicated region fallthrough
CT: control target
= control target key end

     0   :  { %12 = vsyncpa [#allocation7], 0  ;;  %s5263_s0 = inlined_call_operand.vmem [shape: bf16[8,8,64], index: 0, kind: input, shape index: {}]   ;;  %s5264_s1 = inlined_call_operand.hbm [shape: bf16[64,768], index: 1, kind: input, shape index: {}]   ;;  %s5265_s2 = inlined_call_operand.vmem [shape: f32[1,768], index: 2, kind: input, shape index: {}]   ;;  %s5266_s3 = inlined_call_operand.hbm [shape: bf16[256,768], index: 3, kind: input, shape index: {}]   ;;  %s5267_s4 = inlined_call_operand.vmem [shape: f32[1,768], index: 4, kind: input, shape index: {}]   ;;  %s5268_s5 = inlined_call_operand.vmem [shape: f32[1,128], index: 5, kind: input, shape index: {}]   ;;  %s5269_s6 = inlined_call_operand.vmem [shape: f32[1,128], index: 6, kind: input, shape index: {}]   ;;  %s5270_s7 = inlined_call_operand.vmem [shape: bf16[8,256], index: 7, kind: output, shape index: {}]  }
   0x1   :  { %13 = vsyncpa [#allocation9], 0  ;;  %s3539_s24 = smov [#allocation6]   ;;  %s3491_s28 = scalar_lea.hbm %s5264_s1, 3072 }
   0x2   :  { %s21_s25 = sshll.u32 %s3539_s24, 4  ;;  %p3492_p0 = scmp.ne.s32.totalorder %s5264_s1, %s3491_s28  ;;  %s22_s25 = int_to_ptr.vmem [resolvable:$true] %s21_s25 }
   0x3   :  { %p3495_p1 = scmp.lt.u32.totalorder %s3491_s28, %s5264_s1 }
   0x5   :  { %p3497_p2 = pnand %p3495_p1, %p3492_p0 }
   0x7   :  { %3500 = shalt.err (!%p3497_p2)
}
   0x8   :  { %s3501_s10 = scalar_lea.vmem %s22_s25, 3072  ;;  %p3506_p4 = scmp.lt.s32.totalorder %s22_s25, %s22_s25 }
   0x9   :  { %p3502_p3 = scmp.ne.s32.totalorder %s22_s25, %s3501_s10  ;;  %p3507_p5 = scmp.lt.s32.totalorder %s3501_s10, %s3501_s10 }
   0xb   :  { %p3508_p6 = por %p3507_p5, %p3506_p4 }
   0xd   :  { %p3509_p7 = pnand %p3508_p6, %p3502_p3 }
   0xf   :  { %3512 = shalt.err (!%p3509_p7)
}
  0x10   :  { %s3540_s11 = smov 384   ;;  %s3541_s12 = smov 24  }
  0x11   :  { %27 = dma.hbm_to_vmem [thread:$0]  %s5264_s1, 3072, %s22_s25, [#allocation7], %s3540_s11, %s3540_s11, %s3541_s12  }
  0x12   :  { %s3542_s15 = smov [#allocation8]   ;;  %s3513_s19 = scalar_lea.hbm %s5266_s3, 12288 }
  0x13   :  { %s35_s16 = sshll.u32 %s3542_s15, 4  ;;  %p3514_p8 = scmp.ne.s32.totalorder %s5266_s3, %s3513_s19  ;;  %s36_s16 = int_to_ptr.vmem [resolvable:$true] %s35_s16 }
  0x14   :  { %p3517_p9 = scmp.lt.u32.totalorder %s3513_s19, %s5266_s3 }
  0x16   :  { %p3519_p10 = pnand %p3517_p9, %p3514_p8 }
  0x18   :  { %3522 = shalt.err (!%p3519_p10)
}
  0x19   :  { %s3523_s24 = scalar_lea.vmem %s36_s16, 12288  ;;  %p3528_p12 = scmp.lt.s32.totalorder %s36_s16, %s36_s16 }
  0x1a   :  { %p3524_p11 = scmp.ne.s32.totalorder %s36_s16, %s3523_s24  ;;  %p3529_p13 = scmp.lt.s32.totalorder %s3523_s24, %s3523_s24 }
  0x1c   :  { %p3530_p0 = por %p3529_p13, %p3528_p12 }
  0x1e   :  { %p3531_p1 = pnand %p3530_p0, %p3524_p11 }
  0x20   :  { %3534 = shalt.err (!%p3531_p1)
}
  0x21   :  { %41 = dma.hbm_to_vmem [thread:$0]  %s5266_s3, 12288, %s36_s16, [#allocation9], %s3540_s11, %s3540_s11, %s3541_s12  }
  0x22   :  { %3535 = dma.done.wait [#allocation7], 3072  }
  0x23   :  { %3536 = vsyncadd [#allocation7], 4294964224 }
  0x24   :  { %3537 = dma.done.wait [#allocation9], 12288  }
  0x25   :  { %3538 = vsyncadd [#allocation9], 4294955008  ;;  %v5271_v0 = vmov 0   ;;  %v2934_v1 = vld [vmem:[#allocation6 + $0x4] ss:$24 sps:$4 sm:$0xff]   ;;  %v3613_v9 = vld [vmem:[%s5263_s0 + $0x10] sm:$0xff]  }
  0x26   :  { %324 = vmatprep.mubr.bf16.mxu1 %v5271_v0  ;;  %304 = vmatprep.mubr.bf16.mxu0 %v5271_v0  ;;  %v2936_v2 = vld [vmem:[#allocation6] ss:$24 sps:$4 sm:$0xff]   ;;  %v2937_v3 = vld [vmem:[#allocation6 + $0x34] ss:$24 sps:$4 sm:$0xff]   ;;  %v2939_v4 = vld [vmem:[#allocation6 + $0x30] ss:$24 sps:$4 sm:$0xff]  }
  0x27   :  { %272 = vmatprep.subr.bf16.mxu0 %v2934_v1  ;;  %2921 = vmatprep.subr.bf16.mxu1 %v2934_v1  ;;  %v2940_v5 = vld [vmem:[#allocation6 + $0x64] ss:$24 sps:$4 sm:$0xff]   ;;  %v2942_v6 = vld [vmem:[#allocation6 + $0x60] ss:$24 sps:$4 sm:$0xff]   ;;  %v2943_v7 = vld [vmem:[#allocation6 + $0x94] ss:$24 sps:$4 sm:$0xff]  }
  0x28   :  { %273 = vmatpush1.bf16.msra.mxu0 %v2936_v2  ;;  %2925 = vmatpush1.bf16.msra.mxu1 %v2936_v2  ;;  %v2945_v8 = vld [vmem:[#allocation6 + $0x90] ss:$24 sps:$4 sm:$0xff]   ;;  %v2949_v10 = vld [vmem:[#allocation6 + $0xc] ss:$24 sps:$4 sm:$0xff]   ;;  %vm259_vm0 = vcmask 523264   ;;  %v3626_v21 = vld [vmem:[%s5263_s0 + $0x18] sm:$0xff]  }
  0x29   :  { %274 = vmatprep.subr.bf16.mxu0 %v2937_v3  ;;  %2922 = vmatprep.subr.bf16.mxu1 %v2937_v3  ;;  %v2952_v11 = vld [vmem:[#allocation6 + $0x14] ss:$24 sps:$4 sm:$0xff]   ;;  %v2947_v12 = vld [vmem:[#allocation6 + $0x8] ss:$24 sps:$4 sm:$0xff]   ;;  %v2959_v16 = vld [vmem:[#allocation6 + $0x44] ss:$24 sps:$4 sm:$0xff]  }
  0x2a   :  { %v2950_v13 = vld [vmem:[#allocation6 + $0x10] ss:$24 sps:$4 sm:$0xff]   ;;  %v2953_v14 = vld [vmem:[%s5263_s0] sm:$0xff]   ;;  %v2956_v15 = vld [vmem:[#allocation6 + $0x3c] ss:$24 sps:$4 sm:$0xff]  }
  0x2b   :  { %v2954_v17 = vld [vmem:[#allocation6 + $0x38] ss:$24 sps:$4 sm:$0xff]   ;;  %v2963_v19 = vld [vmem:[#allocation6 + $0x6c] ss:$24 sps:$4 sm:$0xff]   ;;  %v2961_v22 = vld [vmem:[#allocation6 + $0x68] ss:$24 sps:$4 sm:$0xff]  }
  0x2c   :  { %275 = vmatpush1.bf16.msra.mxu0 %v2939_v4  ;;  %2926 = vmatpush1.bf16.msra.mxu1 %v2939_v4  ;;  %v2957_v18 = vld [vmem:[#allocation6 + $0x40] ss:$24 sps:$4 sm:$0xff]   ;;  %v2966_v20 = vld [vmem:[#allocation6 + $0x74] ss:$24 sps:$4 sm:$0xff]   ;;  %v2964_v24 = vld [vmem:[#allocation6 + $0x70] ss:$24 sps:$4 sm:$0xff]  }
  0x2d   :  { %276 = vmatprep.subr.bf16.mxu0 %v2940_v5  ;;  %2923 = vmatprep.subr.bf16.mxu1 %v2940_v5  ;;  %v2967_v23 = vld [vmem:[%s5263_s0 + $0x8] sm:$0xff]   ;;  %v2970_v25 = vld [vmem:[#allocation6 + $0x9c] ss:$24 sps:$4 sm:$0xff]   ;;  %v2968_v27 = vld [vmem:[#allocation6 + $0x98] ss:$24 sps:$4 sm:$0xff]  }
  0x2e   :  { %v2973_v26 = vld [vmem:[#allocation6 + $0xa4] ss:$24 sps:$4 sm:$0xff]   ;;  %v2971_v28 = vld [vmem:[#allocation6 + $0xa0] ss:$24 sps:$4 sm:$0xff]   ;;  %v3646_v33 = vld [vmem:[#allocation8 + $0x34] ss:$24 sps:$4 sm:$0xff]  }
  0x2f   :  { %v3634_v29 = vld [vmem:[#allocation8 + $0x4] ss:$24 sps:$4 sm:$0xff]   ;;  %v3640_v31 = vld [vmem:[#allocation8] ss:$24 sps:$4 sm:$0xff]   ;;  %v3654_v35 = vld [vmem:[#allocation8 + $0x30] ss:$24 sps:$4 sm:$0xff]  }
  0x30   :  { %277 = vmatpush1.bf16.msra.mxu0 %v2942_v6  ;;  %2927 = vmatpush1.bf16.msra.mxu1 %v2942_v6  ;;  %5490 = vst [vmem:[#allocation12_spill] sm:$0xff] %v3634_v29  ;;  %v3636_v30 = vld [vmem:[#allocation8 + $0xc] ss:$24 sps:$4 sm:$0xff]   ;;  %v3642_v32 = vld [vmem:[#allocation8 + $0x8] ss:$24 sps:$4 sm:$0xff]  }
  0x31   :  { %278 = vmatprep.subr.bf16.mxu0 %v2943_v7  ;;  %2924 = vmatprep.subr.bf16.mxu1 %v2943_v7  ;;  %v3648_v34 = vld [vmem:[#allocation8 + $0x3c] ss:$24 sps:$4 sm:$0xff]   ;;  %v3656_v36 = vld [vmem:[#allocation8 + $0x38] ss:$24 sps:$4 sm:$0xff]   ;;  %v3662_v38 = vld [vmem:[#allocation8 + $0x6c] ss:$24 sps:$4 sm:$0xff]  }
  0x32   :  { %v3658_v37 = vld [vmem:[#allocation8 + $0x64] ss:$24 sps:$4 sm:$0xff]   ;;  %v3666_v39 = vld [vmem:[#allocation8 + $0x60] ss:$24 sps:$4 sm:$0xff]   ;;  %v3674_v41 = vld [vmem:[#allocation8 + $0x94] ss:$24 sps:$4 sm:$0xff]  }
  0x33   :  { %v3670_v40 = vld [vmem:[#allocation8 + $0x68] ss:$24 sps:$4 sm:$0xff]   ;;  %v3676_v42 = vld [vmem:[#allocation8 + $0x9c] ss:$24 sps:$4 sm:$0xff]   ;;  %v3684_v44 = vld [vmem:[#allocation8 + $0x98] ss:$24 sps:$4 sm:$0xff]  }
  0x34   :  { %279 = vmatpush1.bf16.msra.mxu0 %v2945_v8  ;;  %2928 = vmatpush1.bf16.msra.mxu1 %v2945_v8  ;;  %v3682_v43 = vld [vmem:[#allocation8 + $0x90] ss:$24 sps:$4 sm:$0xff]   ;;  %v3686_v45 = vld [vmem:[#allocation8 + $0xc4] ss:$24 sps:$4 sm:$0xff]   ;;  %v3694_v47 = vld [vmem:[#allocation8 + $0xc0] ss:$24 sps:$4 sm:$0xff]  }
  0x35   :  { %345 = vmatprep.subr.bf16.mxu1 %v2949_v10  ;;  %418 = vmatprep.subr.bf16.mxu0 %v2952_v11  ;;  %5491 = vst [vmem:[#allocation13_spill] sm:$0xff] %v3682_v43  ;;  %v3690_v46 = vld [vmem:[#allocation8 + $0xcc] ss:$24 sps:$4 sm:$0xff]   ;;  %5492 = vst [vmem:[#allocation14_spill] sm:$0xff] %v3694_v47  ;;  %v3698_v48 = vld [vmem:[#allocation8 + $0xc8] ss:$24 sps:$4 sm:$0xff]  }
  0x36   :  { %v3702_v49 = vld [vmem:[#allocation8 + $0xf4] ss:$24 sps:$4 sm:$0xff]   ;;  %v3712_v51 = vld [vmem:[#allocation8 + $0xf0] ss:$24 sps:$4 sm:$0xff]   ;;  %v3716_v53 = vld [vmem:[#allocation8 + $0x124] ss:$24 sps:$4 sm:$0xff]  }
  0x37   :  { %2776 = vmatmul.mubr.msk.bf16.vlgmr.msra.gmra.mrb[0].mxu1 %vm259_vm0, %v3613_v9  ;;  %2774 = vmatmul.mubr.msk.bf16.vlgmr.msra.gmra.mrb[0].mxu0 %vm259_vm0, %v2953_v14  ;;  %v3704_v50 = vld [vmem:[#allocation8 + $0xfc] ss:$24 sps:$4 sm:$0xff]   ;;  %5493 = vst [vmem:[#allocation15_spill] sm:$0xff] %v3712_v51  ;;  %v3714_v52 = vld [vmem:[#allocation8 + $0xf8] ss:$24 sps:$4 sm:$0xff]  }
  0x38   :  { %346 = vmatpush1.bf16.msra.mxu1 %v2947_v12  ;;  %419 = vmatpush1.bf16.msra.mxu0 %v2950_v13  ;;  %v3720_v54 = vld [vmem:[#allocation8 + $0x12c] ss:$24 sps:$4 sm:$0xff]   ;;  %v3724_v55 = vld [vmem:[#allocation8 + $0x120] ss:$24 sps:$4 sm:$0xff]   ;;  %v3734_v58 = vld [vmem:[#allocation8 + $0x15c] ss:$24 sps:$4 sm:$0xff]  }
  0x39   :  { %347 = vmatprep.subr.bf16.mxu1 %v2956_v15  ;;  %420 = vmatprep.subr.bf16.mxu0 %v2959_v16  ;;  %5494 = vst [vmem:[#allocation16_spill] sm:$0xff] %v3724_v55  ;;  %v3728_v56 = vld [vmem:[#allocation8 + $0x128] ss:$24 sps:$4 sm:$0xff]   ;;  %v3732_v57 = vld [vmem:[#allocation8 + $0x154] ss:$24 sps:$4 sm:$0xff]  }
  0x3a   :  { %334 = vmatprep.mubr.bf16.mxu1 %v5271_v0  ;;  %314 = vmatprep.mubr.bf16.mxu0 %v5271_v0  ;;  %v3742_v59 = vld [vmem:[#allocation8 + $0x150] ss:$24 sps:$4 sm:$0xff]   ;;  %v3746_v61 = vld [vmem:[#allocation8 + $0x184] ss:$24 sps:$4 sm:$0xff]   ;;  %v3754_v63 = vld [vmem:[#allocation8 + $0x180] ss:$24 sps:$4 sm:$0xff]  }
  0x3b   :  { %5495 = vst [vmem:[#allocation17_spill] sm:$0xff] %v3742_v59  ;;  %v3744_v60 = vld [vmem:[#allocation8 + $0x158] ss:$24 sps:$4 sm:$0xff]   ;;  %v3750_v62 = vld [vmem:[#allocation8 + $0x18c] ss:$24 sps:$4 sm:$0xff]   ;;  %5498 = vst [vmem:[#allocation20_spill] sm:$0xff] %v3754_v63 }
  0x3c   :  { %348 = vmatpush1.bf16.msra.mxu1 %v2954_v17  ;;  %421 = vmatpush1.bf16.msra.mxu0 %v2957_v18  ;;  %5496 = vst [vmem:[#allocation18_spill] sm:$0xff] %v3744_v60  ;;  %5497 = vst [vmem:[#allocation19_spill] sm:$0xff] %v3750_v62  ;;  %v3758_v1 = vld [vmem:[#allocation8 + $0x188] ss:$24 sps:$4 sm:$0xff]   ;;  %v3760_v2 = vld [vmem:[#allocation8 + $0x1b4] ss:$24 sps:$4 sm:$0xff]  }
  0x3d   :  { %349 = vmatprep.subr.bf16.mxu1 %v2963_v19  ;;  %422 = vmatprep.subr.bf16.mxu0 %v2966_v20  ;;  %5499 = vst [vmem:[#allocation21_spill] sm:$0xff] %v3758_v1  ;;  %v3764_v3 = vld [vmem:[#allocation8 + $0x1bc] ss:$24 sps:$4 sm:$0xff]   ;;  %v3766_v4 = vld [vmem:[#allocation8 + $0x1b0] ss:$24 sps:$4 sm:$0xff]  }
  0x3e   :  { %5500 = vst [vmem:[#allocation22_spill] sm:$0xff] %v3764_v3  ;;  %5501 = vst [vmem:[#allocation23_spill] sm:$0xff] %v3766_v4  ;;  %v3770_v5 = vld [vmem:[#allocation8 + $0x1b8] ss:$24 sps:$4 sm:$0xff]   ;;  %v3772_v6 = vld [vmem:[#allocation8 + $0x1e4] ss:$24 sps:$4 sm:$0xff]  }
  0x3f   :  { %2777 = vmatmul.mubr.msk.bf16.gmra.mrb[4].mxu1 %vm259_vm0, %v3626_v21  ;;  %2775 = vmatmul.mubr.msk.bf16.gmra.mrb[4].mxu0 %vm259_vm0, %v2967_v23  ;;  %5502 = vst [vmem:[#allocation24_spill] sm:$0xff] %v3770_v5  ;;  %v3776_v7 = vld [vmem:[#allocation8 + $0x1ec] ss:$24 sps:$4 sm:$0xff]   ;;  %v3778_v8 = vld [vmem:[#allocation8 + $0x1e0] ss:$24 sps:$4 sm:$0xff]  }
  0x40   :  { %350 = vmatpush1.bf16.msra.mxu1 %v2961_v22  ;;  %423 = vmatpush1.bf16.msra.mxu0 %v2964_v24  ;;  %5503 = vst [vmem:[#allocation25_spill] sm:$0xff] %v3776_v7  ;;  %5504 = vst [vmem:[#allocation26_spill] sm:$0xff] %v3778_v8  ;;  %v3784_v10 = vld [vmem:[#allocation8 + $0x214] ss:$24 sps:$4 sm:$0xff]   ;;  %v3790_v12 = vld [vmem:[#allocation8 + $0x210] ss:$24 sps:$4 sm:$0xff]  }
  0x41   :  { %351 = vmatprep.subr.bf16.mxu1 %v2970_v25  ;;  %424 = vmatprep.subr.bf16.mxu0 %v2973_v26  ;;  %v3788_v11 = vld [vmem:[#allocation8 + $0x21c] ss:$24 sps:$4 sm:$0xff]   ;;  %5507 = vst [vmem:[#allocation29_spill] sm:$0xff] %v3790_v12  ;;  %v3794_v13 = vld [vmem:[#allocation8 + $0x218] ss:$24 sps:$4 sm:$0xff]  }
  0x42   :  { %377 = vmatprep.mubr.bf16.mxu1 %v5271_v0  ;;  %450 = vmatprep.mubr.bf16.mxu0 %v5271_v0  ;;  %5506 = vst [vmem:[#allocation28_spill] sm:$0xff] %v3788_v11  ;;  %5508 = vst [vmem:[#allocation30_spill] sm:$0xff] %v3794_v13  ;;  %v3800_v15 = vld [vmem:[#allocation8 + $0x24c] ss:$24 sps:$4 sm:$0xff]   ;;  %v3802_v16 = vld [vmem:[#allocation8 + $0x240] ss:$24 sps:$4 sm:$0xff]  }
  0x43   :  { %5509 = vst [vmem:[#allocation31_spill] sm:$0xff] %v3800_v15  ;;  %v3806_v17 = vld [vmem:[#allocation8 + $0x248] ss:$24 sps:$4 sm:$0xff]   ;;  %v3808_v18 = vld [vmem:[#allocation8 + $0x274] ss:$24 sps:$4 sm:$0xff]  }
  0x44   :  { %352 = vmatpush1.bf16.msra.mxu1 %v2968_v27  ;;  %425 = vmatpush1.bf16.msra.mxu0 %v2971_v28  ;;  %5510 = vst [vmem:[#allocation32_spill] sm:$0xff] %v3806_v17  ;;  %v3812_v19 = vld [vmem:[#allocation8 + $0x27c] ss:$24 sps:$4 sm:$0xff]   ;;  %v3816_v20 = vld [vmem:[#allocation8 + $0x270] ss:$24 sps:$4 sm:$0xff]  }
  0x45   :  { %1147 = vmatprep.subr.bf16.mxu1 %v3634_v29  ;;  %1188 = vmatprep.subr.bf16.mxu0 %v3636_v30  ;;  %5511 = vst [vmem:[#allocation33_spill] sm:$0xff] %v3812_v19  ;;  %v3822_v22 = vld [vmem:[#allocation8 + $0x2a4] ss:$24 sps:$4 sm:$0xff]   ;;  %v3828_v24 = vld [vmem:[#allocation8 + $0x2a0] ss:$24 sps:$4 sm:$0xff]  }
  0x46   :  { %5514 = vst [vmem:[#allocation36_spill] sm:$0xff] %v3828_v24  ;;  %v3830_v25 = vld [vmem:[#allocation8 + $0x2a8] ss:$24 sps:$4 sm:$0xff]   ;;  %v3834_v26 = vld [vmem:[#allocation8 + $0x2d4] ss:$24 sps:$4 sm:$0xff]  }
  0x47   :  { %2778 = vmatmul.mubr.msk.bf16.vlgmr.msra.gmra.mrb[8].mxu1 %vm259_vm0, %v2953_v14  ;;  %2782 = vmatmul.mubr.msk.bf16.vlgmr.msra.gmra.mrb[8].mxu0 %vm259_vm0, %v2953_v14  ;;  %v3796_v14 = vld [vmem:[#allocation8 + $0x244] ss:$24 sps:$4 sm:$0xff]   ;;  %5515 = vst [vmem:[#allocation37_spill] sm:$0xff] %v3830_v25  ;;  %5516 = vst [vmem:[#allocation38_spill] sm:$0xff] %v3834_v26  ;;  %v3840_v28 = vld [vmem:[#allocation8 + $0x2d0] ss:$24 sps:$4 sm:$0xff]  }
  0x48   :  { %1148 = vmatpush1.bf16.msra.mxu1 %v3640_v31  ;;  %1189 = vmatpush1.bf16.msra.mxu0 %v3642_v32  ;;  %v3836_v27 = vld [vmem:[#allocation8 + $0x2dc] ss:$24 sps:$4 sm:$0xff]   ;;  %5518 = vst [vmem:[#allocation40_spill] sm:$0xff] %v3840_v28 }
  0x49   :  { %1149 = vmatprep.subr.bf16.mxu1 %v3646_v33  ;;  %1190 = vmatprep.subr.bf16.mxu0 %v3648_v34  ;;  %5517 = vst [vmem:[#allocation39_spill] sm:$0xff] %v3836_v27 }
  0x4a   :  { %387 = vmatprep.mubr.bf16.mxu1 %v5271_v0  ;;  %460 = vmatprep.mubr.bf16.mxu0 %v5271_v0 }
  0x4c   :  { %1150 = vmatpush1.bf16.msra.mxu1 %v3654_v35  ;;  %1191 = vmatpush1.bf16.msra.mxu0 %v3656_v36 }
  0x4d   :  { %1151 = vmatprep.subr.bf16.mxu1 %v3658_v37  ;;  %1192 = vmatprep.subr.bf16.mxu0 %v3662_v38 }
  0x4f   :  { %2779 = vmatmul.mubr.msk.bf16.gmra.mrb[12].mxu1 %vm259_vm0, %v2967_v23  ;;  %2783 = vmatmul.mubr.msk.bf16.gmra.mrb[12].mxu0 %vm259_vm0, %v2967_v23  ;;  %v3824_v23 = vld [vmem:[#allocation8 + $0x2ac] ss:$24 sps:$4 sm:$0xff]  }
  0x50   :  { %1152 = vmatpush1.bf16.msra.mxu1 %v3666_v39  ;;  %1193 = vmatpush1.bf16.msra.mxu0 %v3670_v40  ;;  %5513 = vst [vmem:[#allocation35_spill] sm:$0xff] %v3824_v23 }
  0x51   :  { %1153 = vmatprep.subr.bf16.mxu1 %v3674_v41  ;;  %1194 = vmatprep.subr.bf16.mxu0 %v3676_v42 }
  0x52   :  { %397 = vmatprep.mubr.bf16.mxu1 %v5271_v0  ;;  %470 = vmatprep.mubr.bf16.mxu0 %v5271_v0 }
  0x54   :  { %1154 = vmatpush1.bf16.msra.mxu1 %v3682_v43  ;;  %1195 = vmatpush1.bf16.msra.mxu0 %v3684_v44 }
  0x55   :  { %1155 = vmatprep.subr.bf16.mxu1 %v3686_v45  ;;  %1196 = vmatprep.subr.bf16.mxu0 %v3690_v46 }
  0x57   :  { %2780 = vmatmul.mubr.msk.bf16.gmra.mrb[16].mxu1 %vm259_vm0, %v3613_v9  ;;  %2784 = vmatmul.mubr.msk.bf16.gmra.mrb[16].mxu0 %vm259_vm0, %v3613_v9  ;;  %v3782_v9 = vld [vmem:[#allocation8 + $0x1e8] ss:$24 sps:$4 sm:$0xff]  }
  0x58   :  { %1156 = vmatpush1.bf16.msra.mxu1 %v3694_v47  ;;  %1197 = vmatpush1.bf16.msra.mxu0 %v3698_v48  ;;  %5505 = vst [vmem:[#allocation27_spill] sm:$0xff] %v3782_v9 }
  0x59   :  { %1157 = vmatprep.subr.bf16.mxu1 %v3702_v49  ;;  %1198 = vmatprep.subr.bf16.mxu0 %v3704_v50 }
  0x5a   :  { %407 = vmatprep.mubr.bf16.mxu1 %v5271_v0  ;;  %480 = vmatprep.mubr.bf16.mxu0 %v5271_v0 }
  0x5c   :  { %1158 = vmatpush1.bf16.msra.mxu1 %v3712_v51  ;;  %1199 = vmatpush1.bf16.msra.mxu0 %v3714_v52 }
  0x5d   :  { %1159 = vmatprep.subr.bf16.mxu1 %v3716_v53  ;;  %1200 = vmatprep.subr.bf16.mxu0 %v3720_v54 }
  0x5f   :  { %2781 = vmatmul.mubr.msk.bf16.gmra.mrb[20].mxu1 %vm259_vm0, %v3626_v21  ;;  %2785 = vmatmul.mubr.msk.bf16.gmra.mrb[20].mxu0 %vm259_vm0, %v3626_v21  ;;  %v3818_v21 = vld [vmem:[#allocation8 + $0x278] ss:$24 sps:$4 sm:$0xff]  }
  0x60   :  { %1160 = vmatpush1.bf16.msra.mxu1 %v3724_v55  ;;  %1201 = vmatpush1.bf16.msra.mxu0 %v3728_v56  ;;  %5512 = vst [vmem:[#allocation34_spill] sm:$0xff] %v3818_v21 }
  0x61   :  { %1161 = vmatprep.subr.bf16.mxu1 %v3732_v57  ;;  %1202 = vmatprep.subr.bf16.mxu0 %v3734_v58 }
  0x62   :  { %1179 = vmatprep.mubr.bf16.mxu1 %v5271_v0  ;;  %1220 = vmatprep.mubr.bf16.mxu0 %v5271_v0  ;;  %v3842_v0 = vld [vmem:[#allocation8 + $0x2d8] ss:$24 sps:$4 sm:$0xff]  }
  0x63   :  { %5519 = vst [vmem:[#allocation41_spill] sm:$0xff] %v3842_v0 }
  0x64   :  { %1162 = vmatpush1.bf16.msra.mxu1 %v3742_v59  ;;  %1203 = vmatpush1.bf16.msra.mxu0 %v3744_v60 }
  0x65   :  { %1163 = vmatprep.subr.bf16.mxu1 %v3746_v61  ;;  %1204 = vmatprep.subr.bf16.mxu0 %v3750_v62 }
  0x68   :  { %1164 = vmatpush1.bf16.msra.mxu1 %v3754_v63  ;;  %1205 = vmatpush1.bf16.msra.mxu0 %v3758_v1 }
  0x69   :  { %1165 = vmatprep.subr.bf16.mxu1 %v3760_v2  ;;  %1206 = vmatprep.subr.bf16.mxu0 %v3764_v3 }
  0x6c   :  { %1166 = vmatpush1.bf16.msra.mxu1 %v3766_v4  ;;  %1207 = vmatpush1.bf16.msra.mxu0 %v3770_v5 }
  0x6d   :  { %1167 = vmatprep.subr.bf16.mxu1 %v3772_v6  ;;  %1208 = vmatprep.subr.bf16.mxu0 %v3776_v7 }
  0x70   :  { %1168 = vmatpush1.bf16.msra.mxu1 %v3778_v8  ;;  %1209 = vmatpush1.bf16.msra.mxu0 %v3782_v9 }
  0x71   :  { %1169 = vmatprep.subr.bf16.mxu1 %v3784_v10  ;;  %1210 = vmatprep.subr.bf16.mxu0 %v3788_v11 }
  0x74   :  { %1170 = vmatpush1.bf16.msra.mxu1 %v3790_v12  ;;  %1211 = vmatpush1.bf16.msra.mxu0 %v3794_v13 }
  0x75   :  { %1171 = vmatprep.subr.bf16.mxu1 %v3796_v14  ;;  %1212 = vmatprep.subr.bf16.mxu0 %v3800_v15 }
  0x78   :  { %1172 = vmatpush1.bf16.msra.mxu1 %v3802_v16  ;;  %1213 = vmatpush1.bf16.msra.mxu0 %v3806_v17  ;;  %v3871_v17 = vld [vmem:[#allocation8 + $0xa4] ss:$24 sps:$4 sm:$0xff]  }
  0x79   :  { %1173 = vmatprep.subr.bf16.mxu1 %v3808_v18  ;;  %1214 = vmatprep.subr.bf16.mxu0 %v3812_v19  ;;  %v3853_v19 = vld [vmem:[#allocation8 + $0x44] ss:$24 sps:$4 sm:$0xff]  }
  0x7a   :  { %5521 = vst [vmem:[#allocation43_spill] sm:$0xff] %v3853_v19 }
  0x7c   :  { %1174 = vmatpush1.bf16.msra.mxu1 %v3816_v20  ;;  %1215 = vmatpush1.bf16.msra.mxu0 %v3818_v21  ;;  %v3846_v21 = vld [vmem:[#allocation8 + $0x14] ss:$24 sps:$4 sm:$0xff]  }
  0x7d   :  { %1175 = vmatprep.subr.bf16.mxu1 %v3822_v22  ;;  %1216 = vmatprep.subr.bf16.mxu0 %v3824_v23  ;;  %5520 = vst [vmem:[#allocation42_spill] sm:$0xff] %v3846_v21  ;;  %v3850_v23 = vld [vmem:[#allocation8 + $0x10] ss:$24 sps:$4 sm:$0xff]  }
  0x80   :  { %1176 = vmatpush1.bf16.msra.mxu1 %v3828_v24  ;;  %1217 = vmatpush1.bf16.msra.mxu0 %v3830_v25  ;;  %v5522_v25 = vmov 0  }
  0x81   :  { %1177 = vmatprep.subr.bf16.mxu1 %v3834_v26  ;;  %1218 = vmatprep.subr.bf16.mxu0 %v3836_v27  ;;  %v3859_v27 = vld [vmem:[#allocation8 + $0x40] ss:$24 sps:$4 sm:$0xff]  }
  0x84   :  { %1178 = vmatpush1.bf16.msra.mxu1 %v3840_v28  ;;  %1219 = vmatpush1.bf16.msra.mxu0 %v3842_v0  ;;  %v3863_v0 = vld [vmem:[#allocation8 + $0x74] ss:$24 sps:$4 sm:$0xff]  }
  0x85   :  { %1229 = vmatprep.subr.bf16.mxu1 %v3846_v21  ;;  %1324 = vmatprep.subr.bf16.mxu0 %v3634_v29  ;;  %v3868_v29 = vld [vmem:[#allocation8 + $0x70] ss:$24 sps:$4 sm:$0xff]  }
  0x87   :  { %1180 = vmatmul.mubr.bf16.vlgmr.msra.gmra.mrb[24].mxu1 %v5522_v25  ;;  %1221 = vmatmul.mubr.bf16.vlgmr.msra.gmra.mrb[24].mxu0 %v5522_v25 }
  0x88   :  { %1230 = vmatpush1.bf16.msra.mxu1 %v3850_v23  ;;  %1261 = vmatprep.mubr.bf16.mxu1 %v5522_v25 }
  0x89   :  { %1231 = vmatprep.subr.bf16.mxu1 %v3853_v19  ;;  %1325 = vmatpush1.bf16.msra.mxu0 %v3640_v31  ;;  %v3876_v19 = vld [vmem:[#allocation8 + $0xa0] ss:$24 sps:$4 sm:$0xff]   ;;  %v3879_v31 = vld [vmem:[#allocation8 + $0xd4] ss:$24 sps:$4 sm:$0xff]  }
  0x8a   :  { %1326 = vmatprep.subr.bf16.mxu0 %v3646_v33  ;;  %v3884_v33 = vld [vmem:[#allocation8 + $0xd0] ss:$24 sps:$4 sm:$0xff]  }
  0x8c   :  { %1232 = vmatpush1.bf16.msra.mxu1 %v3859_v27 }
  0x8d   :  { %1233 = vmatprep.subr.bf16.mxu1 %v3863_v0  ;;  %1327 = vmatpush1.bf16.msra.mxu0 %v3654_v35  ;;  %v3887_v35 = vld [vmem:[#allocation8 + $0x104] ss:$24 sps:$4 sm:$0xff]  }
  0x8e   :  { %1328 = vmatprep.subr.bf16.mxu0 %v3658_v37  ;;  %5523 = vst [vmem:[#allocation44_spill] sm:$0xff] %v3887_v35  ;;  %v3892_v37 = vld [vmem:[#allocation8 + $0x100] ss:$24 sps:$4 sm:$0xff]  }
  0x90   :  { %1234 = vmatpush1.bf16.msra.mxu1 %v3868_v29 }
  0x91   :  { %1235 = vmatprep.subr.bf16.mxu1 %v3871_v17  ;;  %1329 = vmatpush1.bf16.msra.mxu0 %v3666_v39  ;;  %v3895_v39 = vld [vmem:[#allocation8 + $0x134] ss:$24 sps:$4 sm:$0xff]  }
  0x92   :  { %1330 = vmatprep.subr.bf16.mxu0 %v3674_v41  ;;  %5524 = vst [vmem:[#allocation45_spill] sm:$0xff] %v3895_v39  ;;  %v3900_v41 = vld [vmem:[#allocation8 + $0x130] ss:$24 sps:$4 sm:$0xff]  }
  0x94   :  { %1236 = vmatpush1.bf16.msra.mxu1 %v3876_v19 }
  0x95   :  { %1237 = vmatprep.subr.bf16.mxu1 %v3879_v31  ;;  %1331 = vmatpush1.bf16.msra.mxu0 %v3682_v43  ;;  %v3903_v43 = vld [vmem:[#allocation8 + $0x164] ss:$24 sps:$4 sm:$0xff]  }
  0x96   :  { %1332 = vmatprep.subr.bf16.mxu0 %v3686_v45  ;;  %5525 = vst [vmem:[#allocation46_spill] sm:$0xff] %v3903_v43 }
  0x98   :  { %1238 = vmatpush1.bf16.msra.mxu1 %v3884_v33 }
  0x99   :  { %1239 = vmatprep.subr.bf16.mxu1 %v3887_v35  ;;  %1333 = vmatpush1.bf16.msra.mxu0 %v3694_v47  ;;  %v3908_v35 = vld [vmem:[#allocation8 + $0x160] ss:$24 sps:$4 sm:$0xff]   ;;  %v3911_v47 = vld [vmem:[#allocation8 + $0x194] ss:$24 sps:$4 sm:$0xff]  }
  0x9a   :  { %1334 = vmatprep.subr.bf16.mxu0 %v3702_v49  ;;  %5526 = vst [vmem:[#allocation47_spill] sm:$0xff] %v3911_v47 }
  0x9c   :  { %1240 = vmatpush1.bf16.msra.mxu1 %v3892_v37 }
  0x9d   :  { %1241 = vmatprep.subr.bf16.mxu1 %v3895_v39  ;;  %1335 = vmatpush1.bf16.msra.mxu0 %v3712_v51  ;;  %v3916_v39 = vld [vmem:[#allocation8 + $0x190] ss:$24 sps:$4 sm:$0xff]   ;;  %v3919_v51 = vld [vmem:[#allocation8 + $0x1c4] ss:$24 sps:$4 sm:$0xff]  }
  0x9e   :  { %1336 = vmatprep.subr.bf16.mxu0 %v3716_v53  ;;  %5527 = vst [vmem:[#allocation48_spill] sm:$0xff] %v3919_v51 }
  0xa0   :  { %1242 = vmatpush1.bf16.msra.mxu1 %v3900_v41 }
  0xa1   :  { %1243 = vmatprep.subr.bf16.mxu1 %v3903_v43  ;;  %1337 = vmatpush1.bf16.msra.mxu0 %v3724_v55  ;;  %v3924_v43 = vld [vmem:[#allocation8 + $0x1c0] ss:$24 sps:$4 sm:$0xff]   ;;  %v3927_v55 = vld [vmem:[#allocation8 + $0x1f4] ss:$24 sps:$4 sm:$0xff]  }
  0xa2   :  { %1338 = vmatprep.subr.bf16.mxu0 %v3732_v57  ;;  %5528 = vst [vmem:[#allocation49_spill] sm:$0xff] %v3927_v55 }
  0xa4   :  { %1244 = vmatpush1.bf16.msra.mxu1 %v3908_v35 }
  0xa5   :  { %1245 = vmatprep.subr.bf16.mxu1 %v3911_v47  ;;  %1339 = vmatpush1.bf16.msra.mxu0 %v3742_v59  ;;  %v3932_v47 = vld [vmem:[#allocation8 + $0x1f0] ss:$24 sps:$4 sm:$0xff]   ;;  %v3935_v59 = vld [vmem:[#allocation8 + $0x224] ss:$24 sps:$4 sm:$0xff]  }
  0xa6   :  { %1340 = vmatprep.subr.bf16.mxu0 %v3746_v61  ;;  %5529 = vst [vmem:[#allocation50_spill] sm:$0xff] %v3935_v59 }
  0xa8   :  { %1246 = vmatpush1.bf16.msra.mxu1 %v3916_v39 }
  0xa9   :  { %1247 = vmatprep.subr.bf16.mxu1 %v3919_v51  ;;  %1341 = vmatpush1.bf16.msra.mxu0 %v3754_v63  ;;  %v3940_v51 = vld [vmem:[#allocation8 + $0x220] ss:$24 sps:$4 sm:$0xff]   ;;  %v3943_v63 = vld [vmem:[#allocation8 + $0x254] ss:$24 sps:$4 sm:$0xff]  }
  0xaa   :  { %1342 = vmatprep.subr.bf16.mxu0 %v3760_v2  ;;  %5530 = vst [vmem:[#allocation51_spill] sm:$0xff] %v3943_v63 }
  0xac   :  { %1248 = vmatpush1.bf16.msra.mxu1 %v3924_v43 }
  0xad   :  { %1249 = vmatprep.subr.bf16.mxu1 %v3927_v55  ;;  %1343 = vmatpush1.bf16.msra.mxu0 %v3766_v4  ;;  %v3948_v55 = vld [vmem:[#allocation8 + $0x250] ss:$24 sps:$4 sm:$0xff]   ;;  %v3951_v4 = vld [vmem:[#allocation8 + $0x284] ss:$24 sps:$4 sm:$0xff]  }
  0xae   :  { %1344 = vmatprep.subr.bf16.mxu0 %v3772_v6  ;;  %5531 = vst [vmem:[#allocation52_spill] sm:$0xff] %v3951_v4 }
  0xb0   :  { %1250 = vmatpush1.bf16.msra.mxu1 %v3932_v47 }
  0xb1   :  { %1251 = vmatprep.subr.bf16.mxu1 %v3935_v59  ;;  %1345 = vmatpush1.bf16.msra.mxu0 %v3778_v8  ;;  %v3956_v59 = vld [vmem:[#allocation8 + $0x280] ss:$24 sps:$4 sm:$0xff]   ;;  %v3959_v8 = vld [vmem:[#allocation8 + $0x2b4] ss:$24 sps:$4 sm:$0xff]  }
  0xb2   :  { %1346 = vmatprep.subr.bf16.mxu0 %v3784_v10 }
  0xb4   :  { %1252 = vmatpush1.bf16.msra.mxu1 %v3940_v51 }
  0xb5   :  { %1253 = vmatprep.subr.bf16.mxu1 %v3943_v63  ;;  %1347 = vmatpush1.bf16.msra.mxu0 %v3790_v12  ;;  %v3964_v63 = vld [vmem:[#allocation8 + $0x2b0] ss:$24 sps:$4 sm:$0xff]   ;;  %v3967_v12 = vld [vmem:[#allocation8 + $0x2e4] ss:$24 sps:$4 sm:$0xff]  }
  0xb6   :  { %1348 = vmatprep.subr.bf16.mxu0 %v3796_v14  ;;  %5532 = vst [vmem:[#allocation53_spill] sm:$0xff] %v3967_v12 }
  0xb8   :  { %1254 = vmatpush1.bf16.msra.mxu1 %v3948_v55 }
  0xb9   :  { %1255 = vmatprep.subr.bf16.mxu1 %v3951_v4  ;;  %1349 = vmatpush1.bf16.msra.mxu0 %v3802_v16  ;;  %v3972_v4 = vld [vmem:[#allocation8 + $0x2e0] ss:$24 sps:$4 sm:$0xff]  }
  0xba   :  { %1350 = vmatprep.subr.bf16.mxu0 %v3808_v18  ;;  %5533 = vst [vmem:[#allocation54_spill] sm:$0xff] %v3972_v4 }
  0xbc   :  { %1256 = vmatpush1.bf16.msra.mxu1 %v3956_v59 }
  0xbd   :  { %1257 = vmatprep.subr.bf16.mxu1 %v3959_v8  ;;  %1351 = vmatpush1.bf16.msra.mxu0 %v3816_v20 }
  0xbe   :  { %1352 = vmatprep.subr.bf16.mxu0 %v3822_v22 }
  0xc0   :  { %1258 = vmatpush1.bf16.msra.mxu1 %v3964_v63 }
  0xc1   :  { %1259 = vmatprep.subr.bf16.mxu1 %v3967_v12  ;;  %1353 = vmatpush1.bf16.msra.mxu0 %v3828_v24 }
  0xc2   :  { %1354 = vmatprep.subr.bf16.mxu0 %v3834_v26 }
  0xc4   :  { %1260 = vmatpush1.bf16.msra.mxu1 %v3972_v4 }
  0xc5   :  { %1365 = vmatprep.subr.bf16.mxu1 %v3636_v30  ;;  %1355 = vmatpush1.bf16.msra.mxu0 %v3840_v28  ;;  %v5534_v30 = vld [vmem:[#allocation32_spill] sm:$0xff] }
  0xc6   :  { %1406 = vmatprep.subr.bf16.mxu0 %v3846_v21 }
  0xc7   :  { %1262 = vmatmul.mubr.bf16.vlgmr.msra.gmra.mrb[28].mxu1 %v5522_v25 }
  0xc8   :  { %1366 = vmatpush1.bf16.msra.mxu1 %v3642_v32  ;;  %v5535_v32 = vld [vmem:[#allocation33_spill] sm:$0xff] }
  0xc9   :  { %1367 = vmatprep.subr.bf16.mxu1 %v3648_v34  ;;  %v89_v34 = vlaneseq }
  0xcc   :  { %1368 = vmatpush1.bf16.msra.mxu1 %v3656_v36  ;;  %v5536_v36 = vld [vmem:[#allocation34_spill] sm:$0xff] }
  0xcd   :  { %1369 = vmatprep.subr.bf16.mxu1 %v3662_v38  ;;  %v5537_v38 = vld [vmem:[#allocation35_spill] sm:$0xff] }
  0xd0   :  { %1370 = vmatpush1.bf16.msra.mxu1 %v3670_v40  ;;  %v4010_v40 = vshrl.u32 %v89_v34, 7 }
  0xd1   :  { %1371 = vmatprep.subr.bf16.mxu1 %v3676_v42  ;;  %v5538_v42 = vld [vmem:[#allocation37_spill] sm:$0xff] }
  0xd4   :  { %1372 = vmatpush1.bf16.msra.mxu1 %v3684_v44  ;;  %v5539_v44 = vld [vmem:[#allocation39_spill] sm:$0xff] }
  0xd5   :  { %1373 = vmatprep.subr.bf16.mxu1 %v3690_v46  ;;  %v5317_v46 = vsub.s32 0, %v4010_v40 }
  0xd8   :  { %1374 = vmatpush1.bf16.msra.mxu1 %v3698_v48  ;;  %v87_v48 = vld [vmem:[%s5265_s2] sm:$0x3f] }
  0xd9   :  { %1375 = vmatprep.subr.bf16.mxu1 %v3704_v50  ;;  %v5318_v50 = vsub.s32 1, %v4010_v40 }
  0xdc   :  { %1376 = vmatpush1.bf16.msra.mxu1 %v3714_v52  ;;  %v5540_v52 = vld [vmem:[#allocation41_spill] sm:$0xff] }
  0xdd   :  { %1377 = vmatprep.subr.bf16.mxu1 %v3720_v54  ;;  %v5541_v54 = vld [vmem:[#allocation12_spill] sm:$0xff] }
  0xe0   :  { %1378 = vmatpush1.bf16.msra.mxu1 %v3728_v56  ;;  %v4023_v56 = vrot.slane %v87_v48, %v5317_v46 }
  0xe1   :  { %1379 = vmatprep.subr.bf16.mxu1 %v3734_v58  ;;  %v4027_v58 = vrot.slane %v87_v48, %v5318_v50 }
  0xe4   :  { %1380 = vmatpush1.bf16.msra.mxu1 %v3744_v60 }
  0xe5   :  { %1381 = vmatprep.subr.bf16.mxu1 %v3750_v62 }
  0xe8   :  { %1382 = vmatpush1.bf16.msra.mxu1 %v3758_v1 }
  0xe9   :  { %1383 = vmatprep.subr.bf16.mxu1 %v3764_v3 }
  0xec   :  { %1384 = vmatpush1.bf16.msra.mxu1 %v3770_v5 }
  0xed   :  { %1385 = vmatprep.subr.bf16.mxu1 %v3776_v7 }
  0xf0   :  { %1386 = vmatpush1.bf16.msra.mxu1 %v3782_v9 }
  0xf1   :  { %1387 = vmatprep.subr.bf16.mxu1 %v3788_v11 }
  0xf4   :  { %1388 = vmatpush1.bf16.msra.mxu1 %v3794_v13 }
  0xf5   :  { %1389 = vmatprep.subr.bf16.mxu1 %v3800_v15 }
  0xf8   :  { %1390 = vmatpush1.bf16.msra.mxu1 %v5534_v30 }
  0xf9   :  { %1391 = vmatprep.subr.bf16.mxu1 %v5535_v32 }
  0xfc   :  { %1392 = vmatpush1.bf16.msra.mxu1 %v5536_v36 }
  0xfd   :  { %1393 = vmatprep.subr.bf16.mxu1 %v5537_v38 }
 0x100   :  { %1394 = vmatpush1.bf16.msra.mxu1 %v5538_v42 }
 0x101   :  { %1395 = vmatprep.subr.bf16.mxu1 %v5539_v44 }
 0x104   :  { %1396 = vmatpush1.bf16.msra.mxu1 %v5540_v52 }
 0x105   :  { %1503 = vmatprep.subr.bf16.mxu1 %v5541_v54 }
 0x10a   :  { %v326_v25 = vpop.f32.mrb[0].mxu1  ;;  %v4029_v34 = vpop.f32.mrb[0].mxu0 }
 0x10b   :  { %v4032_v44 = vadd.f32 %v326_v25, %v4023_v56  ;;  %v328_v42 = vpop.f32.mrb[1].mxu1  ;;  %v4034_v38 = vpop.f32.mrb[1].mxu0 }
 0x10c   :  { %v4037_v52 = vadd.f32 %v328_v42, %v4027_v58  ;;  %v330_v54 = vpop.f32.mrb[2].mxu1  ;;  %v310_v36 = vpop.f32.mrb[2].mxu0 }
 0x10d   :  { %5542 = vst [vmem:[#allocation12_spill] sm:$0xff] %v4032_v44  ;;  %v4040_v46 = vadd.f32 %v330_v54, %v4023_v56  ;;  %v332_v32 = vpop.f32.mrb[3].mxu1  ;;  %v4043_v50 = vadd.f32 %v310_v36, %v4023_v56  ;;  %v312_v30 = vpop.f32.mrb[3].mxu0 }
 0x10e   :  { %5543 = vst [vmem:[#allocation55_spill] sm:$0xff] %v4037_v52  ;;  %v4046_v15 = vadd.f32 %v332_v32, %v4027_v58  ;;  %v4049_v25 = vadd.f32 %v312_v30, %v4027_v58 }
 0x10f   :  { %5544 = vst [vmem:[#allocation56_spill] sm:$0xff] %v4040_v46  ;;  %5545 = vst [vmem:[#allocation57_spill] sm:$0xff] %v4043_v50 }
 0x110   :  { %5546 = vst [vmem:[#allocation58_spill] sm:$0xff] %v4046_v15  ;;  %5547 = vst [vmem:[#allocation59_spill] sm:$0xff] %v4049_v25 }
 0x112   :  { %v336_v44 = vpop.f32.mrb[4].mxu1  ;;  %v316_v13 = vpop.f32.mrb[4].mxu0 }
 0x113   :  { %v4052_v42 = vadd.f32 %v336_v44, %v4023_v56  ;;  %v338_v52 = vpop.f32.mrb[5].mxu1  ;;  %v4055_v54 = vadd.f32 %v316_v13, %v4023_v56  ;;  %v318_v46 = vpop.f32.mrb[5].mxu0 }
 0x114   :  { %v4059_v50 = vadd.f32 %v338_v52, %v4027_v58  ;;  %v340_v32 = vpop.f32.mrb[6].mxu1  ;;  %v4063_v30 = vadd.f32 %v318_v46, %v4027_v58  ;;  %v320_v25 = vpop.f32.mrb[6].mxu0  ;;  %v5556_v46 = vsub.s32 4, %v4010_v40 }
 0x115   :  { %5548 = vst [vmem:[#allocation60_spill] sm:$0xff] %v4052_v42  ;;  %5549 = vst [vmem:[#allocation61_spill] sm:$0xff] %v4055_v54  ;;  %v4067_v42 = vadd.f32 %v340_v32, %v4023_v56  ;;  %v342_v13 = vpop.f32.mrb[7].mxu1  ;;  %v4071_v36 = vadd.f32 %v320_v25, %v4023_v56  ;;  %v322_v52 = vpop.f32.mrb[7].mxu0  ;;  %v5557_v32 = vsub.s32 3, %v4010_v40  ;;  %v5558_v54 = vsub.s32 5, %v4010_v40 }
 0x116   :  { %5550 = vst [vmem:[#allocation62_spill] sm:$0xff] %v4059_v50  ;;  %5551 = vst [vmem:[#allocation63_spill] sm:$0xff] %v4063_v30  ;;  %v4074_v50 = vadd.f32 %v342_v13, %v4027_v58  ;;  %v4077_v15 = vadd.f32 %v322_v52, %v4027_v58  ;;  %v4081_v30 = vrot.slane %v87_v48, %v5556_v46  ;;  %v5559_v25 = vsub.s32 2, %v4010_v40 }
 0x117   :  { %5552 = vst [vmem:[#allocation64_spill] sm:$0xff] %v4067_v42  ;;  %5553 = vst [vmem:[#allocation65_spill] sm:$0xff] %v4071_v36  ;;  %v4085_v44 = vrot.slane %v87_v48, %v5557_v32  ;;  %v4089_v42 = vrot.slane %v87_v48, %v5558_v54 }
 0x118   :  { %5554 = vst [vmem:[#allocation66_spill] sm:$0xff] %v4074_v50  ;;  %5555 = vst [vmem:[#allocation67_spill] sm:$0xff] %v4077_v15  ;;  %v4093_v36 = vrot.slane %v87_v48, %v5559_v25 }
 0x11a   :  { %v4095_v13 = vpop.f32.mrb[8].mxu1  ;;  %v452_v52 = vpop.f32.mrb[8].mxu0 }
 0x11b   :  { %v381_v50 = vpop.f32.mrb[9].mxu1  ;;  %v4098_v15 = vadd.f32 %v452_v52, %v4081_v30  ;;  %v454_v46 = vpop.f32.mrb[9].mxu0 }
 0x11c   :  { %v4101_v11 = vadd.f32 %v381_v50, %v4085_v44  ;;  %v383_v32 = vpop.f32.mrb[10].mxu1  ;;  %v4104_v9 = vadd.f32 %v454_v46, %v4089_v42  ;;  %v456_v54 = vpop.f32.mrb[10].mxu0 }
 0x11d   :  { %5560 = vst [vmem:[#allocation68_spill] sm:$0xff] %v4098_v15  ;;  %v4107_v7 = vadd.f32 %v383_v32, %v4093_v36  ;;  %v385_v48 = vpop.f32.mrb[11].mxu1  ;;  %v4110_v25 = vadd.f32 %v456_v54, %v4081_v30  ;;  %v458_v5 = vpop.f32.mrb[11].mxu0 }
 0x11e   :  { %5561 = vst [vmem:[#allocation69_spill] sm:$0xff] %v4101_v11  ;;  %5562 = vst [vmem:[#allocation70_spill] sm:$0xff] %v4104_v9  ;;  %v4113_v52 = vadd.f32 %v385_v48, %v4085_v44  ;;  %v4116_v15 = vadd.f32 %v458_v5, %v4089_v42 }
 0x11f   :  { %5563 = vst [vmem:[#allocation71_spill] sm:$0xff] %v4107_v7  ;;  %5564 = vst [vmem:[#allocation72_spill] sm:$0xff] %v4110_v25 }
 0x120   :  { %5565 = vst [vmem:[#allocation73_spill] sm:$0xff] %v4113_v52  ;;  %5566 = vst [vmem:[#allocation74_spill] sm:$0xff] %v4116_v15 }
 0x122   :  { %v389_v50 = vpop.f32.mrb[12].mxu1  ;;  %v462_v11 = vpop.f32.mrb[12].mxu0 }
 0x123   :  { %v4119_v46 = vadd.f32 %v389_v50, %v4093_v36  ;;  %v391_v9 = vpop.f32.mrb[13].mxu1  ;;  %v4122_v32 = vadd.f32 %v462_v11, %v4081_v30  ;;  %v464_v7 = vpop.f32.mrb[13].mxu0 }
 0x124   :  { %v4125_v54 = vadd.f32 %v391_v9, %v4085_v44  ;;  %v393_v25 = vpop.f32.mrb[14].mxu1  ;;  %v4128_v48 = vadd.f32 %v464_v7, %v4089_v42  ;;  %v466_v52 = vpop.f32.mrb[14].mxu0 }
 0x125   :  { %5567 = vst [vmem:[#allocation75_spill] sm:$0xff] %v4119_v46  ;;  %5568 = vst [vmem:[#allocation76_spill] sm:$0xff] %v4122_v32  ;;  %v4131_v5 = vadd.f32 %v393_v25, %v4093_v36  ;;  %v395_v15 = vpop.f32.mrb[15].mxu1  ;;  %v4134_v50 = vadd.f32 %v466_v52, %v4081_v30  ;;  %v468_v46 = vpop.f32.mrb[15].mxu0 }
 0x126   :  { %5569 = vst [vmem:[#allocation77_spill] sm:$0xff] %v4125_v54  ;;  %5570 = vst [vmem:[#allocation78_spill] sm:$0xff] %v4128_v48  ;;  %v4137_v11 = vadd.f32 %v395_v15, %v4085_v44  ;;  %v4140_v32 = vadd.f32 %v468_v46, %v4089_v42 }
 0x127   :  { %5571 = vst [vmem:[#allocation79_spill] sm:$0xff] %v4131_v5  ;;  %5572 = vst [vmem:[#allocation80_spill] sm:$0xff] %v4134_v50 }
 0x128   :  { %5573 = vst [vmem:[#allocation81_spill] sm:$0xff] %v4137_v11  ;;  %5574 = vst [vmem:[#allocation82_spill] sm:$0xff] %v4140_v32 }
 0x12a   :  { %v399_v9 = vpop.f32.mrb[16].mxu1  ;;  %v472_v54 = vpop.f32.mrb[16].mxu0 }
 0x12b   :  { %v4143_v7 = vadd.f32 %v399_v9, %v4093_v36  ;;  %v401_v48 = vpop.f32.mrb[17].mxu1  ;;  %v4146_v25 = vadd.f32 %v472_v54, %v4081_v30  ;;  %v474_v5 = vpop.f32.mrb[17].mxu0 }
 0x12c   :  { %v4149_v52 = vadd.f32 %v401_v48, %v4085_v44  ;;  %v403_v50 = vpop.f32.mrb[18].mxu1  ;;  %v4152_v15 = vadd.f32 %v474_v5, %v4089_v42  ;;  %v476_v11 = vpop.f32.mrb[18].mxu0 }
 0x12d   :  { %5575 = vst [vmem:[#allocation83_spill] sm:$0xff] %v4143_v7  ;;  %5576 = vst [vmem:[#allocation84_spill] sm:$0xff] %v4146_v25  ;;  %v4155_v46 = vadd.f32 %v403_v50, %v4093_v36  ;;  %v405_v32 = vpop.f32.mrb[19].mxu1  ;;  %v4158_v9 = vadd.f32 %v476_v11, %v4081_v30  ;;  %v478_v7 = vpop.f32.mrb[19].mxu0 }
 0x12e   :  { %5577 = vst [vmem:[#allocation85_spill] sm:$0xff] %v4149_v52  ;;  %5578 = vst [vmem:[#allocation86_spill] sm:$0xff] %v4152_v15  ;;  %v4161_v54 = vadd.f32 %v405_v32, %v4085_v44  ;;  %v4164_v25 = vadd.f32 %v478_v7, %v4089_v42 }
 0x12f   :  { %5579 = vst [vmem:[#allocation87_spill] sm:$0xff] %v4155_v46  ;;  %5580 = vst [vmem:[#allocation88_spill] sm:$0xff] %v4158_v9 }
 0x130   :  { %5581 = vst [vmem:[#allocation89_spill] sm:$0xff] %v4161_v54  ;;  %5582 = vst [vmem:[#allocation90_spill] sm:$0xff] %v4164_v25 }
 0x132   :  { %v409_v48 = vpop.f32.mrb[20].mxu1  ;;  %v482_v52 = vpop.f32.mrb[20].mxu0 }
 0x133   :  { %v4167_v5 = vadd.f32 %v409_v48, %v4093_v36  ;;  %v411_v15 = vpop.f32.mrb[21].mxu1  ;;  %v4170_v50 = vadd.f32 %v482_v52, %v4081_v30  ;;  %v484_v46 = vpop.f32.mrb[21].mxu0 }
 0x134   :  { %v4173_v11 = vadd.f32 %v411_v15, %v4085_v44  ;;  %v413_v9 = vpop.f32.mrb[22].mxu1  ;;  %v4176_v32 = vadd.f32 %v484_v46, %v4089_v42  ;;  %v486_v54 = vpop.f32.mrb[22].mxu0  ;;  %v635_v15 = vld [vmem:[%s5267_s4] sm:$0x3f] }
 0x135   :  { %5583 = vst [vmem:[#allocation91_spill] sm:$0xff] %v4167_v5  ;;  %5584 = vst [vmem:[#allocation92_spill] sm:$0xff] %v4170_v50  ;;  %v4179_v7 = vadd.f32 %v413_v9, %v4093_v36  ;;  %v415_v25 = vpop.f32.mrb[23].mxu1  ;;  %v4182_v48 = vadd.f32 %v486_v54, %v4081_v30  ;;  %v488_v5 = vpop.f32.mrb[23].mxu0  ;;  %v5588_v50 = vsub.s32 0, %v4010_v40 }
 0x136   :  { %5585 = vst [vmem:[#allocation93_spill] sm:$0xff] %v4173_v11  ;;  %5586 = vst [vmem:[#allocation94_spill] sm:$0xff] %v4176_v32  ;;  %v4185_v52 = vadd.f32 %v488_v5, %v4089_v42  ;;  %v5590_v32 = vsub.s32 1, %v4010_v40  ;;  %v307_v42 = vadd.f32 %v4029_v34, %v4023_v56  ;;  %v416_v62 = vadd.f32 %v415_v25, %v4085_v44 }
 0x137   :  { %5587 = vst [vmem:[#allocation95_spill] sm:$0xff] %v4179_v7  ;;  %v4192_v46 = vrot.slane %v635_v15, %v5588_v50  ;;  %v5592_v7 = vsub.s32 3, %v4010_v40  ;;  %v309_v50 = vadd.f32 %v4034_v38, %v4027_v58  ;;  %v5593_v38 = vsub.s32 2, %v4010_v40 }
 0x138   :  { %v4196_v9 = vrot.slane %v635_v15, %v5590_v32 }
 0x139   :  { %5589 = vst [vmem:[#allocation96_spill] sm:$0xff] %v4192_v46  ;;  %v4200_v30 = vrot.slane %v635_v15, %v5592_v7  ;;  %v4212_v58 = vrot.slane %v635_v15, %v5593_v38 }
 0x13a   :  { %5591 = vst [vmem:[#allocation97_spill] sm:$0xff] %v4196_v9 }
 0x15a   :  { %v1181_v54 = vpop.f32.mrb[24].mxu1  ;;  %v1222_v11 = vpop.f32.mrb[24].mxu0 }
 0x15b   :  { %v1182_v5 = vadd.f32 %v1181_v54, %v4192_v46  ;;  %v1183_v3 = vpop.f32.mrb[25].mxu1  ;;  %v1224_v1 = vpop.f32.mrb[25].mxu0 }
 0x15c   :  { %v1184_v32 = vadd.f32 %v1183_v3, %v4196_v9  ;;  %v1225_v60 = vadd.f32 %v1224_v1, %v4200_v30  ;;  %v1185_v7 = vpop.f32.mrb[26].mxu1  ;;  %v1226_v21 = vpop.f32.mrb[26].mxu0  ;;  %v1223_v1 = vadd.f32 %v1222_v11, %v4212_v58  ;;  %v4220_v11 = vld [vmem:[%s5268_s5] ss:$0 sm:$0xff] }
 0x15d   :  { %v1273_v28 = vadd.f32 %v1182_v5, %v307_v42  ;;  %v1186_v4 = vpop.f32.mrb[27].mxu1  ;;  %v1227_v26 = vpop.f32.mrb[27].mxu0  ;;  %v5596_v7 = vsub.s32 5, %v4010_v40 }
 0x15e   :  { %v1280_v24 = vadd.f32 %v1184_v32, %v309_v50  ;;  %v1298_v56 = vadd.f32 %v1225_v60, %v416_v62  ;;  %v380_v4 = vadd.f32 %v4095_v13, %v4093_v36  ;;  %v5595_v50 = vsub.s32 4, %v4010_v40 }
 0x15f   :  { %v2882_v34 = vmul.f32 -1.442695, %v1273_v28 }
 0x160   :  { %v2883_v54 = vmul.f32 -1.442695, %v1280_v24  ;;  %v2884_v24 = vmul.f32 -1.442695, %v1298_v56  ;;  %v4228_v32 = vrot.slane %v635_v15, %v5595_v50  ;;  %v4232_v56 = vrot.slane %v635_v15, %v5596_v7  ;;  %v4253_v50 = vld [vmem:[#allocation8 + $0x34] ss:$24 sps:$4 sm:$0xff]  }
 0x161   :  { %3118 = vpow2.f32 %v2882_v34  ;;  %v4258_v7 = vld [vmem:[#allocation8 + $0x30] ss:$24 sps:$4 sm:$0xff]  }
 0x162   :  { %3120 = vpow2.f32 %v2883_v54 }
 0x16b   :  { %v3119_v46 = vpop.eup %3118 }
 0x16c   :  { %v1277_v12 = vadd.f32 1.0, %v3119_v46  ;;  %v3121_v3 = vpop.eup %3120 }
 0x16d   :  { %v1284_v21 = vadd.f32 1.0, %v3121_v3 }
 0x16e   :  { %3122 = vrcp.f32 %v1277_v12 }
 0x16f   :  { %3124 = vrcp.f32 %v1284_v21 }
 0x178   :  { %v3123_v44 = vpop.eup %3122 }
 0x179   :  { %v1287_v60 = vmul.f32 %v3123_v44, %v1223_v1  ;;  %v3125_v26 = vpop.eup %3124 }
 0x17a   :  { %v1290_v12 = vsub.f32 1.0, %v3125_v26  ;;  %v1292_v46 = vmul.f32 0.0, %v3125_v26 }
 0x17b   :  { %v1288_v62 = vadd.f32 %v1287_v60, %v380_v4 }
 0x17d   :  { %3126 = vtanh.f32 %v1288_v62 }
 0x17e   :  { %3128 = vpow2.f32 %v2884_v24 }
 0x187   :  { %v3127_v28 = vpop.eup %3126 }
 0x188   :  { %v1291_v25 = vmul.f32 %v3127_v28, %v1290_v12  ;;  %v3129_v5 = vpop.eup %3128 }
 0x189   :  { %v1302_v13 = vadd.f32 1.0, %v3129_v5 }
 0x18a   :  { %v4222_v42 = vadd.f32 %v1292_v46, %v1291_v25 }
 0x18b   :  { %3130 = vrcp.f32 %v1302_v13  ;;  %v4250_v13 = vld [vmem:[#allocation8] ss:$24 sps:$4 sm:$0xff]  }
 0x18c   :  { %5594 = vst [vmem:[#allocation98_spill] sm:$0xff] %v4222_v42  ;;  %v2597_v36 = vmul.f32 %v4220_v11, %v4222_v42 }
 0x18e   :  { %2605 = vadd.xlane.f32.xlu0 %v2597_v36  ;;  %v4244_v36 = vpack.c.bf16 %v4222_v42, %v4222_v42 }
 0x195   :  { %v3131_v21 = vpop.eup %3130 }
 0x19a   :  { %v1263_v34 = vpop.f32.mrb[28].mxu1 }
 0x19b   :  { %v1264_v54 = vadd.f32 %v1263_v34, %v4228_v32  ;;  %v1265_v38 = vpop.f32.mrb[29].mxu1  ;;  %v4261_v34 = vld [vmem:[#allocation8 + $0x64] ss:$24 sps:$4 sm:$0xff]  }
 0x19c   :  { %v1266_v3 = vadd.f32 %v1265_v38, %v4232_v56  ;;  %v1267_v1 = vpop.f32.mrb[30].mxu1  ;;  %v4269_v38 = vld [vmem:[#allocation8 + $0x94] ss:$24 sps:$4 sm:$0xff]  }
 0x19d   :  { %v1305_v44 = vadd.f32 %v1264_v54, %v4182_v48  ;;  %v1268_v4 = vpop.f32.mrb[31].mxu1  ;;  %v4266_v54 = vld [vmem:[#allocation8 + $0x60] ss:$24 sps:$4 sm:$0xff]  }
 0x19e   :  { %v1312_v60 = vmul.f32 %v3131_v21, %v1266_v3  ;;  %v5599_v3 = vld [vmem:[#allocation13_spill] sm:$0xff]  ;;  %v5600_v1 = vld [vmem:[#allocation44_spill] sm:$0xff]  ;;  %v5601_v21 = vld [vmem:[#allocation14_spill] sm:$0xff] }
 0x19f   :  { %v2885_v62 = vmul.f32 -1.442695, %v1305_v44  ;;  %v5602_v44 = vld [vmem:[#allocation45_spill] sm:$0xff]  ;;  %v5603_v4 = vld [vmem:[#allocation15_spill] sm:$0xff] }
 0x1a0   :  { %v1313_v24 = vadd.f32 %v1312_v60, %v4185_v52  ;;  %v5598_v52 = vld [vmem:[#allocation43_spill] sm:$0xff]  ;;  %v5604_v60 = vld [vmem:[#allocation46_spill] sm:$0xff] }
 0x1a1   :  { %3132 = vpow2.f32 %v2885_v62  ;;  %v5606_v62 = vld [vmem:[#allocation47_spill] sm:$0xff] }
 0x1ab   :  { %v3133_v26 = vpop.eup %3132 }
 0x1ac   :  { %v1309_v40 = vadd.f32 1.0, %v3133_v26  ;;  %v5610_v26 = vld [vmem:[#allocation49_spill] sm:$0xff] }
 0x1ae   :  { %3134 = vrcp.f32 %v1309_v40  ;;  %v5612_v40 = vld [vmem:[#allocation50_spill] sm:$0xff] }
 0x1af   :  { %3136 = vtanh.f32 %v1313_v24  ;;  %v5608_v24 = vld [vmem:[#allocation48_spill] sm:$0xff] }
 0x1b8   :  { %v3135_v15 = vpop.eup %3134 }
 0x1b9   :  { %v1315_v12 = vsub.f32 1.0, %v3135_v15  ;;  %v3137_v28 = vpop.eup %3136  ;;  %v1317_v46 = vmul.f32 0.0, %v3135_v15  ;;  %v5614_v15 = vld [vmem:[#allocation51_spill] sm:$0xff] }
 0x1bb   :  { %v1316_v25 = vmul.f32 %v3137_v28, %v1315_v12  ;;  %v5616_v12 = vld [vmem:[#allocation52_spill] sm:$0xff]  ;;  %v5620_v28 = vld [vmem:[#allocation54_spill] sm:$0xff] }
 0x1bd   :  { %v4238_v5 = vadd.f32 %v1317_v46, %v1316_v25  ;;  %v5623_v25 = vld [vmem:[#allocation42_spill] sm:$0xff] }
 0x1be   :  { %v4333_v46 = vld [vmem:[#allocation8 + $0x38] ss:$24 sps:$4 sm:$0xff]  }
 0x1bf   :  { %5597 = vst [vmem:[#allocation99_spill] sm:$0xff] %v4238_v5  ;;  %v1323_v48 = vpack.c.bf16 %v4238_v5, %v4238_v5  ;;  %5626 = vst [vmem:[#allocation14_spill] sm:$0xff] %v4333_v46 }
 0x1c1   :  { %1356 = vmatprep.mubr.bf16.mxu0 %v1323_v48  ;;  %1397 = vmatprep.mubr.bf16.mxu1 %v1323_v48 }
 0x1c2   :  { %1357 = vmatmul.mubr.bf16.vlgmr.msra.gmra.mrb[28].mxu0 %v4244_v36  ;;  %1398 = vmatmul.mubr.bf16.vlgmr.msra.gmra.mrb[32].mxu1 %v4244_v36 }
 0x1c3   :  { %1407 = vmatpush1.bf16.msra.mxu0 %v3850_v23  ;;  %1438 = vmatprep.mubr.bf16.mxu0 %v1323_v48  ;;  %v4336_v48 = vld [vmem:[#allocation8 + $0x6c] ss:$24 sps:$4 sm:$0xff]  }
 0x1c4   :  { %1408 = vmatprep.subr.bf16.mxu0 %v5598_v52  ;;  %1504 = vmatpush1.bf16.msra.mxu1 %v4250_v13  ;;  %5627 = vst [vmem:[#allocation45_spill] sm:$0xff] %v4336_v48 }
 0x1c5   :  { %1505 = vmatprep.subr.bf16.mxu1 %v4253_v50 }
 0x1c7   :  { %1409 = vmatpush1.bf16.msra.mxu0 %v3859_v27 }
 0x1c8   :  { %1410 = vmatprep.subr.bf16.mxu0 %v3863_v0  ;;  %1506 = vmatpush1.bf16.msra.mxu1 %v4258_v7 }
 0x1c9   :  { %1507 = vmatprep.subr.bf16.mxu1 %v4261_v34 }
 0x1cb   :  { %1411 = vmatpush1.bf16.msra.mxu0 %v3868_v29 }
 0x1cc   :  { %1412 = vmatprep.subr.bf16.mxu0 %v3871_v17  ;;  %1508 = vmatpush1.bf16.msra.mxu1 %v4266_v54 }
 0x1cd   :  { %1509 = vmatprep.subr.bf16.mxu1 %v4269_v38 }
 0x1cf   :  { %1413 = vmatpush1.bf16.msra.mxu0 %v3876_v19 }
 0x1d0   :  { %1414 = vmatprep.subr.bf16.mxu0 %v3879_v31  ;;  %1510 = vmatpush1.bf16.msra.mxu1 %v5599_v3  ;;  %v4339_v3 = vld [vmem:[#allocation8 + $0x68] ss:$24 sps:$4 sm:$0xff]  }
 0x1d1   :  { %1511 = vmatprep.subr.bf16.mxu1 %v3686_v45  ;;  %v5605_v45 = vld [vmem:[#allocation16_spill] sm:$0xff]  ;;  %5628 = vst [vmem:[#allocation15_spill] sm:$0xff] %v4339_v3 }
 0x1d3   :  { %1415 = vmatpush1.bf16.msra.mxu0 %v3884_v33 }
 0x1d4   :  { %1416 = vmatprep.subr.bf16.mxu0 %v5600_v1  ;;  %1512 = vmatpush1.bf16.msra.mxu1 %v5601_v21  ;;  %v4345_v21 = vld [vmem:[#allocation8 + $0x98] ss:$24 sps:$4 sm:$0xff]  }
 0x1d5   :  { %1513 = vmatprep.subr.bf16.mxu1 %v3702_v49  ;;  %v5607_v49 = vld [vmem:[#allocation17_spill] sm:$0xff]  ;;  %5630 = vst [vmem:[#allocation16_spill] sm:$0xff] %v4345_v21 }
 0x1d7   :  { %1417 = vmatpush1.bf16.msra.mxu0 %v3892_v37 }
 0x1d8   :  { %1418 = vmatprep.subr.bf16.mxu0 %v5602_v44  ;;  %1514 = vmatpush1.bf16.msra.mxu1 %v5603_v4  ;;  %v4348_v4 = vld [vmem:[#allocation8 + $0xcc] ss:$24 sps:$4 sm:$0xff]  }
 0x1d9   :  { %1515 = vmatprep.subr.bf16.mxu1 %v3716_v53  ;;  %v5609_v53 = vld [vmem:[#allocation20_spill] sm:$0xff]  ;;  %5631 = vst [vmem:[#allocation47_spill] sm:$0xff] %v4348_v4 }
 0x1db   :  { %1419 = vmatpush1.bf16.msra.mxu0 %v3900_v41 }
 0x1dc   :  { %1420 = vmatprep.subr.bf16.mxu0 %v5604_v60  ;;  %1516 = vmatpush1.bf16.msra.mxu1 %v5605_v45  ;;  %v4351_v45 = vld [vmem:[#allocation8 + $0xc8] ss:$24 sps:$4 sm:$0xff]  }
 0x1dd   :  { %1517 = vmatprep.subr.bf16.mxu1 %v3732_v57  ;;  %v5611_v57 = vld [vmem:[#allocation23_spill] sm:$0xff]  ;;  %5632 = vst [vmem:[#allocation17_spill] sm:$0xff] %v4351_v45 }
 0x1df   :  { %1421 = vmatpush1.bf16.msra.mxu0 %v3908_v35 }
 0x1e0   :  { %1422 = vmatprep.subr.bf16.mxu0 %v5606_v62  ;;  %1518 = vmatpush1.bf16.msra.mxu1 %v5607_v49  ;;  %v4354_v49 = vld [vmem:[#allocation8 + $0xfc] ss:$24 sps:$4 sm:$0xff]  }
 0x1e1   :  { %1519 = vmatprep.subr.bf16.mxu1 %v3746_v61  ;;  %v5613_v61 = vld [vmem:[#allocation26_spill] sm:$0xff]  ;;  %5633 = vst [vmem:[#allocation48_spill] sm:$0xff] %v4354_v49 }
 0x1e3   :  { %1423 = vmatpush1.bf16.msra.mxu0 %v3916_v39 }
 0x1e4   :  { %1424 = vmatprep.subr.bf16.mxu0 %v5608_v24  ;;  %1520 = vmatpush1.bf16.msra.mxu1 %v5609_v53  ;;  %v4357_v53 = vld [vmem:[#allocation8 + $0xf8] ss:$24 sps:$4 sm:$0xff]  }
 0x1e5   :  { %1521 = vmatprep.subr.bf16.mxu1 %v3760_v2  ;;  %v5615_v2 = vld [vmem:[#allocation29_spill] sm:$0xff]  ;;  %5634 = vst [vmem:[#allocation20_spill] sm:$0xff] %v4357_v53 }
 0x1e7   :  { %1425 = vmatpush1.bf16.msra.mxu0 %v3924_v43 }
 0x1e8   :  { %1426 = vmatprep.subr.bf16.mxu0 %v5610_v26  ;;  %1522 = vmatpush1.bf16.msra.mxu1 %v5611_v57  ;;  %v4360_v57 = vld [vmem:[#allocation8 + $0x12c] ss:$24 sps:$4 sm:$0xff]  }
 0x1e9   :  { %1523 = vmatprep.subr.bf16.mxu1 %v3772_v6  ;;  %v5617_v6 = vld [vmem:[#allocation53_spill] sm:$0xff]  ;;  %5635 = vst [vmem:[#allocation49_spill] sm:$0xff] %v4360_v57 }
 0x1eb   :  { %1427 = vmatpush1.bf16.msra.mxu0 %v3932_v47 }
 0x1ec   :  { %1428 = vmatprep.subr.bf16.mxu0 %v5612_v40  ;;  %1524 = vmatpush1.bf16.msra.mxu1 %v5613_v61  ;;  %v4363_v61 = vld [vmem:[#allocation8 + $0x128] ss:$24 sps:$4 sm:$0xff]  }
 0x1ed   :  { %1525 = vmatprep.subr.bf16.mxu1 %v3784_v10  ;;  %v5618_v10 = vld [vmem:[#allocation36_spill] sm:$0xff]  ;;  %5636 = vst [vmem:[#allocation23_spill] sm:$0xff] %v4363_v61 }
 0x1ef   :  { %1429 = vmatpush1.bf16.msra.mxu0 %v3940_v51 }
 0x1f0   :  { %1430 = vmatprep.subr.bf16.mxu0 %v5614_v15  ;;  %1526 = vmatpush1.bf16.msra.mxu1 %v5615_v2  ;;  %v4366_v2 = vld [vmem:[#allocation8 + $0x15c] ss:$24 sps:$4 sm:$0xff]  }
 0x1f1   :  { %1527 = vmatprep.subr.bf16.mxu1 %v3796_v14  ;;  %v5619_v14 = vld [vmem:[#allocation38_spill] sm:$0xff]  ;;  %5637 = vst [vmem:[#allocation50_spill] sm:$0xff] %v4366_v2 }
 0x1f3   :  { %1431 = vmatpush1.bf16.msra.mxu0 %v3948_v55 }
 0x1f4   :  { %1432 = vmatprep.subr.bf16.mxu0 %v5616_v12  ;;  %1528 = vmatpush1.bf16.msra.mxu1 %v3802_v16  ;;  %v4321_v16 = vld [vmem:[#allocation8 + $0xc] ss:$24 sps:$4 sm:$0xff]  }
 0x1f5   :  { %1529 = vmatprep.subr.bf16.mxu1 %v3808_v18  ;;  %5621 = vst [vmem:[#allocation43_spill] sm:$0xff] %v4321_v16  ;;  %v5622_v18 = vld [vmem:[#allocation40_spill] sm:$0xff] }
 0x1f7   :  { %1433 = vmatpush1.bf16.msra.mxu0 %v3956_v59 }
 0x1f8   :  { %1434 = vmatprep.subr.bf16.mxu0 %v3959_v8  ;;  %1530 = vmatpush1.bf16.msra.mxu1 %v3816_v20  ;;  %v4327_v20 = vld [vmem:[#allocation8 + $0x8] ss:$24 sps:$4 sm:$0xff]  }
 0x1f9   :  { %1531 = vmatprep.subr.bf16.mxu1 %v3822_v22  ;;  %5624 = vst [vmem:[#allocation13_spill] sm:$0xff] %v4327_v20  ;;  %v4330_v22 = vld [vmem:[#allocation8 + $0x3c] ss:$24 sps:$4 sm:$0xff]  }
 0x1fa   :  { %5625 = vst [vmem:[#allocation44_spill] sm:$0xff] %v4330_v22 }
 0x1fb   :  { %1435 = vmatpush1.bf16.msra.mxu0 %v3964_v63 }
 0x1fc   :  { %1436 = vmatprep.subr.bf16.mxu0 %v5617_v6  ;;  %1532 = vmatpush1.bf16.msra.mxu1 %v5618_v10  ;;  %v5638_v10 = vld [vmem:[#allocation18_spill] sm:$0xff] }
 0x1fd   :  { %1533 = vmatprep.subr.bf16.mxu1 %v5619_v14  ;;  %v5639_v14 = vld [vmem:[#allocation19_spill] sm:$0xff] }
 0x1ff   :  { %1437 = vmatpush1.bf16.msra.mxu0 %v5620_v28 }
 0x200   :  { %1544 = vmatprep.subr.bf16.mxu0 %v4321_v16  ;;  %1534 = vmatpush1.bf16.msra.mxu1 %v5622_v18  ;;  %v5640_v18 = vld [vmem:[#allocation21_spill] sm:$0xff] }
 0x201   :  { %1585 = vmatprep.subr.bf16.mxu1 %v5623_v25  ;;  %v5641_v25 = vld [vmem:[#allocation22_spill] sm:$0xff] }
 0x202   :  { %1439 = vmatmul.mubr.bf16.vlgmr.msra.gmra.mrb[32].mxu0 %v4244_v36  ;;  %v4342_v36 = vld [vmem:[#allocation8 + $0x9c] ss:$24 sps:$4 sm:$0xff]  }
 0x203   :  { %1545 = vmatpush1.bf16.msra.mxu0 %v4327_v20  ;;  %5629 = vst [vmem:[#allocation46_spill] sm:$0xff] %v4342_v36  ;;  %v5659_v20 = vld [vmem:[#allocation93_spill] sm:$0xff] }
 0x204   :  { %1546 = vmatprep.subr.bf16.mxu0 %v4330_v22 }
 0x207   :  { %1547 = vmatpush1.bf16.msra.mxu0 %v4333_v46  ;;  %v5658_v46 = vld [vmem:[#allocation59_spill] sm:$0xff] }
 0x208   :  { %1548 = vmatprep.subr.bf16.mxu0 %v4336_v48 }
 0x20b   :  { %1549 = vmatpush1.bf16.msra.mxu0 %v4339_v3  ;;  %v5657_v3 = vld [vmem:[#allocation57_spill] sm:$0xff] }
 0x20c   :  { %1550 = vmatprep.subr.bf16.mxu0 %v4342_v36 }
 0x20f   :  { %1551 = vmatpush1.bf16.msra.mxu0 %v4345_v21 }
 0x210   :  { %1552 = vmatprep.subr.bf16.mxu0 %v4348_v4  ;;  %v5647_v4 = vld [vmem:[#allocation31_spill] sm:$0xff] }
 0x213   :  { %1553 = vmatpush1.bf16.msra.mxu0 %v4351_v45  ;;  %v5645_v45 = vld [vmem:[#allocation28_spill] sm:$0xff] }
 0x214   :  { %1554 = vmatprep.subr.bf16.mxu0 %v4354_v49  ;;  %v5643_v49 = vld [vmem:[#allocation25_spill] sm:$0xff] }
 0x217   :  { %1555 = vmatpush1.bf16.msra.mxu0 %v4357_v53  ;;  %v5642_v53 = vld [vmem:[#allocation24_spill] sm:$0xff] }
 0x218   :  { %1556 = vmatprep.subr.bf16.mxu0 %v4360_v57  ;;  %v5644_v57 = vld [vmem:[#allocation27_spill] sm:$0xff] }
 0x21b   :  { %1557 = vmatpush1.bf16.msra.mxu0 %v4363_v61  ;;  %v5646_v61 = vld [vmem:[#allocation30_spill] sm:$0xff] }
 0x21c   :  { %1558 = vmatprep.subr.bf16.mxu0 %v4366_v2  ;;  %v5648_v2 = vld [vmem:[#allocation32_spill] sm:$0xff] }
 0x21f   :  { %1559 = vmatpush1.bf16.msra.mxu0 %v5638_v10  ;;  %v5649_v10 = vld [vmem:[#allocation33_spill] sm:$0xff] }
 0x220   :  { %1560 = vmatprep.subr.bf16.mxu0 %v5639_v14  ;;  %v5650_v14 = vld [vmem:[#allocation34_spill] sm:$0xff] }
 0x223   :  { %1561 = vmatpush1.bf16.msra.mxu0 %v5640_v18  ;;  %v5651_v18 = vld [vmem:[#allocation35_spill] sm:$0xff] }
 0x224   :  { %1562 = vmatprep.subr.bf16.mxu0 %v5641_v25  ;;  %v5652_v25 = vld [vmem:[#allocation37_spill] sm:$0xff] }
 0x227   :  { %1563 = vmatpush1.bf16.msra.mxu0 %v5642_v53  ;;  %v5653_v53 = vld [vmem:[#allocation39_spill] sm:$0xff] }
 0x228   :  { %1564 = vmatprep.subr.bf16.mxu0 %v5643_v49  ;;  %v5654_v49 = vld [vmem:[#allocation41_spill] sm:$0xff] }
 0x22b   :  { %1565 = vmatpush1.bf16.msra.mxu0 %v5644_v57  ;;  %v4386_v57 = vld [vmem:[#allocation8 + $0x4] ss:$24 sps:$4 sm:$0xff]  }
 0x22c   :  { %1566 = vmatprep.subr.bf16.mxu0 %v5645_v45  ;;  %5655 = vst [vmem:[#allocation26_spill] sm:$0xff] %v4386_v57 }
 0x22f   :  { %1567 = vmatpush1.bf16.msra.mxu0 %v5646_v61  ;;  %v5656_v61 = vld [vmem:[#allocation96_spill] sm:$0xff] }
 0x230   :  { %1568 = vmatprep.subr.bf16.mxu0 %v5647_v4 }
 0x233   :  { %1569 = vmatpush1.bf16.msra.mxu0 %v5648_v2 }
 0x234   :  { %1570 = vmatprep.subr.bf16.mxu0 %v5649_v10 }
 0x237   :  { %1571 = vmatpush1.bf16.msra.mxu0 %v5650_v14 }
 0x238   :  { %1572 = vmatprep.subr.bf16.mxu0 %v5651_v18 }
 0x23b   :  { %1573 = vmatpush1.bf16.msra.mxu0 %v5652_v25 }
 0x23c   :  { %1574 = vmatprep.subr.bf16.mxu0 %v5653_v53 }
 0x23f   :  { %1575 = vmatpush1.bf16.msra.mxu0 %v5654_v49 }
 0x240   :  { %1682 = vmatprep.subr.bf16.mxu0 %v4386_v57 }
 0x295   :  { %v1358_v45 = vpop.f32.mrb[28].mxu0  ;;  %v1399_v4 = vpop.f32.mrb[32].mxu1 }
 0x296   :  { %v1359_v2 = vadd.f32 %v1358_v45, %v5656_v61  ;;  %v1360_v21 = vpop.f32.mrb[29].mxu0  ;;  %v1401_v10 = vpop.f32.mrb[33].mxu1 }
 0x297   :  { %v1361_v14 = vadd.f32 %v1360_v21, %v4196_v9  ;;  %v1402_v18 = vadd.f32 %v1401_v10, %v4200_v30  ;;  %v1362_v36 = vpop.f32.mrb[30].mxu0  ;;  %v1403_v25 = vpop.f32.mrb[34].mxu1 }
 0x298   :  { %v1451_v53 = vadd.f32 %v1359_v2, %v5657_v3  ;;  %v1363_v48 = vpop.f32.mrb[31].mxu0  ;;  %v1404_v49 = vpop.f32.mrb[35].mxu1  ;;  %v1400_v36 = vadd.f32 %v1399_v4, %v4212_v58 }
 0x299   :  { %v1458_v22 = vadd.f32 %v1361_v14, %v5658_v46  ;;  %v1476_v57 = vadd.f32 %v1402_v18, %v5659_v20  ;;  %v5660_v48 = vld [vmem:[#allocation71_spill] sm:$0xff] }
 0x29a   :  { %v2886_v16 = vmul.f32 -1.442695, %v1451_v53 }
 0x29b   :  { %v2887_v28 = vmul.f32 -1.442695, %v1458_v22  ;;  %v2888_v46 = vmul.f32 -1.442695, %v1476_v57 }
 0x29c   :  { %3138 = vpow2.f32 %v2886_v16 }
 0x29d   :  { %3140 = vpow2.f32 %v2887_v28 }
 0x2a6   :  { %v3139_v45 = vpop.eup %3138 }
 0x2a7   :  { %v1455_v61 = vadd.f32 1.0, %v3139_v45  ;;  %v3141_v21 = vpop.eup %3140 }
 0x2a8   :  { %v1462_v9 = vadd.f32 1.0, %v3141_v21 }
 0x2a9   :  { %3142 = vrcp.f32 %v1455_v61 }
 0x2aa   :  { %3144 = vrcp.f32 %v1462_v9 }
 0x2b3   :  { %v3143_v10 = vpop.eup %3142 }
 0x2b4   :  { %v1465_v25 = vmul.f32 %v3143_v10, %v1400_v36  ;;  %v3145_v20 = vpop.eup %3144  ;;  %v5662_v36 = vld [vmem:[#allocation92_spill] sm:$0xff] }
 0x2b5   :  { %v1468_v2 = vsub.f32 1.0, %v3145_v20  ;;  %v1470_v28 = vmul.f32 %v3145_v20, %v4222_v42  ;;  %v4572_v42 = vld [vmem:[#allocation8 + $0x218] ss:$24 sps:$4 sm:$0xff]  }
 0x2b6   :  { %v1466_v3 = vadd.f32 %v1465_v25, %v5660_v48  ;;  %5701 = vst [vmem:[#allocation37_spill] sm:$0xff] %v4572_v42 }
 0x2b8   :  { %3146 = vtanh.f32 %v1466_v3 }
 0x2b9   :  { %3148 = vpow2.f32 %v2888_v46  ;;  %v5663_v46 = vld [vmem:[#allocation94_spill] sm:$0xff] }
 0x2c2   :  { %v3147_v16 = vpop.eup %3146 }
 0x2c3   :  { %v1469_v22 = vmul.f32 %v3147_v16, %v1468_v2  ;;  %v3149_v61 = vpop.eup %3148 }
 0x2c4   :  { %v1480_v18 = vadd.f32 1.0, %v3149_v61 }
 0x2c5   :  { %v4398_v14 = vadd.f32 %v1470_v28, %v1469_v22 }
 0x2c6   :  { %3150 = vrcp.f32 %v1480_v18 }
 0x2c7   :  { %5661 = vst [vmem:[#allocation51_spill] sm:$0xff] %v4398_v14  ;;  %v2598_v4 = vmul.f32 %v4220_v11, %v4398_v14 }
 0x2c9   :  { %2607 = vadd.xlane.f32.xlu0 %v2598_v4 }
 0x2d0   :  { %v3151_v21 = vpop.eup %3150 }
 0x2d5   :  { %v1440_v9 = vpop.f32.mrb[32].mxu0 }
 0x2d6   :  { %v1441_v53 = vadd.f32 %v1440_v9, %v4228_v32  ;;  %v1442_v57 = vpop.f32.mrb[33].mxu0 }
 0x2d7   :  { %v1443_v49 = vadd.f32 %v1442_v57, %v4232_v56  ;;  %v1444_v45 = vpop.f32.mrb[34].mxu0  ;;  %v4413_v57 = vpack.c.bf16 %v4398_v14, %v4398_v14 }
 0x2d8   :  { %v1483_v10 = vadd.f32 %v1441_v53, %v5662_v36  ;;  %v1445_v25 = vpop.f32.mrb[35].mxu0  ;;  %v5682_v45 = vld [vmem:[#allocation45_spill] sm:$0xff]  ;;  %v5684_v36 = vld [vmem:[#allocation46_spill] sm:$0xff] }
 0x2d9   :  { %v1490_v48 = vmul.f32 %v3151_v21, %v1443_v49  ;;  %v5681_v49 = vld [vmem:[#allocation14_spill] sm:$0xff]  ;;  %v5683_v21 = vld [vmem:[#allocation15_spill] sm:$0xff] }
 0x2da   :  { %v2889_v3 = vmul.f32 -1.442695, %v1483_v10  ;;  %v5685_v10 = vld [vmem:[#allocation16_spill] sm:$0xff]  ;;  %v5686_v25 = vld [vmem:[#allocation47_spill] sm:$0xff] }
 0x2db   :  { %v1491_v20 = vadd.f32 %v1490_v48, %v5663_v46  ;;  %v5687_v48 = vld [vmem:[#allocation17_spill] sm:$0xff]  ;;  %v5689_v46 = vld [vmem:[#allocation20_spill] sm:$0xff] }
 0x2dc   :  { %3152 = vpow2.f32 %v2889_v3  ;;  %v5688_v3 = vld [vmem:[#allocation48_spill] sm:$0xff] }
 0x2e6   :  { %v3153_v2 = vpop.eup %3152 }
 0x2e7   :  { %v1487_v16 = vadd.f32 1.0, %v3153_v2  ;;  %v5691_v2 = vld [vmem:[#allocation23_spill] sm:$0xff] }
 0x2e9   :  { %3154 = vrcp.f32 %v1487_v16  ;;  %v5692_v16 = vld [vmem:[#allocation50_spill] sm:$0xff] }
 0x2ea   :  { %3156 = vtanh.f32 %v1491_v20  ;;  %v5690_v20 = vld [vmem:[#allocation49_spill] sm:$0xff] }
 0x2f3   :  { %v3155_v22 = vpop.eup %3154 }
 0x2f4   :  { %v1493_v28 = vsub.f32 1.0, %v3155_v22  ;;  %v3157_v61 = vpop.eup %3156  ;;  %v1495_v18 = vmul.f32 %v3155_v22, %v4238_v5  ;;  %v4548_v22 = vld [vmem:[#allocation8 + $0x158] ss:$24 sps:$4 sm:$0xff]   ;;  %v4575_v5 = vld [vmem:[#allocation8 + $0x24c] ss:$24 sps:$4 sm:$0xff]  }
 0x2f5   :  { %5693 = vst [vmem:[#allocation27_spill] sm:$0xff] %v4548_v22  ;;  %5702 = vst [vmem:[#allocation39_spill] sm:$0xff] %v4575_v5 }
 0x2f6   :  { %v1494_v4 = vmul.f32 %v3157_v61, %v1493_v28  ;;  %v4551_v28 = vld [vmem:[#allocation8 + $0x18c] ss:$24 sps:$4 sm:$0xff]   ;;  %v4554_v61 = vld [vmem:[#allocation8 + $0x188] ss:$24 sps:$4 sm:$0xff]  }
 0x2f7   :  { %5694 = vst [vmem:[#allocation28_spill] sm:$0xff] %v4551_v28  ;;  %5695 = vst [vmem:[#allocation30_spill] sm:$0xff] %v4554_v61 }
 0x2f8   :  { %v4407_v9 = vadd.f32 %v1495_v18, %v1494_v4  ;;  %v4557_v4 = vld [vmem:[#allocation8 + $0x1bc] ss:$24 sps:$4 sm:$0xff]   ;;  %v4560_v18 = vld [vmem:[#allocation8 + $0x1b8] ss:$24 sps:$4 sm:$0xff]  }
 0x2f9   :  { %5696 = vst [vmem:[#allocation31_spill] sm:$0xff] %v4557_v4  ;;  %5697 = vst [vmem:[#allocation32_spill] sm:$0xff] %v4560_v18 }
 0x2fa   :  { %5664 = vst [vmem:[#allocation29_spill] sm:$0xff] %v4407_v9  ;;  %v1502_v53 = vpack.c.bf16 %v4407_v9, %v4407_v9 }
 0x2fc   :  { %1535 = vmatprep.mubr.bf16.mxu1 %v1502_v53  ;;  %1576 = vmatprep.mubr.bf16.mxu0 %v1502_v53 }
 0x2fd   :  { %1536 = vmatmul.mubr.bf16.vlgmr.msra.gmra.mrb[36].mxu1 %v4413_v57  ;;  %1577 = vmatmul.mubr.bf16.vlgmr.msra.gmra.mrb[36].mxu0 %v4413_v57 }
 0x2fe   :  { %1586 = vmatpush1.bf16.msra.mxu1 %v3850_v23  ;;  %1617 = vmatprep.mubr.bf16.mxu1 %v1502_v53  ;;  %v4431_v23 = vld [vmem:[#allocation8 + $0x90] ss:$24 sps:$4 sm:$0xff]   ;;  %v4563_v53 = vld [vmem:[#allocation8 + $0x1ec] ss:$24 sps:$4 sm:$0xff]  }
 0x2ff   :  { %1587 = vmatprep.subr.bf16.mxu1 %v5598_v52  ;;  %1683 = vmatpush1.bf16.msra.mxu0 %v4250_v13  ;;  %v4466_v52 = vld [vmem:[#allocation8 + $0x184] ss:$24 sps:$4 sm:$0xff]   ;;  %5698 = vst [vmem:[#allocation33_spill] sm:$0xff] %v4563_v53 }
 0x300   :  { %1684 = vmatprep.subr.bf16.mxu0 %v4253_v50 }
 0x302   :  { %1588 = vmatpush1.bf16.msra.mxu1 %v3859_v27  ;;  %v4450_v27 = vld [vmem:[#allocation8 + $0x124] ss:$24 sps:$4 sm:$0xff]  }
 0x303   :  { %1589 = vmatprep.subr.bf16.mxu1 %v3863_v0  ;;  %1685 = vmatpush1.bf16.msra.mxu0 %v4258_v7  ;;  %v4434_v0 = vld [vmem:[#allocation8 + $0xc4] ss:$24 sps:$4 sm:$0xff]  }
 0x304   :  { %1686 = vmatprep.subr.bf16.mxu0 %v4261_v34 }
 0x306   :  { %1590 = vmatpush1.bf16.msra.mxu1 %v3868_v29  ;;  %v4439_v29 = vld [vmem:[#allocation8 + $0xc0] ss:$24 sps:$4 sm:$0xff]  }
 0x307   :  { %1591 = vmatprep.subr.bf16.mxu1 %v3871_v17  ;;  %1687 = vmatpush1.bf16.msra.mxu0 %v4266_v54  ;;  %v4442_v17 = vld [vmem:[#allocation8 + $0xf4] ss:$24 sps:$4 sm:$0xff]  }
 0x308   :  { %1688 = vmatprep.subr.bf16.mxu0 %v4269_v38 }
 0x30a   :  { %1592 = vmatpush1.bf16.msra.mxu1 %v3876_v19  ;;  %v4447_v19 = vld [vmem:[#allocation8 + $0xf0] ss:$24 sps:$4 sm:$0xff]  }
 0x30b   :  { %1593 = vmatprep.subr.bf16.mxu1 %v3879_v31  ;;  %1689 = vmatpush1.bf16.msra.mxu0 %v4431_v23  ;;  %v4455_v31 = vld [vmem:[#allocation8 + $0x120] ss:$24 sps:$4 sm:$0xff]  }
 0x30c   :  { %1690 = vmatprep.subr.bf16.mxu0 %v4434_v0 }
 0x30e   :  { %1594 = vmatpush1.bf16.msra.mxu1 %v3884_v33  ;;  %v4458_v33 = vld [vmem:[#allocation8 + $0x154] ss:$24 sps:$4 sm:$0xff]  }
 0x30f   :  { %1595 = vmatprep.subr.bf16.mxu1 %v5600_v1  ;;  %1691 = vmatpush1.bf16.msra.mxu0 %v4439_v29  ;;  %v4474_v1 = vld [vmem:[#allocation8 + $0x1b4] ss:$24 sps:$4 sm:$0xff]  }
 0x310   :  { %1692 = vmatprep.subr.bf16.mxu0 %v4442_v17 }
 0x312   :  { %1596 = vmatpush1.bf16.msra.mxu1 %v3892_v37  ;;  %v4463_v37 = vld [vmem:[#allocation8 + $0x150] ss:$24 sps:$4 sm:$0xff]  }
 0x313   :  { %1597 = vmatprep.subr.bf16.mxu1 %v5602_v44  ;;  %1693 = vmatpush1.bf16.msra.mxu0 %v4447_v19  ;;  %v4482_v44 = vld [vmem:[#allocation8 + $0x1e4] ss:$24 sps:$4 sm:$0xff]  }
 0x314   :  { %1694 = vmatprep.subr.bf16.mxu0 %v4450_v27 }
 0x316   :  { %1598 = vmatpush1.bf16.msra.mxu1 %v3900_v41  ;;  %v4471_v41 = vld [vmem:[#allocation8 + $0x180] ss:$24 sps:$4 sm:$0xff]  }
 0x317   :  { %1599 = vmatprep.subr.bf16.mxu1 %v5604_v60  ;;  %1695 = vmatpush1.bf16.msra.mxu0 %v4455_v31  ;;  %v4490_v60 = vld [vmem:[#allocation8 + $0x214] ss:$24 sps:$4 sm:$0xff]  }
 0x318   :  { %1696 = vmatprep.subr.bf16.mxu0 %v4458_v33  ;;  %5666 = vst [vmem:[#allocation53_spill] sm:$0xff] %v4490_v60 }
 0x31a   :  { %1600 = vmatpush1.bf16.msra.mxu1 %v3908_v35  ;;  %v4479_v35 = vld [vmem:[#allocation8 + $0x1b0] ss:$24 sps:$4 sm:$0xff]  }
 0x31b   :  { %1601 = vmatprep.subr.bf16.mxu1 %v5606_v62  ;;  %1697 = vmatpush1.bf16.msra.mxu0 %v4463_v37  ;;  %v4498_v62 = vld [vmem:[#allocation8 + $0x244] ss:$24 sps:$4 sm:$0xff]  }
 0x31c   :  { %1698 = vmatprep.subr.bf16.mxu0 %v4466_v52  ;;  %5668 = vst [vmem:[#allocation38_spill] sm:$0xff] %v4498_v62 }
 0x31e   :  { %1602 = vmatpush1.bf16.msra.mxu1 %v3916_v39  ;;  %v4487_v39 = vld [vmem:[#allocation8 + $0x1e0] ss:$24 sps:$4 sm:$0xff]  }
 0x31f   :  { %1603 = vmatprep.subr.bf16.mxu1 %v5608_v24  ;;  %1699 = vmatpush1.bf16.msra.mxu0 %v4471_v41  ;;  %5665 = vst [vmem:[#allocation52_spill] sm:$0xff] %v4487_v39  ;;  %v4506_v24 = vld [vmem:[#allocation8 + $0x274] ss:$24 sps:$4 sm:$0xff]  }
 0x320   :  { %1700 = vmatprep.subr.bf16.mxu0 %v4474_v1  ;;  %5670 = vst [vmem:[#allocation42_spill] sm:$0xff] %v4506_v24 }
 0x322   :  { %1604 = vmatpush1.bf16.msra.mxu1 %v3924_v43  ;;  %v4495_v43 = vld [vmem:[#allocation8 + $0x210] ss:$24 sps:$4 sm:$0xff]  }
 0x323   :  { %1605 = vmatprep.subr.bf16.mxu1 %v5610_v26  ;;  %1701 = vmatpush1.bf16.msra.mxu0 %v4479_v35  ;;  %5667 = vst [vmem:[#allocation36_spill] sm:$0xff] %v4495_v43  ;;  %v4514_v26 = vld [vmem:[#allocation8 + $0x2a4] ss:$24 sps:$4 sm:$0xff]  }
 0x324   :  { %1702 = vmatprep.subr.bf16.mxu0 %v4482_v44  ;;  %5672 = vst [vmem:[#allocation19_spill] sm:$0xff] %v4514_v26 }
 0x326   :  { %1606 = vmatpush1.bf16.msra.mxu1 %v3932_v47  ;;  %v4503_v47 = vld [vmem:[#allocation8 + $0x240] ss:$24 sps:$4 sm:$0xff]  }
 0x327   :  { %1607 = vmatprep.subr.bf16.mxu1 %v5612_v40  ;;  %1703 = vmatpush1.bf16.msra.mxu0 %v4487_v39  ;;  %5669 = vst [vmem:[#allocation40_spill] sm:$0xff] %v4503_v47  ;;  %v4522_v40 = vld [vmem:[#allocation8 + $0x2d4] ss:$24 sps:$4 sm:$0xff]  }
 0x328   :  { %1704 = vmatprep.subr.bf16.mxu0 %v4490_v60  ;;  %5674 = vst [vmem:[#allocation22_spill] sm:$0xff] %v4522_v40 }
 0x32a   :  { %1608 = vmatpush1.bf16.msra.mxu1 %v3940_v51  ;;  %v4511_v51 = vld [vmem:[#allocation8 + $0x270] ss:$24 sps:$4 sm:$0xff]  }
 0x32b   :  { %1609 = vmatprep.subr.bf16.mxu1 %v5614_v15  ;;  %1705 = vmatpush1.bf16.msra.mxu0 %v4495_v43  ;;  %5671 = vst [vmem:[#allocation18_spill] sm:$0xff] %v4511_v51  ;;  %v4527_v15 = vld [vmem:[#allocation8 + $0x2d0] ss:$24 sps:$4 sm:$0xff]  }
 0x32c   :  { %1706 = vmatprep.subr.bf16.mxu0 %v4498_v62  ;;  %5677 = vst [vmem:[#allocation24_spill] sm:$0xff] %v4527_v15 }
 0x32e   :  { %1610 = vmatpush1.bf16.msra.mxu1 %v3948_v55  ;;  %v4519_v55 = vld [vmem:[#allocation8 + $0x2a0] ss:$24 sps:$4 sm:$0xff]  }
 0x32f   :  { %1611 = vmatprep.subr.bf16.mxu1 %v5616_v12  ;;  %1707 = vmatpush1.bf16.msra.mxu0 %v4503_v47  ;;  %5673 = vst [vmem:[#allocation21_spill] sm:$0xff] %v4519_v55  ;;  %v4530_v12 = vld [vmem:[#allocation8 + $0x14] ss:$24 sps:$4 sm:$0xff]  }
 0x330   :  { %1708 = vmatprep.subr.bf16.mxu0 %v4506_v24  ;;  %5678 = vst [vmem:[#allocation25_spill] sm:$0xff] %v4530_v12 }
 0x332   :  { %1612 = vmatpush1.bf16.msra.mxu1 %v3956_v59  ;;  %v5675_v59 = vld [vmem:[#allocation54_spill] sm:$0xff] }
 0x333   :  { %1613 = vmatprep.subr.bf16.mxu1 %v3959_v8  ;;  %1709 = vmatpush1.bf16.msra.mxu0 %v4511_v51  ;;  %v5676_v8 = vld [vmem:[#allocation43_spill] sm:$0xff] }
 0x334   :  { %1710 = vmatprep.subr.bf16.mxu0 %v4514_v26 }
 0x336   :  { %1614 = vmatpush1.bf16.msra.mxu1 %v3964_v63  ;;  %v5679_v63 = vld [vmem:[#allocation13_spill] sm:$0xff] }
 0x337   :  { %1615 = vmatprep.subr.bf16.mxu1 %v5617_v6  ;;  %1711 = vmatpush1.bf16.msra.mxu0 %v4519_v55  ;;  %v5680_v6 = vld [vmem:[#allocation44_spill] sm:$0xff] }
 0x338   :  { %1712 = vmatprep.subr.bf16.mxu0 %v4522_v40 }
 0x33a   :  { %1616 = vmatpush1.bf16.msra.mxu1 %v5675_v59  ;;  %v4569_v59 = vld [vmem:[#allocation8 + $0x21c] ss:$24 sps:$4 sm:$0xff]  }
 0x33b   :  { %1723 = vmatprep.subr.bf16.mxu1 %v5676_v8  ;;  %1713 = vmatpush1.bf16.msra.mxu0 %v4527_v15  ;;  %5700 = vst [vmem:[#allocation35_spill] sm:$0xff] %v4569_v59 }
 0x33c   :  { %1764 = vmatprep.subr.bf16.mxu0 %v4530_v12 }
 0x33d   :  { %1618 = vmatmul.mubr.bf16.vlgmr.msra.gmra.mrb[40].mxu1 %v4413_v57  ;;  %v4566_v57 = vld [vmem:[#allocation8 + $0x1e8] ss:$24 sps:$4 sm:$0xff]  }
 0x33e   :  { %1724 = vmatpush1.bf16.msra.mxu1 %v5679_v63  ;;  %5699 = vst [vmem:[#allocation34_spill] sm:$0xff] %v4566_v57 }
 0x33f   :  { %1725 = vmatprep.subr.bf16.mxu1 %v5680_v6 }
 0x342   :  { %1726 = vmatpush1.bf16.msra.mxu1 %v5681_v49 }
 0x343   :  { %1727 = vmatprep.subr.bf16.mxu1 %v5682_v45 }
 0x346   :  { %1728 = vmatpush1.bf16.msra.mxu1 %v5683_v21 }
 0x347   :  { %1729 = vmatprep.subr.bf16.mxu1 %v5684_v36  ;;  %v5715_v36 = vld [vmem:[#allocation89_spill] sm:$0xff] }
 0x34a   :  { %1730 = vmatpush1.bf16.msra.mxu1 %v5685_v10  ;;  %v5714_v10 = vld [vmem:[#allocation63_spill] sm:$0xff] }
 0x34b   :  { %1731 = vmatprep.subr.bf16.mxu1 %v5686_v25 }
 0x34e   :  { %1732 = vmatpush1.bf16.msra.mxu1 %v5687_v48 }
 0x34f   :  { %1733 = vmatprep.subr.bf16.mxu1 %v5688_v3  ;;  %v5713_v3 = vld [vmem:[#allocation61_spill] sm:$0xff] }
 0x352   :  { %1734 = vmatpush1.bf16.msra.mxu1 %v5689_v46 }
 0x353   :  { %1735 = vmatprep.subr.bf16.mxu1 %v5690_v20 }
 0x356   :  { %1736 = vmatpush1.bf16.msra.mxu1 %v5691_v2 }
 0x357   :  { %1737 = vmatprep.subr.bf16.mxu1 %v5692_v16  ;;  %v5712_v16 = vld [vmem:[#allocation97_spill] sm:$0xff] }
 0x35a   :  { %1738 = vmatpush1.bf16.msra.mxu1 %v4548_v22 }
 0x35b   :  { %1739 = vmatprep.subr.bf16.mxu1 %v4551_v28 }
 0x35e   :  { %1740 = vmatpush1.bf16.msra.mxu1 %v4554_v61  ;;  %v5711_v61 = vld [vmem:[#allocation96_spill] sm:$0xff] }
 0x35f   :  { %1741 = vmatprep.subr.bf16.mxu1 %v4557_v4 }
 0x362   :  { %1742 = vmatpush1.bf16.msra.mxu1 %v4560_v18  ;;  %v4578_v18 = vld [vmem:[#allocation8 + $0x248] ss:$24 sps:$4 sm:$0xff]  }
 0x363   :  { %1743 = vmatprep.subr.bf16.mxu1 %v4563_v53  ;;  %5703 = vst [vmem:[#allocation41_spill] sm:$0xff] %v4578_v18  ;;  %v4581_v53 = vld [vmem:[#allocation8 + $0x27c] ss:$24 sps:$4 sm:$0xff]  }
 0x364   :  { %5704 = vst [vmem:[#allocation57_spill] sm:$0xff] %v4581_v53 }
 0x366   :  { %1744 = vmatpush1.bf16.msra.mxu1 %v4566_v57  ;;  %v4584_v57 = vld [vmem:[#allocation8 + $0x278] ss:$24 sps:$4 sm:$0xff]  }
 0x367   :  { %1745 = vmatprep.subr.bf16.mxu1 %v4569_v59  ;;  %5705 = vst [vmem:[#allocation59_spill] sm:$0xff] %v4584_v57  ;;  %v4587_v59 = vld [vmem:[#allocation8 + $0x2ac] ss:$24 sps:$4 sm:$0xff]  }
 0x368   :  { %5706 = vst [vmem:[#allocation93_spill] sm:$0xff] %v4587_v59 }
 0x36a   :  { %1746 = vmatpush1.bf16.msra.mxu1 %v4572_v42  ;;  %v4590_v42 = vld [vmem:[#allocation8 + $0x2a8] ss:$24 sps:$4 sm:$0xff]  }
 0x36b   :  { %1747 = vmatprep.subr.bf16.mxu1 %v4575_v5  ;;  %5707 = vst [vmem:[#allocation71_spill] sm:$0xff] %v4590_v42  ;;  %v4593_v5 = vld [vmem:[#allocation8 + $0x2dc] ss:$24 sps:$4 sm:$0xff]  }
 0x36c   :  { %5708 = vst [vmem:[#allocation92_spill] sm:$0xff] %v4593_v5 }
 0x36e   :  { %1748 = vmatpush1.bf16.msra.mxu1 %v4578_v18  ;;  %v4596_v18 = vld [vmem:[#allocation8 + $0x2d8] ss:$24 sps:$4 sm:$0xff]  }
 0x36f   :  { %1749 = vmatprep.subr.bf16.mxu1 %v4581_v53  ;;  %5709 = vst [vmem:[#allocation94_spill] sm:$0xff] %v4596_v18  ;;  %v5710_v53 = vld [vmem:[#allocation26_spill] sm:$0xff] }
 0x372   :  { %1750 = vmatpush1.bf16.msra.mxu1 %v4584_v57 }
 0x373   :  { %1751 = vmatprep.subr.bf16.mxu1 %v4587_v59 }
 0x376   :  { %1752 = vmatpush1.bf16.msra.mxu1 %v4590_v42 }
 0x377   :  { %1753 = vmatprep.subr.bf16.mxu1 %v4593_v5 }
 0x37a   :  { %1754 = vmatpush1.bf16.msra.mxu1 %v4596_v18 }
 0x37b   :  { %1861 = vmatprep.subr.bf16.mxu1 %v5710_v53 }
 0x3d0   :  { %v1537_v4 = vpop.f32.mrb[36].mxu1  ;;  %v1578_v57 = vpop.f32.mrb[36].mxu0 }
 0x3d1   :  { %v1538_v28 = vadd.f32 %v1537_v4, %v5711_v61  ;;  %v1539_v22 = vpop.f32.mrb[37].mxu1  ;;  %v1580_v59 = vpop.f32.mrb[37].mxu0 }
 0x3d2   :  { %v1540_v2 = vadd.f32 %v1539_v22, %v5712_v16  ;;  %v1581_v42 = vadd.f32 %v1580_v59, %v4200_v30  ;;  %v1541_v20 = vpop.f32.mrb[38].mxu1  ;;  %v1582_v46 = vpop.f32.mrb[38].mxu0 }
 0x3d3   :  { %v1630_v5 = vadd.f32 %v1538_v28, %v5713_v3  ;;  %v1542_v48 = vpop.f32.mrb[39].mxu1  ;;  %v1583_v25 = vpop.f32.mrb[39].mxu0  ;;  %v1579_v20 = vadd.f32 %v1578_v57, %v4212_v58 }
 0x3d4   :  { %v1637_v18 = vadd.f32 %v1540_v2, %v5714_v10  ;;  %v1655_v53 = vadd.f32 %v1581_v42, %v5715_v36  ;;  %v5716_v48 = vld [vmem:[#allocation75_spill] sm:$0xff] }
 0x3d5   :  { %v2890_v21 = vmul.f32 -1.442695, %v1630_v5 }
 0x3d6   :  { %v2891_v45 = vmul.f32 -1.442695, %v1637_v18  ;;  %v2892_v10 = vmul.f32 -1.442695, %v1655_v53 }
 0x3d7   :  { %3158 = vpow2.f32 %v2890_v21 }
 0x3d8   :  { %3160 = vpow2.f32 %v2891_v45 }
 0x3e1   :  { %v3159_v4 = vpop.eup %3158 }
 0x3e2   :  { %v1634_v61 = vadd.f32 1.0, %v3159_v4  ;;  %v3161_v22 = vpop.eup %3160 }
 0x3e3   :  { %v1641_v16 = vadd.f32 1.0, %v3161_v22 }
 0x3e4   :  { %3162 = vrcp.f32 %v1634_v61 }
 0x3e5   :  { %3164 = vrcp.f32 %v1641_v16 }
 0x3ee   :  { %v3163_v46 = vpop.eup %3162 }
 0x3ef   :  { %v1644_v59 = vmul.f32 %v3163_v46, %v1579_v20  ;;  %v3165_v42 = vpop.eup %3164  ;;  %v5718_v20 = vld [vmem:[#allocation88_spill] sm:$0xff] }
 0x3f0   :  { %v1647_v5 = vsub.f32 1.0, %v3165_v42  ;;  %v1649_v45 = vmul.f32 %v3165_v42, %v4398_v14  ;;  %v4707_v14 = vld [vmem:[#allocation8 + $0x1c0] ss:$24 sps:$4 sm:$0xff]  }
 0x3f1   :  { %v1645_v25 = vadd.f32 %v1644_v59, %v5716_v48  ;;  %5723 = vst [vmem:[#allocation75_spill] sm:$0xff] %v4707_v14 }
 0x3f3   :  { %3166 = vtanh.f32 %v1645_v25 }
 0x3f4   :  { %3168 = vpow2.f32 %v2892_v10  ;;  %v5719_v10 = vld [vmem:[#allocation90_spill] sm:$0xff] }
 0x3fd   :  { %v3167_v21 = vpop.eup %3166 }
 0x3fe   :  { %v1648_v36 = vmul.f32 %v3167_v21, %v1647_v5  ;;  %v3169_v2 = vpop.eup %3168 }
 0x3ff   :  { %v1659_v61 = vadd.f32 1.0, %v3169_v2 }
 0x400   :  { %v4609_v3 = vadd.f32 %v1649_v45, %v1648_v36 }
 0x401   :  { %3170 = vrcp.f32 %v1659_v61 }
 0x402   :  { %5717 = vst [vmem:[#allocation54_spill] sm:$0xff] %v4609_v3  ;;  %v2599_v28 = vmul.f32 %v4220_v11, %v4609_v3 }
 0x404   :  { %2609 = vadd.xlane.f32.xlu1 %v2599_v28 }
 0x40b   :  { %v3171_v22 = vpop.eup %3170 }
 0x410   :  { %v1619_v16 = vpop.f32.mrb[40].mxu1 }
 0x411   :  { %v1620_v18 = vadd.f32 %v1619_v16, %v4228_v32  ;;  %v1621_v53 = vpop.f32.mrb[41].mxu1  ;;  %v4623_v16 = vld [vmem:[%s5269_s6] ss:$0 sm:$0xff] }
 0x412   :  { %v1622_v57 = vadd.f32 %v1621_v53, %v4232_v56  ;;  %v1623_v4 = vpop.f32.mrb[42].mxu1 }
 0x413   :  { %v1662_v46 = vadd.f32 %v1620_v18, %v5718_v20  ;;  %v1624_v59 = vpop.f32.mrb[43].mxu1  ;;  %v4635_v4 = vld [vmem:[#allocation8 + $0x10] ss:$24 sps:$4 sm:$0xff]   ;;  %v4643_v20 = vld [vmem:[#allocation8 + $0x40] ss:$24 sps:$4 sm:$0xff]  }
 0x414   :  { %v1669_v48 = vmul.f32 %v3171_v22, %v1622_v57  ;;  %v4631_v57 = vpack.c.bf16 %v4609_v3, %v4609_v3  ;;  %v4638_v22 = vld [vmem:[#allocation8 + $0x44] ss:$24 sps:$4 sm:$0xff]   ;;  %v4651_v59 = vld [vmem:[#allocation8 + $0x70] ss:$24 sps:$4 sm:$0xff]  }
 0x415   :  { %v2893_v25 = vmul.f32 -1.442695, %v1662_v46  ;;  %v4646_v46 = vld [vmem:[#allocation8 + $0x74] ss:$24 sps:$4 sm:$0xff]  }
 0x416   :  { %v1670_v42 = vadd.f32 %v1669_v48, %v5719_v10  ;;  %v4654_v48 = vld [vmem:[#allocation8 + $0xa4] ss:$24 sps:$4 sm:$0xff]   ;;  %v4662_v10 = vld [vmem:[#allocation8 + $0xd4] ss:$24 sps:$4 sm:$0xff]  }
 0x417   :  { %3172 = vpow2.f32 %v2893_v25  ;;  %v4659_v25 = vld [vmem:[#allocation8 + $0xa0] ss:$24 sps:$4 sm:$0xff]  }
 0x421   :  { %v3173_v11 = vpop.eup %3172 }
 0x422   :  { %v1666_v5 = vadd.f32 1.0, %v3173_v11  ;;  %v4670_v11 = vld [vmem:[#allocation8 + $0x104] ss:$24 sps:$4 sm:$0xff]  }
 0x424   :  { %3174 = vrcp.f32 %v1666_v5  ;;  %v4675_v5 = vld [vmem:[#allocation8 + $0x100] ss:$24 sps:$4 sm:$0xff]  }
 0x425   :  { %3176 = vtanh.f32 %v1670_v42  ;;  %v4667_v42 = vld [vmem:[#allocation8 + $0xd0] ss:$24 sps:$4 sm:$0xff]  }
 0x42e   :  { %v3175_v21 = vpop.eup %3174 }
 0x42f   :  { %v1672_v36 = vsub.f32 1.0, %v3175_v21  ;;  %v3177_v45 = vpop.eup %3176  ;;  %v1674_v28 = vmul.f32 %v3175_v21, %v4407_v9  ;;  %v4678_v21 = vld [vmem:[#allocation8 + $0x134] ss:$24 sps:$4 sm:$0xff]  }
 0x430   :  { %v4710_v9 = vld [vmem:[#allocation8 + $0x1f4] ss:$24 sps:$4 sm:$0xff]  }
 0x431   :  { %v1673_v2 = vmul.f32 %v3177_v45, %v1672_v36  ;;  %v4683_v36 = vld [vmem:[#allocation8 + $0x130] ss:$24 sps:$4 sm:$0xff]   ;;  %v4686_v45 = vld [vmem:[#allocation8 + $0x164] ss:$24 sps:$4 sm:$0xff]   ;;  %5724 = vst [vmem:[#allocation88_spill] sm:$0xff] %v4710_v9 }
 0x433   :  { %v4618_v61 = vadd.f32 %v1674_v28, %v1673_v2  ;;  %v4691_v2 = vld [vmem:[#allocation8 + $0x160] ss:$24 sps:$4 sm:$0xff]   ;;  %v4694_v28 = vld [vmem:[#allocation8 + $0x194] ss:$24 sps:$4 sm:$0xff]  }
 0x435   :  { %5720 = vst [vmem:[#allocation61_spill] sm:$0xff] %v4618_v61  ;;  %v1681_v18 = vpack.c.bf16 %v4618_v61, %v4618_v61  ;;  %v2632_v53 = vmul.f32 %v4623_v16, %v4618_v61 }
 0x437   :  { %1714 = vmatprep.mubr.bf16.mxu0 %v1681_v18  ;;  %1755 = vmatprep.mubr.bf16.mxu1 %v1681_v18 }
 0x438   :  { %2645 = vadd.xlane.f32.xlu1 %v2632_v53  ;;  %1715 = vmatmul.mubr.bf16.vlgmr.msra.gmra.mrb[40].mxu0 %v4631_v57  ;;  %v4702_v53 = vld [vmem:[#allocation8 + $0x1c4] ss:$24 sps:$4 sm:$0xff]  }
 0x439   :  { %1756 = vmatmul.mubr.bf16.vlgmr.msra.gmra.mrb[44].mxu1 %v4631_v57  ;;  %1765 = vmatpush1.bf16.msra.mxu0 %v4635_v4  ;;  %5722 = vst [vmem:[#allocation89_spill] sm:$0xff] %v4702_v53 }
 0x43a   :  { %1796 = vmatprep.mubr.bf16.mxu0 %v1681_v18  ;;  %1766 = vmatprep.subr.bf16.mxu0 %v4638_v22  ;;  %v4699_v18 = vld [vmem:[#allocation8 + $0x190] ss:$24 sps:$4 sm:$0xff]  }
 0x43b   :  { %1862 = vmatpush1.bf16.msra.mxu1 %v4250_v13  ;;  %5721 = vst [vmem:[#allocation63_spill] sm:$0xff] %v4699_v18 }
 0x43c   :  { %1863 = vmatprep.subr.bf16.mxu1 %v4253_v50 }
 0x43d   :  { %1767 = vmatpush1.bf16.msra.mxu0 %v4643_v20 }
 0x43e   :  { %1768 = vmatprep.subr.bf16.mxu0 %v4646_v46 }
 0x43f   :  { %1864 = vmatpush1.bf16.msra.mxu1 %v4258_v7 }
 0x440   :  { %1865 = vmatprep.subr.bf16.mxu1 %v4261_v34 }
 0x441   :  { %1769 = vmatpush1.bf16.msra.mxu0 %v4651_v59 }
 0x442   :  { %1770 = vmatprep.subr.bf16.mxu0 %v4654_v48 }
 0x443   :  { %1866 = vmatpush1.bf16.msra.mxu1 %v4266_v54 }
 0x444   :  { %1867 = vmatprep.subr.bf16.mxu1 %v4269_v38 }
 0x445   :  { %1771 = vmatpush1.bf16.msra.mxu0 %v4659_v25 }
 0x446   :  { %1772 = vmatprep.subr.bf16.mxu0 %v4662_v10 }
 0x447   :  { %1868 = vmatpush1.bf16.msra.mxu1 %v4431_v23 }
 0x448   :  { %1869 = vmatprep.subr.bf16.mxu1 %v4434_v0 }
 0x449   :  { %1773 = vmatpush1.bf16.msra.mxu0 %v4667_v42 }
 0x44a   :  { %1774 = vmatprep.subr.bf16.mxu0 %v4670_v11 }
 0x44b   :  { %1870 = vmatpush1.bf16.msra.mxu1 %v4439_v29 }
 0x44c   :  { %1871 = vmatprep.subr.bf16.mxu1 %v4442_v17 }
 0x44d   :  { %1775 = vmatpush1.bf16.msra.mxu0 %v4675_v5 }
 0x44e   :  { %1776 = vmatprep.subr.bf16.mxu0 %v4678_v21 }
 0x44f   :  { %1872 = vmatpush1.bf16.msra.mxu1 %v4447_v19 }
 0x450   :  { %1873 = vmatprep.subr.bf16.mxu1 %v4450_v27 }
 0x451   :  { %1777 = vmatpush1.bf16.msra.mxu0 %v4683_v36 }
 0x452   :  { %1778 = vmatprep.subr.bf16.mxu0 %v4686_v45 }
 0x453   :  { %1874 = vmatpush1.bf16.msra.mxu1 %v4455_v31 }
 0x454   :  { %1875 = vmatprep.subr.bf16.mxu1 %v4458_v33 }
 0x455   :  { %1779 = vmatpush1.bf16.msra.mxu0 %v4691_v2 }
 0x456   :  { %1780 = vmatprep.subr.bf16.mxu0 %v4694_v28 }
 0x457   :  { %1876 = vmatpush1.bf16.msra.mxu1 %v4463_v37 }
 0x458   :  { %1877 = vmatprep.subr.bf16.mxu1 %v4466_v52 }
 0x459   :  { %1781 = vmatpush1.bf16.msra.mxu0 %v4699_v18  ;;  %v4715_v18 = vld [vmem:[#allocation8 + $0x1f0] ss:$24 sps:$4 sm:$0xff]  }
 0x45a   :  { %1782 = vmatprep.subr.bf16.mxu0 %v4702_v53  ;;  %5725 = vst [vmem:[#allocation90_spill] sm:$0xff] %v4715_v18  ;;  %v4718_v53 = vld [vmem:[#allocation8 + $0x224] ss:$24 sps:$4 sm:$0xff]  }
 0x45b   :  { %1878 = vmatpush1.bf16.msra.mxu1 %v4471_v41  ;;  %5726 = vst [vmem:[#allocation100_spill] sm:$0xff] %v4718_v53 }
 0x45c   :  { %1879 = vmatprep.subr.bf16.mxu1 %v4474_v1 }
 0x45d   :  { %1783 = vmatpush1.bf16.msra.mxu0 %v4707_v14  ;;  %v4723_v14 = vld [vmem:[#allocation8 + $0x220] ss:$24 sps:$4 sm:$0xff]  }
 0x45e   :  { %1784 = vmatprep.subr.bf16.mxu0 %v4710_v9  ;;  %5727 = vst [vmem:[#allocation101_spill] sm:$0xff] %v4723_v14  ;;  %v4726_v9 = vld [vmem:[#allocation8 + $0x254] ss:$24 sps:$4 sm:$0xff]  }
 0x45f   :  { %1880 = vmatpush1.bf16.msra.mxu1 %v4479_v35  ;;  %5728 = vst [vmem:[#allocation102_spill] sm:$0xff] %v4726_v9 }
 0x460   :  { %1881 = vmatprep.subr.bf16.mxu1 %v4482_v44 }
 0x461   :  { %1785 = vmatpush1.bf16.msra.mxu0 %v4715_v18  ;;  %v4731_v18 = vld [vmem:[#allocation8 + $0x250] ss:$24 sps:$4 sm:$0xff]  }
 0x462   :  { %1786 = vmatprep.subr.bf16.mxu0 %v4718_v53  ;;  %5729 = vst [vmem:[#allocation103_spill] sm:$0xff] %v4731_v18  ;;  %v4734_v53 = vld [vmem:[#allocation8 + $0x284] ss:$24 sps:$4 sm:$0xff]  }
 0x463   :  { %1882 = vmatpush1.bf16.msra.mxu1 %v4487_v39  ;;  %5730 = vst [vmem:[#allocation104_spill] sm:$0xff] %v4734_v53 }
 0x464   :  { %1883 = vmatprep.subr.bf16.mxu1 %v4490_v60 }
 0x465   :  { %1787 = vmatpush1.bf16.msra.mxu0 %v4723_v14  ;;  %v4739_v14 = vld [vmem:[#allocation8 + $0x280] ss:$24 sps:$4 sm:$0xff]  }
 0x466   :  { %1788 = vmatprep.subr.bf16.mxu0 %v4726_v9  ;;  %5731 = vst [vmem:[#allocation105_spill] sm:$0xff] %v4739_v14  ;;  %v4742_v9 = vld [vmem:[#allocation8 + $0x2b4] ss:$24 sps:$4 sm:$0xff]  }
 0x467   :  { %1884 = vmatpush1.bf16.msra.mxu1 %v4495_v43  ;;  %5732 = vst [vmem:[#allocation106_spill] sm:$0xff] %v4742_v9 }
 0x468   :  { %1885 = vmatprep.subr.bf16.mxu1 %v4498_v62 }
 0x469   :  { %1789 = vmatpush1.bf16.msra.mxu0 %v4731_v18  ;;  %v4747_v18 = vld [vmem:[#allocation8 + $0x2b0] ss:$24 sps:$4 sm:$0xff]  }
 0x46a   :  { %1790 = vmatprep.subr.bf16.mxu0 %v4734_v53  ;;  %5733 = vst [vmem:[#allocation107_spill] sm:$0xff] %v4747_v18  ;;  %v4750_v53 = vld [vmem:[#allocation8 + $0x2e4] ss:$24 sps:$4 sm:$0xff]  }
 0x46b   :  { %1886 = vmatpush1.bf16.msra.mxu1 %v4503_v47  ;;  %5734 = vst [vmem:[#allocation108_spill] sm:$0xff] %v4750_v53 }
 0x46c   :  { %1887 = vmatprep.subr.bf16.mxu1 %v4506_v24 }
 0x46d   :  { %1791 = vmatpush1.bf16.msra.mxu0 %v4739_v14  ;;  %v4755_v14 = vld [vmem:[#allocation8 + $0x2e0] ss:$24 sps:$4 sm:$0xff]  }
 0x46e   :  { %1792 = vmatprep.subr.bf16.mxu0 %v4742_v9  ;;  %5735 = vst [vmem:[#allocation109_spill] sm:$0xff] %v4755_v14 }
 0x46f   :  { %1888 = vmatpush1.bf16.msra.mxu1 %v4511_v51 }
 0x470   :  { %1889 = vmatprep.subr.bf16.mxu1 %v4514_v26 }
 0x471   :  { %1793 = vmatpush1.bf16.msra.mxu0 %v4747_v18 }
 0x472   :  { %1794 = vmatprep.subr.bf16.mxu0 %v4750_v53  ;;  %v5738_v53 = vld [vmem:[#allocation46_spill] sm:$0xff] }
 0x473   :  { %1890 = vmatpush1.bf16.msra.mxu1 %v4519_v55  ;;  %v5736_v55 = vld [vmem:[#allocation45_spill] sm:$0xff] }
 0x474   :  { %1891 = vmatprep.subr.bf16.mxu1 %v4522_v40  ;;  %v5737_v40 = vld [vmem:[#allocation15_spill] sm:$0xff] }
 0x475   :  { %1795 = vmatpush1.bf16.msra.mxu0 %v4755_v14  ;;  %v5739_v14 = vld [vmem:[#allocation16_spill] sm:$0xff] }
 0x476   :  { %1902 = vmatprep.subr.bf16.mxu0 %v5676_v8  ;;  %v5740_v8 = vld [vmem:[#allocation47_spill] sm:$0xff] }
 0x477   :  { %1892 = vmatpush1.bf16.msra.mxu1 %v4527_v15  ;;  %v5741_v15 = vld [vmem:[#allocation17_spill] sm:$0xff] }
 0x478   :  { %1797 = vmatmul.mubr.bf16.vlgmr.msra.gmra.mrb[44].mxu0 %v4631_v57  ;;  %1943 = vmatprep.subr.bf16.mxu1 %v4530_v12  ;;  %v5742_v57 = vld [vmem:[#allocation48_spill] sm:$0xff] }
 0x479   :  { %1903 = vmatpush1.bf16.msra.mxu0 %v5679_v63  ;;  %v5743_v12 = vld [vmem:[#allocation20_spill] sm:$0xff]  ;;  %v5744_v63 = vld [vmem:[#allocation49_spill] sm:$0xff] }
 0x47a   :  { %1904 = vmatprep.subr.bf16.mxu0 %v5680_v6  ;;  %v5745_v6 = vld [vmem:[#allocation23_spill] sm:$0xff] }
 0x47d   :  { %1905 = vmatpush1.bf16.msra.mxu0 %v5681_v49  ;;  %v5746_v49 = vld [vmem:[#allocation50_spill] sm:$0xff] }
 0x47e   :  { %1906 = vmatprep.subr.bf16.mxu0 %v5736_v55  ;;  %v5747_v55 = vld [vmem:[#allocation27_spill] sm:$0xff] }
 0x481   :  { %1907 = vmatpush1.bf16.msra.mxu0 %v5737_v40  ;;  %v5748_v40 = vld [vmem:[#allocation28_spill] sm:$0xff] }
 0x482   :  { %1908 = vmatprep.subr.bf16.mxu0 %v5738_v53  ;;  %v5749_v53 = vld [vmem:[#allocation30_spill] sm:$0xff] }
 0x485   :  { %1909 = vmatpush1.bf16.msra.mxu0 %v5739_v14  ;;  %v5750_v14 = vld [vmem:[#allocation31_spill] sm:$0xff] }
 0x486   :  { %1910 = vmatprep.subr.bf16.mxu0 %v5740_v8  ;;  %v5751_v8 = vld [vmem:[#allocation32_spill] sm:$0xff] }
 0x489   :  { %1911 = vmatpush1.bf16.msra.mxu0 %v5741_v15  ;;  %v5752_v15 = vld [vmem:[#allocation33_spill] sm:$0xff] }
 0x48a   :  { %1912 = vmatprep.subr.bf16.mxu0 %v5742_v57  ;;  %v5753_v57 = vld [vmem:[#allocation34_spill] sm:$0xff] }
 0x48d   :  { %1913 = vmatpush1.bf16.msra.mxu0 %v5743_v12  ;;  %v5754_v12 = vld [vmem:[#allocation35_spill] sm:$0xff] }
 0x48e   :  { %1914 = vmatprep.subr.bf16.mxu0 %v5744_v63  ;;  %v5755_v63 = vld [vmem:[#allocation37_spill] sm:$0xff] }
 0x491   :  { %1915 = vmatpush1.bf16.msra.mxu0 %v5745_v6  ;;  %v5756_v6 = vld [vmem:[#allocation39_spill] sm:$0xff] }
 0x492   :  { %1916 = vmatprep.subr.bf16.mxu0 %v5746_v49  ;;  %v5757_v49 = vld [vmem:[#allocation41_spill] sm:$0xff] }
 0x495   :  { %1917 = vmatpush1.bf16.msra.mxu0 %v5747_v55  ;;  %v5758_v55 = vld [vmem:[#allocation57_spill] sm:$0xff] }
 0x496   :  { %1918 = vmatprep.subr.bf16.mxu0 %v5748_v40  ;;  %v5759_v40 = vld [vmem:[#allocation59_spill] sm:$0xff] }
 0x499   :  { %1919 = vmatpush1.bf16.msra.mxu0 %v5749_v53  ;;  %v5760_v53 = vld [vmem:[#allocation93_spill] sm:$0xff] }
 0x49a   :  { %1920 = vmatprep.subr.bf16.mxu0 %v5750_v14  ;;  %v5761_v14 = vld [vmem:[#allocation71_spill] sm:$0xff] }
 0x49d   :  { %1921 = vmatpush1.bf16.msra.mxu0 %v5751_v8  ;;  %v5762_v8 = vld [vmem:[#allocation92_spill] sm:$0xff] }
 0x49e   :  { %1922 = vmatprep.subr.bf16.mxu0 %v5752_v15  ;;  %v5763_v15 = vld [vmem:[#allocation94_spill] sm:$0xff] }
 0x4a1   :  { %1923 = vmatpush1.bf16.msra.mxu0 %v5753_v57  ;;  %v5764_v57 = vld [vmem:[#allocation26_spill] sm:$0xff] }
 0x4a2   :  { %1924 = vmatprep.subr.bf16.mxu0 %v5754_v12 }
 0x4a5   :  { %1925 = vmatpush1.bf16.msra.mxu0 %v5755_v63  ;;  %v5765_v63 = vld [vmem:[#allocation96_spill] sm:$0xff] }
 0x4a6   :  { %1926 = vmatprep.subr.bf16.mxu0 %v5756_v6 }
 0x4a9   :  { %1927 = vmatpush1.bf16.msra.mxu0 %v5757_v49  ;;  %v5766_v49 = vld [vmem:[#allocation97_spill] sm:$0xff] }
 0x4aa   :  { %1928 = vmatprep.subr.bf16.mxu0 %v5758_v55 }
 0x4ad   :  { %1929 = vmatpush1.bf16.msra.mxu0 %v5759_v40  ;;  %v5767_v40 = vld [vmem:[#allocation65_spill] sm:$0xff] }
 0x4ae   :  { %1930 = vmatprep.subr.bf16.mxu0 %v5760_v53 }
 0x4b1   :  { %1931 = vmatpush1.bf16.msra.mxu0 %v5761_v14 }
 0x4b2   :  { %1932 = vmatprep.subr.bf16.mxu0 %v5762_v8  ;;  %v5768_v8 = vld [vmem:[#allocation67_spill] sm:$0xff] }
 0x4b5   :  { %1933 = vmatpush1.bf16.msra.mxu0 %v5763_v15 }
 0x4b6   :  { %2040 = vmatprep.subr.bf16.mxu0 %v5764_v57  ;;  %v5769_v57 = vld [vmem:[#allocation85_spill] sm:$0xff] }
 0x50b   :  { %v1716_v12 = vpop.f32.mrb[40].mxu0 }
 0x50c   :  { %v1717_v18 = vadd.f32 %v1716_v12, %v5765_v63  ;;  %v1757_v6 = vpop.f32.mrb[44].mxu1  ;;  %v1718_v26 = vpop.f32.mrb[41].mxu0 }
 0x50d   :  { %v1719_v51 = vadd.f32 %v1718_v26, %v5766_v49  ;;  %v1759_v55 = vpop.f32.mrb[45].mxu1  ;;  %v1720_v9 = vpop.f32.mrb[42].mxu0 }
 0x50e   :  { %v1809_v24 = vadd.f32 %v1717_v18, %v5767_v40  ;;  %v1760_v53 = vadd.f32 %v1759_v55, %v4200_v30  ;;  %v1761_v14 = vpop.f32.mrb[46].mxu1  ;;  %v1721_v47 = vpop.f32.mrb[43].mxu0  ;;  %v1758_v40 = vadd.f32 %v1757_v6, %v4212_v58  ;;  %v4808_v6 = vld [vmem:[%s5268_s5] ss:$0 sm:$0xff] }
 0x50f   :  { %v1816_v62 = vadd.f32 %v1719_v51, %v5768_v8  ;;  %v1762_v15 = vpop.f32.mrb[47].mxu1  ;;  %v5770_v14 = vld [vmem:[#allocation79_spill] sm:$0xff] }
 0x510   :  { %v2894_v43 = vmul.f32 -1.442695, %v1809_v24  ;;  %v1834_v60 = vadd.f32 %v1760_v53, %v5769_v57 }
 0x511   :  { %v2895_v12 = vmul.f32 -1.442695, %v1816_v62 }
 0x512   :  { %3178 = vpow2.f32 %v2894_v43  ;;  %v2896_v51 = vmul.f32 -1.442695, %v1834_v60 }
 0x513   :  { %3180 = vpow2.f32 %v2895_v12 }
 0x51c   :  { %v3179_v63 = vpop.eup %3178 }
 0x51d   :  { %v1813_v39 = vadd.f32 1.0, %v3179_v63  ;;  %v3181_v26 = vpop.eup %3180 }
 0x51e   :  { %v1820_v9 = vadd.f32 1.0, %v3181_v26 }
 0x51f   :  { %3182 = vrcp.f32 %v1813_v39 }
 0x520   :  { %3184 = vrcp.f32 %v1820_v9 }
 0x529   :  { %v3183_v18 = vpop.eup %3182 }
 0x52a   :  { %v1823_v55 = vmul.f32 %v3183_v18, %v1758_v40  ;;  %v3185_v24 = vpop.eup %3184 }
 0x52b   :  { %v1826_v8 = vsub.f32 1.0, %v3185_v24  ;;  %v1828_v15 = vmul.f32 %v3185_v24, %v4609_v3  ;;  %v5798_v3 = vld [vmem:[#allocation22_spill] sm:$0xff] }
 0x52c   :  { %v1824_v47 = vadd.f32 %v1823_v55, %v5770_v14  ;;  %v5772_v55 = vld [vmem:[#allocation84_spill] sm:$0xff] }
 0x52e   :  { %3186 = vtanh.f32 %v1824_v47 }
 0x52f   :  { %3188 = vpow2.f32 %v2896_v51 }
 0x538   :  { %v3187_v43 = vpop.eup %3186 }
 0x539   :  { %v1827_v62 = vmul.f32 %v3187_v43, %v1826_v8  ;;  %v3189_v39 = vpop.eup %3188  ;;  %v5773_v8 = vld [vmem:[#allocation86_spill] sm:$0xff] }
 0x53a   :  { %v1838_v60 = vadd.f32 1.0, %v3189_v39 }
 0x53b   :  { %v4803_v63 = vadd.f32 %v1828_v15, %v1827_v62 }
 0x53c   :  { %3190 = vrcp.f32 %v1838_v60 }
 0x53d   :  { %5771 = vst [vmem:[#allocation97_spill] sm:$0xff] %v4803_v63  ;;  %v2600_v53 = vmul.f32 %v4808_v6, %v4803_v63 }
 0x53f   :  { %2611 = vadd.xlane.f32.xlu1 %v2600_v53 }
 0x546   :  { %v3191_v18 = vpop.eup %3190 }
 0x54b   :  { %v1798_v57 = vpop.f32.mrb[44].mxu0 }
 0x54c   :  { %v1799_v12 = vadd.f32 %v1798_v57, %v4228_v32  ;;  %v1800_v26 = vpop.f32.mrb[45].mxu0 }
 0x54d   :  { %v1801_v9 = vadd.f32 %v1800_v26, %v4232_v56  ;;  %v1802_v40 = vpop.f32.mrb[46].mxu0 }
 0x54e   :  { %v1841_v14 = vadd.f32 %v1799_v12, %v5772_v55  ;;  %v1803_v47 = vpop.f32.mrb[47].mxu0  ;;  %v5781_v55 = vld [vmem:[#allocation52_spill] sm:$0xff] }
 0x54f   :  { %v1848_v51 = vmul.f32 %v3191_v18, %v1801_v9  ;;  %v4825_v18 = vpack.c.bf16 %v4803_v63, %v4803_v63  ;;  %v5783_v47 = vld [vmem:[#allocation101_spill] sm:$0xff] }
 0x550   :  { %v2897_v24 = vmul.f32 -1.442695, %v1841_v14  ;;  %v5782_v14 = vld [vmem:[#allocation53_spill] sm:$0xff] }
 0x551   :  { %v1849_v43 = vadd.f32 %v1848_v51, %v5773_v8  ;;  %v5784_v51 = vld [vmem:[#allocation102_spill] sm:$0xff] }
 0x552   :  { %3192 = vpow2.f32 %v2897_v24  ;;  %v5785_v24 = vld [vmem:[#allocation36_spill] sm:$0xff]  ;;  %v5786_v8 = vld [vmem:[#allocation38_spill] sm:$0xff] }
 0x55c   :  { %v3193_v62 = vpop.eup %3192 }
 0x55d   :  { %v1845_v15 = vadd.f32 1.0, %v3193_v62  ;;  %v5788_v62 = vld [vmem:[#allocation104_spill] sm:$0xff] }
 0x55f   :  { %3194 = vrcp.f32 %v1845_v15  ;;  %v5789_v15 = vld [vmem:[#allocation40_spill] sm:$0xff] }
 0x560   :  { %3196 = vtanh.f32 %v1849_v43  ;;  %v5787_v43 = vld [vmem:[#allocation103_spill] sm:$0xff] }
 0x569   :  { %v3195_v39 = vpop.eup %3194 }
 0x56a   :  { %v1851_v53 = vsub.f32 1.0, %v3195_v39  ;;  %v3197_v60 = vpop.eup %3196  ;;  %v1853_v26 = vmul.f32 %v3195_v39, %v4618_v61  ;;  %v5790_v39 = vld [vmem:[#allocation42_spill] sm:$0xff]  ;;  %v5797_v61 = vld [vmem:[#allocation21_spill] sm:$0xff] }
 0x56c   :  { %v1852_v57 = vmul.f32 %v3197_v60, %v1851_v53  ;;  %v5791_v53 = vld [vmem:[#allocation105_spill] sm:$0xff]  ;;  %v5792_v60 = vld [vmem:[#allocation106_spill] sm:$0xff] }
 0x56e   :  { %v4817_v40 = vadd.f32 %v1853_v26, %v1852_v57  ;;  %v5793_v57 = vld [vmem:[#allocation18_spill] sm:$0xff]  ;;  %v5794_v26 = vld [vmem:[#allocation19_spill] sm:$0xff] }
 0x570   :  { %5774 = vst [vmem:[#allocation65_spill] sm:$0xff] %v4817_v40  ;;  %v2631_v12 = vmul.f32 %v4623_v16, %v4817_v40  ;;  %v1860_v9 = vpack.c.bf16 %v4817_v40, %v4817_v40 }
 0x572   :  { %2643 = vadd.xlane.f32.xlu0 %v2631_v12  ;;  %1893 = vmatprep.mubr.bf16.mxu1 %v1860_v9  ;;  %v5795_v12 = vld [vmem:[#allocation107_spill] sm:$0xff] }
 0x573   :  { %1934 = vmatprep.mubr.bf16.mxu0 %v1860_v9  ;;  %1894 = vmatmul.mubr.bf16.vlgmr.msra.gmra.mrb[48].mxu1 %v4825_v18 }
 0x574   :  { %1935 = vmatmul.mubr.bf16.vlgmr.msra.gmra.mrb[48].mxu0 %v4825_v18  ;;  %1944 = vmatpush1.bf16.msra.mxu1 %v4635_v4 }
 0x575   :  { %1975 = vmatprep.mubr.bf16.mxu1 %v1860_v9  ;;  %1945 = vmatprep.subr.bf16.mxu1 %v4638_v22  ;;  %v5796_v9 = vld [vmem:[#allocation108_spill] sm:$0xff] }
 0x576   :  { %2041 = vmatpush1.bf16.msra.mxu0 %v4250_v13  ;;  %v5775_v13 = vld [vmem:[#allocation63_spill] sm:$0xff] }
 0x577   :  { %2042 = vmatprep.subr.bf16.mxu0 %v4253_v50  ;;  %v5776_v50 = vld [vmem:[#allocation89_spill] sm:$0xff] }
 0x578   :  { %1946 = vmatpush1.bf16.msra.mxu1 %v4643_v20 }
 0x579   :  { %1947 = vmatprep.subr.bf16.mxu1 %v4646_v46 }
 0x57a   :  { %2043 = vmatpush1.bf16.msra.mxu0 %v4258_v7  ;;  %v5777_v7 = vld [vmem:[#allocation75_spill] sm:$0xff] }
 0x57b   :  { %2044 = vmatprep.subr.bf16.mxu0 %v4261_v34  ;;  %v5778_v34 = vld [vmem:[#allocation88_spill] sm:$0xff] }
 0x57c   :  { %1948 = vmatpush1.bf16.msra.mxu1 %v4651_v59 }
 0x57d   :  { %1949 = vmatprep.subr.bf16.mxu1 %v4654_v48 }
 0x57e   :  { %2045 = vmatpush1.bf16.msra.mxu0 %v4266_v54  ;;  %v5779_v54 = vld [vmem:[#allocation90_spill] sm:$0xff] }
 0x57f   :  { %2046 = vmatprep.subr.bf16.mxu0 %v4269_v38  ;;  %v5780_v38 = vld [vmem:[#allocation100_spill] sm:$0xff] }
 0x580   :  { %1950 = vmatpush1.bf16.msra.mxu1 %v4659_v25 }
 0x581   :  { %1951 = vmatprep.subr.bf16.mxu1 %v4662_v10 }
 0x582   :  { %2047 = vmatpush1.bf16.msra.mxu0 %v4431_v23 }
 0x583   :  { %2048 = vmatprep.subr.bf16.mxu0 %v4434_v0 }
 0x584   :  { %1952 = vmatpush1.bf16.msra.mxu1 %v4667_v42 }
 0x585   :  { %1953 = vmatprep.subr.bf16.mxu1 %v4670_v11 }
 0x586   :  { %2049 = vmatpush1.bf16.msra.mxu0 %v4439_v29 }
 0x587   :  { %2050 = vmatprep.subr.bf16.mxu0 %v4442_v17 }
 0x588   :  { %1954 = vmatpush1.bf16.msra.mxu1 %v4675_v5 }
 0x589   :  { %1955 = vmatprep.subr.bf16.mxu1 %v4678_v21 }
 0x58a   :  { %2051 = vmatpush1.bf16.msra.mxu0 %v4447_v19 }
 0x58b   :  { %2052 = vmatprep.subr.bf16.mxu0 %v4450_v27 }
 0x58c   :  { %1956 = vmatpush1.bf16.msra.mxu1 %v4683_v36 }
 0x58d   :  { %1957 = vmatprep.subr.bf16.mxu1 %v4686_v45 }
 0x58e   :  { %2053 = vmatpush1.bf16.msra.mxu0 %v4455_v31 }
 0x58f   :  { %2054 = vmatprep.subr.bf16.mxu0 %v4458_v33 }
 0x590   :  { %1958 = vmatpush1.bf16.msra.mxu1 %v4691_v2 }
 0x591   :  { %1959 = vmatprep.subr.bf16.mxu1 %v4694_v28 }
 0x592   :  { %2055 = vmatpush1.bf16.msra.mxu0 %v4463_v37 }
 0x593   :  { %2056 = vmatprep.subr.bf16.mxu0 %v4466_v52 }
 0x594   :  { %1960 = vmatpush1.bf16.msra.mxu1 %v5775_v13 }
 0x595   :  { %1961 = vmatprep.subr.bf16.mxu1 %v5776_v50 }
 0x596   :  { %2057 = vmatpush1.bf16.msra.mxu0 %v4471_v41 }
 0x597   :  { %2058 = vmatprep.subr.bf16.mxu0 %v4474_v1 }
 0x598   :  { %1962 = vmatpush1.bf16.msra.mxu1 %v5777_v7 }
 0x599   :  { %1963 = vmatprep.subr.bf16.mxu1 %v5778_v34 }
 0x59a   :  { %2059 = vmatpush1.bf16.msra.mxu0 %v4479_v35 }
 0x59b   :  { %2060 = vmatprep.subr.bf16.mxu0 %v4482_v44 }
 0x59c   :  { %1964 = vmatpush1.bf16.msra.mxu1 %v5779_v54 }
 0x59d   :  { %1965 = vmatprep.subr.bf16.mxu1 %v5780_v38 }
 0x59e   :  { %2061 = vmatpush1.bf16.msra.mxu0 %v5781_v55 }
 0x59f   :  { %2062 = vmatprep.subr.bf16.mxu0 %v5782_v14 }
 0x5a0   :  { %1966 = vmatpush1.bf16.msra.mxu1 %v5783_v47 }
 0x5a1   :  { %1967 = vmatprep.subr.bf16.mxu1 %v5784_v51 }
 0x5a2   :  { %2063 = vmatpush1.bf16.msra.mxu0 %v5785_v24 }
 0x5a3   :  { %2064 = vmatprep.subr.bf16.mxu0 %v5786_v8 }
 0x5a4   :  { %1968 = vmatpush1.bf16.msra.mxu1 %v5787_v43 }
 0x5a5   :  { %1969 = vmatprep.subr.bf16.mxu1 %v5788_v62  ;;  %v5799_v62 = vld [vmem:[#allocation109_spill] sm:$0xff] }
 0x5a6   :  { %2065 = vmatpush1.bf16.msra.mxu0 %v5789_v15  ;;  %v5800_v15 = vld [vmem:[#allocation43_spill] sm:$0xff] }
 0x5a7   :  { %2066 = vmatprep.subr.bf16.mxu0 %v5790_v39  ;;  %v5801_v39 = vld [vmem:[#allocation24_spill] sm:$0xff] }
 0x5a8   :  { %1970 = vmatpush1.bf16.msra.mxu1 %v5791_v53 }
 0x5a9   :  { %1971 = vmatprep.subr.bf16.mxu1 %v5792_v60  ;;  %v5802_v60 = vld [vmem:[#allocation25_spill] sm:$0xff] }
 0x5aa   :  { %2067 = vmatpush1.bf16.msra.mxu0 %v5793_v57  ;;  %v5803_v57 = vld [vmem:[#allocation13_spill] sm:$0xff] }
 0x5ab   :  { %2068 = vmatprep.subr.bf16.mxu0 %v5794_v26  ;;  %v5804_v26 = vld [vmem:[#allocation44_spill] sm:$0xff] }
 0x5ac   :  { %1972 = vmatpush1.bf16.msra.mxu1 %v5795_v12  ;;  %v5805_v12 = vld [vmem:[#allocation14_spill] sm:$0xff] }
 0x5ad   :  { %1973 = vmatprep.subr.bf16.mxu1 %v5796_v9  ;;  %v5806_v9 = vld [vmem:[#allocation45_spill] sm:$0xff] }
 0x5ae   :  { %2069 = vmatpush1.bf16.msra.mxu0 %v5797_v61  ;;  %v5807_v61 = vld [vmem:[#allocation15_spill] sm:$0xff] }
 0x5af   :  { %2070 = vmatprep.subr.bf16.mxu0 %v5798_v3  ;;  %v5808_v3 = vld [vmem:[#allocation46_spill] sm:$0xff] }
 0x5b0   :  { %1974 = vmatpush1.bf16.msra.mxu1 %v5799_v62  ;;  %v5809_v62 = vld [vmem:[#allocation16_spill] sm:$0xff] }
 0x5b1   :  { %2081 = vmatprep.subr.bf16.mxu1 %v5800_v15  ;;  %v5810_v15 = vld [vmem:[#allocation47_spill] sm:$0xff] }
 0x5b2   :  { %2071 = vmatpush1.bf16.msra.mxu0 %v5801_v39  ;;  %v5811_v39 = vld [vmem:[#allocation17_spill] sm:$0xff] }
 0x5b3   :  { %1976 = vmatmul.mubr.bf16.vlgmr.msra.gmra.mrb[52].mxu1 %v4825_v18  ;;  %2122 = vmatprep.subr.bf16.mxu0 %v5802_v60  ;;  %v5812_v18 = vld [vmem:[#allocation48_spill] sm:$0xff] }
 0x5b4   :  { %2082 = vmatpush1.bf16.msra.mxu1 %v5803_v57  ;;  %v5813_v60 = vld [vmem:[#allocation20_spill] sm:$0xff]  ;;  %v5814_v57 = vld [vmem:[#allocation49_spill] sm:$0xff] }
 0x5b5   :  { %2083 = vmatprep.subr.bf16.mxu1 %v5804_v26  ;;  %v5815_v26 = vld [vmem:[#allocation23_spill] sm:$0xff] }
 0x5b8   :  { %2084 = vmatpush1.bf16.msra.mxu1 %v5805_v12  ;;  %v5816_v12 = vld [vmem:[#allocation50_spill] sm:$0xff] }
 0x5b9   :  { %2085 = vmatprep.subr.bf16.mxu1 %v5806_v9  ;;  %v5817_v9 = vld [vmem:[#allocation27_spill] sm:$0xff] }
 0x5bc   :  { %2086 = vmatpush1.bf16.msra.mxu1 %v5807_v61  ;;  %v5818_v61 = vld [vmem:[#allocation28_spill] sm:$0xff] }
 0x5bd   :  { %2087 = vmatprep.subr.bf16.mxu1 %v5808_v3  ;;  %v5819_v3 = vld [vmem:[#allocation30_spill] sm:$0xff] }
 0x5c0   :  { %2088 = vmatpush1.bf16.msra.mxu1 %v5809_v62  ;;  %v5820_v62 = vld [vmem:[#allocation31_spill] sm:$0xff] }
 0x5c1   :  { %2089 = vmatprep.subr.bf16.mxu1 %v5810_v15  ;;  %v5821_v15 = vld [vmem:[#allocation32_spill] sm:$0xff] }
 0x5c4   :  { %2090 = vmatpush1.bf16.msra.mxu1 %v5811_v39  ;;  %v5822_v39 = vld [vmem:[#allocation33_spill] sm:$0xff] }
 0x5c5   :  { %2091 = vmatprep.subr.bf16.mxu1 %v5812_v18  ;;  %v5823_v18 = vld [vmem:[#allocation34_spill] sm:$0xff] }
 0x5c8   :  { %2092 = vmatpush1.bf16.msra.mxu1 %v5813_v60  ;;  %v5824_v60 = vld [vmem:[#allocation35_spill] sm:$0xff] }
 0x5c9   :  { %2093 = vmatprep.subr.bf16.mxu1 %v5814_v57  ;;  %v5825_v57 = vld [vmem:[#allocation37_spill] sm:$0xff] }
 0x5cc   :  { %2094 = vmatpush1.bf16.msra.mxu1 %v5815_v26  ;;  %v5826_v26 = vld [vmem:[#allocation39_spill] sm:$0xff] }
 0x5cd   :  { %2095 = vmatprep.subr.bf16.mxu1 %v5816_v12  ;;  %v5827_v12 = vld [vmem:[#allocation41_spill] sm:$0xff] }
 0x5d0   :  { %2096 = vmatpush1.bf16.msra.mxu1 %v5817_v9  ;;  %v5828_v9 = vld [vmem:[#allocation57_spill] sm:$0xff] }
 0x5d1   :  { %2097 = vmatprep.subr.bf16.mxu1 %v5818_v61  ;;  %v5829_v61 = vld [vmem:[#allocation59_spill] sm:$0xff] }
 0x5d4   :  { %2098 = vmatpush1.bf16.msra.mxu1 %v5819_v3  ;;  %v5830_v3 = vld [vmem:[#allocation93_spill] sm:$0xff] }
 0x5d5   :  { %2099 = vmatprep.subr.bf16.mxu1 %v5820_v62  ;;  %v5831_v62 = vld [vmem:[#allocation71_spill] sm:$0xff] }
 0x5d8   :  { %2100 = vmatpush1.bf16.msra.mxu1 %v5821_v15  ;;  %v5832_v15 = vld [vmem:[#allocation92_spill] sm:$0xff] }
 0x5d9   :  { %2101 = vmatprep.subr.bf16.mxu1 %v5822_v39  ;;  %v5833_v39 = vld [vmem:[#allocation94_spill] sm:$0xff] }
 0x5dc   :  { %2102 = vmatpush1.bf16.msra.mxu1 %v5823_v18  ;;  %v5834_v18 = vld [vmem:[#allocation26_spill] sm:$0xff] }
 0x5dd   :  { %2103 = vmatprep.subr.bf16.mxu1 %v5824_v60 }
 0x5e0   :  { %2104 = vmatpush1.bf16.msra.mxu1 %v5825_v57  ;;  %v5835_v57 = vld [vmem:[#allocation96_spill] sm:$0xff] }
 0x5e1   :  { %2105 = vmatprep.subr.bf16.mxu1 %v5826_v26 }
 0x5e4   :  { %2106 = vmatpush1.bf16.msra.mxu1 %v5827_v12 }
 0x5e5   :  { %2107 = vmatprep.subr.bf16.mxu1 %v5828_v9 }
 0x5e8   :  { %2108 = vmatpush1.bf16.msra.mxu1 %v5829_v61  ;;  %v5836_v61 = vld [vmem:[#allocation12_spill] sm:$0xff] }
 0x5e9   :  { %2109 = vmatprep.subr.bf16.mxu1 %v5830_v3 }
 0x5ec   :  { %2110 = vmatpush1.bf16.msra.mxu1 %v5831_v62 }
 0x5ed   :  { %2111 = vmatprep.subr.bf16.mxu1 %v5832_v15  ;;  %v5837_v15 = vld [vmem:[#allocation55_spill] sm:$0xff] }
 0x5f0   :  { %2112 = vmatpush1.bf16.msra.mxu1 %v5833_v39 }
 0x5f1   :  { %2219 = vmatprep.subr.bf16.mxu1 %v5834_v18  ;;  %v5838_v18 = vld [vmem:[#allocation81_spill] sm:$0xff] }
 0x646   :  { %v1895_v60 = vpop.f32.mrb[48].mxu1 }
 0x647   :  { %v1896_v53 = vadd.f32 %v1895_v60, %v5835_v57  ;;  %v1936_v26 = vpop.f32.mrb[48].mxu0  ;;  %v1897_v43 = vpop.f32.mrb[49].mxu1 }
 0x648   :  { %v1898_v12 = vadd.f32 %v1897_v43, %v5766_v49  ;;  %v1938_v9 = vpop.f32.mrb[49].mxu0  ;;  %v1899_v8 = vpop.f32.mrb[50].mxu1 }
 0x649   :  { %v1988_v24 = vadd.f32 %v1896_v53, %v5836_v61  ;;  %v1939_v3 = vadd.f32 %v1938_v9, %v4200_v30  ;;  %v1940_v62 = vpop.f32.mrb[50].mxu0  ;;  %v1900_v51 = vpop.f32.mrb[51].mxu1  ;;  %v1937_v53 = vadd.f32 %v1936_v26, %v4212_v58 }
 0x64a   :  { %v1995_v47 = vadd.f32 %v1898_v12, %v5837_v15  ;;  %v1941_v39 = vpop.f32.mrb[51].mxu0  ;;  %v5839_v51 = vld [vmem:[#allocation83_spill] sm:$0xff] }
 0x64b   :  { %v2898_v14 = vmul.f32 -1.442695, %v1988_v24  ;;  %v2013_v55 = vadd.f32 %v1939_v3, %v5838_v18 }
 0x64c   :  { %v2899_v60 = vmul.f32 -1.442695, %v1995_v47 }
 0x64d   :  { %3198 = vpow2.f32 %v2898_v14  ;;  %v2900_v15 = vmul.f32 -1.442695, %v2013_v55 }
 0x64e   :  { %3200 = vpow2.f32 %v2899_v60 }
 0x657   :  { %v3199_v57 = vpop.eup %3198 }
 0x658   :  { %v1992_v38 = vadd.f32 1.0, %v3199_v57  ;;  %v3201_v43 = vpop.eup %3200 }
 0x659   :  { %v1999_v8 = vadd.f32 1.0, %v3201_v43 }
 0x65a   :  { %3202 = vrcp.f32 %v1992_v38 }
 0x65b   :  { %3204 = vrcp.f32 %v1999_v8 }
 0x664   :  { %v3203_v61 = vpop.eup %3202 }
 0x665   :  { %v2002_v9 = vmul.f32 %v3203_v61, %v1937_v53  ;;  %v3205_v24 = vpop.eup %3204  ;;  %v5840_v61 = vld [vmem:[#allocation80_spill] sm:$0xff] }
 0x666   :  { %v2005_v3 = vsub.f32 1.0, %v3205_v24  ;;  %v2007_v39 = vmul.f32 %v3205_v24, %v4803_v63  ;;  %v5841_v24 = vld [vmem:[#allocation82_spill] sm:$0xff]  ;;  %v5880_v63 = vld [vmem:[#allocation28_spill] sm:$0xff] }
 0x667   :  { %v2003_v62 = vadd.f32 %v2002_v9, %v5839_v51 }
 0x669   :  { %3206 = vtanh.f32 %v2003_v62 }
 0x66a   :  { %3208 = vpow2.f32 %v2900_v15 }
 0x673   :  { %v3207_v14 = vpop.eup %3206 }
 0x674   :  { %v2006_v47 = vmul.f32 %v3207_v14, %v2005_v3  ;;  %v3209_v38 = vpop.eup %3208 }
 0x675   :  { %v2017_v12 = vadd.f32 1.0, %v3209_v38 }
 0x676   :  { %v4935_v57 = vadd.f32 %v2007_v39, %v2006_v47 }
 0x677   :  { %3210 = vrcp.f32 %v2017_v12 }
 0x678   :  { %v2601_v26 = vmul.f32 %v4808_v6, %v4935_v57 }
 0x67a   :  { %2613 = vadd.xlane.f32.xlu0 %v2601_v26 }
 0x681   :  { %v3211_v53 = vpop.eup %3210 }
 0x686   :  { %v1977_v18 = vpop.f32.mrb[52].mxu1 }
 0x687   :  { %v1978_v60 = vadd.f32 %v1977_v18, %v4228_v32  ;;  %v1979_v55 = vpop.f32.mrb[53].mxu1 }
 0x688   :  { %v1980_v43 = vadd.f32 %v1979_v55, %v4232_v56  ;;  %v1981_v8 = vpop.f32.mrb[54].mxu1 }
 0x689   :  { %v2020_v9 = vadd.f32 %v1978_v60, %v5840_v61  ;;  %v1982_v51 = vpop.f32.mrb[55].mxu1  ;;  %v4952_v8 = vpack.c.bf16 %v4935_v57, %v4935_v57  ;;  %v4961_v61 = vld [vmem:[#allocation8 + $0x34] ss:$24 sps:$4 sm:$0xff]  }
 0x68a   :  { %v2027_v62 = vmul.f32 %v3211_v53, %v1980_v43  ;;  %v4958_v53 = vld [vmem:[#allocation8] ss:$24 sps:$4 sm:$0xff]   ;;  %v4969_v51 = vld [vmem:[#allocation8 + $0x64] ss:$24 sps:$4 sm:$0xff]  }
 0x68b   :  { %v2901_v15 = vmul.f32 -1.442695, %v2020_v9  ;;  %v4966_v9 = vld [vmem:[#allocation8 + $0x30] ss:$24 sps:$4 sm:$0xff]  }
 0x68c   :  { %v2028_v3 = vadd.f32 %v2027_v62, %v5841_v24  ;;  %v4974_v62 = vld [vmem:[#allocation8 + $0x60] ss:$24 sps:$4 sm:$0xff]  }
 0x68d   :  { %3212 = vpow2.f32 %v2901_v15  ;;  %v4977_v15 = vld [vmem:[#allocation8 + $0x94] ss:$24 sps:$4 sm:$0xff]   ;;  %v5856_v24 = vld [vmem:[#allocation19_spill] sm:$0xff] }
 0x697   :  { %v3213_v14 = vpop.eup %3212 }
 0x698   :  { %v2024_v47 = vadd.f32 1.0, %v3213_v14  ;;  %v5858_v14 = vld [vmem:[#allocation108_spill] sm:$0xff] }
 0x69a   :  { %3214 = vrcp.f32 %v2024_v47  ;;  %v5859_v47 = vld [vmem:[#allocation21_spill] sm:$0xff] }
 0x69b   :  { %3216 = vtanh.f32 %v2028_v3  ;;  %v5857_v3 = vld [vmem:[#allocation107_spill] sm:$0xff] }
 0x6a4   :  { %v3215_v39 = vpop.eup %3214 }
 0x6a5   :  { %v2030_v38 = vsub.f32 1.0, %v3215_v39  ;;  %v3217_v26 = vpop.eup %3216  ;;  %v2032_v18 = vmul.f32 %v3215_v39, %v4817_v40  ;;  %v5860_v39 = vld [vmem:[#allocation22_spill] sm:$0xff]  ;;  %v5879_v40 = vld [vmem:[#allocation27_spill] sm:$0xff] }
 0x6a7   :  { %v2031_v12 = vmul.f32 %v3217_v26, %v2030_v38  ;;  %v5861_v38 = vld [vmem:[#allocation109_spill] sm:$0xff] }
 0x6a8   :  { %v5029_v26 = vld [vmem:[#allocation8 + $0xc] ss:$24 sps:$4 sm:$0xff]  }
 0x6a9   :  { %v4944_v55 = vadd.f32 %v2032_v18, %v2031_v12  ;;  %5862 = vst [vmem:[#allocation67_spill] sm:$0xff] %v5029_v26  ;;  %v5863_v12 = vld [vmem:[#allocation24_spill] sm:$0xff]  ;;  %v5034_v18 = vld [vmem:[#allocation8 + $0x14] ss:$24 sps:$4 sm:$0xff]  }
 0x6aa   :  { %5864 = vst [vmem:[#allocation85_spill] sm:$0xff] %v5034_v18 }
 0x6ab   :  { %v2630_v60 = vmul.f32 %v4623_v16, %v4944_v55  ;;  %v2039_v43 = vpack.c.bf16 %v4944_v55, %v4944_v55 }
 0x6ad   :  { %2641 = vadd.xlane.f32.xlu1 %v2630_v60  ;;  %2072 = vmatprep.mubr.bf16.mxu0 %v2039_v43  ;;  %v5037_v60 = vld [vmem:[#allocation8 + $0x8] ss:$24 sps:$4 sm:$0xff]  }
 0x6ae   :  { %2113 = vmatprep.mubr.bf16.mxu1 %v2039_v43  ;;  %2073 = vmatmul.mubr.bf16.vlgmr.msra.gmra.mrb[52].mxu0 %v4952_v8  ;;  %5865 = vst [vmem:[#allocation79_spill] sm:$0xff] %v5037_v60 }
 0x6af   :  { %2114 = vmatmul.mubr.bf16.vlgmr.msra.gmra.mrb[56].mxu1 %v4952_v8  ;;  %2123 = vmatpush1.bf16.msra.mxu0 %v4635_v4 }
 0x6b0   :  { %2154 = vmatprep.mubr.bf16.mxu0 %v2039_v43  ;;  %2124 = vmatprep.subr.bf16.mxu0 %v4638_v22  ;;  %v5040_v43 = vld [vmem:[#allocation8 + $0x3c] ss:$24 sps:$4 sm:$0xff]  }
 0x6b1   :  { %2220 = vmatpush1.bf16.msra.mxu1 %v4958_v53  ;;  %5866 = vst [vmem:[#allocation84_spill] sm:$0xff] %v5040_v43 }
 0x6b2   :  { %2221 = vmatprep.subr.bf16.mxu1 %v4961_v61 }
 0x6b3   :  { %2125 = vmatpush1.bf16.msra.mxu0 %v4643_v20 }
 0x6b4   :  { %2126 = vmatprep.subr.bf16.mxu0 %v4646_v46 }
 0x6b5   :  { %2222 = vmatpush1.bf16.msra.mxu1 %v4966_v9 }
 0x6b6   :  { %2223 = vmatprep.subr.bf16.mxu1 %v4969_v51 }
 0x6b7   :  { %2127 = vmatpush1.bf16.msra.mxu0 %v4651_v59 }
 0x6b8   :  { %2128 = vmatprep.subr.bf16.mxu0 %v4654_v48 }
 0x6b9   :  { %2224 = vmatpush1.bf16.msra.mxu1 %v4974_v62 }
 0x6ba   :  { %2225 = vmatprep.subr.bf16.mxu1 %v4977_v15 }
 0x6bb   :  { %2129 = vmatpush1.bf16.msra.mxu0 %v4659_v25 }
 0x6bc   :  { %2130 = vmatprep.subr.bf16.mxu0 %v4662_v10 }
 0x6bd   :  { %2226 = vmatpush1.bf16.msra.mxu1 %v4431_v23  ;;  %v5842_v23 = vld [vmem:[#allocation100_spill] sm:$0xff] }
 0x6be   :  { %2227 = vmatprep.subr.bf16.mxu1 %v4434_v0  ;;  %v5843_v0 = vld [vmem:[#allocation52_spill] sm:$0xff] }
 0x6bf   :  { %2131 = vmatpush1.bf16.msra.mxu0 %v4667_v42 }
 0x6c0   :  { %2132 = vmatprep.subr.bf16.mxu0 %v4670_v11 }
 0x6c1   :  { %2228 = vmatpush1.bf16.msra.mxu1 %v4439_v29  ;;  %v5844_v29 = vld [vmem:[#allocation53_spill] sm:$0xff] }
 0x6c2   :  { %2229 = vmatprep.subr.bf16.mxu1 %v4442_v17  ;;  %v5845_v17 = vld [vmem:[#allocation101_spill] sm:$0xff] }
 0x6c3   :  { %2133 = vmatpush1.bf16.msra.mxu0 %v4675_v5 }
 0x6c4   :  { %2134 = vmatprep.subr.bf16.mxu0 %v4678_v21 }
 0x6c5   :  { %2230 = vmatpush1.bf16.msra.mxu1 %v4447_v19  ;;  %v5846_v19 = vld [vmem:[#allocation102_spill] sm:$0xff] }
 0x6c6   :  { %2231 = vmatprep.subr.bf16.mxu1 %v4450_v27  ;;  %v5847_v27 = vld [vmem:[#allocation36_spill] sm:$0xff] }
 0x6c7   :  { %2135 = vmatpush1.bf16.msra.mxu0 %v4683_v36 }
 0x6c8   :  { %2136 = vmatprep.subr.bf16.mxu0 %v4686_v45 }
 0x6c9   :  { %2232 = vmatpush1.bf16.msra.mxu1 %v4455_v31  ;;  %v5848_v31 = vld [vmem:[#allocation38_spill] sm:$0xff] }
 0x6ca   :  { %2233 = vmatprep.subr.bf16.mxu1 %v4458_v33  ;;  %v5849_v33 = vld [vmem:[#allocation103_spill] sm:$0xff] }
 0x6cb   :  { %2137 = vmatpush1.bf16.msra.mxu0 %v4691_v2 }
 0x6cc   :  { %2138 = vmatprep.subr.bf16.mxu0 %v4694_v28 }
 0x6cd   :  { %2234 = vmatpush1.bf16.msra.mxu1 %v4463_v37  ;;  %v5850_v37 = vld [vmem:[#allocation104_spill] sm:$0xff] }
 0x6ce   :  { %2235 = vmatprep.subr.bf16.mxu1 %v4466_v52  ;;  %v5851_v52 = vld [vmem:[#allocation40_spill] sm:$0xff] }
 0x6cf   :  { %2139 = vmatpush1.bf16.msra.mxu0 %v5775_v13 }
 0x6d0   :  { %2140 = vmatprep.subr.bf16.mxu0 %v5776_v50 }
 0x6d1   :  { %2236 = vmatpush1.bf16.msra.mxu1 %v4471_v41  ;;  %v5852_v41 = vld [vmem:[#allocation42_spill] sm:$0xff] }
 0x6d2   :  { %2237 = vmatprep.subr.bf16.mxu1 %v4474_v1  ;;  %v5853_v1 = vld [vmem:[#allocation105_spill] sm:$0xff] }
 0x6d3   :  { %2141 = vmatpush1.bf16.msra.mxu0 %v5777_v7 }
 0x6d4   :  { %2142 = vmatprep.subr.bf16.mxu0 %v5778_v34 }
 0x6d5   :  { %2238 = vmatpush1.bf16.msra.mxu1 %v4479_v35  ;;  %v5854_v35 = vld [vmem:[#allocation106_spill] sm:$0xff] }
 0x6d6   :  { %2239 = vmatprep.subr.bf16.mxu1 %v4482_v44  ;;  %v5855_v44 = vld [vmem:[#allocation18_spill] sm:$0xff] }
 0x6d7   :  { %2143 = vmatpush1.bf16.msra.mxu0 %v5779_v54 }
 0x6d8   :  { %2144 = vmatprep.subr.bf16.mxu0 %v5842_v23 }
 0x6d9   :  { %2240 = vmatpush1.bf16.msra.mxu1 %v5843_v0  ;;  %v5043_v0 = vld [vmem:[#allocation8 + $0x38] ss:$24 sps:$4 sm:$0xff]  }
 0x6da   :  { %2241 = vmatprep.subr.bf16.mxu1 %v5844_v29  ;;  %5867 = vst [vmem:[#allocation86_spill] sm:$0xff] %v5043_v0  ;;  %v5046_v29 = vld [vmem:[#allocation8 + $0x6c] ss:$24 sps:$4 sm:$0xff]  }
 0x6db   :  { %2145 = vmatpush1.bf16.msra.mxu0 %v5845_v17  ;;  %5868 = vst [vmem:[#allocation63_spill] sm:$0xff] %v5046_v29 }
 0x6dc   :  { %2146 = vmatprep.subr.bf16.mxu0 %v5846_v19 }
 0x6dd   :  { %2242 = vmatpush1.bf16.msra.mxu1 %v5847_v27  ;;  %v5052_v27 = vld [vmem:[#allocation8 + $0x9c] ss:$24 sps:$4 sm:$0xff]  }
 0x6de   :  { %2243 = vmatprep.subr.bf16.mxu1 %v5848_v31  ;;  %5870 = vst [vmem:[#allocation75_spill] sm:$0xff] %v5052_v27  ;;  %v5055_v31 = vld [vmem:[#allocation8 + $0x98] ss:$24 sps:$4 sm:$0xff]  }
 0x6df   :  { %2147 = vmatpush1.bf16.msra.mxu0 %v5849_v33  ;;  %5871 = vst [vmem:[#allocation88_spill] sm:$0xff] %v5055_v31 }
 0x6e0   :  { %2148 = vmatprep.subr.bf16.mxu0 %v5850_v37 }
 0x6e1   :  { %2244 = vmatpush1.bf16.msra.mxu1 %v5851_v52  ;;  %v5058_v52 = vld [vmem:[#allocation8 + $0xcc] ss:$24 sps:$4 sm:$0xff]  }
 0x6e2   :  { %2245 = vmatprep.subr.bf16.mxu1 %v5852_v41  ;;  %5872 = vst [vmem:[#allocation90_spill] sm:$0xff] %v5058_v52  ;;  %v5061_v41 = vld [vmem:[#allocation8 + $0xc8] ss:$24 sps:$4 sm:$0xff]  }
 0x6e3   :  { %2149 = vmatpush1.bf16.msra.mxu0 %v5853_v1  ;;  %5873 = vst [vmem:[#allocation43_spill] sm:$0xff] %v5061_v41 }
 0x6e4   :  { %2150 = vmatprep.subr.bf16.mxu0 %v5854_v35 }
 0x6e5   :  { %2246 = vmatpush1.bf16.msra.mxu1 %v5855_v44  ;;  %v5064_v44 = vld [vmem:[#allocation8 + $0xfc] ss:$24 sps:$4 sm:$0xff]  }
 0x6e6   :  { %2247 = vmatprep.subr.bf16.mxu1 %v5856_v24  ;;  %5874 = vst [vmem:[#allocation25_spill] sm:$0xff] %v5064_v44  ;;  %v5067_v24 = vld [vmem:[#allocation8 + $0xf8] ss:$24 sps:$4 sm:$0xff]  }
 0x6e7   :  { %2151 = vmatpush1.bf16.msra.mxu0 %v5857_v3  ;;  %5875 = vst [vmem:[#allocation13_spill] sm:$0xff] %v5067_v24 }
 0x6e8   :  { %2152 = vmatprep.subr.bf16.mxu0 %v5858_v14 }
 0x6e9   :  { %2248 = vmatpush1.bf16.msra.mxu1 %v5859_v47  ;;  %v5070_v47 = vld [vmem:[#allocation8 + $0x12c] ss:$24 sps:$4 sm:$0xff]  }
 0x6ea   :  { %2249 = vmatprep.subr.bf16.mxu1 %v5860_v39  ;;  %5876 = vst [vmem:[#allocation44_spill] sm:$0xff] %v5070_v47  ;;  %v5073_v39 = vld [vmem:[#allocation8 + $0x128] ss:$24 sps:$4 sm:$0xff]  }
 0x6eb   :  { %2153 = vmatpush1.bf16.msra.mxu0 %v5861_v38  ;;  %5877 = vst [vmem:[#allocation14_spill] sm:$0xff] %v5073_v39 }
 0x6ec   :  { %2260 = vmatprep.subr.bf16.mxu0 %v5029_v26 }
 0x6ed   :  { %2250 = vmatpush1.bf16.msra.mxu1 %v5863_v12  ;;  %v5076_v12 = vld [vmem:[#allocation8 + $0x15c] ss:$24 sps:$4 sm:$0xff]  }
 0x6ee   :  { %2155 = vmatmul.mubr.bf16.vlgmr.msra.gmra.mrb[56].mxu0 %v4952_v8  ;;  %2301 = vmatprep.subr.bf16.mxu1 %v5034_v18  ;;  %v5049_v8 = vld [vmem:[#allocation8 + $0x68] ss:$24 sps:$4 sm:$0xff]   ;;  %5878 = vst [vmem:[#allocation45_spill] sm:$0xff] %v5076_v12 }
 0x6ef   :  { %2261 = vmatpush1.bf16.msra.mxu0 %v5037_v60  ;;  %5869 = vst [vmem:[#allocation89_spill] sm:$0xff] %v5049_v8 }
 0x6f0   :  { %2262 = vmatprep.subr.bf16.mxu0 %v5040_v43 }
 0x6f3   :  { %2263 = vmatpush1.bf16.msra.mxu0 %v5043_v0 }
 0x6f4   :  { %2264 = vmatprep.subr.bf16.mxu0 %v5046_v29 }
 0x6f7   :  { %2265 = vmatpush1.bf16.msra.mxu0 %v5049_v8 }
 0x6f8   :  { %2266 = vmatprep.subr.bf16.mxu0 %v5052_v27  ;;  %v5888_v27 = vld [vmem:[#allocation39_spill] sm:$0xff] }
 0x6fb   :  { %2267 = vmatpush1.bf16.msra.mxu0 %v5055_v31  ;;  %v5886_v31 = vld [vmem:[#allocation35_spill] sm:$0xff] }
 0x6fc   :  { %2268 = vmatprep.subr.bf16.mxu0 %v5058_v52  ;;  %v5884_v52 = vld [vmem:[#allocation33_spill] sm:$0xff] }
 0x6ff   :  { %2269 = vmatpush1.bf16.msra.mxu0 %v5061_v41  ;;  %v5882_v41 = vld [vmem:[#allocation31_spill] sm:$0xff] }
 0x700   :  { %2270 = vmatprep.subr.bf16.mxu0 %v5064_v44  ;;  %v5881_v44 = vld [vmem:[#allocation30_spill] sm:$0xff] }
 0x703   :  { %2271 = vmatpush1.bf16.msra.mxu0 %v5067_v24  ;;  %v5883_v24 = vld [vmem:[#allocation32_spill] sm:$0xff] }
 0x704   :  { %2272 = vmatprep.subr.bf16.mxu0 %v5070_v47  ;;  %v5885_v47 = vld [vmem:[#allocation34_spill] sm:$0xff] }
 0x707   :  { %2273 = vmatpush1.bf16.msra.mxu0 %v5073_v39  ;;  %v5887_v39 = vld [vmem:[#allocation37_spill] sm:$0xff] }
 0x708   :  { %2274 = vmatprep.subr.bf16.mxu0 %v5076_v12  ;;  %v5889_v12 = vld [vmem:[#allocation41_spill] sm:$0xff] }
 0x70b   :  { %2275 = vmatpush1.bf16.msra.mxu0 %v5879_v40  ;;  %v5890_v40 = vld [vmem:[#allocation57_spill] sm:$0xff] }
 0x70c   :  { %2276 = vmatprep.subr.bf16.mxu0 %v5880_v63  ;;  %v5891_v63 = vld [vmem:[#allocation59_spill] sm:$0xff] }
 0x70f   :  { %2277 = vmatpush1.bf16.msra.mxu0 %v5881_v44  ;;  %v5892_v44 = vld [vmem:[#allocation93_spill] sm:$0xff] }
 0x710   :  { %2278 = vmatprep.subr.bf16.mxu0 %v5882_v41  ;;  %v5893_v41 = vld [vmem:[#allocation71_spill] sm:$0xff] }
 0x713   :  { %2279 = vmatpush1.bf16.msra.mxu0 %v5883_v24  ;;  %v5894_v24 = vld [vmem:[#allocation92_spill] sm:$0xff] }
 0x714   :  { %2280 = vmatprep.subr.bf16.mxu0 %v5884_v52  ;;  %v5895_v52 = vld [vmem:[#allocation94_spill] sm:$0xff] }
 0x717   :  { %2281 = vmatpush1.bf16.msra.mxu0 %v5885_v47  ;;  %v3415_v47 = vld [vmem:[#allocation8 + $0x4] ss:$24 sps:$4 sm:$0xff]  }
 0x718   :  { %2282 = vmatprep.subr.bf16.mxu0 %v5886_v31 }
 0x71b   :  { %2283 = vmatpush1.bf16.msra.mxu0 %v5887_v39  ;;  %v5896_v39 = vld [vmem:[#allocation96_spill] sm:$0xff] }
 0x71c   :  { %2284 = vmatprep.subr.bf16.mxu0 %v5888_v27 }
 0x71f   :  { %2285 = vmatpush1.bf16.msra.mxu0 %v5889_v12 }
 0x720   :  { %2286 = vmatprep.subr.bf16.mxu0 %v5890_v40 }
 0x723   :  { %2287 = vmatpush1.bf16.msra.mxu0 %v5891_v63  ;;  %v5897_v63 = vld [vmem:[#allocation56_spill] sm:$0xff] }
 0x724   :  { %2288 = vmatprep.subr.bf16.mxu0 %v5892_v44 }
 0x727   :  { %2289 = vmatpush1.bf16.msra.mxu0 %v5893_v41 }
 0x728   :  { %2290 = vmatprep.subr.bf16.mxu0 %v5894_v24  ;;  %v5898_v24 = vld [vmem:[#allocation58_spill] sm:$0xff] }
 0x72b   :  { %2291 = vmatpush1.bf16.msra.mxu0 %v5895_v52 }
 0x72c   :  { %2398 = vmatprep.subr.bf16.mxu0 %v3415_v47  ;;  %v5899_v47 = vld [vmem:[#allocation77_spill] sm:$0xff] }
 0x781   :  { %v2074_v31 = vpop.f32.mrb[52].mxu0 }
 0x782   :  { %v2075_v8 = vadd.f32 %v2074_v31, %v5896_v39  ;;  %v2115_v27 = vpop.f32.mrb[56].mxu1  ;;  %v2076_v29 = vpop.f32.mrb[53].mxu0 }
 0x783   :  { %v2077_v12 = vadd.f32 %v2076_v29, %v5766_v49  ;;  %v2117_v40 = vpop.f32.mrb[57].mxu1  ;;  %v2078_v0 = vpop.f32.mrb[54].mxu0 }
 0x784   :  { %v2167_v43 = vadd.f32 %v2075_v8, %v5897_v63  ;;  %v2118_v44 = vadd.f32 %v2117_v40, %v4200_v30  ;;  %v2119_v41 = vpop.f32.mrb[58].mxu1  ;;  %v2079_v60 = vpop.f32.mrb[55].mxu0  ;;  %v2116_v8 = vadd.f32 %v2115_v27, %v4212_v58 }
 0x785   :  { %v2174_v18 = vadd.f32 %v2077_v12, %v5898_v24  ;;  %v2120_v52 = vpop.f32.mrb[59].mxu1  ;;  %v5900_v60 = vld [vmem:[#allocation87_spill] sm:$0xff] }
 0x786   :  { %v2902_v26 = vmul.f32 -1.442695, %v2167_v43  ;;  %v2192_v38 = vadd.f32 %v2118_v44, %v5899_v47 }
 0x787   :  { %v2903_v31 = vmul.f32 -1.442695, %v2174_v18 }
 0x788   :  { %3218 = vpow2.f32 %v2902_v26  ;;  %v2904_v12 = vmul.f32 -1.442695, %v2192_v38 }
 0x789   :  { %3220 = vpow2.f32 %v2903_v31 }
 0x792   :  { %v3219_v39 = vpop.eup %3218 }
 0x793   :  { %v2171_v14 = vadd.f32 1.0, %v3219_v39  ;;  %v3221_v29 = vpop.eup %3220 }
 0x794   :  { %v2178_v0 = vadd.f32 1.0, %v3221_v29 }
 0x795   :  { %3222 = vrcp.f32 %v2171_v14 }
 0x796   :  { %3224 = vrcp.f32 %v2178_v0 }
 0x79f   :  { %v3223_v63 = vpop.eup %3222 }
 0x7a0   :  { %v2181_v40 = vmul.f32 %v3223_v63, %v2116_v8  ;;  %v3225_v43 = vpop.eup %3224  ;;  %v5901_v63 = vld [vmem:[#allocation76_spill] sm:$0xff] }
 0x7a1   :  { %v2184_v44 = vsub.f32 1.0, %v3225_v43  ;;  %v2186_v24 = vmul.f32 %v3225_v43, %v4935_v57  ;;  %v5902_v43 = vld [vmem:[#allocation78_spill] sm:$0xff] }
 0x7a2   :  { %v2182_v41 = vadd.f32 %v2181_v40, %v5900_v60 }
 0x7a4   :  { %3226 = vtanh.f32 %v2182_v41 }
 0x7a5   :  { %3228 = vpow2.f32 %v2904_v12 }
 0x7ae   :  { %v3227_v26 = vpop.eup %3226 }
 0x7af   :  { %v2185_v18 = vmul.f32 %v3227_v26, %v2184_v44  ;;  %v3229_v14 = vpop.eup %3228 }
 0x7b0   :  { %v2196_v52 = vadd.f32 1.0, %v3229_v14 }
 0x7b1   :  { %v5105_v39 = vadd.f32 %v2186_v24, %v2185_v18 }
 0x7b2   :  { %3230 = vrcp.f32 %v2196_v52 }
 0x7b3   :  { %v2602_v27 = vmul.f32 %v4808_v6, %v5105_v39 }
 0x7b5   :  { %2615 = vadd.xlane.f32.xlu1 %v2602_v27 }
 0x7bc   :  { %v3231_v8 = vpop.eup %3230 }
 0x7c1   :  { %v2156_v47 = vpop.f32.mrb[56].mxu0 }
 0x7c2   :  { %v2157_v31 = vadd.f32 %v2156_v47, %v4228_v32  ;;  %v2158_v38 = vpop.f32.mrb[57].mxu0 }
 0x7c3   :  { %v2159_v29 = vadd.f32 %v2158_v38, %v4232_v56  ;;  %v2160_v0 = vpop.f32.mrb[58].mxu0 }
 0x7c4   :  { %v2199_v40 = vadd.f32 %v2157_v31, %v5901_v63  ;;  %v2161_v60 = vpop.f32.mrb[59].mxu0  ;;  %v5122_v0 = vpack.c.bf16 %v5105_v39, %v5105_v39  ;;  %v5915_v63 = vld [vmem:[#allocation43_spill] sm:$0xff] }
 0x7c5   :  { %v2206_v41 = vmul.f32 %v3231_v8, %v2159_v29  ;;  %v5914_v8 = vld [vmem:[#allocation90_spill] sm:$0xff]  ;;  %v5917_v60 = vld [vmem:[#allocation13_spill] sm:$0xff] }
 0x7c6   :  { %v2905_v12 = vmul.f32 -1.442695, %v2199_v40  ;;  %v5916_v40 = vld [vmem:[#allocation25_spill] sm:$0xff] }
 0x7c7   :  { %v2207_v44 = vadd.f32 %v2206_v41, %v5902_v43  ;;  %v5918_v41 = vld [vmem:[#allocation44_spill] sm:$0xff]  ;;  %v5920_v43 = vld [vmem:[#allocation45_spill] sm:$0xff] }
 0x7c8   :  { %3232 = vpow2.f32 %v2905_v12  ;;  %v5919_v12 = vld [vmem:[#allocation14_spill] sm:$0xff] }
 0x7d2   :  { %v3233_v26 = vpop.eup %3232 }
 0x7d3   :  { %v2203_v18 = vadd.f32 1.0, %v3233_v26  ;;  %v3442_v26 = vld [vmem:[#allocation8 + $0x18c] ss:$24 sps:$4 sm:$0xff]  }
 0x7d5   :  { %3234 = vrcp.f32 %v2203_v18  ;;  %v3443_v18 = vld [vmem:[#allocation8 + $0x188] ss:$24 sps:$4 sm:$0xff]  }
 0x7d6   :  { %3236 = vtanh.f32 %v2207_v44  ;;  %v3441_v44 = vld [vmem:[#allocation8 + $0x158] ss:$24 sps:$4 sm:$0xff]  }
 0x7df   :  { %v3235_v24 = vpop.eup %3234 }
 0x7e0   :  { %v2209_v14 = vsub.f32 1.0, %v3235_v24  ;;  %v3237_v27 = vpop.eup %3236  ;;  %v2211_v47 = vmul.f32 %v3235_v24, %v4944_v55  ;;  %v3444_v24 = vld [vmem:[#allocation8 + $0x1bc] ss:$24 sps:$4 sm:$0xff]  }
 0x7e2   :  { %v2210_v52 = vmul.f32 %v3237_v27, %v2209_v14  ;;  %v3445_v14 = vld [vmem:[#allocation8 + $0x1b8] ss:$24 sps:$4 sm:$0xff]   ;;  %v3446_v27 = vld [vmem:[#allocation8 + $0x1ec] ss:$24 sps:$4 sm:$0xff]  }
 0x7e4   :  { %v5114_v38 = vadd.f32 %v2211_v47, %v2210_v52  ;;  %v3447_v52 = vld [vmem:[#allocation8 + $0x1e8] ss:$24 sps:$4 sm:$0xff]   ;;  %v3448_v47 = vld [vmem:[#allocation8 + $0x21c] ss:$24 sps:$4 sm:$0xff]  }
 0x7e6   :  { %v2629_v31 = vmul.f32 %v4623_v16, %v5114_v38  ;;  %v2218_v29 = vpack.c.bf16 %v5114_v38, %v5114_v38  ;;  %v3416_v16 = vld [vmem:[#allocation8 + $0x90] ss:$24 sps:$4 sm:$0xff]  }
 0x7e8   :  { %2639 = vadd.xlane.f32.xlu0 %v2629_v31  ;;  %2251 = vmatprep.mubr.bf16.mxu1 %v2218_v29  ;;  %v3449_v31 = vld [vmem:[#allocation8 + $0x218] ss:$24 sps:$4 sm:$0xff]  }
 0x7e9   :  { %2292 = vmatprep.mubr.bf16.mxu0 %v2218_v29  ;;  %2252 = vmatmul.mubr.bf16.vlgmr.msra.gmra.mrb[60].mxu1 %v5122_v0 }
 0x7ea   :  { %2293 = vmatmul.mubr.bf16.vlgmr.msra.gmra.mrb[60].mxu0 %v5122_v0  ;;  %2302 = vmatpush1.bf16.msra.mxu1 %v4635_v4  ;;  %v3417_v4 = vld [vmem:[#allocation8 + $0xc4] ss:$24 sps:$4 sm:$0xff]  }
 0x7eb   :  { %2333 = vmatprep.mubr.bf16.mxu1 %v2218_v29  ;;  %2303 = vmatprep.subr.bf16.mxu1 %v4638_v22  ;;  %v3418_v22 = vld [vmem:[#allocation8 + $0xc0] ss:$24 sps:$4 sm:$0xff]   ;;  %v3450_v29 = vld [vmem:[#allocation8 + $0x24c] ss:$24 sps:$4 sm:$0xff]  }
 0x7ec   :  { %2399 = vmatpush1.bf16.msra.mxu0 %v4958_v53  ;;  %v5903_v53 = vld [vmem:[#allocation108_spill] sm:$0xff] }
 0x7ed   :  { %2400 = vmatprep.subr.bf16.mxu0 %v4961_v61  ;;  %v3438_v61 = vld [vmem:[#allocation8 + $0x2a0] ss:$24 sps:$4 sm:$0xff]  }
 0x7ee   :  { %2304 = vmatpush1.bf16.msra.mxu1 %v4643_v20  ;;  %v3419_v20 = vld [vmem:[#allocation8 + $0xf4] ss:$24 sps:$4 sm:$0xff]  }
 0x7ef   :  { %2305 = vmatprep.subr.bf16.mxu1 %v4646_v46  ;;  %v3420_v46 = vld [vmem:[#allocation8 + $0xf0] ss:$24 sps:$4 sm:$0xff]  }
 0x7f0   :  { %2401 = vmatpush1.bf16.msra.mxu0 %v4966_v9  ;;  %v3439_v9 = vld [vmem:[#allocation8 + $0x2d4] ss:$24 sps:$4 sm:$0xff]  }
 0x7f1   :  { %2402 = vmatprep.subr.bf16.mxu0 %v4969_v51  ;;  %v5904_v51 = vld [vmem:[#allocation109_spill] sm:$0xff] }
 0x7f2   :  { %2306 = vmatpush1.bf16.msra.mxu1 %v4651_v59  ;;  %v3421_v59 = vld [vmem:[#allocation8 + $0x124] ss:$24 sps:$4 sm:$0xff]  }
 0x7f3   :  { %2307 = vmatprep.subr.bf16.mxu1 %v4654_v48  ;;  %v3422_v48 = vld [vmem:[#allocation8 + $0x120] ss:$24 sps:$4 sm:$0xff]  }
 0x7f4   :  { %2403 = vmatpush1.bf16.msra.mxu0 %v4974_v62  ;;  %v5905_v62 = vld [vmem:[#allocation67_spill] sm:$0xff] }
 0x7f5   :  { %2404 = vmatprep.subr.bf16.mxu0 %v4977_v15  ;;  %v3440_v15 = vld [vmem:[#allocation8 + $0x2d0] ss:$24 sps:$4 sm:$0xff]  }
 0x7f6   :  { %2308 = vmatpush1.bf16.msra.mxu1 %v4659_v25  ;;  %v3423_v25 = vld [vmem:[#allocation8 + $0x154] ss:$24 sps:$4 sm:$0xff]  }
 0x7f7   :  { %2309 = vmatprep.subr.bf16.mxu1 %v4662_v10  ;;  %v3424_v10 = vld [vmem:[#allocation8 + $0x150] ss:$24 sps:$4 sm:$0xff]  }
 0x7f8   :  { %2405 = vmatpush1.bf16.msra.mxu0 %v3416_v16  ;;  %v3452_v16 = vld [vmem:[#allocation8 + $0x27c] ss:$24 sps:$4 sm:$0xff]  }
 0x7f9   :  { %2406 = vmatprep.subr.bf16.mxu0 %v3417_v4  ;;  %v3453_v4 = vld [vmem:[#allocation8 + $0x278] ss:$24 sps:$4 sm:$0xff]  }
 0x7fa   :  { %2310 = vmatpush1.bf16.msra.mxu1 %v4667_v42  ;;  %v3425_v42 = vld [vmem:[#allocation8 + $0x184] ss:$24 sps:$4 sm:$0xff]  }
 0x7fb   :  { %2311 = vmatprep.subr.bf16.mxu1 %v4670_v11  ;;  %v3426_v11 = vld [vmem:[#allocation8 + $0x180] ss:$24 sps:$4 sm:$0xff]  }
 0x7fc   :  { %2407 = vmatpush1.bf16.msra.mxu0 %v3418_v22  ;;  %v3454_v22 = vld [vmem:[#allocation8 + $0x2ac] ss:$24 sps:$4 sm:$0xff]  }
 0x7fd   :  { %2408 = vmatprep.subr.bf16.mxu0 %v3419_v20  ;;  %v3455_v20 = vld [vmem:[#allocation8 + $0x2a8] ss:$24 sps:$4 sm:$0xff]  }
 0x7fe   :  { %2312 = vmatpush1.bf16.msra.mxu1 %v4675_v5  ;;  %v3427_v5 = vld [vmem:[#allocation8 + $0x1b4] ss:$24 sps:$4 sm:$0xff]  }
 0x7ff   :  { %2313 = vmatprep.subr.bf16.mxu1 %v4678_v21  ;;  %v3428_v21 = vld [vmem:[#allocation8 + $0x1b0] ss:$24 sps:$4 sm:$0xff]  }
 0x800   :  { %2409 = vmatpush1.bf16.msra.mxu0 %v3420_v46  ;;  %v3456_v46 = vld [vmem:[#allocation8 + $0x2dc] ss:$24 sps:$4 sm:$0xff]  }
 0x801   :  { %2410 = vmatprep.subr.bf16.mxu0 %v3421_v59  ;;  %v3457_v59 = vld [vmem:[#allocation8 + $0x2d8] ss:$24 sps:$4 sm:$0xff]  }
 0x802   :  { %2314 = vmatpush1.bf16.msra.mxu1 %v4683_v36  ;;  %v3429_v36 = vld [vmem:[#allocation8 + $0x1e4] ss:$24 sps:$4 sm:$0xff]  }
 0x803   :  { %2315 = vmatprep.subr.bf16.mxu1 %v4686_v45  ;;  %v3430_v45 = vld [vmem:[#allocation8 + $0x1e0] ss:$24 sps:$4 sm:$0xff]  }
 0x804   :  { %2411 = vmatpush1.bf16.msra.mxu0 %v3422_v48 }
 0x805   :  { %2412 = vmatprep.subr.bf16.mxu0 %v3423_v25  ;;  %v5921_v25 = vld [vmem:[#allocation96_spill] sm:$0xff] }
 0x806   :  { %2316 = vmatpush1.bf16.msra.mxu1 %v4691_v2  ;;  %v3431_v2 = vld [vmem:[#allocation8 + $0x214] ss:$24 sps:$4 sm:$0xff]  }
 0x807   :  { %2317 = vmatprep.subr.bf16.mxu1 %v4694_v28  ;;  %v3432_v28 = vld [vmem:[#allocation8 + $0x210] ss:$24 sps:$4 sm:$0xff]  }
 0x808   :  { %2413 = vmatpush1.bf16.msra.mxu0 %v3424_v10 }
 0x809   :  { %2414 = vmatprep.subr.bf16.mxu0 %v3425_v42 }
 0x80a   :  { %2318 = vmatpush1.bf16.msra.mxu1 %v5775_v13  ;;  %v3433_v13 = vld [vmem:[#allocation8 + $0x244] ss:$24 sps:$4 sm:$0xff]  }
 0x80b   :  { %2319 = vmatprep.subr.bf16.mxu1 %v5776_v50  ;;  %v3434_v50 = vld [vmem:[#allocation8 + $0x240] ss:$24 sps:$4 sm:$0xff]  }
 0x80c   :  { %2415 = vmatpush1.bf16.msra.mxu0 %v3426_v11 }
 0x80d   :  { %2416 = vmatprep.subr.bf16.mxu0 %v3427_v5 }
 0x80e   :  { %2320 = vmatpush1.bf16.msra.mxu1 %v5777_v7  ;;  %v3435_v7 = vld [vmem:[#allocation8 + $0x274] ss:$24 sps:$4 sm:$0xff]  }
 0x80f   :  { %2321 = vmatprep.subr.bf16.mxu1 %v5778_v34  ;;  %v3436_v34 = vld [vmem:[#allocation8 + $0x270] ss:$24 sps:$4 sm:$0xff]  }
 0x810   :  { %2417 = vmatpush1.bf16.msra.mxu0 %v3428_v21 }
 0x811   :  { %2418 = vmatprep.subr.bf16.mxu0 %v3429_v36 }
 0x812   :  { %2322 = vmatpush1.bf16.msra.mxu1 %v5779_v54  ;;  %v3437_v54 = vld [vmem:[#allocation8 + $0x2a4] ss:$24 sps:$4 sm:$0xff]  }
 0x813   :  { %2323 = vmatprep.subr.bf16.mxu1 %v5842_v23  ;;  %v5906_v23 = vld [vmem:[#allocation85_spill] sm:$0xff] }
 0x814   :  { %2419 = vmatpush1.bf16.msra.mxu0 %v3430_v45  ;;  %v5922_v45 = vld [vmem:[#allocation60_spill] sm:$0xff] }
 0x815   :  { %2420 = vmatprep.subr.bf16.mxu0 %v3431_v2 }
 0x816   :  { %2324 = vmatpush1.bf16.msra.mxu1 %v5845_v17  ;;  %v5907_v17 = vld [vmem:[#allocation79_spill] sm:$0xff] }
 0x817   :  { %2325 = vmatprep.subr.bf16.mxu1 %v5846_v19  ;;  %v5908_v19 = vld [vmem:[#allocation84_spill] sm:$0xff] }
 0x818   :  { %2421 = vmatpush1.bf16.msra.mxu0 %v3432_v28 }
 0x819   :  { %2422 = vmatprep.subr.bf16.mxu0 %v3433_v13 }
 0x81a   :  { %2326 = vmatpush1.bf16.msra.mxu1 %v5849_v33  ;;  %v5909_v33 = vld [vmem:[#allocation86_spill] sm:$0xff] }
 0x81b   :  { %2327 = vmatprep.subr.bf16.mxu1 %v5850_v37  ;;  %v5910_v37 = vld [vmem:[#allocation63_spill] sm:$0xff] }
 0x81c   :  { %2423 = vmatpush1.bf16.msra.mxu0 %v3434_v50 }
 0x81d   :  { %2424 = vmatprep.subr.bf16.mxu0 %v3435_v7  ;;  %v5923_v7 = vld [vmem:[#allocation62_spill] sm:$0xff] }
 0x81e   :  { %2328 = vmatpush1.bf16.msra.mxu1 %v5853_v1  ;;  %v5911_v1 = vld [vmem:[#allocation89_spill] sm:$0xff] }
 0x81f   :  { %2329 = vmatprep.subr.bf16.mxu1 %v5854_v35  ;;  %v5912_v35 = vld [vmem:[#allocation75_spill] sm:$0xff] }
 0x820   :  { %2425 = vmatpush1.bf16.msra.mxu0 %v3436_v34 }
 0x821   :  { %2426 = vmatprep.subr.bf16.mxu0 %v3437_v54 }
 0x822   :  { %2330 = vmatpush1.bf16.msra.mxu1 %v5857_v3  ;;  %v5913_v3 = vld [vmem:[#allocation88_spill] sm:$0xff] }
 0x823   :  { %2331 = vmatprep.subr.bf16.mxu1 %v5903_v53 }
 0x824   :  { %2427 = vmatpush1.bf16.msra.mxu0 %v3438_v61  ;;  %v5924_v61 = vld [vmem:[#allocation73_spill] sm:$0xff] }
 0x825   :  { %2428 = vmatprep.subr.bf16.mxu0 %v3439_v9 }
 0x826   :  { %2332 = vmatpush1.bf16.msra.mxu1 %v5904_v51 }
 0x827   :  { %2439 = vmatprep.subr.bf16.mxu1 %v5905_v62 }
 0x828   :  { %2429 = vmatpush1.bf16.msra.mxu0 %v3440_v15 }
 0x829   :  { %2334 = vmatmul.mubr.bf16.vlgmr.msra.gmra.mrb[64].mxu1 %v5122_v0  ;;  %2480 = vmatprep.subr.bf16.mxu0 %v5906_v23  ;;  %v3451_v0 = vld [vmem:[#allocation8 + $0x248] ss:$24 sps:$4 sm:$0xff]  }
 0x82a   :  { %2440 = vmatpush1.bf16.msra.mxu1 %v5907_v17 }
 0x82b   :  { %2441 = vmatprep.subr.bf16.mxu1 %v5908_v19 }
 0x82e   :  { %2442 = vmatpush1.bf16.msra.mxu1 %v5909_v33 }
 0x82f   :  { %2443 = vmatprep.subr.bf16.mxu1 %v5910_v37 }
 0x832   :  { %2444 = vmatpush1.bf16.msra.mxu1 %v5911_v1  ;;  %v5925_v1 = vld [vmem:[#allocation91_spill] sm:$0xff] }
 0x833   :  { %2445 = vmatprep.subr.bf16.mxu1 %v5912_v35 }
 0x836   :  { %2446 = vmatpush1.bf16.msra.mxu1 %v5913_v3 }
 0x837   :  { %2447 = vmatprep.subr.bf16.mxu1 %v5914_v8 }
 0x83a   :  { %2448 = vmatpush1.bf16.msra.mxu1 %v5915_v63 }
 0x83b   :  { %2449 = vmatprep.subr.bf16.mxu1 %v5916_v40 }
 0x83e   :  { %2450 = vmatpush1.bf16.msra.mxu1 %v5917_v60 }
 0x83f   :  { %2451 = vmatprep.subr.bf16.mxu1 %v5918_v41 }
 0x842   :  { %2452 = vmatpush1.bf16.msra.mxu1 %v5919_v12 }
 0x843   :  { %2453 = vmatprep.subr.bf16.mxu1 %v5920_v43 }
 0x846   :  { %2454 = vmatpush1.bf16.msra.mxu1 %v3441_v44 }
 0x847   :  { %2455 = vmatprep.subr.bf16.mxu1 %v3442_v26 }
 0x84a   :  { %2456 = vmatpush1.bf16.msra.mxu1 %v3443_v18 }
 0x84b   :  { %2457 = vmatprep.subr.bf16.mxu1 %v3444_v24 }
 0x84e   :  { %2458 = vmatpush1.bf16.msra.mxu1 %v3445_v14 }
 0x84f   :  { %2459 = vmatprep.subr.bf16.mxu1 %v3446_v27 }
 0x852   :  { %2460 = vmatpush1.bf16.msra.mxu1 %v3447_v52 }
 0x853   :  { %2461 = vmatprep.subr.bf16.mxu1 %v3448_v47 }
 0x856   :  { %2462 = vmatpush1.bf16.msra.mxu1 %v3449_v31  ;;  %v5926_v31 = vld [vmem:[#allocation72_spill] sm:$0xff] }
 0x857   :  { %2463 = vmatprep.subr.bf16.mxu1 %v3450_v29 }
 0x85a   :  { %2464 = vmatpush1.bf16.msra.mxu1 %v3451_v0 }
 0x85b   :  { %2465 = vmatprep.subr.bf16.mxu1 %v3452_v16 }
 0x85e   :  { %2466 = vmatpush1.bf16.msra.mxu1 %v3453_v4 }
 0x85f   :  { %2467 = vmatprep.subr.bf16.mxu1 %v3454_v22  ;;  %v5927_v22 = vld [vmem:[#allocation74_spill] sm:$0xff] }
 0x862   :  { %2468 = vmatpush1.bf16.msra.mxu1 %v3455_v20 }
 0x863   :  { %2469 = vmatprep.subr.bf16.mxu1 %v3456_v46 }
 0x866   :  { %2470 = vmatpush1.bf16.msra.mxu1 %v3457_v59 }
 0x8bc   :  { %v2253_v48 = vpop.f32.mrb[60].mxu1 }
 0x8bd   :  { %v2254_v10 = vadd.f32 %v2253_v48, %v5921_v25  ;;  %v2294_v42 = vpop.f32.mrb[60].mxu0  ;;  %v2255_v11 = vpop.f32.mrb[61].mxu1 }
 0x8be   :  { %v2256_v5 = vadd.f32 %v2255_v11, %v5766_v49  ;;  %v2296_v21 = vpop.f32.mrb[61].mxu0  ;;  %v2257_v36 = vpop.f32.mrb[62].mxu1  ;;  %v2295_v19 = vadd.f32 %v2294_v42, %v4212_v58 }
 0x8bf   :  { %v2346_v2 = vadd.f32 %v2254_v10, %v5922_v45  ;;  %v2297_v28 = vadd.f32 %v2296_v21, %v4200_v30  ;;  %v2298_v13 = vpop.f32.mrb[62].mxu0  ;;  %v2258_v50 = vpop.f32.mrb[63].mxu1  ;;  %v5203_v21 = vld [vmem:[%s5269_s6] ss:$0 sm:$0xff] }
 0x8c0   :  { %v2353_v34 = vadd.f32 %v2256_v5, %v5923_v7  ;;  %v2299_v54 = vpop.f32.mrb[63].mxu0  ;;  %v3460_v13 = vld [vmem:[#allocation8 + $0x44] ss:$24 sps:$4 sm:$0xff]   ;;  %v3461_v50 = vld [vmem:[#allocation8 + $0x40] ss:$24 sps:$4 sm:$0xff]  }
 0x8c1   :  { %v2906_v53 = vmul.f32 -1.442695, %v2346_v2  ;;  %v2371_v9 = vadd.f32 %v2297_v28, %v5924_v61  ;;  %v3459_v28 = vld [vmem:[#allocation8 + $0x10] ss:$24 sps:$4 sm:$0xff]   ;;  %v3462_v7 = vld [vmem:[#allocation8 + $0x74] ss:$24 sps:$4 sm:$0xff]  }
 0x8c2   :  { %v2907_v51 = vmul.f32 -1.442695, %v2353_v34  ;;  %v3463_v34 = vld [vmem:[#allocation8 + $0x70] ss:$24 sps:$4 sm:$0xff]   ;;  %v3464_v54 = vld [vmem:[#allocation8 + $0xa4] ss:$24 sps:$4 sm:$0xff]  }
 0x8c3   :  { %3238 = vpow2.f32 %v2906_v53  ;;  %v2908_v3 = vmul.f32 -1.442695, %v2371_v9  ;;  %v3465_v53 = vld [vmem:[#allocation8 + $0xa0] ss:$24 sps:$4 sm:$0xff]   ;;  %v3466_v61 = vld [vmem:[#allocation8 + $0xd4] ss:$24 sps:$4 sm:$0xff]  }
 0x8c4   :  { %3240 = vpow2.f32 %v2907_v51  ;;  %v3467_v9 = vld [vmem:[#allocation8 + $0xd0] ss:$24 sps:$4 sm:$0xff]   ;;  %v3468_v51 = vld [vmem:[#allocation8 + $0x104] ss:$24 sps:$4 sm:$0xff]  }
 0x8cd   :  { %v3239_v62 = vpop.eup %3238 }
 0x8ce   :  { %v2350_v15 = vadd.f32 1.0, %v3239_v62  ;;  %v3241_v23 = vpop.eup %3240  ;;  %v3469_v62 = vld [vmem:[#allocation8 + $0x100] ss:$24 sps:$4 sm:$0xff]  }
 0x8cf   :  { %v2357_v17 = vadd.f32 1.0, %v3241_v23  ;;  %v3471_v23 = vld [vmem:[#allocation8 + $0x130] ss:$24 sps:$4 sm:$0xff]  }
 0x8d0   :  { %3242 = vrcp.f32 %v2350_v15  ;;  %v3470_v15 = vld [vmem:[#allocation8 + $0x134] ss:$24 sps:$4 sm:$0xff]  }
 0x8d1   :  { %3244 = vrcp.f32 %v2357_v17  ;;  %v3472_v17 = vld [vmem:[#allocation8 + $0x164] ss:$24 sps:$4 sm:$0xff]  }
 0x8da   :  { %v3243_v33 = vpop.eup %3242 }
 0x8db   :  { %v2360_v37 = vmul.f32 %v3243_v33, %v2295_v19  ;;  %v3245_v8 = vpop.eup %3244  ;;  %v3473_v19 = vld [vmem:[#allocation8 + $0x160] ss:$24 sps:$4 sm:$0xff]   ;;  %v3474_v33 = vld [vmem:[#allocation8 + $0x194] ss:$24 sps:$4 sm:$0xff]  }
 0x8dc   :  { %v2363_v63 = vsub.f32 1.0, %v3245_v8  ;;  %v2365_v41 = vmul.f32 %v3245_v8, %v5105_v39  ;;  %v3479_v8 = vld [vmem:[#allocation8 + $0x1f0] ss:$24 sps:$4 sm:$0xff]  }
 0x8dd   :  { %v2361_v35 = vadd.f32 %v2360_v37, %v5925_v1  ;;  %v3475_v37 = vld [vmem:[#allocation8 + $0x190] ss:$24 sps:$4 sm:$0xff]   ;;  %v3476_v1 = vld [vmem:[#allocation8 + $0x1c4] ss:$24 sps:$4 sm:$0xff]  }
 0x8df   :  { %3246 = vtanh.f32 %v2361_v35  ;;  %v3477_v35 = vld [vmem:[#allocation8 + $0x1c0] ss:$24 sps:$4 sm:$0xff]  }
 0x8e0   :  { %3248 = vpow2.f32 %v2908_v3  ;;  %v3478_v3 = vld [vmem:[#allocation8 + $0x1f4] ss:$24 sps:$4 sm:$0xff]  }
 0x8e9   :  { %v3247_v40 = vpop.eup %3246 }
 0x8ea   :  { %v2364_v60 = vmul.f32 %v3247_v40, %v2363_v63  ;;  %v3249_v43 = vpop.eup %3248  ;;  %v3480_v63 = vld [vmem:[#allocation8 + $0x224] ss:$24 sps:$4 sm:$0xff]   ;;  %v3481_v40 = vld [vmem:[#allocation8 + $0x220] ss:$24 sps:$4 sm:$0xff]  }
 0x8eb   :  { %v2375_v26 = vadd.f32 1.0, %v3249_v43  ;;  %v3484_v43 = vld [vmem:[#allocation8 + $0x284] ss:$24 sps:$4 sm:$0xff]  }
 0x8ec   :  { %v5189_v12 = vadd.f32 %v2365_v41, %v2364_v60  ;;  %v3482_v60 = vld [vmem:[#allocation8 + $0x254] ss:$24 sps:$4 sm:$0xff]   ;;  %v3483_v41 = vld [vmem:[#allocation8 + $0x250] ss:$24 sps:$4 sm:$0xff]  }
 0x8ed   :  { %3250 = vrcp.f32 %v2375_v26  ;;  %v3486_v26 = vld [vmem:[#allocation8 + $0x2b4] ss:$24 sps:$4 sm:$0xff]  }
 0x8ee   :  { %v2603_v44 = vmul.f32 %v4808_v6, %v5189_v12  ;;  %v5211_v2 = vpack.c.bf16 %v5189_v12, %v5189_v12 }
 0x8f0   :  { %2617 = vadd.xlane.f32.xlu0 %v2603_v44  ;;  %v3485_v44 = vld [vmem:[#allocation8 + $0x280] ss:$24 sps:$4 sm:$0xff]  }
 0x8f7   :  { %v3251_v47 = vpop.eup %3250 }
 0x8fc   :  { %v2335_v18 = vpop.f32.mrb[64].mxu1 }
 0x8fd   :  { %v2336_v24 = vadd.f32 %v2335_v18, %v4228_v32  ;;  %v2337_v14 = vpop.f32.mrb[65].mxu1  ;;  %v3487_v18 = vld [vmem:[#allocation8 + $0x2b0] ss:$24 sps:$4 sm:$0xff]  }
 0x8fe   :  { %v2338_v27 = vadd.f32 %v2337_v14, %v4232_v56  ;;  %v2339_v52 = vpop.f32.mrb[66].mxu1  ;;  %v3489_v14 = vld [vmem:[#allocation8 + $0x2e0] ss:$24 sps:$4 sm:$0xff]  }
 0x8ff   :  { %v2378_v29 = vadd.f32 %v2336_v24, %v5926_v31  ;;  %v2340_v0 = vpop.f32.mrb[67].mxu1  ;;  %v3488_v24 = vld [vmem:[#allocation8 + $0x2e4] ss:$24 sps:$4 sm:$0xff]  }
 0x900   :  { %v2385_v16 = vmul.f32 %v3251_v47, %v2338_v27 }
 0x901   :  { %v2909_v4 = vmul.f32 -1.442695, %v2378_v29 }
 0x902   :  { %v2386_v20 = vadd.f32 %v2385_v16, %v5927_v22 }
 0x903   :  { %3252 = vpow2.f32 %v2909_v4  ;;  %v5928_v4 = vld [vmem:[#allocation64_spill] sm:$0xff] }
 0x90d   :  { %v3253_v6 = vpop.eup %3252 }
 0x90e   :  { %v2382_v46 = vadd.f32 1.0, %v3253_v6 }
 0x910   :  { %3254 = vrcp.f32 %v2382_v46 }
 0x911   :  { %3256 = vtanh.f32 %v2386_v20 }
 0x91a   :  { %v3255_v59 = vpop.eup %3254 }
 0x91b   :  { %v2388_v48 = vsub.f32 1.0, %v3255_v59  ;;  %v3257_v10 = vpop.eup %3256  ;;  %v2390_v11 = vmul.f32 %v3255_v59, %v5114_v38  ;;  %v5929_v59 = vld [vmem:[#allocation66_spill] sm:$0xff] }
 0x91d   :  { %v2389_v42 = vmul.f32 %v3257_v10, %v2388_v48 }
 0x91f   :  { %v5198_v5 = vadd.f32 %v2390_v11, %v2389_v42  ;;  %v5930_v11 = vld [vmem:[#allocation69_spill] sm:$0xff] }
 0x921   :  { %v2628_v36 = vmul.f32 %v5203_v21, %v5198_v5  ;;  %v2397_v45 = vpack.c.bf16 %v5198_v5, %v5198_v5 }
 0x923   :  { %2637 = vadd.xlane.f32.xlu1 %v2628_v36  ;;  %2430 = vmatprep.mubr.bf16.mxu0 %v2397_v45 }
 0x924   :  { %2471 = vmatprep.mubr.bf16.mxu1 %v2397_v45  ;;  %2431 = vmatmul.mubr.bf16.vlgmr.msra.gmra.mrb[64].mxu0 %v5211_v2 }
 0x925   :  { %2472 = vmatmul.mubr.bf16.vlgmr.msra.gmra.mrb[68].mxu1 %v5211_v2  ;;  %2481 = vmatpush1.bf16.msra.mxu0 %v3459_v28 }
 0x926   :  { %2512 = vmatprep.mubr.bf16.mxu0 %v2397_v45  ;;  %2482 = vmatprep.subr.bf16.mxu0 %v3460_v13 }
 0x929   :  { %2483 = vmatpush1.bf16.msra.mxu0 %v3461_v50 }
 0x92a   :  { %2484 = vmatprep.subr.bf16.mxu0 %v3462_v7  ;;  %v5931_v7 = vld [vmem:[#allocation95_spill] sm:$0xff] }
 0x92d   :  { %2485 = vmatpush1.bf16.msra.mxu0 %v3463_v34 }
 0x92e   :  { %2486 = vmatprep.subr.bf16.mxu0 %v3464_v54 }
 0x931   :  { %2487 = vmatpush1.bf16.msra.mxu0 %v3465_v53 }
 0x932   :  { %2488 = vmatprep.subr.bf16.mxu0 %v3466_v61 }
 0x935   :  { %2489 = vmatpush1.bf16.msra.mxu0 %v3467_v9 }
 0x936   :  { %2490 = vmatprep.subr.bf16.mxu0 %v3468_v51 }
 0x939   :  { %2491 = vmatpush1.bf16.msra.mxu0 %v3469_v62 }
 0x93a   :  { %2492 = vmatprep.subr.bf16.mxu0 %v3470_v15 }
 0x93d   :  { %2493 = vmatpush1.bf16.msra.mxu0 %v3471_v23 }
 0x93e   :  { %2494 = vmatprep.subr.bf16.mxu0 %v3472_v17 }
 0x941   :  { %2495 = vmatpush1.bf16.msra.mxu0 %v3473_v19 }
 0x942   :  { %2496 = vmatprep.subr.bf16.mxu0 %v3474_v33  ;;  %v5932_v33 = vld [vmem:[#allocation99_spill] sm:$0xff] }
 0x945   :  { %2497 = vmatpush1.bf16.msra.mxu0 %v3475_v37  ;;  %v2634_v37 = vmul.f32 %v5203_v21, %v5932_v33 }
 0x946   :  { %2498 = vmatprep.subr.bf16.mxu0 %v3476_v1 }
 0x949   :  { %2499 = vmatpush1.bf16.msra.mxu0 %v3477_v35 }
 0x94a   :  { %2500 = vmatprep.subr.bf16.mxu0 %v3478_v3 }
 0x94d   :  { %2501 = vmatpush1.bf16.msra.mxu0 %v3479_v8 }
 0x94e   :  { %2502 = vmatprep.subr.bf16.mxu0 %v3480_v63 }
 0x951   :  { %2503 = vmatpush1.bf16.msra.mxu0 %v3481_v40 }
 0x952   :  { %2504 = vmatprep.subr.bf16.mxu0 %v3482_v60  ;;  %v5933_v60 = vld [vmem:[#allocation68_spill] sm:$0xff] }
 0x955   :  { %2505 = vmatpush1.bf16.msra.mxu0 %v3483_v41 }
 0x956   :  { %2506 = vmatprep.subr.bf16.mxu0 %v3484_v43 }
 0x959   :  { %2507 = vmatpush1.bf16.msra.mxu0 %v3485_v44 }
 0x95a   :  { %2508 = vmatprep.subr.bf16.mxu0 %v3486_v26 }
 0x95d   :  { %2509 = vmatpush1.bf16.msra.mxu0 %v3487_v18  ;;  %v5934_v18 = vld [vmem:[#allocation70_spill] sm:$0xff] }
 0x95e   :  { %2510 = vmatprep.subr.bf16.mxu0 %v3488_v24 }
 0x961   :  { %2511 = vmatpush1.bf16.msra.mxu0 %v3489_v14 }
 0x964   :  { %2513 = vmatmul.mubr.bf16.vlgmr.msra.gmra.mrb[68].mxu0 %v5211_v2 }
 0x9f7   :  { %v2432_v27 = vpop.f32.mrb[64].mxu0 }
 0x9f8   :  { %v2433_v52 = vadd.f32 %v2432_v27, %v5921_v25  ;;  %v2473_v47 = vpop.f32.mrb[68].mxu1  ;;  %v2434_v31 = vpop.f32.mrb[65].mxu0 }
 0x9f9   :  { %v2435_v29 = vadd.f32 %v2434_v31, %v5766_v49  ;;  %v2475_v0 = vpop.f32.mrb[69].mxu1  ;;  %v2436_v16 = vpop.f32.mrb[66].mxu0  ;;  %v2474_v13 = vadd.f32 %v2473_v47, %v4212_v58  ;;  %v3490_v58 = vld [vmem:[%s5268_s5] ss:$0 sm:$0xff] }
 0x9fa   :  { %v2525_v22 = vadd.f32 %v2433_v52, %v5928_v4  ;;  %v2476_v20 = vadd.f32 %v2475_v0, %v4200_v30  ;;  %v2477_v6 = vpop.f32.mrb[70].mxu1  ;;  %v2437_v46 = vpop.f32.mrb[67].mxu0  ;;  %v5935_v16 = vld [vmem:[#allocation29_spill] sm:$0xff] }
 0x9fb   :  { %v2532_v48 = vadd.f32 %v2435_v29, %v5929_v59  ;;  %v2478_v10 = vpop.f32.mrb[71].mxu1  ;;  %v2633_v4 = vmul.f32 %v5203_v21, %v5935_v16  ;;  %v2606_v6 = vpop.xlane.xlu0 %2605 }
 0x9fc   :  { %v2910_v42 = vmul.f32 -1.442695, %v2525_v22  ;;  %v2549_v36 = vadd.f32 %v2476_v20, %v5930_v11  ;;  %v2610_v22 = vpop.xlane.xlu1 %2609 }
 0x9fd   :  { %v2911_v25 = vmul.f32 -1.442695, %v2532_v48 }
 0x9fe   :  { %3258 = vpow2.f32 %v2910_v42  ;;  %v2912_v54 = vmul.f32 -1.442695, %v2549_v36 }
 0x9ff   :  { %3260 = vpow2.f32 %v2911_v25  ;;  %v2608_v59 = vpop.xlane.xlu0 %2607 }
 0xa00   :  { %v2646_v20 = vpop.xlane.xlu1 %2645 }
 0xa03   :  { %v2644_v10 = vpop.xlane.xlu0 %2643 }
 0xa04   :  { %v2612_v46 = vpop.xlane.xlu1 %2611 }
 0xa07   :  { %v2614_v11 = vpop.xlane.xlu0 %2613 }
 0xa08   :  { %v3259_v45 = vpop.eup %3258  ;;  %v2642_v48 = vpop.xlane.xlu1 %2641 }
 0xa09   :  { %v2529_v2 = vadd.f32 1.0, %v3259_v45  ;;  %v3261_v49 = vpop.eup %3260 }
 0xa0a   :  { %v2536_v28 = vadd.f32 1.0, %v3261_v49 }
 0xa0b   :  { %3262 = vrcp.f32 %v2529_v2  ;;  %v2640_v25 = vpop.xlane.xlu0 %2639 }
 0xa0c   :  { %3264 = vrcp.f32 %v2536_v28  ;;  %v2616_v42 = vpop.xlane.xlu1 %2615 }
 0xa0f   :  { %v2618_v2 = vpop.xlane.xlu0 %2617 }
 0xa10   :  { %v2638_v36 = vpop.xlane.xlu1 %2637 }
 0xa15   :  { %v3263_v50 = vpop.eup %3262 }
 0xa16   :  { %v2539_v30 = vmul.f32 %v3263_v50, %v2474_v13  ;;  %v3265_v53 = vpop.eup %3264  ;;  %v2655_v50 = vadd.f32 %v2644_v10, %v2614_v11 }
 0xa17   :  { %v2542_v61 = vsub.f32 1.0, %v3265_v53  ;;  %v2544_v62 = vmul.f32 %v3265_v53, %v5189_v12  ;;  %v2653_v53 = vadd.f32 %v2640_v25, %v2610_v22 }
 0xa18   :  { %v2540_v34 = vadd.f32 %v2539_v30, %v5931_v7  ;;  %v2652_v30 = vadd.f32 %v2638_v36, %v2608_v59  ;;  %v2654_v7 = vadd.f32 %v2642_v48, %v2612_v46 }
 0xa1a   :  { %3266 = vtanh.f32 %v2540_v34 }
 0xa1b   :  { %3268 = vpow2.f32 %v2912_v54  ;;  %v2656_v54 = vadd.f32 %v2646_v20, %v2616_v42 }
 0xa24   :  { %v3267_v9 = vpop.eup %3266 }
 0xa25   :  { %v2543_v51 = vmul.f32 %v3267_v9, %v2542_v61  ;;  %v3269_v23 = vpop.eup %3268 }
 0xa26   :  { %v2553_v19 = vadd.f32 1.0, %v3269_v23 }
 0xa27   :  { %v5225_v15 = vadd.f32 %v2544_v62, %v2543_v51  ;;  %v2660_v51 = vmax.f32 %v2652_v30, %v2656_v54 }
 0xa28   :  { %3270 = vrcp.f32 %v2553_v19 }
 0xa29   :  { %v2604_v17 = vmul.f32 %v3490_v58, %v5225_v15 }
 0xa2b   :  { %2619 = vadd.xlane.f32.xlu1 %v2604_v17 }
 0xa2f   :  { %2649 = vadd.xlane.f32.xlu1 %v2634_v37 }
 0xa32   :  { %v3271_v40 = vpop.eup %3270 }
 0xa37   :  { %v2514_v1 = vpop.f32.mrb[68].mxu0 }
 0xa38   :  { %v2515_v35 = vadd.f32 %v2514_v1, %v4228_v32  ;;  %v2516_v3 = vpop.f32.mrb[69].mxu0 }
 0xa39   :  { %v2517_v8 = vadd.f32 %v2516_v3, %v4232_v56  ;;  %v2518_v63 = vpop.f32.mrb[70].mxu0 }
 0xa3a   :  { %v2556_v41 = vadd.f32 %v2515_v35, %v5933_v60  ;;  %v2519_v43 = vpop.f32.mrb[71].mxu0 }
 0xa3b   :  { %v2563_v44 = vmul.f32 %v3271_v40, %v2517_v8 }
 0xa3c   :  { %v2913_v26 = vmul.f32 -1.442695, %v2556_v41 }
 0xa3d   :  { %v2564_v24 = vadd.f32 %v2563_v44, %v5934_v18 }
 0xa3e   :  { %3272 = vpow2.f32 %v2913_v26 }
 0xa48   :  { %v3273_v14 = vpop.eup %3272 }
 0xa49   :  { %v2560_v27 = vadd.f32 1.0, %v3273_v14 }
 0xa4b   :  { %3274 = vrcp.f32 %v2560_v27 }
 0xa4c   :  { %3276 = vtanh.f32 %v2564_v24 }
 0xa55   :  { %v3275_v52 = vpop.eup %3274 }
 0xa56   :  { %v2566_v47 = vsub.f32 1.0, %v3275_v52  ;;  %v3277_v32 = vpop.eup %3276  ;;  %v2568_v56 = vmul.f32 %v3275_v52, %v5198_v5 }
 0xa58   :  { %v2567_v31 = vmul.f32 %v3277_v32, %v2566_v47 }
 0xa5a   :  { %v5238_v29 = vadd.f32 %v2568_v56, %v2567_v31 }
 0xa5c   :  { %v2627_v0 = vmul.f32 %v5203_v21, %v5238_v29 }
 0xa5e   :  { %2635 = vadd.xlane.f32.xlu0 %v2627_v0 }
 0xa62   :  { %2647 = vadd.xlane.f32.xlu0 %v2633_v4 }
 0xab8   :  { %v2620_v45 = vpop.xlane.xlu1 %2619 }
 0xabc   :  { %v2650_v49 = vpop.xlane.xlu1 %2649 }
 0xabd   :  { %v2658_v21 = vadd.f32 %v2650_v49, %v2620_v45  ;;  %v5936_v49 = vld [vmem:[#allocation98_spill] sm:$0xff] }
 0xabf   :  { %v2662_v62 = vmax.f32 %v2654_v7, %v2658_v21 }
 0xaeb   :  { %v2636_v28 = vpop.xlane.xlu0 %2635 }
 0xaec   :  { %v2651_v13 = vadd.f32 %v2636_v28, %v2606_v6 }
 0xaee   :  { %v2659_v61 = vmax.f32 %v2651_v13, %v2655_v50 }
 0xaef   :  { %v2648_v34 = vpop.xlane.xlu0 %2647 }
 0xaf0   :  { %v2657_v9 = vadd.f32 %v2648_v34, %v2618_v2  ;;  %v2663_v58 = vmax.f32 %v2659_v61, %v2660_v51 }
 0xaf2   :  { %v2661_v23 = vmax.f32 %v2653_v53, %v2657_v9 }
 0xaf4   :  { %v2664_v17 = vmax.f32 %v2661_v23, %v2662_v62 }
 0xaf6   :  { %v2665_v19 = vmax.f32 %v2663_v58, %v2664_v17 }
 0xaf8   :  { %v2666_v37 = vsub.f32 %v2651_v13, %v2665_v19  ;;  %v2667_v1 = vsub.f32 %v2652_v30, %v2665_v19  ;;  %v2668_v35 = vsub.f32 %v2653_v53, %v2665_v19  ;;  %v2669_v3 = vsub.f32 %v2654_v7, %v2665_v19  ;;  %v5937_v13 = vld [vmem:[#allocation51_spill] sm:$0xff] }
 0xaf9   :  { %v2670_v40 = vsub.f32 %v2655_v50, %v2665_v19  ;;  %v2671_v41 = vsub.f32 %v2656_v54, %v2665_v19  ;;  %v2672_v44 = vsub.f32 %v2657_v9, %v2665_v19  ;;  %v2673_v18 = vsub.f32 %v2658_v21, %v2665_v19  ;;  %v5938_v21 = vld [vmem:[#allocation54_spill] sm:$0xff]  ;;  %v5939_v9 = vld [vmem:[#allocation97_spill] sm:$0xff] }
 0xafa   :  { %v2674_v8 = vmul.f32 1.442695, %v2666_v37  ;;  %v2676_v63 = vmul.f32 1.442695, %v2667_v1  ;;  %v2678_v60 = vmul.f32 1.442695, %v2668_v35 }
 0xafb   :  { %v2680_v43 = vmul.f32 1.442695, %v2669_v3  ;;  %v2682_v26 = vmul.f32 1.442695, %v2670_v40  ;;  %v2684_v24 = vmul.f32 1.442695, %v2671_v41 }
 0xafc   :  { %3278 = vpow2.f32 %v2674_v8  ;;  %v2686_v14 = vmul.f32 1.442695, %v2672_v44  ;;  %v2688_v27 = vmul.f32 1.442695, %v2673_v18 }
 0xafd   :  { %3280 = vpow2.f32 %v2676_v63  ;;  %v5940_v63 = vld [vmem:[#allocation65_spill] sm:$0xff] }
 0xafe   :  { %3282 = vpow2.f32 %v2678_v60 }
 0xaff   :  { %3284 = vpow2.f32 %v2680_v43  ;;  %v5941_v43 = vld [vmem:[#allocation61_spill] sm:$0xff] }
 0xb00   :  { %3286 = vpow2.f32 %v2682_v26 }
 0xb01   :  { %3288 = vpow2.f32 %v2684_v24 }
 0xb02   :  { %3290 = vpow2.f32 %v2686_v14 }
 0xb03   :  { %3292 = vpow2.f32 %v2688_v27 }
 0xb06   :  { %v3279_v52 = vpop.eup %3278 }
 0xb07   :  { %v3281_v47 = vpop.eup %3280 }
 0xb08   :  { %v2690_v32 = vadd.f32 %v3281_v47, %v3279_v52  ;;  %v3283_v31 = vpop.eup %3282 }
 0xb09   :  { %v3285_v0 = vpop.eup %3284 }
 0xb0a   :  { %v2691_v56 = vadd.f32 %v3283_v31, %v2690_v32  ;;  %v3287_v22 = vpop.eup %3286 }
 0xb0b   :  { %v3289_v6 = vpop.eup %3288 }
 0xb0c   :  { %v2692_v4 = vadd.f32 %v3285_v0, %v2691_v56  ;;  %v3291_v59 = vpop.eup %3290 }
 0xb0d   :  { %v3293_v10 = vpop.eup %3292 }
 0xb0e   :  { %v2693_v20 = vadd.f32 %v3287_v22, %v2692_v4 }
 0xb10   :  { %v2694_v46 = vadd.f32 %v3289_v6, %v2693_v20 }
 0xb12   :  { %v2695_v48 = vadd.f32 %v3291_v59, %v2694_v46 }
 0xb14   :  { %v2696_v42 = vadd.f32 %v3293_v10, %v2695_v48 }
 0xb16   :  { %3294 = vrcp.f32 %v2696_v42 }
 0xb20   :  { %v3295_v11 = vpop.eup %3294 }
 0xb21   :  { %v2698_v36 = vmul.f32 %v3295_v11, %v3279_v52  ;;  %v2699_v25 = vmul.f32 %v3295_v11, %v3281_v47  ;;  %v2700_v45 = vmul.f32 %v3295_v11, %v3283_v31  ;;  %v2701_v2 = vmul.f32 %v3295_v11, %v3285_v0 }
 0xb22   :  { %v2702_v30 = vmul.f32 %v3295_v11, %v3287_v22  ;;  %v2703_v61 = vmul.f32 %v3295_v11, %v3289_v6  ;;  %v2704_v17 = vmul.f32 %v3295_v11, %v3291_v59  ;;  %v2705_v3 = vmul.f32 %v3295_v11, %v3293_v10 }
 0xb23   :  { %v2706_v28 = vmul.f32 %v2698_v36, %v5936_v49  ;;  %v2707_v50 = vmul.f32 %v2699_v25, %v5937_v13  ;;  %v2708_v7 = vmul.f32 %v2700_v45, %v5938_v21  ;;  %v2721_v54 = vmul.f32 %v2698_v36, %v5238_v29 }
 0xb24   :  { %v2722_v53 = vmul.f32 %v2699_v25, %v5198_v5  ;;  %v2709_v51 = vmul.f32 %v2701_v2, %v5939_v9  ;;  %v2723_v23 = vmul.f32 %v2700_v45, %v5114_v38  ;;  %v2710_v19 = vmul.f32 %v2702_v30, %v4935_v57 }
 0xb25   :  { %v2714_v34 = vadd.f32 %v2707_v50, %v2706_v28  ;;  %v2724_v1 = vmul.f32 %v2701_v2, %v4944_v55  ;;  %v2711_v8 = vmul.f32 %v2703_v61, %v5105_v39  ;;  %v2725_v5 = vmul.f32 %v2702_v30, %v5940_v63 }
 0xb26   :  { %v2729_v58 = vadd.f32 %v2722_v53, %v2721_v54  ;;  %v2712_v60 = vmul.f32 %v2704_v17, %v5189_v12  ;;  %v2726_v38 = vmul.f32 %v2703_v61, %v5941_v43  ;;  %v2713_v26 = vmul.f32 %v2705_v3, %v5225_v15 }
 0xb27   :  { %v2715_v62 = vadd.f32 %v2714_v34, %v2708_v7  ;;  %v2727_v18 = vmul.f32 %v2704_v17, %v5935_v16  ;;  %v2728_v14 = vmul.f32 %v2705_v3, %v5932_v33 }
 0xb28   :  { %v2730_v35 = vadd.f32 %v2729_v58, %v2723_v23 }
 0xb29   :  { %v2716_v37 = vadd.f32 %v2715_v62, %v2709_v51 }
 0xb2a   :  { %v2731_v40 = vadd.f32 %v2730_v35, %v2724_v1 }
 0xb2b   :  { %v2717_v29 = vadd.f32 %v2716_v37, %v2710_v19 }
 0xb2c   :  { %v2732_v44 = vadd.f32 %v2731_v40, %v2725_v5 }
 0xb2d   :  { %v2718_v41 = vadd.f32 %v2717_v29, %v2711_v8 }
 0xb2e   :  { %v2733_v55 = vadd.f32 %v2732_v44, %v2726_v38 }
 0xb2f   :  { %v2719_v57 = vadd.f32 %v2718_v41, %v2712_v60 }
 0xb30   :  { %v2734_v39 = vadd.f32 %v2733_v55, %v2727_v18 }
 0xb31   :  { %v2720_v24 = vadd.f32 %v2719_v57, %v2713_v26 }
 0xb32   :  { %v2735_v27 = vadd.f32 %v2734_v39, %v2728_v14 }
 0xb34   :  { %v2919_v52 = vpack.c.bf16 %v2735_v27, %v2720_v24 }
 0xb36   :  { %2920 = vst [vmem:[%s5270_s7] sm:$0xff] %v2919_v52  }
 0xb37   :  { %2744 = vsyncpa [#allocation7], 1 }
 0xb38   :  { %2745 = vsyncpa [#allocation9], 1 }

// kernel: han_forward.3
= control target key start
LH: loop header
LB: loop body
LE: loop exit
PB: predicated region body
PF: predicated region fallthrough
CT: control target
= control target key end

     0   :  { %v139_v38 = vlaneseq  ;;  %v3391_v39 = vmov 1966171168   ;;  %s5194_s0 = inlined_call_operand.vmem [shape: bf16[4,2,256], index: 0, kind: input, shape index: {}]   ;;  %s5195_s1 = inlined_call_operand.vmem [shape: bf16[256,768], index: 1, kind: input, shape index: {}]   ;;  %s5196_s2 = inlined_call_operand.vmem [shape: f32[1,768], index: 2, kind: input, shape index: {}]   ;;  %s5197_s3 = inlined_call_operand.vmem [shape: bf16[256,768], index: 3, kind: input, shape index: {}]   ;;  %s5198_s4 = inlined_call_operand.vmem [shape: f32[1,768], index: 4, kind: input, shape index: {}]   ;;  %s5199_s5 = inlined_call_operand.vmem [shape: f32[1,128], index: 5, kind: input, shape index: {}]   ;;  %s5200_s6 = inlined_call_operand.vmem [shape: f32[1,128], index: 6, kind: input, shape index: {}]   ;;  %s5201_s7 = inlined_call_operand.vmem [shape: bf16[128,8], index: 7, kind: input, shape index: {}]   ;;  %s5202_s8 = inlined_call_operand.vmem [shape: bf16[128,8], index: 8, kind: input, shape index: {}]   ;;  %s5203_s9 = inlined_call_operand.vmem [shape: f32[1,8], index: 9, kind: input, shape index: {}]   ;;  %s5204_s10 = inlined_call_operand.hbm [shape: f32[2,8], index: 10, kind: output, shape index: {}]  }
   0x1   :  { %v2877_v0 = vld [vmem:[%s5195_s1 + $0x4] ss:$24 sps:$4 sm:$0xff]   ;;  %v2881_v2 = vld [vmem:[%s5195_s1] ss:$24 sps:$4 sm:$0xff]   ;;  %v2883_v4 = vld [vmem:[%s5195_s1 + $0x34] ss:$24 sps:$4 sm:$0xff]   ;;  %v176_v40 = vunpack.c.l.s4 %v3391_v39 }
   0x2   :  { %v2879_v1 = vld [vmem:[%s5195_s1 + $0xc] ss:$24 sps:$4 sm:$0xff]   ;;  %687 = vmatprep.subr.bf16.mxu0 %v2877_v0  ;;  %v2882_v3 = vld [vmem:[%s5195_s1 + $0x8] ss:$24 sps:$4 sm:$0xff]   ;;  %v2885_v5 = vld [vmem:[%s5195_s1 + $0x3c] ss:$24 sps:$4 sm:$0xff]  }
   0x3   :  { %728 = vmatprep.subr.bf16.mxu1 %v2879_v1  ;;  %688 = vmatpush1.bf16.msra.mxu0 %v2881_v2  ;;  %v2887_v6 = vld [vmem:[%s5195_s1 + $0x30] ss:$24 sps:$4 sm:$0xff]   ;;  %v2889_v8 = vld [vmem:[%s5195_s1 + $0x64] ss:$24 sps:$4 sm:$0xff]   ;;  %v2893_v10 = vld [vmem:[%s5195_s1 + $0x60] ss:$24 sps:$4 sm:$0xff]   ;;  %v177_v46 = vunpack.c.0.s8 %v176_v40 }
   0x4   :  { %729 = vmatpush1.bf16.msra.mxu1 %v2882_v3  ;;  %689 = vmatprep.subr.bf16.mxu0 %v2883_v4  ;;  %v2888_v7 = vld [vmem:[%s5195_s1 + $0x38] ss:$24 sps:$4 sm:$0xff]   ;;  %v2891_v9 = vld [vmem:[%s5195_s1 + $0x6c] ss:$24 sps:$4 sm:$0xff]   ;;  %v2894_v11 = vld [vmem:[%s5195_s1 + $0x68] ss:$24 sps:$4 sm:$0xff]  }
   0x5   :  { %730 = vmatprep.subr.bf16.mxu1 %v2885_v5  ;;  %v2895_v12 = vld [vmem:[%s5195_s1 + $0x94] ss:$24 sps:$4 sm:$0xff]   ;;  %v2899_v14 = vld [vmem:[%s5195_s1 + $0x90] ss:$24 sps:$4 sm:$0xff]   ;;  %v2901_v16 = vld [vmem:[%s5195_s1 + $0xc4] ss:$24 sps:$4 sm:$0xff]  }
   0x6   :  { %v2897_v13 = vld [vmem:[%s5195_s1 + $0x9c] ss:$24 sps:$4 sm:$0xff]   ;;  %v2900_v15 = vld [vmem:[%s5195_s1 + $0x98] ss:$24 sps:$4 sm:$0xff]   ;;  %v2903_v17 = vld [vmem:[%s5195_s1 + $0xcc] ss:$24 sps:$4 sm:$0xff]  }
   0x7   :  { %690 = vmatpush1.bf16.msra.mxu0 %v2887_v6  ;;  %v2905_v18 = vld [vmem:[%s5195_s1 + $0xc0] ss:$24 sps:$4 sm:$0xff]   ;;  %v2907_v20 = vld [vmem:[%s5195_s1 + $0xf4] ss:$24 sps:$4 sm:$0xff]   ;;  %v2911_v22 = vld [vmem:[%s5195_s1 + $0xf0] ss:$24 sps:$4 sm:$0xff]  }
   0x8   :  { %731 = vmatpush1.bf16.msra.mxu1 %v2888_v7  ;;  %691 = vmatprep.subr.bf16.mxu0 %v2889_v8  ;;  %v2906_v19 = vld [vmem:[%s5195_s1 + $0xc8] ss:$24 sps:$4 sm:$0xff]   ;;  %v2909_v21 = vld [vmem:[%s5195_s1 + $0xfc] ss:$24 sps:$4 sm:$0xff]   ;;  %v2912_v23 = vld [vmem:[%s5195_s1 + $0xf8] ss:$24 sps:$4 sm:$0xff]  }
   0x9   :  { %732 = vmatprep.subr.bf16.mxu1 %v2891_v9  ;;  %v2913_v24 = vld [vmem:[%s5195_s1 + $0x124] ss:$24 sps:$4 sm:$0xff]   ;;  %v2917_v26 = vld [vmem:[%s5195_s1 + $0x120] ss:$24 sps:$4 sm:$0xff]   ;;  %v2919_v28 = vld [vmem:[%s5195_s1 + $0x154] ss:$24 sps:$4 sm:$0xff]  }
   0xa   :  { %v2915_v25 = vld [vmem:[%s5195_s1 + $0x12c] ss:$24 sps:$4 sm:$0xff]   ;;  %v2918_v27 = vld [vmem:[%s5195_s1 + $0x128] ss:$24 sps:$4 sm:$0xff]   ;;  %v2921_v29 = vld [vmem:[%s5195_s1 + $0x15c] ss:$24 sps:$4 sm:$0xff]  }
   0xb   :  { %692 = vmatpush1.bf16.msra.mxu0 %v2893_v10  ;;  %v2923_v30 = vld [vmem:[%s5195_s1 + $0x150] ss:$24 sps:$4 sm:$0xff]   ;;  %v2925_v32 = vld [vmem:[%s5195_s1 + $0x184] ss:$24 sps:$4 sm:$0xff]   ;;  %v2929_v34 = vld [vmem:[%s5195_s1 + $0x180] ss:$24 sps:$4 sm:$0xff]  }
   0xc   :  { %733 = vmatpush1.bf16.msra.mxu1 %v2894_v11  ;;  %693 = vmatprep.subr.bf16.mxu0 %v2895_v12  ;;  %v2924_v31 = vld [vmem:[%s5195_s1 + $0x158] ss:$24 sps:$4 sm:$0xff]   ;;  %v2927_v33 = vld [vmem:[%s5195_s1 + $0x18c] ss:$24 sps:$4 sm:$0xff]   ;;  %v2930_v35 = vld [vmem:[%s5195_s1 + $0x188] ss:$24 sps:$4 sm:$0xff]  }
   0xd   :  { %734 = vmatprep.subr.bf16.mxu1 %v2897_v13  ;;  %v2931_v36 = vld [vmem:[%s5195_s1 + $0x1b4] ss:$24 sps:$4 sm:$0xff]   ;;  %v2935_v41 = vld [vmem:[%s5195_s1 + $0x1b0] ss:$24 sps:$4 sm:$0xff]   ;;  %v2937_v43 = vld [vmem:[%s5195_s1 + $0x1e4] ss:$24 sps:$4 sm:$0xff]  }
   0xe   :  { %v2933_v37 = vld [vmem:[%s5195_s1 + $0x1bc] ss:$24 sps:$4 sm:$0xff]   ;;  %v2936_v42 = vld [vmem:[%s5195_s1 + $0x1b8] ss:$24 sps:$4 sm:$0xff]   ;;  %v2939_v44 = vld [vmem:[%s5195_s1 + $0x1ec] ss:$24 sps:$4 sm:$0xff]  }
   0xf   :  { %694 = vmatpush1.bf16.msra.mxu0 %v2899_v14  ;;  %v3578_v45 = vshrl.u32 %v139_v38, 7  ;;  %v2941_v47 = vld [vmem:[%s5195_s1 + $0x1e0] ss:$24 sps:$4 sm:$0xff]   ;;  %v2943_v49 = vld [vmem:[%s5195_s1 + $0x214] ss:$24 sps:$4 sm:$0xff]  }
  0x10   :  { %735 = vmatpush1.bf16.msra.mxu1 %v2900_v15  ;;  %695 = vmatprep.subr.bf16.mxu0 %v2901_v16  ;;  %v2942_v48 = vld [vmem:[%s5195_s1 + $0x1e8] ss:$24 sps:$4 sm:$0xff]   ;;  %v2945_v50 = vld [vmem:[%s5195_s1 + $0x21c] ss:$24 sps:$4 sm:$0xff]   ;;  %v2948_v52 = vld [vmem:[%s5195_s1 + $0x218] ss:$24 sps:$4 sm:$0xff]  }
  0x11   :  { %736 = vmatprep.subr.bf16.mxu1 %v2903_v17  ;;  %5290 = vst [vmem:[#allocation9_spill] sm:$0xff] %v3578_v45  ;;  %v2947_v51 = vld [vmem:[%s5195_s1 + $0x210] ss:$24 sps:$4 sm:$0xff]   ;;  %v37_v53 = vld [vmem:[%s5194_s0] sm:$0x3]  ;;  %v180_v54 = vsub.s32 %v177_v46, %v3578_v45 }
  0x12   :  { %v38_v55 = vld [vmem:[%s5194_s0 + $0x2] sm:$0x3]  ;;  %v39_v56 = vld [vmem:[%s5194_s0 + $0x4] sm:$0x3]  ;;  %v40_v57 = vld [vmem:[%s5194_s0 + $0x6] sm:$0x3] }
  0x13   :  { %696 = vmatpush1.bf16.msra.mxu0 %v2905_v18  ;;  %v2949_v58 = vld [vmem:[%s5195_s1 + $0x244] ss:$24 sps:$4 sm:$0xff]   ;;  %v173_v59 = vcombine.low %v37_v53, %v38_v55  ;;  %v174_v60 = vcombine.low %v39_v56, %v40_v57  ;;  %v2953_v0 = vld [vmem:[%s5195_s1 + $0x240] ss:$24 sps:$4 sm:$0xff]   ;;  %v2955_v2 = vld [vmem:[%s5195_s1 + $0x274] ss:$24 sps:$4 sm:$0xff]  }
  0x14   :  { %737 = vmatpush1.bf16.msra.mxu1 %v2906_v19  ;;  %697 = vmatprep.subr.bf16.mxu0 %v2907_v20  ;;  %v2951_v61 = vld [vmem:[%s5195_s1 + $0x24c] ss:$24 sps:$4 sm:$0xff]   ;;  %v2954_v1 = vld [vmem:[%s5195_s1 + $0x248] ss:$24 sps:$4 sm:$0xff]   ;;  %v2957_v4 = vld [vmem:[%s5195_s1 + $0x27c] ss:$24 sps:$4 sm:$0xff]  }
  0x15   :  { %738 = vmatprep.subr.bf16.mxu1 %v2909_v21  ;;  %v181_v62 = vrot.slane %v173_v59, %v180_v54  ;;  %v188_v63 = vrot.slane %v174_v60, %v180_v54  ;;  %v2959_v6 = vld [vmem:[%s5195_s1 + $0x270] ss:$24 sps:$4 sm:$0xff]   ;;  %v2961_v8 = vld [vmem:[%s5195_s1 + $0x2a4] ss:$24 sps:$4 sm:$0xff]   ;;  %v2965_v10 = vld [vmem:[%s5195_s1 + $0x2a0] ss:$24 sps:$4 sm:$0xff]  }
  0x16   :  { %v2960_v7 = vld [vmem:[%s5195_s1 + $0x278] ss:$24 sps:$4 sm:$0xff]   ;;  %v2963_v9 = vld [vmem:[%s5195_s1 + $0x2ac] ss:$24 sps:$4 sm:$0xff]   ;;  %v2966_v11 = vld [vmem:[%s5195_s1 + $0x2a8] ss:$24 sps:$4 sm:$0xff]  }
  0x17   :  { %698 = vmatpush1.bf16.msra.mxu0 %v2911_v22  ;;  %v190_v3 = vcombine.high %v181_v62, %v188_v63  ;;  %v2967_v12 = vld [vmem:[%s5195_s1 + $0x2d4] ss:$24 sps:$4 sm:$0xff]   ;;  %v2971_v14 = vld [vmem:[%s5195_s1 + $0x2d0] ss:$24 sps:$4 sm:$0xff]   ;;  %v189_v16 = vcombine.low %v181_v62, %v188_v63  ;;  %v3665_v18 = vld [vmem:[%s5197_s3 + $0x4] ss:$24 sps:$4 sm:$0xff]  }
  0x18   :  { %739 = vmatpush1.bf16.msra.mxu1 %v2912_v23  ;;  %699 = vmatprep.subr.bf16.mxu0 %v2913_v24  ;;  %v2969_v13 = vld [vmem:[%s5195_s1 + $0x2dc] ss:$24 sps:$4 sm:$0xff]   ;;  %v2972_v15 = vld [vmem:[%s5195_s1 + $0x2d8] ss:$24 sps:$4 sm:$0xff]  }
  0x19   :  { %740 = vmatprep.subr.bf16.mxu1 %v2915_v25  ;;  %v204_v5 = vrot.slane %v190_v3, %v180_v54  ;;  %v2975_v17 = vld [vmem:[%s5195_s1 + $0x14] ss:$24 sps:$4 sm:$0xff]   ;;  %v3667_v19 = vrot.slane %v189_v16, %v180_v54  ;;  %v2973_v20 = vld [vmem:[%s5195_s1 + $0x10] ss:$24 sps:$4 sm:$0xff]   ;;  %v3675_v21 = vld [vmem:[%s5197_s3] ss:$24 sps:$4 sm:$0xff]  }
  0x1a   :  { %v2981_v22 = vld [vmem:[%s5195_s1 + $0x44] ss:$24 sps:$4 sm:$0xff]   ;;  %v3684_v23 = vld [vmem:[%s5197_s3 + $0x34] ss:$24 sps:$4 sm:$0xff]   ;;  %v2979_v24 = vld [vmem:[%s5195_s1 + $0x40] ss:$24 sps:$4 sm:$0xff]  }
  0x1b   :  { %700 = vmatpush1.bf16.msra.mxu0 %v2917_v26  ;;  %719 = vmatprep.mubr.bf16.mxu0 %v204_v5  ;;  %v3694_v25 = vld [vmem:[%s5197_s3 + $0x30] ss:$24 sps:$4 sm:$0xff]   ;;  %v2987_v26 = vld [vmem:[%s5195_s1 + $0x74] ss:$24 sps:$4 sm:$0xff]   ;;  %v3749_v38 = vld [vmem:[%s5197_s3 + $0xc0] ss:$24 sps:$4 sm:$0xff]  }
  0x1c   :  { %741 = vmatpush1.bf16.msra.mxu1 %v2918_v27  ;;  %701 = vmatprep.subr.bf16.mxu0 %v2919_v28  ;;  %v3704_v27 = vld [vmem:[%s5197_s3 + $0x64] ss:$24 sps:$4 sm:$0xff]   ;;  %v5205_v28 = vmov 0   ;;  %v3759_v40 = vld [vmem:[%s5197_s3 + $0xf4] ss:$24 sps:$4 sm:$0xff]  }
  0x1d   :  { %742 = vmatprep.subr.bf16.mxu1 %v2921_v29  ;;  %760 = vmatprep.mubr.bf16.mxu1 %v204_v5  ;;  %v2985_v29 = vld [vmem:[%s5195_s1 + $0x70] ss:$24 sps:$4 sm:$0xff]   ;;  %v3005_v39 = vld [vmem:[%s5195_s1 + $0x104] ss:$24 sps:$4 sm:$0xff]   ;;  %v3822_v55 = vld [vmem:[%s5197_s3 + $0x180] ss:$24 sps:$4 sm:$0xff]  }
  0x1e   :  { %v3009_v46 = vld [vmem:[%s5195_s1 + $0x130] ss:$24 sps:$4 sm:$0xff]   ;;  %v3813_v53 = vld [vmem:[%s5197_s3 + $0x184] ss:$24 sps:$4 sm:$0xff]   ;;  %v3831_v57 = vld [vmem:[%s5197_s3 + $0x1b4] ss:$24 sps:$4 sm:$0xff]  }
  0x1f   :  { %702 = vmatpush1.bf16.msra.mxu0 %v2923_v30  ;;  %v3713_v30 = vld [vmem:[%s5197_s3 + $0x60] ss:$24 sps:$4 sm:$0xff]   ;;  %v3021_v54 = vld [vmem:[%s5195_s1 + $0x190] ss:$24 sps:$4 sm:$0xff]   ;;  %v3029_v56 = vld [vmem:[%s5195_s1 + $0x1c4] ss:$24 sps:$4 sm:$0xff]  }
  0x20   :  { %743 = vmatpush1.bf16.msra.mxu1 %v2924_v31  ;;  %703 = vmatprep.subr.bf16.mxu0 %v2925_v32  ;;  %v2993_v31 = vld [vmem:[%s5195_s1 + $0xa4] ss:$24 sps:$4 sm:$0xff]   ;;  %v3723_v32 = vld [vmem:[%s5197_s3 + $0x94] ss:$24 sps:$4 sm:$0xff]   ;;  %v3839_v59 = vld [vmem:[%s5197_s3 + $0x1b0] ss:$24 sps:$4 sm:$0xff]  }
  0x21   :  { %744 = vmatprep.subr.bf16.mxu1 %v2927_v33  ;;  %v2991_v33 = vld [vmem:[%s5195_s1 + $0xa0] ss:$24 sps:$4 sm:$0xff]   ;;  %v3035_v60 = vld [vmem:[%s5195_s1 + $0x1f4] ss:$24 sps:$4 sm:$0xff]   ;;  %v3033_v62 = vld [vmem:[%s5195_s1 + $0x1f0] ss:$24 sps:$4 sm:$0xff]  }
  0x22   :  { %v3858_v63 = vld [vmem:[%s5197_s3 + $0x1e0] ss:$24 sps:$4 sm:$0xff]   ;;  %v3875_v3 = vld [vmem:[%s5197_s3 + $0x210] ss:$24 sps:$4 sm:$0xff]   ;;  %v3065_v16 = vld [vmem:[%s5195_s1 + $0x2e4] ss:$24 sps:$4 sm:$0xff]  }
  0x23   :  { %704 = vmatpush1.bf16.msra.mxu0 %v2929_v34  ;;  %v3731_v34 = vld [vmem:[%s5197_s3 + $0x90] ss:$24 sps:$4 sm:$0xff]  }
  0x24   :  { %745 = vmatpush1.bf16.msra.mxu1 %v2930_v35  ;;  %705 = vmatprep.subr.bf16.mxu0 %v2931_v36  ;;  %v2999_v35 = vld [vmem:[%s5195_s1 + $0xd4] ss:$24 sps:$4 sm:$0xff]   ;;  %v3741_v36 = vld [vmem:[%s5197_s3 + $0xc4] ss:$24 sps:$4 sm:$0xff]  }
  0x25   :  { %746 = vmatprep.subr.bf16.mxu1 %v2933_v37  ;;  %v2997_v37 = vld [vmem:[%s5195_s1 + $0xd0] ss:$24 sps:$4 sm:$0xff]  }
  0x27   :  { %706 = vmatpush1.bf16.msra.mxu0 %v2935_v41  ;;  %v3003_v41 = vld [vmem:[%s5195_s1 + $0x100] ss:$24 sps:$4 sm:$0xff]  }
  0x28   :  { %747 = vmatpush1.bf16.msra.mxu1 %v2936_v42  ;;  %707 = vmatprep.subr.bf16.mxu0 %v2937_v43  ;;  %v3767_v42 = vld [vmem:[%s5197_s3 + $0xf0] ss:$24 sps:$4 sm:$0xff]   ;;  %v3011_v43 = vld [vmem:[%s5195_s1 + $0x134] ss:$24 sps:$4 sm:$0xff]  }
  0x29   :  { %748 = vmatprep.subr.bf16.mxu1 %v2939_v44  ;;  %v3777_v44 = vld [vmem:[%s5197_s3 + $0x124] ss:$24 sps:$4 sm:$0xff]  }
  0x2b   :  { %708 = vmatpush1.bf16.msra.mxu0 %v2941_v47  ;;  %v3786_v47 = vld [vmem:[%s5197_s3 + $0x120] ss:$24 sps:$4 sm:$0xff]  }
  0x2c   :  { %749 = vmatpush1.bf16.msra.mxu1 %v2942_v48  ;;  %709 = vmatprep.subr.bf16.mxu0 %v2943_v49  ;;  %v3017_v48 = vld [vmem:[%s5195_s1 + $0x164] ss:$24 sps:$4 sm:$0xff]   ;;  %v3795_v49 = vld [vmem:[%s5197_s3 + $0x154] ss:$24 sps:$4 sm:$0xff]  }
  0x2d   :  { %750 = vmatprep.subr.bf16.mxu1 %v2945_v50  ;;  %v3015_v50 = vld [vmem:[%s5195_s1 + $0x160] ss:$24 sps:$4 sm:$0xff]  }
  0x2f   :  { %710 = vmatpush1.bf16.msra.mxu0 %v2947_v51  ;;  %v3803_v51 = vld [vmem:[%s5197_s3 + $0x150] ss:$24 sps:$4 sm:$0xff]  }
  0x30   :  { %751 = vmatpush1.bf16.msra.mxu1 %v2948_v52  ;;  %711 = vmatprep.subr.bf16.mxu0 %v2949_v58  ;;  %v3023_v52 = vld [vmem:[%s5195_s1 + $0x194] ss:$24 sps:$4 sm:$0xff]   ;;  %v3027_v58 = vld [vmem:[%s5195_s1 + $0x1c0] ss:$24 sps:$4 sm:$0xff]  }
  0x31   :  { %752 = vmatprep.subr.bf16.mxu1 %v2951_v61  ;;  %v3849_v61 = vld [vmem:[%s5197_s3 + $0x1e4] ss:$24 sps:$4 sm:$0xff]  }
  0x33   :  { %712 = vmatpush1.bf16.msra.mxu0 %v2953_v0  ;;  %v3041_v0 = vld [vmem:[%s5195_s1 + $0x224] ss:$24 sps:$4 sm:$0xff]  }
  0x34   :  { %753 = vmatpush1.bf16.msra.mxu1 %v2954_v1  ;;  %713 = vmatprep.subr.bf16.mxu0 %v2955_v2  ;;  %v3867_v1 = vld [vmem:[%s5197_s3 + $0x214] ss:$24 sps:$4 sm:$0xff]   ;;  %v3039_v2 = vld [vmem:[%s5195_s1 + $0x220] ss:$24 sps:$4 sm:$0xff]  }
  0x35   :  { %754 = vmatprep.subr.bf16.mxu1 %v2957_v4  ;;  %v3047_v4 = vld [vmem:[%s5195_s1 + $0x254] ss:$24 sps:$4 sm:$0xff]  }
  0x37   :  { %714 = vmatpush1.bf16.msra.mxu0 %v2959_v6  ;;  %v3045_v6 = vld [vmem:[%s5195_s1 + $0x250] ss:$24 sps:$4 sm:$0xff]  }
  0x38   :  { %755 = vmatpush1.bf16.msra.mxu1 %v2960_v7  ;;  %715 = vmatprep.subr.bf16.mxu0 %v2961_v8  ;;  %v3894_v7 = vld [vmem:[%s5197_s3 + $0x240] ss:$24 sps:$4 sm:$0xff]   ;;  %v3053_v8 = vld [vmem:[%s5195_s1 + $0x284] ss:$24 sps:$4 sm:$0xff]  }
  0x39   :  { %756 = vmatprep.subr.bf16.mxu1 %v2963_v9  ;;  %v3903_v9 = vld [vmem:[%s5197_s3 + $0x274] ss:$24 sps:$4 sm:$0xff]  }
  0x3b   :  { %716 = vmatpush1.bf16.msra.mxu0 %v2965_v10  ;;  %v3051_v10 = vld [vmem:[%s5195_s1 + $0x280] ss:$24 sps:$4 sm:$0xff]  }
  0x3c   :  { %757 = vmatpush1.bf16.msra.mxu1 %v2966_v11  ;;  %717 = vmatprep.subr.bf16.mxu0 %v2967_v12  ;;  %v3911_v11 = vld [vmem:[%s5197_s3 + $0x270] ss:$24 sps:$4 sm:$0xff]   ;;  %v3059_v12 = vld [vmem:[%s5195_s1 + $0x2b4] ss:$24 sps:$4 sm:$0xff]  }
  0x3d   :  { %758 = vmatprep.subr.bf16.mxu1 %v2969_v13  ;;  %v3921_v13 = vld [vmem:[%s5197_s3 + $0x2a4] ss:$24 sps:$4 sm:$0xff]  }
  0x3f   :  { %718 = vmatpush1.bf16.msra.mxu0 %v2971_v14  ;;  %v3057_v14 = vld [vmem:[%s5195_s1 + $0x2b0] ss:$24 sps:$4 sm:$0xff]  }
  0x40   :  { %759 = vmatpush1.bf16.msra.mxu1 %v2972_v15  ;;  %769 = vmatprep.subr.bf16.mxu0 %v2975_v17  ;;  %v3930_v15 = vld [vmem:[%s5197_s3 + $0x2a0] ss:$24 sps:$4 sm:$0xff]   ;;  %v3939_v17 = vld [vmem:[%s5197_s3 + $0x2d4] ss:$24 sps:$4 sm:$0xff]  }
  0x41   :  { %1507 = vmatprep.subr.bf16.mxu1 %v3665_v18  ;;  %5291 = vst [vmem:[#allocation10_spill] sm:$0xff] %v3930_v15  ;;  %5292 = vst [vmem:[#allocation11_spill] sm:$0xff] %v3939_v17 }
  0x42   :  { %720 = vmatmul.mubr.bf16.vlgmr.msra.gmra.mrb[0].mxu0 %v3667_v19 }
  0x43   :  { %761 = vmatmul.mubr.bf16.vlgmr.msra.gmra.mrb[0].mxu1 %v3667_v19  ;;  %770 = vmatpush1.bf16.msra.mxu0 %v2973_v20  ;;  %v3063_v20 = vld [vmem:[%s5195_s1 + $0x2e0] ss:$24 sps:$4 sm:$0xff]  }
  0x44   :  { %1508 = vmatpush1.bf16.msra.mxu1 %v3675_v21  ;;  %771 = vmatprep.subr.bf16.mxu0 %v2981_v22  ;;  %v3947_v22 = vld [vmem:[%s5197_s3 + $0x2d0] ss:$24 sps:$4 sm:$0xff]  }
  0x45   :  { %1509 = vmatprep.subr.bf16.mxu1 %v3684_v23  ;;  %801 = vmatprep.mubr.bf16.mxu0 %v204_v5  ;;  %v3885_v5 = vld [vmem:[%s5197_s3 + $0x244] ss:$24 sps:$4 sm:$0xff]   ;;  %5293 = vst [vmem:[#allocation12_spill] sm:$0xff] %v3947_v22 }
  0x46   :  { %1539 = vmatprep.mubr.bf16.mxu1 %v5205_v28 }
  0x47   :  { %772 = vmatpush1.bf16.msra.mxu0 %v2979_v24  ;;  %v3953_v24 = vld [vmem:[%s5197_s3 + $0xc] ss:$24 sps:$4 sm:$0xff]  }
  0x48   :  { %1510 = vmatpush1.bf16.msra.mxu1 %v3694_v25  ;;  %773 = vmatprep.subr.bf16.mxu0 %v2987_v26  ;;  %v3959_v26 = vld [vmem:[%s5197_s3 + $0x14] ss:$24 sps:$4 sm:$0xff]  }
  0x49   :  { %1511 = vmatprep.subr.bf16.mxu1 %v3704_v27  ;;  %5294 = vst [vmem:[#allocation13_spill] sm:$0xff] %v3959_v26 }
  0x4b   :  { %774 = vmatpush1.bf16.msra.mxu0 %v2985_v29  ;;  %v3965_v29 = vld [vmem:[%s5197_s3 + $0x8] ss:$24 sps:$4 sm:$0xff]  }
  0x4c   :  { %1512 = vmatpush1.bf16.msra.mxu1 %v3713_v30  ;;  %775 = vmatprep.subr.bf16.mxu0 %v2993_v31  ;;  %v3970_v31 = vld [vmem:[%s5197_s3 + $0x10] ss:$24 sps:$4 sm:$0xff]  }
  0x4d   :  { %1513 = vmatprep.subr.bf16.mxu1 %v3723_v32  ;;  %5295 = vst [vmem:[#allocation14_spill] sm:$0xff] %v3970_v31 }
  0x4f   :  { %776 = vmatpush1.bf16.msra.mxu0 %v2991_v33  ;;  %v3977_v33 = vld [vmem:[%s5197_s3 + $0x3c] ss:$24 sps:$4 sm:$0xff]  }
  0x50   :  { %1514 = vmatpush1.bf16.msra.mxu1 %v3731_v34  ;;  %777 = vmatprep.subr.bf16.mxu0 %v2999_v35  ;;  %v3982_v35 = vld [vmem:[%s5197_s3 + $0x44] ss:$24 sps:$4 sm:$0xff]  }
  0x51   :  { %1515 = vmatprep.subr.bf16.mxu1 %v3741_v36  ;;  %5296 = vst [vmem:[#allocation15_spill] sm:$0xff] %v3982_v35 }
  0x53   :  { %778 = vmatpush1.bf16.msra.mxu0 %v2997_v37  ;;  %v3987_v37 = vld [vmem:[%s5197_s3 + $0x38] ss:$24 sps:$4 sm:$0xff]  }
  0x54   :  { %1516 = vmatpush1.bf16.msra.mxu1 %v3749_v38  ;;  %779 = vmatprep.subr.bf16.mxu0 %v3005_v39  ;;  %v3992_v39 = vld [vmem:[%s5197_s3 + $0x40] ss:$24 sps:$4 sm:$0xff]  }
  0x55   :  { %1517 = vmatprep.subr.bf16.mxu1 %v3759_v40  ;;  %5297 = vst [vmem:[#allocation16_spill] sm:$0xff] %v3992_v39 }
  0x57   :  { %780 = vmatpush1.bf16.msra.mxu0 %v3003_v41  ;;  %v3999_v41 = vld [vmem:[%s5197_s3 + $0x6c] ss:$24 sps:$4 sm:$0xff]  }
  0x58   :  { %1518 = vmatpush1.bf16.msra.mxu1 %v3767_v42  ;;  %781 = vmatprep.subr.bf16.mxu0 %v3011_v43  ;;  %v4004_v43 = vld [vmem:[%s5197_s3 + $0x74] ss:$24 sps:$4 sm:$0xff]  }
  0x59   :  { %1519 = vmatprep.subr.bf16.mxu1 %v3777_v44  ;;  %5298 = vst [vmem:[#allocation17_spill] sm:$0xff] %v4004_v43 }
  0x5b   :  { %782 = vmatpush1.bf16.msra.mxu0 %v3009_v46  ;;  %v4018_v46 = vld [vmem:[%s5197_s3 + $0x70] ss:$24 sps:$4 sm:$0xff]  }
  0x5c   :  { %1520 = vmatpush1.bf16.msra.mxu1 %v3786_v47  ;;  %783 = vmatprep.subr.bf16.mxu0 %v3017_v48  ;;  %5299 = vst [vmem:[#allocation18_spill] sm:$0xff] %v4018_v46  ;;  %v4025_v48 = vld [vmem:[%s5197_s3 + $0x9c] ss:$24 sps:$4 sm:$0xff]  }
  0x5d   :  { %1521 = vmatprep.subr.bf16.mxu1 %v3795_v49 }
  0x5f   :  { %784 = vmatpush1.bf16.msra.mxu0 %v3015_v50  ;;  %v4030_v50 = vld [vmem:[%s5197_s3 + $0xa4] ss:$24 sps:$4 sm:$0xff]  }
  0x60   :  { %1522 = vmatpush1.bf16.msra.mxu1 %v3803_v51  ;;  %785 = vmatprep.subr.bf16.mxu0 %v3023_v52  ;;  %5300 = vst [vmem:[#allocation19_spill] sm:$0xff] %v4030_v50  ;;  %v4039_v52 = vld [vmem:[%s5197_s3 + $0x98] ss:$24 sps:$4 sm:$0xff]  }
  0x61   :  { %1523 = vmatprep.subr.bf16.mxu1 %v3813_v53 }
  0x63   :  { %786 = vmatpush1.bf16.msra.mxu0 %v3021_v54  ;;  %v4046_v54 = vld [vmem:[%s5197_s3 + $0xa0] ss:$24 sps:$4 sm:$0xff]  }
  0x64   :  { %1524 = vmatpush1.bf16.msra.mxu1 %v3822_v55  ;;  %787 = vmatprep.subr.bf16.mxu0 %v3029_v56  ;;  %5301 = vst [vmem:[#allocation20_spill] sm:$0xff] %v4046_v54 }
  0x65   :  { %1525 = vmatprep.subr.bf16.mxu1 %v3831_v57 }
  0x67   :  { %788 = vmatpush1.bf16.msra.mxu0 %v3027_v58 }
  0x68   :  { %1526 = vmatpush1.bf16.msra.mxu1 %v3839_v59  ;;  %789 = vmatprep.subr.bf16.mxu0 %v3035_v60 }
  0x69   :  { %1527 = vmatprep.subr.bf16.mxu1 %v3849_v61 }
  0x6b   :  { %790 = vmatpush1.bf16.msra.mxu0 %v3033_v62 }
  0x6c   :  { %1528 = vmatpush1.bf16.msra.mxu1 %v3858_v63  ;;  %791 = vmatprep.subr.bf16.mxu0 %v3041_v0 }
  0x6d   :  { %1529 = vmatprep.subr.bf16.mxu1 %v3867_v1 }
  0x6f   :  { %792 = vmatpush1.bf16.msra.mxu0 %v3039_v2 }
  0x70   :  { %1530 = vmatpush1.bf16.msra.mxu1 %v3875_v3  ;;  %793 = vmatprep.subr.bf16.mxu0 %v3047_v4 }
  0x71   :  { %1531 = vmatprep.subr.bf16.mxu1 %v3885_v5 }
  0x73   :  { %794 = vmatpush1.bf16.msra.mxu0 %v3045_v6 }
  0x74   :  { %1532 = vmatpush1.bf16.msra.mxu1 %v3894_v7  ;;  %795 = vmatprep.subr.bf16.mxu0 %v3053_v8 }
  0x75   :  { %1533 = vmatprep.subr.bf16.mxu1 %v3903_v9 }
  0x77   :  { %796 = vmatpush1.bf16.msra.mxu0 %v3051_v10 }
  0x78   :  { %1534 = vmatpush1.bf16.msra.mxu1 %v3911_v11  ;;  %797 = vmatprep.subr.bf16.mxu0 %v3059_v12 }
  0x79   :  { %1535 = vmatprep.subr.bf16.mxu1 %v3921_v13 }
  0x7b   :  { %798 = vmatpush1.bf16.msra.mxu0 %v3057_v14 }
  0x7c   :  { %1536 = vmatpush1.bf16.msra.mxu1 %v3930_v15  ;;  %799 = vmatprep.subr.bf16.mxu0 %v3065_v16 }
  0x7d   :  { %1537 = vmatprep.subr.bf16.mxu1 %v3939_v17 }
  0x7f   :  { %800 = vmatpush1.bf16.msra.mxu0 %v3063_v20 }
  0x80   :  { %1538 = vmatpush1.bf16.msra.mxu1 %v3947_v22  ;;  %1548 = vmatprep.subr.bf16.mxu0 %v3953_v24 }
  0x81   :  { %1589 = vmatprep.subr.bf16.mxu1 %v3959_v26 }
  0x82   :  { %802 = vmatmul.mubr.bf16.vlgmr.msra.gmra.mrb[4].mxu0 %v3667_v19  ;;  %v4013_v19 = vld [vmem:[%s5197_s3 + $0x68] ss:$24 sps:$4 sm:$0xff]  }
  0x83   :  { %1540 = vmatmul.mubr.bf16.vlgmr.msra.gmra.mrb[4].mxu1 %v5205_v28  ;;  %1549 = vmatpush1.bf16.msra.mxu0 %v3965_v29 }
  0x84   :  { %1590 = vmatpush1.bf16.msra.mxu1 %v3970_v31  ;;  %1550 = vmatprep.subr.bf16.mxu0 %v3977_v33 }
  0x85   :  { %1591 = vmatprep.subr.bf16.mxu1 %v3982_v35  ;;  %1580 = vmatprep.mubr.bf16.mxu0 %v5205_v28 }
  0x86   :  { %1621 = vmatprep.mubr.bf16.mxu1 %v5205_v28 }
  0x87   :  { %1551 = vmatpush1.bf16.msra.mxu0 %v3987_v37 }
  0x88   :  { %1592 = vmatpush1.bf16.msra.mxu1 %v3992_v39  ;;  %1552 = vmatprep.subr.bf16.mxu0 %v3999_v41 }
  0x89   :  { %1593 = vmatprep.subr.bf16.mxu1 %v4004_v43 }
  0x8b   :  { %1553 = vmatpush1.bf16.msra.mxu0 %v4013_v19 }
  0x8c   :  { %1594 = vmatpush1.bf16.msra.mxu1 %v4018_v46 }
  0x8d   :  { %15 = vsyncpa [#allocation7], 0  ;;  %1554 = vmatprep.subr.bf16.mxu0 %v4025_v48  ;;  %1595 = vmatprep.subr.bf16.mxu1 %v4030_v50  ;;  %v4053_v56 = vld [vmem:[%s5197_s3 + $0xcc] ss:$24 sps:$4 sm:$0xff]   ;;  %v4065_v60 = vld [vmem:[%s5197_s3 + $0xc8] ss:$24 sps:$4 sm:$0xff]  }
  0x8e   :  { %v4058_v58 = vld [vmem:[%s5197_s3 + $0xd4] ss:$24 sps:$4 sm:$0xff]   ;;  %v4070_v62 = vld [vmem:[%s5197_s3 + $0xd0] ss:$24 sps:$4 sm:$0xff]   ;;  %v4082_v2 = vld [vmem:[%s5197_s3 + $0x104] ss:$24 sps:$4 sm:$0xff]  }
  0x8f   :  { %5302 = vst [vmem:[#allocation21_spill] sm:$0xff] %v4058_v58  ;;  %1555 = vmatpush1.bf16.msra.mxu0 %v4039_v52  ;;  %5303 = vst [vmem:[#allocation22_spill] sm:$0xff] %v4070_v62  ;;  %v4077_v0 = vld [vmem:[%s5197_s3 + $0xfc] ss:$24 sps:$4 sm:$0xff]   ;;  %v4089_v4 = vld [vmem:[%s5197_s3 + $0xf8] ss:$24 sps:$4 sm:$0xff]  }
  0x90   :  { %1596 = vmatpush1.bf16.msra.mxu1 %v4046_v54  ;;  %1556 = vmatprep.subr.bf16.mxu0 %v4053_v56  ;;  %5304 = vst [vmem:[#allocation23_spill] sm:$0xff] %v4082_v2  ;;  %v4094_v6 = vld [vmem:[%s5197_s3 + $0x100] ss:$24 sps:$4 sm:$0xff]   ;;  %v4101_v8 = vld [vmem:[%s5197_s3 + $0x12c] ss:$24 sps:$4 sm:$0xff]   ;;  %vm886_vm0 = vcmask 1041408  }
  0x91   :  { %1597 = vmatprep.subr.bf16.mxu1 %v4058_v58  ;;  %5305 = vst [vmem:[#allocation24_spill] sm:$0xff] %v4094_v6  ;;  %v4106_v10 = vld [vmem:[%s5197_s3 + $0x134] ss:$24 sps:$4 sm:$0xff]   ;;  %v4113_v12 = vld [vmem:[%s5197_s3 + $0x128] ss:$24 sps:$4 sm:$0xff]   ;;  %vm3395_vm1 = vmmov 0  }
  0x92   :  { %5306 = vst [vmem:[#allocation25_spill] sm:$0xff] %v4106_v10  ;;  %v4118_v14 = vld [vmem:[%s5197_s3 + $0x130] ss:$24 sps:$4 sm:$0xff]   ;;  %v4125_v16 = vld [vmem:[%s5197_s3 + $0x15c] ss:$24 sps:$4 sm:$0xff]   ;;  %s3396_s26 = smov [#allocation6]  }
  0x93   :  { %1557 = vmatpush1.bf16.msra.mxu0 %v4065_v60  ;;  %5307 = vst [vmem:[#allocation26_spill] sm:$0xff] %v4118_v14  ;;  %v4130_v20 = vld [vmem:[%s5197_s3 + $0x164] ss:$24 sps:$4 sm:$0xff]   ;;  %v4137_v28 = vld [vmem:[%s5197_s3 + $0x158] ss:$24 sps:$4 sm:$0xff]   ;;  %vm2570_vm2 = vcmask 58368  }
  0x94   :  { %1598 = vmatpush1.bf16.msra.mxu1 %v4070_v62  ;;  %1558 = vmatprep.subr.bf16.mxu0 %v4077_v0  ;;  %5308 = vst [vmem:[#allocation27_spill] sm:$0xff] %v4130_v20  ;;  %v4173_v62 = vld [vmem:[%s5197_s3 + $0x1bc] ss:$24 sps:$4 sm:$0xff]   ;;  %v4185_v58 = vld [vmem:[%s5197_s3 + $0x1b8] ss:$24 sps:$4 sm:$0xff]  }
  0x95   :  { %1599 = vmatprep.subr.bf16.mxu1 %v4082_v2  ;;  %v4161_v2 = vld [vmem:[%s5197_s3 + $0x188] ss:$24 sps:$4 sm:$0xff]   ;;  %v4197_v54 = vld [vmem:[%s5197_s3 + $0x1ec] ss:$24 sps:$4 sm:$0xff]   ;;  %v4221_v46 = vld [vmem:[%s5197_s3 + $0x21c] ss:$24 sps:$4 sm:$0xff]  }
  0x96   :  { %v4209_v50 = vld [vmem:[%s5197_s3 + $0x1e8] ss:$24 sps:$4 sm:$0xff]   ;;  %5316 = vst [vmem:[#allocation35_spill] sm:$0xff] %v4221_v46  ;;  %v4233_v43 = vld [vmem:[%s5197_s3 + $0x218] ss:$24 sps:$4 sm:$0xff]  }
  0x97   :  { %1559 = vmatpush1.bf16.msra.mxu0 %v4089_v4  ;;  %5318 = vst [vmem:[#allocation37_spill] sm:$0xff] %v4233_v43  ;;  %v4245_v39 = vld [vmem:[%s5197_s3 + $0x24c] ss:$24 sps:$4 sm:$0xff]   ;;  %v4257_v35 = vld [vmem:[%s5197_s3 + $0x248] ss:$24 sps:$4 sm:$0xff]  }
  0x98   :  { %1600 = vmatpush1.bf16.msra.mxu1 %v4094_v6  ;;  %1560 = vmatprep.subr.bf16.mxu0 %v4101_v8  ;;  %v4149_v6 = vld [vmem:[%s5197_s3 + $0x18c] ss:$24 sps:$4 sm:$0xff]   ;;  %5320 = vst [vmem:[#allocation39_spill] sm:$0xff] %v4245_v39  ;;  %5322 = vst [vmem:[#allocation41_spill] sm:$0xff] %v4257_v35  ;;  %v4269_v31 = vld [vmem:[%s5197_s3 + $0x27c] ss:$24 sps:$4 sm:$0xff]  }
  0x99   :  { %1601 = vmatprep.subr.bf16.mxu1 %v4106_v10  ;;  %v4142_v10 = vld [vmem:[%s5197_s3 + $0x160] ss:$24 sps:$4 sm:$0xff]   ;;  %5324 = vst [vmem:[#allocation43_spill] sm:$0xff] %v4269_v31  ;;  %v4293_v26 = vld [vmem:[%s5197_s3 + $0x2ac] ss:$24 sps:$4 sm:$0xff]  }
  0x9a   :  { %5309 = vst [vmem:[#allocation28_spill] sm:$0xff] %v4142_v10  ;;  %v4281_v45 = vld [vmem:[%s5197_s3 + $0x278] ss:$24 sps:$4 sm:$0xff]   ;;  %5328 = vst [vmem:[#allocation47_spill] sm:$0xff] %v4293_v26  ;;  %v4305_v22 = vld [vmem:[%s5197_s3 + $0x2a8] ss:$24 sps:$4 sm:$0xff]  }
  0x9b   :  { %1561 = vmatpush1.bf16.msra.mxu0 %v4113_v12  ;;  %5326 = vst [vmem:[#allocation45_spill] sm:$0xff] %v4281_v45  ;;  %5330 = vst [vmem:[#allocation49_spill] sm:$0xff] %v4305_v22  ;;  %v4317_v17 = vld [vmem:[%s5197_s3 + $0x2dc] ss:$24 sps:$4 sm:$0xff]   ;;  %v4329_v15 = vld [vmem:[%s5197_s3 + $0x2d8] ss:$24 sps:$4 sm:$0xff]  }
  0x9c   :  { %1602 = vmatpush1.bf16.msra.mxu1 %v4118_v14  ;;  %1562 = vmatprep.subr.bf16.mxu0 %v4125_v16  ;;  %v4154_v14 = vld [vmem:[%s5197_s3 + $0x194] ss:$24 sps:$4 sm:$0xff]   ;;  %5332 = vst [vmem:[#allocation51_spill] sm:$0xff] %v4317_v17  ;;  %5333 = vst [vmem:[#allocation52_spill] sm:$0xff] %v4329_v15 }
  0x9d   :  { %1603 = vmatprep.subr.bf16.mxu1 %v4130_v20  ;;  %5310 = vst [vmem:[#allocation29_spill] sm:$0xff] %v4154_v14  ;;  %v4166_v20 = vld [vmem:[%s5197_s3 + $0x190] ss:$24 sps:$4 sm:$0xff]  }
  0x9e   :  { %5311 = vst [vmem:[#allocation30_spill] sm:$0xff] %v4166_v20 }
  0x9f   :  { %1563 = vmatpush1.bf16.msra.mxu0 %v4137_v28 }
  0xa0   :  { %1604 = vmatpush1.bf16.msra.mxu1 %v4142_v10  ;;  %1564 = vmatprep.subr.bf16.mxu0 %v4149_v6  ;;  %v4178_v10 = vld [vmem:[%s5197_s3 + $0x1c4] ss:$24 sps:$4 sm:$0xff]  }
  0xa1   :  { %1605 = vmatprep.subr.bf16.mxu1 %v4154_v14  ;;  %5312 = vst [vmem:[#allocation31_spill] sm:$0xff] %v4178_v10  ;;  %v4190_v14 = vld [vmem:[%s5197_s3 + $0x1c0] ss:$24 sps:$4 sm:$0xff]  }
  0xa2   :  { %5313 = vst [vmem:[#allocation32_spill] sm:$0xff] %v4190_v14 }
  0xa3   :  { %1565 = vmatpush1.bf16.msra.mxu0 %v4161_v2 }
  0xa4   :  { %1606 = vmatpush1.bf16.msra.mxu1 %v4166_v20  ;;  %1566 = vmatprep.subr.bf16.mxu0 %v4173_v62  ;;  %v4202_v20 = vld [vmem:[%s5197_s3 + $0x1f4] ss:$24 sps:$4 sm:$0xff]  }
  0xa5   :  { %1607 = vmatprep.subr.bf16.mxu1 %v4178_v10  ;;  %5314 = vst [vmem:[#allocation33_spill] sm:$0xff] %v4202_v20  ;;  %v4214_v10 = vld [vmem:[%s5197_s3 + $0x1f0] ss:$24 sps:$4 sm:$0xff]  }
  0xa6   :  { %5315 = vst [vmem:[#allocation34_spill] sm:$0xff] %v4214_v10 }
  0xa7   :  { %1567 = vmatpush1.bf16.msra.mxu0 %v4185_v58 }
  0xa8   :  { %1608 = vmatpush1.bf16.msra.mxu1 %v4190_v14  ;;  %1568 = vmatprep.subr.bf16.mxu0 %v4197_v54  ;;  %v4226_v14 = vld [vmem:[%s5197_s3 + $0x224] ss:$24 sps:$4 sm:$0xff]  }
  0xa9   :  { %1609 = vmatprep.subr.bf16.mxu1 %v4202_v20  ;;  %5317 = vst [vmem:[#allocation36_spill] sm:$0xff] %v4226_v14  ;;  %v4238_v20 = vld [vmem:[%s5197_s3 + $0x220] ss:$24 sps:$4 sm:$0xff]  }
  0xaa   :  { %5319 = vst [vmem:[#allocation38_spill] sm:$0xff] %v4238_v20 }
  0xab   :  { %1569 = vmatpush1.bf16.msra.mxu0 %v4209_v50 }
  0xac   :  { %1610 = vmatpush1.bf16.msra.mxu1 %v4214_v10  ;;  %1570 = vmatprep.subr.bf16.mxu0 %v4221_v46  ;;  %v4250_v10 = vld [vmem:[%s5197_s3 + $0x254] ss:$24 sps:$4 sm:$0xff]  }
  0xad   :  { %1611 = vmatprep.subr.bf16.mxu1 %v4226_v14  ;;  %5321 = vst [vmem:[#allocation40_spill] sm:$0xff] %v4250_v10  ;;  %v4262_v14 = vld [vmem:[%s5197_s3 + $0x250] ss:$24 sps:$4 sm:$0xff]  }
  0xae   :  { %5323 = vst [vmem:[#allocation42_spill] sm:$0xff] %v4262_v14 }
  0xaf   :  { %1571 = vmatpush1.bf16.msra.mxu0 %v4233_v43 }
  0xb0   :  { %1612 = vmatpush1.bf16.msra.mxu1 %v4238_v20  ;;  %1572 = vmatprep.subr.bf16.mxu0 %v4245_v39  ;;  %v4274_v20 = vld [vmem:[%s5197_s3 + $0x284] ss:$24 sps:$4 sm:$0xff]  }
  0xb1   :  { %1613 = vmatprep.subr.bf16.mxu1 %v4250_v10  ;;  %5325 = vst [vmem:[#allocation44_spill] sm:$0xff] %v4274_v20  ;;  %v4286_v10 = vld [vmem:[%s5197_s3 + $0x280] ss:$24 sps:$4 sm:$0xff]  }
  0xb2   :  { %5327 = vst [vmem:[#allocation46_spill] sm:$0xff] %v4286_v10 }
  0xb3   :  { %1573 = vmatpush1.bf16.msra.mxu0 %v4257_v35 }
  0xb4   :  { %1614 = vmatpush1.bf16.msra.mxu1 %v4262_v14  ;;  %1574 = vmatprep.subr.bf16.mxu0 %v4269_v31  ;;  %v4298_v14 = vld [vmem:[%s5197_s3 + $0x2b4] ss:$24 sps:$4 sm:$0xff]  }
  0xb5   :  { %1615 = vmatprep.subr.bf16.mxu1 %v4274_v20  ;;  %5329 = vst [vmem:[#allocation48_spill] sm:$0xff] %v4298_v14  ;;  %v4310_v20 = vld [vmem:[%s5197_s3 + $0x2b0] ss:$24 sps:$4 sm:$0xff]  }
  0xb6   :  { %5331 = vst [vmem:[#allocation50_spill] sm:$0xff] %v4310_v20 }
  0xb7   :  { %1575 = vmatpush1.bf16.msra.mxu0 %v4281_v45 }
  0xb8   :  { %1616 = vmatpush1.bf16.msra.mxu1 %v4286_v10  ;;  %1576 = vmatprep.subr.bf16.mxu0 %v4293_v26  ;;  %v4322_v10 = vld [vmem:[%s5197_s3 + $0x2e4] ss:$24 sps:$4 sm:$0xff]  }
  0xb9   :  { %1617 = vmatprep.subr.bf16.mxu1 %v4298_v14  ;;  %v4334_v14 = vld [vmem:[%s5197_s3 + $0x2e0] ss:$24 sps:$4 sm:$0xff]  }
  0xbb   :  { %1577 = vmatpush1.bf16.msra.mxu0 %v4305_v22 }
  0xbc   :  { %1618 = vmatpush1.bf16.msra.mxu1 %v4310_v20  ;;  %1578 = vmatprep.subr.bf16.mxu0 %v4317_v17  ;;  %v5334_v20 = vmov 0  }
  0xbd   :  { %1619 = vmatprep.subr.bf16.mxu1 %v4322_v10 }
  0xbf   :  { %1579 = vmatpush1.bf16.msra.mxu0 %v4329_v15 }
  0xc0   :  { %1620 = vmatpush1.bf16.msra.mxu1 %v4334_v14  ;;  %1690 = vmatprep.subr.bf16.mxu0 %v3665_v18 }
  0xc1   :  { %1731 = vmatprep.subr.bf16.mxu1 %v3953_v24 }
  0xc2   :  { %1581 = vmatmul.mubr.bf16.vlgmr.msra.gmra.mrb[8].mxu0 %v5334_v20 }
  0xc3   :  { %1622 = vmatmul.mubr.bf16.vlgmr.msra.gmra.mrb[8].mxu1 %v5334_v20  ;;  %1691 = vmatpush1.bf16.msra.mxu0 %v3675_v21  ;;  %v5335_v21 = vld [vmem:[#allocation10_spill] sm:$0xff] }
  0xc4   :  { %1732 = vmatpush1.bf16.msra.mxu1 %v3965_v29  ;;  %1692 = vmatprep.subr.bf16.mxu0 %v3684_v23  ;;  %v5336_v23 = vld [vmem:[#allocation11_spill] sm:$0xff] }
  0xc5   :  { %1733 = vmatprep.subr.bf16.mxu1 %v3977_v33 }
  0xc7   :  { %1693 = vmatpush1.bf16.msra.mxu0 %v3694_v25  ;;  %v5337_v25 = vld [vmem:[#allocation12_spill] sm:$0xff] }
  0xc8   :  { %1734 = vmatpush1.bf16.msra.mxu1 %v3987_v37  ;;  %1694 = vmatprep.subr.bf16.mxu0 %v3704_v27  ;;  %v5338_v27 = vld [vmem:[#allocation13_spill] sm:$0xff] }
  0xc9   :  { %1735 = vmatprep.subr.bf16.mxu1 %v3999_v41 }
  0xcb   :  { %1695 = vmatpush1.bf16.msra.mxu0 %v3713_v30  ;;  %v5339_v30 = vld [vmem:[#allocation9_spill] sm:$0xff] }
  0xcc   :  { %1736 = vmatpush1.bf16.msra.mxu1 %v4013_v19  ;;  %1696 = vmatprep.subr.bf16.mxu0 %v3723_v32  ;;  %v5264_v32 = vsub.s32 0, %v5339_v30 }
  0xcd   :  { %1737 = vmatprep.subr.bf16.mxu1 %v4025_v48 }
  0xcf   :  { %1697 = vmatpush1.bf16.msra.mxu0 %v3731_v34  ;;  %v5267_v34 = vsub.s32 2, %v5339_v30 }
  0xd0   :  { %1738 = vmatpush1.bf16.msra.mxu1 %v4039_v52  ;;  %1698 = vmatprep.subr.bf16.mxu0 %v3741_v36  ;;  %v137_v36 = vld [vmem:[%s5196_s2] sm:$0x3f]  ;;  %s2578_s2 = sshll.u32 %s3396_s26, 4  ;;  %s2579_s2 = int_to_ptr.vmem [resolvable:$true] %s2578_s2 }
  0xd1   :  { %1739 = vmatprep.subr.bf16.mxu1 %v4053_v56  ;;  %p3372_p1 = scmp.lt.s32.totalorder %s2579_s2, %s2579_s2 }
  0xd3   :  { %1699 = vmatpush1.bf16.msra.mxu0 %v3749_v38  ;;  %v5270_v38 = vsub.s32 1, %v5339_v30 }
  0xd4   :  { %1740 = vmatpush1.bf16.msra.mxu1 %v4065_v60  ;;  %1700 = vmatprep.subr.bf16.mxu0 %v3759_v40  ;;  %v3393_v40 = vmov 1983009808  }
  0xd5   :  { %1741 = vmatprep.subr.bf16.mxu1 %v4077_v0 }
  0xd7   :  { %1701 = vmatpush1.bf16.msra.mxu0 %v3767_v42  ;;  %v821_v42 = vunpack.c.l.s4 %v3393_v40 }
  0xd8   :  { %1742 = vmatpush1.bf16.msra.mxu1 %v4089_v4  ;;  %1702 = vmatprep.subr.bf16.mxu0 %v3777_v44  ;;  %v5273_v44 = vsub.s32 3, %v5339_v30 }
  0xd9   :  { %1743 = vmatprep.subr.bf16.mxu1 %v4101_v8 }
  0xdb   :  { %1703 = vmatpush1.bf16.msra.mxu0 %v3786_v47  ;;  %v142_v47 = vrot.slane %v137_v36, %v5264_v32 }
  0xdc   :  { %1744 = vmatpush1.bf16.msra.mxu1 %v4113_v12  ;;  %1704 = vmatprep.subr.bf16.mxu0 %v3795_v49  ;;  %v146_v49 = vrot.slane %v137_v36, %v5270_v38 }
  0xdd   :  { %1745 = vmatprep.subr.bf16.mxu1 %v4125_v16 }
  0xdf   :  { %1705 = vmatpush1.bf16.msra.mxu0 %v3803_v51  ;;  %v822_v51 = vunpack.c.0.s8 %v821_v42 }
  0xe0   :  { %1746 = vmatpush1.bf16.msra.mxu1 %v4137_v28  ;;  %1706 = vmatprep.subr.bf16.mxu0 %v3813_v53  ;;  %v154_v53 = vrot.slane %v137_v36, %v5273_v44 }
  0xe1   :  { %1747 = vmatprep.subr.bf16.mxu1 %v4149_v6  ;;  %v825_v20 = vsub.s32 %v822_v51, %v5339_v30 }
  0xe3   :  { %1707 = vmatpush1.bf16.msra.mxu0 %v3822_v55 }
  0xe4   :  { %1748 = vmatpush1.bf16.msra.mxu1 %v4161_v2  ;;  %1708 = vmatprep.subr.bf16.mxu0 %v3831_v57 }
  0xe5   :  { %1749 = vmatprep.subr.bf16.mxu1 %v4173_v62 }
  0xe7   :  { %1709 = vmatpush1.bf16.msra.mxu0 %v3839_v59 }
  0xe8   :  { %1750 = vmatpush1.bf16.msra.mxu1 %v4185_v58  ;;  %1710 = vmatprep.subr.bf16.mxu0 %v3849_v61 }
  0xe9   :  { %1751 = vmatprep.subr.bf16.mxu1 %v4197_v54 }
  0xeb   :  { %1711 = vmatpush1.bf16.msra.mxu0 %v3858_v63 }
  0xec   :  { %1752 = vmatpush1.bf16.msra.mxu1 %v4209_v50  ;;  %1712 = vmatprep.subr.bf16.mxu0 %v3867_v1 }
  0xed   :  { %1753 = vmatprep.subr.bf16.mxu1 %v4221_v46 }
  0xef   :  { %1713 = vmatpush1.bf16.msra.mxu0 %v3875_v3 }
  0xf0   :  { %1754 = vmatpush1.bf16.msra.mxu1 %v4233_v43  ;;  %1714 = vmatprep.subr.bf16.mxu0 %v3885_v5 }
  0xf1   :  { %1755 = vmatprep.subr.bf16.mxu1 %v4245_v39 }
  0xf3   :  { %1715 = vmatpush1.bf16.msra.mxu0 %v3894_v7 }
  0xf4   :  { %1756 = vmatpush1.bf16.msra.mxu1 %v4257_v35  ;;  %1716 = vmatprep.subr.bf16.mxu0 %v3903_v9 }
  0xf5   :  { %1757 = vmatprep.subr.bf16.mxu1 %v4269_v31 }
  0xf7   :  { %1717 = vmatpush1.bf16.msra.mxu0 %v3911_v11 }
  0xf8   :  { %1758 = vmatpush1.bf16.msra.mxu1 %v4281_v45  ;;  %1718 = vmatprep.subr.bf16.mxu0 %v3921_v13 }
  0xf9   :  { %1759 = vmatprep.subr.bf16.mxu1 %v4293_v26 }
  0xfb   :  { %1719 = vmatpush1.bf16.msra.mxu0 %v5335_v21 }
  0xfc   :  { %1760 = vmatpush1.bf16.msra.mxu1 %v4305_v22  ;;  %1720 = vmatprep.subr.bf16.mxu0 %v5336_v23 }
  0xfd   :  { %1761 = vmatprep.subr.bf16.mxu1 %v4317_v17 }
  0xff   :  { %1721 = vmatpush1.bf16.msra.mxu0 %v5337_v25 }
 0x100   :  { %1762 = vmatpush1.bf16.msra.mxu1 %v4329_v15  ;;  %1772 = vmatprep.subr.bf16.mxu0 %v5338_v27 }
 0x101   :  { %1875 = vmatprep.subr.bf16.mxu1 %v3665_v18  ;;  %v150_v18 = vrot.slane %v137_v36, %v5267_v34 }
 0x115   :  { %v721_v55 = vpop.f32.mrb[0].mxu0 }
 0x116   :  { %v762_v57 = vpop.f32.mrb[0].mxu1  ;;  %v722_v59 = vadd.f32 %v721_v55, %v142_v47  ;;  %v723_v63 = vpop.f32.mrb[1].mxu0 }
 0x117   :  { %v763_v61 = vadd.f32 %v762_v57, %v150_v18  ;;  %v764_v1 = vpop.f32.mrb[1].mxu1  ;;  %v724_v3 = vadd.f32 %v723_v63, %v146_v49  ;;  %v725_v32 = vpop.f32.mrb[2].mxu0 }
 0x118   :  { %v765_v40 = vadd.f32 %v764_v1, %v154_v53  ;;  %v766_v15 = vpop.f32.mrb[2].mxu1  ;;  %v726_v34 = vpop.f32.mrb[3].mxu0 }
 0x119   :  { %v767_v17 = vpop.f32.mrb[3].mxu1  ;;  %v816_v22 = vcombine.low %v722_v59, %v724_v3  ;;  %v817_v38 = vcombine.high %v722_v59, %v724_v3  ;;  %v157_v15 = vsub.s32 4, %v5339_v30 }
 0x11a   :  { %v818_v42 = vcombine.low %v763_v61, %v765_v40  ;;  %v819_v26 = vcombine.high %v763_v61, %v765_v40  ;;  %v5277_v17 = vsub.s32 5, %v5339_v30 }
 0x11b   :  { %v826_v45 = vrot.slane %v816_v22, %v825_v20  ;;  %v833_v44 = vrot.slane %v817_v38, %v825_v20  ;;  %v158_v32 = vrot.slane %v137_v36, %v157_v15 }
 0x11c   :  { %v840_v31 = vrot.slane %v818_v42, %v825_v20  ;;  %v847_v35 = vrot.slane %v819_v26, %v825_v20  ;;  %v162_v34 = vrot.slane %v137_v36, %v5277_v17 }
 0x11e   :  { %v848_v47 = vcombine.low %v826_v45, %v840_v31  ;;  %v849_v18 = vcombine.high %v826_v45, %v840_v31  ;;  %v850_v55 = vcombine.low %v833_v44, %v847_v35  ;;  %v851_v57 = vcombine.high %v833_v44, %v847_v35 }
 0x120   :  { %874 = vst [vmem:[#allocation2] sm:$0x3f] %v848_v47  ;;  %875 = vst [vmem:[#allocation2 + $0x6] sm:$0x3f] %v849_v18  ;;  %v878_v3 = vrot.slane %v848_v47, 6  ;;  %v882_v40 = vrot.slane %v850_v55, 6 }
 0x121   :  { %876 = vst [vmem:[#allocation2 + $0xc] sm:$0x3f] %v850_v55  ;;  %877 = vst [vmem:[#allocation2 + $0x12] sm:$0x3f] %v851_v57  ;;  %v880_v43 = vrot.slane %v849_v18, 6  ;;  %v5340_v18 = vsub.s32 0, %v5339_v30 }
 0x122   :  { %v995_v47 = vld [vmem:[%s5198_s4] sm:$0x3f] }
 0x123   :  { %v4437_v55 = vrot.slane %v995_v47, %v5340_v18 }
 0x155   :  { %v803_v22 = vpop.f32.mrb[4].mxu0 }
 0x156   :  { %v1541_v38 = vpop.f32.mrb[4].mxu1  ;;  %v804_v49 = vadd.f32 %v803_v22, %v158_v32  ;;  %v805_v26 = vpop.f32.mrb[5].mxu0  ;;  %v884_v32 = vrot.slane %v851_v57, 6  ;;  %v1630_v57 = vld [vmem:[#allocation2] sm:$0x3f] }
 0x157   :  { %v1543_v51 = vpop.f32.mrb[5].mxu1  ;;  %v806_v45 = vadd.f32 %v805_v26, %v162_v34  ;;  %v807_v31 = vpop.f32.mrb[6].mxu0 }
 0x158   :  { %v1545_v35 = vpop.f32.mrb[6].mxu1  ;;  %v808_v44 = vpop.f32.mrb[7].mxu0 }
 0x159   :  { %v1546_v53 = vpop.f32.mrb[7].mxu1  ;;  %v852_v59 = vcombine.low %v804_v49, %v806_v45  ;;  %v853_v61 = vcombine.high %v804_v49, %v806_v45  ;;  %v5341_v45 = vsub.s32 1, %v5339_v30  ;;  %v1639_v35 = vrot.slane %v1630_v57, 2 }
 0x15b   :  { %v860_v63 = vrot.slane %v852_v59, %v825_v20  ;;  %v867_v1 = vrot.slane %v853_v61, %v825_v20  ;;  %v4442_v31 = vrot.slane %v995_v47, %v5341_v45  ;;  %v1649_v45 = vrot.slane %v1630_v57, 4 }
 0x15d   :  { %v868_v42 = vcombine.high %v860_v63, %v860_v63  ;;  %v869_v39 = vcombine.high %v867_v1, %v867_v1  ;;  %v879_v36 = vrot.slane %v860_v63, 6  ;;  %v883_v17 = vrot.slane %v867_v1, 6 }
 0x15f   :  { %v881_v22 = vrot.slane %v868_v42, 6  ;;  %v885_v46 = vrot.slane %v869_v39, 6  ;;  %v887_v34 = vsel %vm886_vm0, %v878_v3, %v879_v36  ;;  %v889_v26 = vsel %vm886_vm0, %v882_v40, %v883_v17 }
 0x160   :  { %895 = vst [vmem:[#allocation3] sm:$0x3f] %v887_v34  ;;  %897 = vst [vmem:[#allocation3 + $0xc] sm:$0x3f] %v889_v26  ;;  %v1542_v39 = vadd.f32 %v1541_v38, %v4437_v55  ;;  %v5342_v38 = vsub.s32 2, %v5339_v30  ;;  %v5343_v3 = vsub.s32 3, %v5339_v30  ;;  %v4453_v36 = vrot.slane %v995_v47, %v157_v15 }
 0x161   :  { %v888_v49 = vsel %vm886_vm0, %v880_v43, %v881_v22  ;;  %v890_v20 = vsel %vm886_vm0, %v884_v32, %v885_v46  ;;  %v1544_v46 = vadd.f32 %v1543_v51, %v4442_v31 }
 0x162   :  { %896 = vst [vmem:[#allocation3 + $0x6] sm:$0x3f] %v888_v49  ;;  %898 = vst [vmem:[#allocation3 + $0x12] sm:$0x3f] %v890_v20  ;;  %v1631_v17 = vadd.f32 %v1630_v57, %v1542_v39  ;;  %v4447_v1 = vrot.slane %v995_v47, %v5342_v38  ;;  %v4451_v40 = vrot.slane %v995_v47, %v5343_v3 }
 0x163   :  { %v1641_v44 = vadd.f32 %v1639_v35, %v1544_v46 }
 0x164   :  { %v2778_v43 = vmul.f32 -1.442695, %v1631_v17 }
 0x165   :  { %v2779_v53 = vmul.f32 -1.442695, %v1641_v44 }
 0x166   :  { %3181 = vpow2.f32 %v2778_v43 }
 0x167   :  { %3183 = vpow2.f32 %v2779_v53 }
 0x169   :  { %v1658_v43 = vld [vmem:[#allocation3 + $0x12] sm:$0x3f] }
 0x170   :  { %v3182_v59 = vpop.eup %3181 }
 0x171   :  { %v1635_v61 = vadd.f32 1.0, %v3182_v59  ;;  %v3184_v63 = vpop.eup %3183  ;;  %v1667_v59 = vrot.slane %v1658_v43, 2 }
 0x172   :  { %v1645_v42 = vadd.f32 1.0, %v3184_v63 }
 0x173   :  { %3185 = vrcp.f32 %v1635_v61 }
 0x174   :  { %3187 = vrcp.f32 %v1645_v42 }
 0x17d   :  { %v3186_v49 = vpop.eup %3185 }
 0x17e   :  { %v3188_v3 = vpop.eup %3187 }
 0x17f   :  { %v1655_v42 = vmul.f32 0.0, %v3188_v3 }
 0x195   :  { %v1582_v51 = vpop.f32.mrb[8].mxu0 }
 0x196   :  { %v1623_v32 = vpop.f32.mrb[8].mxu1  ;;  %v1583_v22 = vadd.f32 %v1582_v51, %v4447_v1  ;;  %v1584_v34 = vpop.f32.mrb[9].mxu0  ;;  %v1653_v51 = vsub.f32 1.0, %v3188_v3 }
 0x197   :  { %v1625_v26 = vpop.f32.mrb[9].mxu1  ;;  %v1585_v20 = vadd.f32 %v1584_v34, %v4451_v40  ;;  %v1586_v18 = vpop.f32.mrb[10].mxu0  ;;  %v1624_v15 = vadd.f32 %v1623_v32, %v4453_v36 }
 0x198   :  { %v1627_v39 = vpop.f32.mrb[10].mxu1  ;;  %v1648_v17 = vmul.f32 %v3186_v49, %v1583_v22  ;;  %v1587_v46 = vpop.f32.mrb[11].mxu0 }
 0x199   :  { %v1628_v35 = vpop.f32.mrb[11].mxu1  ;;  %v1659_v44 = vadd.f32 %v1658_v43, %v1585_v20  ;;  %v1669_v63 = vadd.f32 %v1667_v59, %v1624_v15  ;;  %v5344_v20 = vsub.s32 5, %v5339_v30 }
 0x19a   :  { %v1651_v53 = vadd.f32 %v1649_v45, %v1648_v17  ;;  %v4468_v17 = vld [vmem:[%s5199_s5] ss:$0 sm:$0xff] }
 0x19b   :  { %v2780_v61 = vmul.f32 -1.442695, %v1659_v44  ;;  %v2781_v38 = vmul.f32 -1.442695, %v1669_v63  ;;  %v4463_v39 = vrot.slane %v995_v47, %v5344_v20  ;;  %v5348_v20 = vld [vmem:[#allocation17_spill] sm:$0xff] }
 0x19c   :  { %3189 = vtanh.f32 %v1651_v53 }
 0x19d   :  { %3191 = vpow2.f32 %v2780_v61  ;;  %v1626_v15 = vadd.f32 %v1625_v26, %v4463_v39  ;;  %v1677_v61 = vrot.slane %v1658_v43, 4  ;;  %v5345_v43 = vld [vmem:[#allocation14_spill] sm:$0xff] }
 0x19e   :  { %3193 = vpow2.f32 %v2781_v38 }
 0x1a6   :  { %v3190_v34 = vpop.eup %3189 }
 0x1a7   :  { %v1654_v22 = vmul.f32 %v3190_v34, %v1653_v51  ;;  %v3192_v57 = vpop.eup %3191 }
 0x1a8   :  { %v1663_v18 = vadd.f32 1.0, %v3192_v57  ;;  %v3194_v32 = vpop.eup %3193  ;;  %v4489_v57 = vld [vmem:[%s5197_s3] ss:$24 sps:$4 sm:$0xff]  }
 0x1a9   :  { %v4458_v49 = vadd.f32 %v1655_v42, %v1654_v22  ;;  %v1673_v45 = vadd.f32 1.0, %v3194_v32  ;;  %v5346_v22 = vld [vmem:[#allocation15_spill] sm:$0xff]  ;;  %v5347_v32 = vld [vmem:[#allocation16_spill] sm:$0xff] }
 0x1aa   :  { %3195 = vrcp.f32 %v1663_v18  ;;  %v4495_v18 = vld [vmem:[%s5197_s3 + $0x34] ss:$24 sps:$4 sm:$0xff]  }
 0x1ab   :  { %1685 = vst [vmem:[#allocation4] sm:$0x3] %v4458_v49  ;;  %3197 = vrcp.f32 %v1673_v45  ;;  %v4480_v42 = vpack.c.bf16 %v4458_v49, %v4458_v49  ;;  %v4503_v45 = vld [vmem:[%s5197_s3 + $0x30] ss:$24 sps:$4 sm:$0xff]  }
 0x1b2   :  { %v2241_v46 = vld [vmem:[#allocation4] sm:$0x3] }
 0x1b3   :  { %v2257_v35 = vmul.f32 %v4468_v17, %v2241_v46  ;;  %v4509_v46 = vld [vmem:[%s5197_s3 + $0x64] ss:$24 sps:$4 sm:$0xff]  }
 0x1b4   :  { %v3196_v44 = vpop.eup %3195 }
 0x1b5   :  { %v2261_v53 = vsel %vm886_vm0, %v2257_v35, 0.0  ;;  %v1676_v59 = vmul.f32 %v3196_v44, %v1626_v15  ;;  %v3198_v47 = vpop.eup %3197  ;;  %v5349_v35 = vld [vmem:[#allocation18_spill] sm:$0xff]  ;;  %v5350_v15 = vld [vmem:[#allocation19_spill] sm:$0xff] }
 0x1b6   :  { %2262 = vadd.xlane.f32.xlu0 %v2261_v53  ;;  %v1681_v63 = vsub.f32 1.0, %v3198_v47  ;;  %v1683_v51 = vmul.f32 0.0, %v3198_v47  ;;  %v4517_v44 = vld [vmem:[%s5197_s3 + $0x60] ss:$24 sps:$4 sm:$0xff]   ;;  %v4523_v53 = vld [vmem:[%s5197_s3 + $0x94] ss:$24 sps:$4 sm:$0xff]  }
 0x1b7   :  { %v1679_v30 = vadd.f32 %v1677_v61, %v1676_v59  ;;  %v5351_v59 = vld [vmem:[#allocation20_spill] sm:$0xff]  ;;  %v5352_v61 = vld [vmem:[#allocation21_spill] sm:$0xff] }
 0x1b8   :  { %v4537_v47 = vld [vmem:[%s5197_s3 + $0xc4] ss:$24 sps:$4 sm:$0xff]  }
 0x1b9   :  { %3199 = vtanh.f32 %v1679_v30  ;;  %v4531_v30 = vld [vmem:[%s5197_s3 + $0x90] ss:$24 sps:$4 sm:$0xff]  }
 0x1c3   :  { %v3200_v38 = vpop.eup %3199 }
 0x1c4   :  { %v1682_v3 = vmul.f32 %v3200_v38, %v1681_v63  ;;  %v5353_v63 = vld [vmem:[#allocation22_spill] sm:$0xff]  ;;  %v5354_v38 = vld [vmem:[#allocation23_spill] sm:$0xff] }
 0x1c6   :  { %v4473_v34 = vadd.f32 %v1683_v51, %v1682_v3  ;;  %v4545_v3 = vld [vmem:[%s5197_s3 + $0xc0] ss:$24 sps:$4 sm:$0xff]   ;;  %v4551_v51 = vld [vmem:[%s5197_s3 + $0xf4] ss:$24 sps:$4 sm:$0xff]  }
 0x1c8   :  { %1687 = vst [vmem:[#allocation5 + $0x6] sm:$0x3] %v4473_v34  ;;  %v1689_v26 = vpack.c.bf16 %v4473_v34, %v4473_v34 }
 0x1ca   :  { %1722 = vmatprep.mubr.bf16.mxu0 %v1689_v26  ;;  %1763 = vmatprep.mubr.bf16.mxu1 %v1689_v26 }
 0x1cb   :  { %1723 = vmatmul.mubr.bf16.vlgmr.msra.gmra.mrb[12].mxu0 %v4480_v42  ;;  %1764 = vmatmul.mubr.bf16.vlgmr.msra.gmra.mrb[12].mxu1 %v4480_v42 }
 0x1cc   :  { %1773 = vmatpush1.bf16.msra.mxu0 %v5345_v43  ;;  %1804 = vmatprep.mubr.bf16.mxu0 %v1689_v26  ;;  %v5355_v26 = vld [vmem:[#allocation24_spill] sm:$0xff]  ;;  %v5356_v43 = vld [vmem:[#allocation25_spill] sm:$0xff] }
 0x1cd   :  { %1774 = vmatprep.subr.bf16.mxu0 %v5346_v22  ;;  %1876 = vmatpush1.bf16.msra.mxu1 %v4489_v57  ;;  %v4559_v22 = vld [vmem:[%s5197_s3 + $0xf0] ss:$24 sps:$4 sm:$0xff]  }
 0x1ce   :  { %1877 = vmatprep.subr.bf16.mxu1 %v4495_v18 }
 0x1d0   :  { %1775 = vmatpush1.bf16.msra.mxu0 %v5347_v32  ;;  %v4565_v32 = vld [vmem:[%s5197_s3 + $0x124] ss:$24 sps:$4 sm:$0xff]  }
 0x1d1   :  { %1776 = vmatprep.subr.bf16.mxu0 %v5348_v20  ;;  %1878 = vmatpush1.bf16.msra.mxu1 %v4503_v45  ;;  %v5357_v20 = vld [vmem:[#allocation26_spill] sm:$0xff] }
 0x1d2   :  { %1879 = vmatprep.subr.bf16.mxu1 %v4509_v46 }
 0x1d4   :  { %1777 = vmatpush1.bf16.msra.mxu0 %v5349_v35  ;;  %v5358_v35 = vld [vmem:[#allocation27_spill] sm:$0xff] }
 0x1d5   :  { %1778 = vmatprep.subr.bf16.mxu0 %v5350_v15  ;;  %1880 = vmatpush1.bf16.msra.mxu1 %v4517_v44  ;;  %v4573_v15 = vld [vmem:[%s5197_s3 + $0x120] ss:$24 sps:$4 sm:$0xff]  }
 0x1d6   :  { %1881 = vmatprep.subr.bf16.mxu1 %v4523_v53  ;;  %5359 = vst [vmem:[#allocation10_spill] sm:$0xff] %v4573_v15 }
 0x1d8   :  { %1779 = vmatpush1.bf16.msra.mxu0 %v5351_v59  ;;  %v4579_v59 = vld [vmem:[%s5197_s3 + $0x154] ss:$24 sps:$4 sm:$0xff]  }
 0x1d9   :  { %1780 = vmatprep.subr.bf16.mxu0 %v5352_v61  ;;  %1882 = vmatpush1.bf16.msra.mxu1 %v4531_v30  ;;  %5360 = vst [vmem:[#allocation11_spill] sm:$0xff] %v4579_v59  ;;  %v5361_v61 = vld [vmem:[#allocation28_spill] sm:$0xff] }
 0x1da   :  { %1883 = vmatprep.subr.bf16.mxu1 %v4537_v47 }
 0x1dc   :  { %1781 = vmatpush1.bf16.msra.mxu0 %v5353_v63  ;;  %v5362_v63 = vld [vmem:[#allocation29_spill] sm:$0xff] }
 0x1dd   :  { %1782 = vmatprep.subr.bf16.mxu0 %v5354_v38  ;;  %1884 = vmatpush1.bf16.msra.mxu1 %v4545_v3  ;;  %v4587_v38 = vld [vmem:[%s5197_s3 + $0x150] ss:$24 sps:$4 sm:$0xff]  }
 0x1de   :  { %1885 = vmatprep.subr.bf16.mxu1 %v4551_v51  ;;  %5363 = vst [vmem:[#allocation12_spill] sm:$0xff] %v4587_v38 }
 0x1e0   :  { %1783 = vmatpush1.bf16.msra.mxu0 %v5355_v26  ;;  %v4593_v26 = vld [vmem:[%s5197_s3 + $0x184] ss:$24 sps:$4 sm:$0xff]  }
 0x1e1   :  { %1784 = vmatprep.subr.bf16.mxu0 %v5356_v43  ;;  %1886 = vmatpush1.bf16.msra.mxu1 %v4559_v22  ;;  %5364 = vst [vmem:[#allocation13_spill] sm:$0xff] %v4593_v26 }
 0x1e2   :  { %1887 = vmatprep.subr.bf16.mxu1 %v4565_v32 }
 0x1e4   :  { %1785 = vmatpush1.bf16.msra.mxu0 %v5357_v20 }
 0x1e5   :  { %1786 = vmatprep.subr.bf16.mxu0 %v5358_v35  ;;  %1888 = vmatpush1.bf16.msra.mxu1 %v4573_v15  ;;  %v5365_v15 = vld [vmem:[#allocation30_spill] sm:$0xff] }
 0x1e6   :  { %1889 = vmatprep.subr.bf16.mxu1 %v4579_v59  ;;  %v5366_v59 = vld [vmem:[#allocation31_spill] sm:$0xff] }
 0x1e8   :  { %1787 = vmatpush1.bf16.msra.mxu0 %v5361_v61  ;;  %v5369_v61 = vld [vmem:[#allocation32_spill] sm:$0xff] }
 0x1e9   :  { %1788 = vmatprep.subr.bf16.mxu0 %v5362_v63  ;;  %1890 = vmatpush1.bf16.msra.mxu1 %v4587_v38  ;;  %v4601_v63 = vld [vmem:[%s5197_s3 + $0x180] ss:$24 sps:$4 sm:$0xff]   ;;  %v4607_v38 = vld [vmem:[%s5197_s3 + $0x1b4] ss:$24 sps:$4 sm:$0xff]  }
 0x1ea   :  { %1891 = vmatprep.subr.bf16.mxu1 %v4593_v26  ;;  %5367 = vst [vmem:[#allocation9_spill] sm:$0xff] %v4601_v63  ;;  %5368 = vst [vmem:[#allocation14_spill] sm:$0xff] %v4607_v38  ;;  %v5370_v26 = vld [vmem:[#allocation33_spill] sm:$0xff] }
 0x1ec   :  { %1789 = vmatpush1.bf16.msra.mxu0 %v5365_v15  ;;  %v5373_v15 = vld [vmem:[#allocation34_spill] sm:$0xff] }
 0x1ed   :  { %1790 = vmatprep.subr.bf16.mxu0 %v5366_v59  ;;  %1892 = vmatpush1.bf16.msra.mxu1 %v4601_v63  ;;  %v4615_v59 = vld [vmem:[%s5197_s3 + $0x1b0] ss:$24 sps:$4 sm:$0xff]   ;;  %v4621_v63 = vld [vmem:[%s5197_s3 + $0x1e4] ss:$24 sps:$4 sm:$0xff]  }
 0x1ee   :  { %1893 = vmatprep.subr.bf16.mxu1 %v4607_v38  ;;  %5371 = vst [vmem:[#allocation15_spill] sm:$0xff] %v4615_v59  ;;  %5372 = vst [vmem:[#allocation16_spill] sm:$0xff] %v4621_v63  ;;  %v5374_v38 = vld [vmem:[#allocation36_spill] sm:$0xff] }
 0x1f0   :  { %1791 = vmatpush1.bf16.msra.mxu0 %v5369_v61  ;;  %v5377_v61 = vld [vmem:[#allocation38_spill] sm:$0xff] }
 0x1f1   :  { %1792 = vmatprep.subr.bf16.mxu0 %v5370_v26  ;;  %1894 = vmatpush1.bf16.msra.mxu1 %v4615_v59  ;;  %v4629_v26 = vld [vmem:[%s5197_s3 + $0x1e0] ss:$24 sps:$4 sm:$0xff]   ;;  %v4635_v59 = vld [vmem:[%s5197_s3 + $0x214] ss:$24 sps:$4 sm:$0xff]  }
 0x1f2   :  { %1895 = vmatprep.subr.bf16.mxu1 %v4621_v63  ;;  %5375 = vst [vmem:[#allocation17_spill] sm:$0xff] %v4629_v26  ;;  %5376 = vst [vmem:[#allocation18_spill] sm:$0xff] %v4635_v59  ;;  %v5378_v63 = vld [vmem:[#allocation40_spill] sm:$0xff] }
 0x1f4   :  { %1793 = vmatpush1.bf16.msra.mxu0 %v5373_v15  ;;  %v5380_v15 = vld [vmem:[#allocation44_spill] sm:$0xff] }
 0x1f5   :  { %1794 = vmatprep.subr.bf16.mxu0 %v5374_v38  ;;  %1896 = vmatpush1.bf16.msra.mxu1 %v4629_v26  ;;  %v4643_v38 = vld [vmem:[%s5197_s3 + $0x210] ss:$24 sps:$4 sm:$0xff]  }
 0x1f6   :  { %1897 = vmatprep.subr.bf16.mxu1 %v4635_v59  ;;  %v5379_v26 = vld [vmem:[#allocation42_spill] sm:$0xff] }
 0x1f7   :  { %v5383_v59 = vld [vmem:[#allocation50_spill] sm:$0xff] }
 0x1f8   :  { %1795 = vmatpush1.bf16.msra.mxu0 %v5377_v61  ;;  %v5381_v61 = vld [vmem:[#allocation46_spill] sm:$0xff] }
 0x1f9   :  { %1796 = vmatprep.subr.bf16.mxu0 %v5378_v63  ;;  %1898 = vmatpush1.bf16.msra.mxu1 %v4643_v38  ;;  %v5382_v63 = vld [vmem:[#allocation48_spill] sm:$0xff] }
 0x1fa   :  { %1899 = vmatprep.subr.bf16.mxu1 %v3885_v5  ;;  %v5384_v5 = vld [vmem:[#allocation35_spill] sm:$0xff] }
 0x1fc   :  { %1797 = vmatpush1.bf16.msra.mxu0 %v5379_v26 }
 0x1fd   :  { %1798 = vmatprep.subr.bf16.mxu0 %v5380_v15  ;;  %1900 = vmatpush1.bf16.msra.mxu1 %v3894_v7  ;;  %v5385_v7 = vld [vmem:[#allocation37_spill] sm:$0xff] }
 0x1fe   :  { %1901 = vmatprep.subr.bf16.mxu1 %v3903_v9  ;;  %v5386_v9 = vld [vmem:[#allocation39_spill] sm:$0xff] }
 0x200   :  { %1799 = vmatpush1.bf16.msra.mxu0 %v5381_v61 }
 0x201   :  { %1800 = vmatprep.subr.bf16.mxu0 %v5382_v63  ;;  %1902 = vmatpush1.bf16.msra.mxu1 %v3911_v11  ;;  %v5387_v11 = vld [vmem:[#allocation41_spill] sm:$0xff] }
 0x202   :  { %1903 = vmatprep.subr.bf16.mxu1 %v3921_v13  ;;  %v5389_v13 = vld [vmem:[#allocation45_spill] sm:$0xff] }
 0x204   :  { %1801 = vmatpush1.bf16.msra.mxu0 %v5383_v59 }
 0x205   :  { %1802 = vmatprep.subr.bf16.mxu0 %v4322_v10  ;;  %1904 = vmatpush1.bf16.msra.mxu1 %v5335_v21 }
 0x206   :  { %1905 = vmatprep.subr.bf16.mxu1 %v5336_v23 }
 0x208   :  { %1803 = vmatpush1.bf16.msra.mxu0 %v4334_v14 }
 0x209   :  { %1916 = vmatprep.subr.bf16.mxu0 %v3953_v24  ;;  %1906 = vmatpush1.bf16.msra.mxu1 %v5337_v25  ;;  %v5390_v24 = vld [vmem:[#allocation47_spill] sm:$0xff] }
 0x20a   :  { %1957 = vmatprep.subr.bf16.mxu1 %v5338_v27 }
 0x20b   :  { %1805 = vmatmul.mubr.bf16.vlgmr.msra.gmra.mrb[16].mxu0 %v4480_v42 }
 0x20c   :  { %1917 = vmatpush1.bf16.msra.mxu0 %v3965_v29  ;;  %v5391_v29 = vld [vmem:[#allocation49_spill] sm:$0xff] }
 0x20d   :  { %1918 = vmatprep.subr.bf16.mxu0 %v3977_v33  ;;  %v5392_v33 = vld [vmem:[#allocation51_spill] sm:$0xff] }
 0x210   :  { %1919 = vmatpush1.bf16.msra.mxu0 %v3987_v37  ;;  %v5393_v37 = vld [vmem:[#allocation52_spill] sm:$0xff] }
 0x211   :  { %1920 = vmatprep.subr.bf16.mxu0 %v3999_v41  ;;  %v3294_v41 = vld [vmem:[%s5197_s3 + $0x4] ss:$24 sps:$4 sm:$0xff]  }
 0x214   :  { %1921 = vmatpush1.bf16.msra.mxu0 %v4013_v19 }
 0x215   :  { %1922 = vmatprep.subr.bf16.mxu0 %v4025_v48 }
 0x218   :  { %1923 = vmatpush1.bf16.msra.mxu0 %v4039_v52  ;;  %v1814_v52 = vld [vmem:[#allocation2 + $0x6] sm:$0x3f] }
 0x219   :  { %1924 = vmatprep.subr.bf16.mxu0 %v4053_v56 }
 0x21c   :  { %1925 = vmatpush1.bf16.msra.mxu0 %v4065_v60 }
 0x21d   :  { %1926 = vmatprep.subr.bf16.mxu0 %v4077_v0 }
 0x220   :  { %1927 = vmatpush1.bf16.msra.mxu0 %v4089_v4 }
 0x221   :  { %1928 = vmatprep.subr.bf16.mxu0 %v4101_v8 }
 0x224   :  { %1929 = vmatpush1.bf16.msra.mxu0 %v4113_v12 }
 0x225   :  { %1930 = vmatprep.subr.bf16.mxu0 %v4125_v16 }
 0x228   :  { %1931 = vmatpush1.bf16.msra.mxu0 %v4137_v28  ;;  %v5388_v28 = vld [vmem:[#allocation43_spill] sm:$0xff] }
 0x229   :  { %1932 = vmatprep.subr.bf16.mxu0 %v4149_v6  ;;  %v1823_v6 = vrot.slane %v1814_v52, 2 }
 0x22c   :  { %1933 = vmatpush1.bf16.msra.mxu0 %v4161_v2 }
 0x22d   :  { %1934 = vmatprep.subr.bf16.mxu0 %v4173_v62 }
 0x230   :  { %1935 = vmatpush1.bf16.msra.mxu0 %v4185_v58 }
 0x231   :  { %1936 = vmatprep.subr.bf16.mxu0 %v4197_v54 }
 0x234   :  { %1937 = vmatpush1.bf16.msra.mxu0 %v4209_v50 }
 0x235   :  { %1938 = vmatprep.subr.bf16.mxu0 %v5384_v5 }
 0x238   :  { %1939 = vmatpush1.bf16.msra.mxu0 %v5385_v7 }
 0x239   :  { %1940 = vmatprep.subr.bf16.mxu0 %v5386_v9 }
 0x23c   :  { %1941 = vmatpush1.bf16.msra.mxu0 %v5387_v11  ;;  %v1833_v11 = vrot.slane %v1814_v52, 4 }
 0x23d   :  { %1942 = vmatprep.subr.bf16.mxu0 %v5388_v28  ;;  %v1842_v28 = vld [vmem:[#allocation3 + $0xc] sm:$0x3f] }
 0x240   :  { %1943 = vmatpush1.bf16.msra.mxu0 %v5389_v13 }
 0x241   :  { %1944 = vmatprep.subr.bf16.mxu0 %v5390_v24 }
 0x244   :  { %1945 = vmatpush1.bf16.msra.mxu0 %v5391_v29 }
 0x245   :  { %1946 = vmatprep.subr.bf16.mxu0 %v5392_v33 }
 0x248   :  { %1947 = vmatpush1.bf16.msra.mxu0 %v5393_v37 }
 0x249   :  { %2060 = vmatprep.subr.bf16.mxu0 %v3294_v41 }
 0x29e   :  { %v1724_v19 = vpop.f32.mrb[12].mxu0  ;;  %v1765_v48 = vpop.f32.mrb[12].mxu1 }
 0x29f   :  { %v1725_v50 = vadd.f32 %v1724_v19, %v4437_v55  ;;  %v1726_v54 = vpop.f32.mrb[13].mxu0  ;;  %v1767_v56 = vpop.f32.mrb[13].mxu1  ;;  %v1766_v5 = vadd.f32 %v1765_v48, %v4447_v1 }
 0x2a0   :  { %v1727_v58 = vadd.f32 %v1726_v54, %v4442_v31  ;;  %v1728_v60 = vpop.f32.mrb[14].mxu0  ;;  %v1769_v62 = vpop.f32.mrb[14].mxu1  ;;  %v1768_v42 = vadd.f32 %v1767_v56, %v4451_v40 }
 0x2a1   :  { %v1815_v0 = vadd.f32 %v1814_v52, %v1725_v50  ;;  %v1729_v2 = vpop.f32.mrb[15].mxu0  ;;  %v1770_v4 = vpop.f32.mrb[15].mxu1 }
 0x2a2   :  { %v1825_v12 = vadd.f32 %v1823_v6, %v1727_v58  ;;  %v1843_v13 = vadd.f32 %v1842_v28, %v1768_v42  ;;  %v1851_v4 = vrot.slane %v1842_v28, 2 }
 0x2a3   :  { %v2782_v8 = vmul.f32 -1.442695, %v1815_v0 }
 0x2a4   :  { %v2783_v16 = vmul.f32 -1.442695, %v1825_v12  ;;  %v2784_v29 = vmul.f32 -1.442695, %v1843_v13 }
 0x2a5   :  { %3201 = vpow2.f32 %v2782_v8 }
 0x2a6   :  { %3203 = vpow2.f32 %v2783_v16 }
 0x2af   :  { %v3202_v21 = vpop.eup %3201 }
 0x2b0   :  { %v1819_v23 = vadd.f32 1.0, %v3202_v21  ;;  %v3204_v25 = vpop.eup %3203 }
 0x2b1   :  { %v1829_v27 = vadd.f32 1.0, %v3204_v25 }
 0x2b2   :  { %3205 = vrcp.f32 %v1819_v23 }
 0x2b3   :  { %3207 = vrcp.f32 %v1829_v27  ;;  %v1861_v27 = vrot.slane %v1842_v28, 4 }
 0x2bc   :  { %v3206_v7 = vpop.eup %3205 }
 0x2bd   :  { %v1832_v9 = vmul.f32 %v3206_v7, %v1766_v5  ;;  %v3208_v33 = vpop.eup %3207 }
 0x2be   :  { %v1837_v41 = vsub.f32 1.0, %v3208_v33  ;;  %v1839_v54 = vmul.f32 %v3208_v33, %v4458_v49 }
 0x2bf   :  { %v1835_v24 = vadd.f32 %v1833_v11, %v1832_v9 }
 0x2c1   :  { %3209 = vtanh.f32 %v1835_v24 }
 0x2c2   :  { %3211 = vpow2.f32 %v2784_v29 }
 0x2cb   :  { %v3210_v19 = vpop.eup %3209 }
 0x2cc   :  { %v1838_v50 = vmul.f32 %v3210_v19, %v1837_v41  ;;  %v3212_v56 = vpop.eup %3211  ;;  %v4734_v19 = vld [vmem:[%s5197_s3 + $0x44] ss:$24 sps:$4 sm:$0xff]  }
 0x2cd   :  { %v1847_v48 = vadd.f32 1.0, %v3212_v56  ;;  %v5397_v56 = vld [vmem:[#allocation29_spill] sm:$0xff] }
 0x2ce   :  { %v4703_v58 = vadd.f32 %v1839_v54, %v1838_v50  ;;  %v4742_v50 = vld [vmem:[%s5197_s3 + $0x40] ss:$24 sps:$4 sm:$0xff]   ;;  %v4748_v54 = vld [vmem:[%s5197_s3 + $0x74] ss:$24 sps:$4 sm:$0xff]  }
 0x2cf   :  { %3213 = vrcp.f32 %v1847_v48  ;;  %v5398_v48 = vld [vmem:[#allocation12_spill] sm:$0xff] }
 0x2d0   :  { %1870 = vst [vmem:[#allocation4 + $0x2] sm:$0x3] %v4703_v58  ;;  %v4721_v28 = vpack.c.bf16 %v4703_v58, %v4703_v58 }
 0x2d7   :  { %v4706_v52 = vld [vmem:[#allocation4 + $0x2] sm:$0x3] }
 0x2d8   :  { %v2258_v60 = vmul.f32 %v4468_v17, %v4706_v52 }
 0x2d9   :  { %v3214_v12 = vpop.eup %3213 }
 0x2da   :  { %v2264_v62 = vsel %vm886_vm0, %v2258_v60, 0.0  ;;  %v5399_v60 = vld [vmem:[#allocation13_spill] sm:$0xff] }
 0x2db   :  { %2265 = vadd.xlane.f32.xlu0 %v2264_v62  ;;  %v5405_v62 = vld [vmem:[#allocation33_spill] sm:$0xff] }
 0x2de   :  { %v1806_v0 = vpop.f32.mrb[16].mxu0 }
 0x2df   :  { %v1807_v2 = vadd.f32 %v1806_v0, %v4453_v36  ;;  %v1808_v49 = vpop.f32.mrb[17].mxu0  ;;  %v5406_v0 = vld [vmem:[#allocation15_spill] sm:$0xff] }
 0x2e0   :  { %v1809_v6 = vadd.f32 %v1808_v49, %v4463_v39  ;;  %v1810_v8 = vpop.f32.mrb[18].mxu0  ;;  %v5409_v49 = vld [vmem:[#allocation36_spill] sm:$0xff] }
 0x2e1   :  { %v1853_v16 = vadd.f32 %v1851_v4, %v1807_v2  ;;  %v1811_v21 = vpop.f32.mrb[19].mxu0  ;;  %v5407_v2 = vld [vmem:[#allocation16_spill] sm:$0xff]  ;;  %v5408_v4 = vld [vmem:[#allocation34_spill] sm:$0xff] }
 0x2e2   :  { %v1860_v23 = vmul.f32 %v3214_v12, %v1809_v6  ;;  %v5410_v6 = vld [vmem:[#allocation17_spill] sm:$0xff]  ;;  %v5411_v8 = vld [vmem:[#allocation18_spill] sm:$0xff] }
 0x2e3   :  { %v2785_v25 = vmul.f32 -1.442695, %v1853_v16  ;;  %v5412_v12 = vld [vmem:[#allocation38_spill] sm:$0xff]  ;;  %v5413_v16 = vld [vmem:[#allocation40_spill] sm:$0xff] }
 0x2e4   :  { %v1863_v7 = vadd.f32 %v1861_v27, %v1860_v23  ;;  %v3306_v21 = vld [vmem:[%s5197_s3 + $0x244] ss:$24 sps:$4 sm:$0xff]   ;;  %v3307_v23 = vld [vmem:[%s5197_s3 + $0x240] ss:$24 sps:$4 sm:$0xff]  }
 0x2e5   :  { %3215 = vpow2.f32 %v2785_v25  ;;  %v3308_v25 = vld [vmem:[%s5197_s3 + $0x274] ss:$24 sps:$4 sm:$0xff]  }
 0x2e6   :  { %v3317_v27 = vld [vmem:[%s5197_s3 + $0x3c] ss:$24 sps:$4 sm:$0xff]  }
 0x2ef   :  { %v3216_v42 = vpop.eup %3215 }
 0x2f0   :  { %v1857_v5 = vadd.f32 1.0, %v3216_v42  ;;  %v3318_v42 = vld [vmem:[%s5197_s3 + $0x38] ss:$24 sps:$4 sm:$0xff]  }
 0x2f2   :  { %3217 = vrcp.f32 %v1857_v5  ;;  %v3319_v5 = vld [vmem:[%s5197_s3 + $0x6c] ss:$24 sps:$4 sm:$0xff]  }
 0x2f3   :  { %3219 = vtanh.f32 %v1863_v7  ;;  %v3320_v7 = vld [vmem:[%s5197_s3 + $0x68] ss:$24 sps:$4 sm:$0xff]  }
 0x2fc   :  { %v3218_v9 = vpop.eup %3217 }
 0x2fd   :  { %v1865_v11 = vsub.f32 1.0, %v3218_v9  ;;  %v3220_v13 = vpop.eup %3219  ;;  %v1867_v29 = vmul.f32 %v3218_v9, %v4473_v34  ;;  %v4728_v34 = vld [vmem:[%s5197_s3 + $0x10] ss:$24 sps:$4 sm:$0xff]   ;;  %v3321_v9 = vld [vmem:[%s5197_s3 + $0x9c] ss:$24 sps:$4 sm:$0xff]  }
 0x2ff   :  { %v1866_v24 = vmul.f32 %v3220_v13, %v1865_v11  ;;  %v3322_v11 = vld [vmem:[%s5197_s3 + $0x98] ss:$24 sps:$4 sm:$0xff]   ;;  %v3323_v13 = vld [vmem:[%s5197_s3 + $0xcc] ss:$24 sps:$4 sm:$0xff]  }
 0x301   :  { %v4714_v33 = vadd.f32 %v1867_v29, %v1866_v24  ;;  %v3324_v24 = vld [vmem:[%s5197_s3 + $0xc8] ss:$24 sps:$4 sm:$0xff]   ;;  %v3325_v29 = vld [vmem:[%s5197_s3 + $0xfc] ss:$24 sps:$4 sm:$0xff]  }
 0x303   :  { %1872 = vst [vmem:[#allocation5 + $0x4] sm:$0x3] %v4714_v33  ;;  %v1874_v41 = vpack.c.bf16 %v4714_v33, %v4714_v33 }
 0x305   :  { %1907 = vmatprep.mubr.bf16.mxu1 %v1874_v41  ;;  %1948 = vmatprep.mubr.bf16.mxu0 %v1874_v41 }
 0x306   :  { %1908 = vmatmul.mubr.bf16.vlgmr.msra.gmra.mrb[16].mxu1 %v4721_v28  ;;  %1949 = vmatmul.mubr.bf16.vlgmr.msra.gmra.mrb[20].mxu0 %v4721_v28 }
 0x307   :  { %1958 = vmatpush1.bf16.msra.mxu1 %v4728_v34  ;;  %1989 = vmatprep.mubr.bf16.mxu1 %v1874_v41  ;;  %v3326_v41 = vld [vmem:[%s5197_s3 + $0xf8] ss:$24 sps:$4 sm:$0xff]  }
 0x308   :  { %1959 = vmatprep.subr.bf16.mxu1 %v4734_v19  ;;  %2061 = vmatpush1.bf16.msra.mxu0 %v4489_v57  ;;  %v4756_v57 = vld [vmem:[%s5197_s3 + $0x70] ss:$24 sps:$4 sm:$0xff]  }
 0x309   :  { %2062 = vmatprep.subr.bf16.mxu0 %v4495_v18  ;;  %v4762_v18 = vld [vmem:[%s5197_s3 + $0xa4] ss:$24 sps:$4 sm:$0xff]  }
 0x30b   :  { %1960 = vmatpush1.bf16.msra.mxu1 %v4742_v50 }
 0x30c   :  { %1961 = vmatprep.subr.bf16.mxu1 %v4748_v54  ;;  %2063 = vmatpush1.bf16.msra.mxu0 %v4503_v45  ;;  %v4770_v45 = vld [vmem:[%s5197_s3 + $0xa0] ss:$24 sps:$4 sm:$0xff]  }
 0x30d   :  { %2064 = vmatprep.subr.bf16.mxu0 %v4509_v46  ;;  %v4776_v46 = vld [vmem:[%s5197_s3 + $0xd4] ss:$24 sps:$4 sm:$0xff]  }
 0x30f   :  { %1962 = vmatpush1.bf16.msra.mxu1 %v4756_v57 }
 0x310   :  { %1963 = vmatprep.subr.bf16.mxu1 %v4762_v18  ;;  %2065 = vmatpush1.bf16.msra.mxu0 %v4517_v44  ;;  %v4784_v44 = vld [vmem:[%s5197_s3 + $0xd0] ss:$24 sps:$4 sm:$0xff]  }
 0x311   :  { %2066 = vmatprep.subr.bf16.mxu0 %v4523_v53  ;;  %v4790_v53 = vld [vmem:[%s5197_s3 + $0x104] ss:$24 sps:$4 sm:$0xff]  }
 0x313   :  { %1964 = vmatpush1.bf16.msra.mxu1 %v4770_v45 }
 0x314   :  { %1965 = vmatprep.subr.bf16.mxu1 %v4776_v46  ;;  %2067 = vmatpush1.bf16.msra.mxu0 %v4531_v30  ;;  %v4798_v30 = vld [vmem:[%s5197_s3 + $0x100] ss:$24 sps:$4 sm:$0xff]  }
 0x315   :  { %2068 = vmatprep.subr.bf16.mxu0 %v4537_v47  ;;  %v5394_v47 = vld [vmem:[#allocation10_spill] sm:$0xff] }
 0x317   :  { %1966 = vmatpush1.bf16.msra.mxu1 %v4784_v44 }
 0x318   :  { %1967 = vmatprep.subr.bf16.mxu1 %v4790_v53  ;;  %2069 = vmatpush1.bf16.msra.mxu0 %v4545_v3  ;;  %v5395_v3 = vld [vmem:[#allocation11_spill] sm:$0xff] }
 0x319   :  { %2070 = vmatprep.subr.bf16.mxu0 %v4551_v51  ;;  %v5396_v51 = vld [vmem:[#allocation28_spill] sm:$0xff] }
 0x31b   :  { %1968 = vmatpush1.bf16.msra.mxu1 %v4798_v30 }
 0x31c   :  { %1969 = vmatprep.subr.bf16.mxu1 %v5356_v43  ;;  %2071 = vmatpush1.bf16.msra.mxu0 %v4559_v22  ;;  %v5400_v43 = vld [vmem:[#allocation30_spill] sm:$0xff]  ;;  %v5401_v22 = vld [vmem:[#allocation31_spill] sm:$0xff] }
 0x31d   :  { %2072 = vmatprep.subr.bf16.mxu0 %v4565_v32  ;;  %v5402_v32 = vld [vmem:[#allocation9_spill] sm:$0xff] }
 0x31f   :  { %1970 = vmatpush1.bf16.msra.mxu1 %v5357_v20  ;;  %v5403_v20 = vld [vmem:[#allocation14_spill] sm:$0xff] }
 0x320   :  { %1971 = vmatprep.subr.bf16.mxu1 %v5358_v35  ;;  %2073 = vmatpush1.bf16.msra.mxu0 %v5394_v47  ;;  %v5404_v35 = vld [vmem:[#allocation32_spill] sm:$0xff] }
 0x321   :  { %2074 = vmatprep.subr.bf16.mxu0 %v5395_v3  ;;  %v3328_v47 = vld [vmem:[%s5197_s3 + $0x128] ss:$24 sps:$4 sm:$0xff]   ;;  %v3329_v3 = vld [vmem:[%s5197_s3 + $0x15c] ss:$24 sps:$4 sm:$0xff]  }
 0x323   :  { %1972 = vmatpush1.bf16.msra.mxu1 %v5396_v51  ;;  %v3330_v51 = vld [vmem:[%s5197_s3 + $0x158] ss:$24 sps:$4 sm:$0xff]  }
 0x324   :  { %1973 = vmatprep.subr.bf16.mxu1 %v5397_v56  ;;  %2075 = vmatpush1.bf16.msra.mxu0 %v5398_v48  ;;  %v3331_v56 = vld [vmem:[%s5197_s3 + $0x18c] ss:$24 sps:$4 sm:$0xff]   ;;  %v3332_v48 = vld [vmem:[%s5197_s3 + $0x188] ss:$24 sps:$4 sm:$0xff]  }
 0x325   :  { %2076 = vmatprep.subr.bf16.mxu0 %v5399_v60  ;;  %v3333_v60 = vld [vmem:[%s5197_s3 + $0x1bc] ss:$24 sps:$4 sm:$0xff]  }
 0x327   :  { %1974 = vmatpush1.bf16.msra.mxu1 %v5400_v43  ;;  %v3334_v43 = vld [vmem:[%s5197_s3 + $0x1b8] ss:$24 sps:$4 sm:$0xff]  }
 0x328   :  { %1975 = vmatprep.subr.bf16.mxu1 %v5401_v22  ;;  %2077 = vmatpush1.bf16.msra.mxu0 %v5402_v32  ;;  %v3335_v22 = vld [vmem:[%s5197_s3 + $0x1ec] ss:$24 sps:$4 sm:$0xff]   ;;  %v3336_v32 = vld [vmem:[%s5197_s3 + $0x1e8] ss:$24 sps:$4 sm:$0xff]  }
 0x329   :  { %2078 = vmatprep.subr.bf16.mxu0 %v5403_v20  ;;  %v3337_v20 = vld [vmem:[%s5197_s3 + $0x21c] ss:$24 sps:$4 sm:$0xff]  }
 0x32b   :  { %1976 = vmatpush1.bf16.msra.mxu1 %v5404_v35  ;;  %v3338_v35 = vld [vmem:[%s5197_s3 + $0x218] ss:$24 sps:$4 sm:$0xff]  }
 0x32c   :  { %1977 = vmatprep.subr.bf16.mxu1 %v5405_v62  ;;  %2079 = vmatpush1.bf16.msra.mxu0 %v5406_v0  ;;  %v3339_v62 = vld [vmem:[%s5197_s3 + $0x24c] ss:$24 sps:$4 sm:$0xff]   ;;  %v3340_v0 = vld [vmem:[%s5197_s3 + $0x248] ss:$24 sps:$4 sm:$0xff]  }
 0x32d   :  { %2080 = vmatprep.subr.bf16.mxu0 %v5407_v2  ;;  %v3341_v2 = vld [vmem:[%s5197_s3 + $0x27c] ss:$24 sps:$4 sm:$0xff]  }
 0x32f   :  { %1978 = vmatpush1.bf16.msra.mxu1 %v5408_v4  ;;  %v3342_v4 = vld [vmem:[%s5197_s3 + $0x278] ss:$24 sps:$4 sm:$0xff]  }
 0x330   :  { %1979 = vmatprep.subr.bf16.mxu1 %v5409_v49  ;;  %2081 = vmatpush1.bf16.msra.mxu0 %v5410_v6  ;;  %v3343_v49 = vld [vmem:[%s5197_s3 + $0x2ac] ss:$24 sps:$4 sm:$0xff]   ;;  %v3344_v6 = vld [vmem:[%s5197_s3 + $0x2a8] ss:$24 sps:$4 sm:$0xff]  }
 0x331   :  { %2082 = vmatprep.subr.bf16.mxu0 %v5411_v8  ;;  %v3345_v8 = vld [vmem:[%s5197_s3 + $0x2dc] ss:$24 sps:$4 sm:$0xff]  }
 0x333   :  { %1980 = vmatpush1.bf16.msra.mxu1 %v5412_v12 }
 0x334   :  { %1981 = vmatprep.subr.bf16.mxu1 %v5413_v16  ;;  %2083 = vmatpush1.bf16.msra.mxu0 %v4643_v38  ;;  %v3309_v38 = vld [vmem:[%s5197_s3 + $0x270] ss:$24 sps:$4 sm:$0xff]  }
 0x335   :  { %2084 = vmatprep.subr.bf16.mxu0 %v3306_v21 }
 0x337   :  { %1982 = vmatpush1.bf16.msra.mxu1 %v5379_v26  ;;  %v3313_v26 = vld [vmem:[%s5197_s3 + $0xc] ss:$24 sps:$4 sm:$0xff]  }
 0x338   :  { %1983 = vmatprep.subr.bf16.mxu1 %v5380_v15  ;;  %2085 = vmatpush1.bf16.msra.mxu0 %v3307_v23  ;;  %v3310_v15 = vld [vmem:[%s5197_s3 + $0x2a4] ss:$24 sps:$4 sm:$0xff]   ;;  %v1999_v23 = vld [vmem:[#allocation2 + $0xc] sm:$0x3f] }
 0x339   :  { %2086 = vmatprep.subr.bf16.mxu0 %v3308_v25 }
 0x33b   :  { %1984 = vmatpush1.bf16.msra.mxu1 %v5381_v61  ;;  %v3311_v61 = vld [vmem:[%s5197_s3 + $0x2a0] ss:$24 sps:$4 sm:$0xff]  }
 0x33c   :  { %1985 = vmatprep.subr.bf16.mxu1 %v5382_v63  ;;  %2087 = vmatpush1.bf16.msra.mxu0 %v3309_v38  ;;  %v3312_v63 = vld [vmem:[%s5197_s3 + $0x2d4] ss:$24 sps:$4 sm:$0xff]  }
 0x33d   :  { %2088 = vmatprep.subr.bf16.mxu0 %v3310_v15 }
 0x33f   :  { %1986 = vmatpush1.bf16.msra.mxu1 %v5383_v59  ;;  %v3315_v59 = vld [vmem:[%s5197_s3 + $0x14] ss:$24 sps:$4 sm:$0xff]  }
 0x340   :  { %1987 = vmatprep.subr.bf16.mxu1 %v4322_v10  ;;  %2089 = vmatpush1.bf16.msra.mxu0 %v3311_v61  ;;  %v3314_v10 = vld [vmem:[%s5197_s3 + $0x2d0] ss:$24 sps:$4 sm:$0xff]  }
 0x341   :  { %2090 = vmatprep.subr.bf16.mxu0 %v3312_v63 }
 0x343   :  { %1988 = vmatpush1.bf16.msra.mxu1 %v4334_v14  ;;  %v3316_v14 = vld [vmem:[%s5197_s3 + $0x8] ss:$24 sps:$4 sm:$0xff]  }
 0x344   :  { %2101 = vmatprep.subr.bf16.mxu1 %v3313_v26  ;;  %2091 = vmatpush1.bf16.msra.mxu0 %v3314_v10 }
 0x345   :  { %2142 = vmatprep.subr.bf16.mxu0 %v3315_v59 }
 0x346   :  { %1990 = vmatmul.mubr.bf16.vlgmr.msra.gmra.mrb[20].mxu1 %v4721_v28  ;;  %v3327_v28 = vld [vmem:[%s5197_s3 + $0x12c] ss:$24 sps:$4 sm:$0xff]  }
 0x347   :  { %2102 = vmatpush1.bf16.msra.mxu1 %v3316_v14  ;;  %v2008_v14 = vrot.slane %v1999_v23, 2 }
 0x348   :  { %2103 = vmatprep.subr.bf16.mxu1 %v3317_v27 }
 0x34b   :  { %2104 = vmatpush1.bf16.msra.mxu1 %v3318_v42 }
 0x34c   :  { %2105 = vmatprep.subr.bf16.mxu1 %v3319_v5 }
 0x34f   :  { %2106 = vmatpush1.bf16.msra.mxu1 %v3320_v7 }
 0x350   :  { %2107 = vmatprep.subr.bf16.mxu1 %v3321_v9 }
 0x353   :  { %2108 = vmatpush1.bf16.msra.mxu1 %v3322_v11 }
 0x354   :  { %2109 = vmatprep.subr.bf16.mxu1 %v3323_v13 }
 0x357   :  { %2110 = vmatpush1.bf16.msra.mxu1 %v3324_v24 }
 0x358   :  { %2111 = vmatprep.subr.bf16.mxu1 %v3325_v29 }
 0x35b   :  { %2112 = vmatpush1.bf16.msra.mxu1 %v3326_v41 }
 0x35c   :  { %2113 = vmatprep.subr.bf16.mxu1 %v3327_v28  ;;  %v2018_v28 = vrot.slane %v1999_v23, 4 }
 0x35f   :  { %2114 = vmatpush1.bf16.msra.mxu1 %v3328_v47  ;;  %v2027_v47 = vld [vmem:[#allocation3 + $0x6] sm:$0x3f] }
 0x360   :  { %2115 = vmatprep.subr.bf16.mxu1 %v3329_v3 }
 0x363   :  { %2116 = vmatpush1.bf16.msra.mxu1 %v3330_v51 }
 0x364   :  { %2117 = vmatprep.subr.bf16.mxu1 %v3331_v56 }
 0x367   :  { %2118 = vmatpush1.bf16.msra.mxu1 %v3332_v48 }
 0x368   :  { %2119 = vmatprep.subr.bf16.mxu1 %v3333_v60 }
 0x36b   :  { %2120 = vmatpush1.bf16.msra.mxu1 %v3334_v43 }
 0x36c   :  { %2121 = vmatprep.subr.bf16.mxu1 %v3335_v22 }
 0x36f   :  { %2122 = vmatpush1.bf16.msra.mxu1 %v3336_v32 }
 0x370   :  { %2123 = vmatprep.subr.bf16.mxu1 %v3337_v20 }
 0x373   :  { %2124 = vmatpush1.bf16.msra.mxu1 %v3338_v35 }
 0x374   :  { %2125 = vmatprep.subr.bf16.mxu1 %v3339_v62 }
 0x377   :  { %2126 = vmatpush1.bf16.msra.mxu1 %v3340_v0 }
 0x378   :  { %2127 = vmatprep.subr.bf16.mxu1 %v3341_v2 }
 0x37b   :  { %2128 = vmatpush1.bf16.msra.mxu1 %v3342_v4 }
 0x37c   :  { %2129 = vmatprep.subr.bf16.mxu1 %v3343_v49 }
 0x37f   :  { %2130 = vmatpush1.bf16.msra.mxu1 %v3344_v6 }
 0x380   :  { %2131 = vmatprep.subr.bf16.mxu1 %v3345_v8  ;;  %v2036_v8 = vrot.slane %v2027_v47, 2 }
 0x383   :  { %2132 = vmatpush1.bf16.msra.mxu1 %v5393_v37 }
 0x3d9   :  { %v1909_v12 = vpop.f32.mrb[16].mxu1  ;;  %v1950_v16 = vpop.f32.mrb[20].mxu0 }
 0x3da   :  { %v1910_v21 = vadd.f32 %v1909_v12, %v4437_v55  ;;  %v1911_v25 = vpop.f32.mrb[17].mxu1  ;;  %v1952_v38 = vpop.f32.mrb[21].mxu0  ;;  %v1951_v24 = vadd.f32 %v1950_v16, %v4447_v1 }
 0x3db   :  { %v1912_v15 = vadd.f32 %v1911_v25, %v4442_v31  ;;  %v1913_v61 = vpop.f32.mrb[18].mxu1  ;;  %v1954_v63 = vpop.f32.mrb[22].mxu0  ;;  %v1953_v13 = vadd.f32 %v1952_v38, %v4451_v40 }
 0x3dc   :  { %v2000_v26 = vadd.f32 %v1999_v23, %v1910_v21  ;;  %v1914_v10 = vpop.f32.mrb[19].mxu1  ;;  %v1955_v59 = vpop.f32.mrb[23].mxu0  ;;  %v2046_v61 = vrot.slane %v2027_v47, 4 }
 0x3dd   :  { %v2010_v42 = vadd.f32 %v2008_v14, %v1912_v15  ;;  %v2028_v3 = vadd.f32 %v2027_v47, %v1953_v13  ;;  %v3360_v47 = vld [vmem:[%s5197_s3 + $0x284] ss:$24 sps:$4 sm:$0xff]  }
 0x3de   :  { %v2786_v27 = vmul.f32 -1.442695, %v2000_v26 }
 0x3df   :  { %v2787_v5 = vmul.f32 -1.442695, %v2010_v42  ;;  %v2788_v56 = vmul.f32 -1.442695, %v2028_v3  ;;  %v3361_v3 = vld [vmem:[%s5197_s3 + $0x280] ss:$24 sps:$4 sm:$0xff]  }
 0x3e0   :  { %3221 = vpow2.f32 %v2786_v27 }
 0x3e1   :  { %3223 = vpow2.f32 %v2787_v5 }
 0x3ea   :  { %v3222_v37 = vpop.eup %3221 }
 0x3eb   :  { %v2004_v7 = vadd.f32 1.0, %v3222_v37  ;;  %v3224_v9 = vpop.eup %3223 }
 0x3ec   :  { %v2014_v11 = vadd.f32 1.0, %v3224_v9 }
 0x3ed   :  { %3225 = vrcp.f32 %v2004_v7 }
 0x3ee   :  { %3227 = vrcp.f32 %v2014_v11  ;;  %v4986_v11 = vld [vmem:[%s5200_s6] ss:$0 sm:$0xff] }
 0x3f7   :  { %v3226_v29 = vpop.eup %3225 }
 0x3f8   :  { %v2017_v41 = vmul.f32 %v3226_v29, %v1951_v24  ;;  %v3228_v48 = vpop.eup %3227  ;;  %v3357_v29 = vld [vmem:[%s5197_s3 + $0x220] ss:$24 sps:$4 sm:$0xff]  }
 0x3f9   :  { %v2022_v60 = vsub.f32 1.0, %v3228_v48  ;;  %v2024_v32 = vmul.f32 %v3228_v48, %v4703_v58  ;;  %v3364_v48 = vld [vmem:[%s5197_s3 + $0x2e4] ss:$24 sps:$4 sm:$0xff]  }
 0x3fa   :  { %v2020_v51 = vadd.f32 %v2018_v28, %v2017_v41  ;;  %v3358_v41 = vld [vmem:[%s5197_s3 + $0x254] ss:$24 sps:$4 sm:$0xff]   ;;  %v3359_v28 = vld [vmem:[%s5197_s3 + $0x250] ss:$24 sps:$4 sm:$0xff]  }
 0x3fc   :  { %3229 = vtanh.f32 %v2020_v51  ;;  %v3362_v51 = vld [vmem:[%s5197_s3 + $0x2b4] ss:$24 sps:$4 sm:$0xff]  }
 0x3fd   :  { %3231 = vpow2.f32 %v2788_v56  ;;  %v3363_v56 = vld [vmem:[%s5197_s3 + $0x2b0] ss:$24 sps:$4 sm:$0xff]  }
 0x406   :  { %v3230_v43 = vpop.eup %3229 }
 0x407   :  { %v2023_v22 = vmul.f32 %v3230_v43, %v2022_v60  ;;  %v3232_v35 = vpop.eup %3231  ;;  %v3365_v60 = vld [vmem:[%s5197_s3 + $0x2e0] ss:$24 sps:$4 sm:$0xff]  }
 0x408   :  { %v2032_v62 = vadd.f32 1.0, %v3232_v35  ;;  %v2184_v35 = vld [vmem:[#allocation2 + $0x12] sm:$0x3f] }
 0x409   :  { %v4961_v20 = vadd.f32 %v2024_v32, %v2023_v22 }
 0x40a   :  { %3233 = vrcp.f32 %v2032_v62 }
 0x40b   :  { %2055 = vst [vmem:[#allocation4 + $0x4] sm:$0x3] %v4961_v20  ;;  %v2058_v9 = vpack.c.bf16 %v4961_v20, %v4961_v20 }
 0x412   :  { %v4964_v0 = vld [vmem:[#allocation4 + $0x4] sm:$0x3] }
 0x413   :  { %v2259_v2 = vmul.f32 %v4468_v17, %v4964_v0 }
 0x414   :  { %v3234_v21 = vpop.eup %3233 }
 0x415   :  { %v2267_v4 = vsel %vm886_vm0, %v2259_v2, 0.0 }
 0x416   :  { %2268 = vadd.xlane.f32.xlu1 %v2267_v4 }
 0x419   :  { %v1991_v49 = vpop.f32.mrb[20].mxu1 }
 0x41a   :  { %v1992_v6 = vadd.f32 %v1991_v49, %v4453_v36  ;;  %v1993_v58 = vpop.f32.mrb[21].mxu1 }
 0x41b   :  { %v1994_v12 = vadd.f32 %v1993_v58, %v4463_v39  ;;  %v1995_v16 = vpop.f32.mrb[22].mxu1 }
 0x41c   :  { %v2038_v23 = vadd.f32 %v2036_v8, %v1992_v6  ;;  %v1996_v25 = vpop.f32.mrb[23].mxu1  ;;  %v2193_v16 = vrot.slane %v2184_v35, 2 }
 0x41d   :  { %v2045_v38 = vmul.f32 %v3234_v21, %v1994_v12 }
 0x41e   :  { %v2789_v15 = vmul.f32 -1.442695, %v2038_v23 }
 0x41f   :  { %v2048_v10 = vadd.f32 %v2046_v61, %v2045_v38 }
 0x420   :  { %3235 = vpow2.f32 %v2789_v15 }
 0x42a   :  { %v3236_v63 = vpop.eup %3235 }
 0x42b   :  { %v2042_v26 = vadd.f32 1.0, %v3236_v63 }
 0x42d   :  { %3237 = vrcp.f32 %v2042_v26 }
 0x42e   :  { %3239 = vtanh.f32 %v2048_v10 }
 0x437   :  { %v3238_v59 = vpop.eup %3237 }
 0x438   :  { %v2050_v14 = vsub.f32 1.0, %v3238_v59  ;;  %v3240_v27 = vpop.eup %3239  ;;  %v2052_v5 = vmul.f32 %v3238_v59, %v4714_v33  ;;  %v2203_v59 = vrot.slane %v2184_v35, 4 }
 0x43a   :  { %v2051_v42 = vmul.f32 %v3240_v27, %v2050_v14  ;;  %v2211_v14 = vld [vmem:[#allocation3] sm:$0x3f] }
 0x43c   :  { %v4972_v37 = vadd.f32 %v2052_v5, %v2051_v42 }
 0x43e   :  { %2057 = vst [vmem:[#allocation5 + $0x2] sm:$0x3] %v4972_v37  ;;  %v2059_v7 = vpack.c.bf16 %v4972_v37, %v4972_v37 }
 0x440   :  { %2092 = vmatprep.mubr.bf16.mxu0 %v2059_v7  ;;  %2133 = vmatprep.mubr.bf16.mxu1 %v2059_v7 }
 0x441   :  { %2093 = vmatmul.mubr.bf16.vlgmr.msra.gmra.mrb[24].mxu0 %v2058_v9  ;;  %2134 = vmatmul.mubr.bf16.vlgmr.msra.gmra.mrb[24].mxu1 %v2058_v9 }
 0x442   :  { %2143 = vmatpush1.bf16.msra.mxu0 %v4728_v34  ;;  %2174 = vmatprep.mubr.bf16.mxu0 %v2059_v7  ;;  %v3346_v34 = vld [vmem:[%s5197_s3 + $0x134] ss:$24 sps:$4 sm:$0xff]  }
 0x443   :  { %2144 = vmatprep.subr.bf16.mxu0 %v4734_v19  ;;  %v3347_v19 = vld [vmem:[%s5197_s3 + $0x130] ss:$24 sps:$4 sm:$0xff]  }
 0x445   :  { %v4981_v33 = vld [vmem:[#allocation5 + $0x2] sm:$0x3] }
 0x446   :  { %2145 = vmatpush1.bf16.msra.mxu0 %v4742_v50  ;;  %v2280_v13 = vmul.f32 %v4986_v11, %v4981_v33  ;;  %v3348_v50 = vld [vmem:[%s5197_s3 + $0x164] ss:$24 sps:$4 sm:$0xff]  }
 0x447   :  { %2146 = vmatprep.subr.bf16.mxu0 %v4748_v54  ;;  %v3349_v54 = vld [vmem:[%s5197_s3 + $0x160] ss:$24 sps:$4 sm:$0xff]  }
 0x448   :  { %v2286_v24 = vsel %vm886_vm0, %v2280_v13, 0.0 }
 0x449   :  { %2287 = vadd.xlane.f32.xlu1 %v2286_v24 }
 0x44a   :  { %2147 = vmatpush1.bf16.msra.mxu0 %v4756_v57  ;;  %v3350_v57 = vld [vmem:[%s5197_s3 + $0x194] ss:$24 sps:$4 sm:$0xff]  }
 0x44b   :  { %2148 = vmatprep.subr.bf16.mxu0 %v4762_v18  ;;  %v3351_v18 = vld [vmem:[%s5197_s3 + $0x190] ss:$24 sps:$4 sm:$0xff]  }
 0x44e   :  { %2149 = vmatpush1.bf16.msra.mxu0 %v4770_v45  ;;  %v3352_v45 = vld [vmem:[%s5197_s3 + $0x1c4] ss:$24 sps:$4 sm:$0xff]  }
 0x44f   :  { %2150 = vmatprep.subr.bf16.mxu0 %v4776_v46  ;;  %v3353_v46 = vld [vmem:[%s5197_s3 + $0x1c0] ss:$24 sps:$4 sm:$0xff]  }
 0x452   :  { %2151 = vmatpush1.bf16.msra.mxu0 %v4784_v44  ;;  %v3354_v44 = vld [vmem:[%s5197_s3 + $0x1f4] ss:$24 sps:$4 sm:$0xff]  }
 0x453   :  { %2152 = vmatprep.subr.bf16.mxu0 %v4790_v53  ;;  %v3355_v53 = vld [vmem:[%s5197_s3 + $0x1f0] ss:$24 sps:$4 sm:$0xff]  }
 0x456   :  { %2153 = vmatpush1.bf16.msra.mxu0 %v4798_v30  ;;  %v3356_v30 = vld [vmem:[%s5197_s3 + $0x224] ss:$24 sps:$4 sm:$0xff]  }
 0x457   :  { %2154 = vmatprep.subr.bf16.mxu0 %v3346_v34 }
 0x45a   :  { %2155 = vmatpush1.bf16.msra.mxu0 %v3347_v19 }
 0x45b   :  { %2156 = vmatprep.subr.bf16.mxu0 %v3348_v50 }
 0x45e   :  { %2157 = vmatpush1.bf16.msra.mxu0 %v3349_v54  ;;  %v5067_v54 = vld [vmem:[#allocation5 + $0x6] sm:$0x3] }
 0x45f   :  { %2158 = vmatprep.subr.bf16.mxu0 %v3350_v57 }
 0x462   :  { %2159 = vmatpush1.bf16.msra.mxu0 %v3351_v18 }
 0x463   :  { %2160 = vmatprep.subr.bf16.mxu0 %v3352_v45  ;;  %v2282_v45 = vmul.f32 %v4986_v11, %v5067_v54 }
 0x466   :  { %2161 = vmatpush1.bf16.msra.mxu0 %v3353_v46 }
 0x467   :  { %2162 = vmatprep.subr.bf16.mxu0 %v3354_v44 }
 0x46a   :  { %2163 = vmatpush1.bf16.msra.mxu0 %v3355_v53  ;;  %v2220_v53 = vrot.slane %v2211_v14, 2 }
 0x46b   :  { %2164 = vmatprep.subr.bf16.mxu0 %v3356_v30 }
 0x46e   :  { %2165 = vmatpush1.bf16.msra.mxu0 %v3357_v29 }
 0x46f   :  { %2166 = vmatprep.subr.bf16.mxu0 %v3358_v41 }
 0x472   :  { %2167 = vmatpush1.bf16.msra.mxu0 %v3359_v28 }
 0x473   :  { %2168 = vmatprep.subr.bf16.mxu0 %v3360_v47 }
 0x476   :  { %2169 = vmatpush1.bf16.msra.mxu0 %v3361_v3 }
 0x477   :  { %2170 = vmatprep.subr.bf16.mxu0 %v3362_v51 }
 0x47a   :  { %2171 = vmatpush1.bf16.msra.mxu0 %v3363_v56  ;;  %v2230_v56 = vrot.slane %v2211_v14, 4 }
 0x47b   :  { %2172 = vmatprep.subr.bf16.mxu0 %v3364_v48 }
 0x47e   :  { %2173 = vmatpush1.bf16.msra.mxu0 %v3365_v60 }
 0x481   :  { %2175 = vmatmul.mubr.bf16.vlgmr.msra.gmra.mrb[28].mxu0 %v2058_v9 }
 0x514   :  { %v2094_v43 = vpop.f32.mrb[24].mxu0  ;;  %v2135_v22 = vpop.f32.mrb[24].mxu1 }
 0x515   :  { %v2095_v32 = vadd.f32 %v2094_v43, %v4437_v55  ;;  %v2096_v62 = vpop.f32.mrb[25].mxu0  ;;  %v2137_v2 = vpop.f32.mrb[25].mxu1 }
 0x516   :  { %v2097_v4 = vadd.f32 %v2096_v62, %v4442_v31  ;;  %v2098_v49 = vpop.f32.mrb[26].mxu0  ;;  %v2139_v6 = vpop.f32.mrb[26].mxu1  ;;  %v2138_v63 = vadd.f32 %v2137_v2, %v4451_v40  ;;  %v2136_v31 = vadd.f32 %v2135_v22, %v4447_v1 }
 0x517   :  { %v2185_v8 = vadd.f32 %v2184_v35, %v2095_v32  ;;  %v2099_v58 = vpop.f32.mrb[27].mxu0  ;;  %v2140_v12 = vpop.f32.mrb[27].mxu1 }
 0x518   :  { %v2195_v23 = vadd.f32 %v2193_v16, %v2097_v4  ;;  %v2212_v27 = vadd.f32 %v2211_v14, %v2138_v63  ;;  %v5080_v4 = vld [vmem:[#allocation5 + $0x4] sm:$0x3]  ;;  %v3394_v12 = vmov 0.0   ;;  %v3166_v16 = vld [vmem:[%s5202_s8 + $0x8] sm:$0xff]   ;;  %v2263_v63 = vpop.xlane.xlu0 %2262 }
 0x519   :  { %v2790_v21 = vmul.f32 -1.442695, %v2185_v8  ;;  %v2281_v8 = vmul.f32 %v4986_v11, %v5080_v4  ;;  %2831 = vmatprep.subr.bf16.mxu1 %v3394_v12  ;;  %2847 = vmatprep.mubr.msk.bf16.mxu1 %vm3395_vm1, %v3394_v12 }
 0x51a   :  { %v2791_v25 = vmul.f32 -1.442695, %v2195_v23  ;;  %v2792_v5 = vmul.f32 -1.442695, %v2212_v27  ;;  %v3169_v23 = vld [vmem:[%s5202_s8 + $0x20] sm:$0xff]  }
 0x51b   :  { %3241 = vpow2.f32 %v2790_v21  ;;  %v2289_v58 = vsel %vm886_vm0, %v2281_v8, 0.0  ;;  %v3168_v21 = vld [vmem:[%s5202_s8 + $0x18] sm:$0xff]  }
 0x51c   :  { %3243 = vpow2.f32 %v2791_v25  ;;  %v3170_v25 = vld [vmem:[%s5202_s8 + $0x28] sm:$0xff]  }
 0x525   :  { %v3242_v38 = vpop.eup %3241 }
 0x526   :  { %v2189_v15 = vadd.f32 1.0, %v3242_v38  ;;  %v3244_v55 = vpop.eup %3243  ;;  %v3171_v38 = vld [vmem:[%s5202_s8 + $0x30] sm:$0xff]  }
 0x527   :  { %v2199_v61 = vadd.f32 1.0, %v3244_v55  ;;  %v2269_v55 = vpop.xlane.xlu1 %2268 }
 0x528   :  { %3245 = vrcp.f32 %v2189_v15  ;;  %v3172_v15 = vld [vmem:[%s5202_s8 + $0x38] sm:$0xff]  }
 0x529   :  { %3247 = vrcp.f32 %v2199_v61 }
 0x52b   :  { %v2288_v61 = vpop.xlane.xlu1 %2287 }
 0x532   :  { %v3246_v26 = vpop.eup %3245 }
 0x533   :  { %v2202_v10 = vmul.f32 %v3246_v26, %v2136_v31  ;;  %v3248_v7 = vpop.eup %3247  ;;  %v2266_v26 = vpop.xlane.xlu0 %2265 }
 0x534   :  { %v2207_v9 = vsub.f32 1.0, %v3248_v7  ;;  %v2209_v34 = vmul.f32 %v3248_v7, %v4961_v20  ;;  %v2292_v20 = vsel %vm886_vm0, %v2282_v45, 0.0  ;;  %v2296_v27 = vadd.f32 %v2288_v61, %v2266_v26 }
 0x535   :  { %v2205_v42 = vadd.f32 %v2203_v59, %v2202_v10 }
 0x537   :  { %3249 = vtanh.f32 %v2205_v42 }
 0x538   :  { %3251 = vpow2.f32 %v2792_v5 }
 0x541   :  { %v3250_v13 = vpop.eup %3249 }
 0x542   :  { %v2208_v24 = vmul.f32 %v3250_v13, %v2207_v9  ;;  %v3252_v40 = vpop.eup %3251  ;;  %v2300_v13 = vsel %vm886_vm0, %v2296_v27, -inf }
 0x543   :  { %v2216_v1 = vadd.f32 1.0, %v3252_v40 }
 0x544   :  { %v2210_v19 = vadd.f32 %v2209_v34, %v2208_v24 }
 0x545   :  { %3253 = vrcp.f32 %v2216_v1 }
 0x546   :  { %2239 = vst [vmem:[#allocation4 + $0x6] sm:$0x3] %v2210_v19 }
 0x54d   :  { %v5065_v50 = vld [vmem:[#allocation4 + $0x6] sm:$0x3] }
 0x54e   :  { %v2260_v57 = vmul.f32 %v4468_v17, %v5065_v50 }
 0x54f   :  { %v3254_v28 = vpop.eup %3253 }
 0x550   :  { %v2270_v18 = vsel %vm886_vm0, %v2260_v57, 0.0 }
 0x551   :  { %2271 = vadd.xlane.f32.xlu1 %v2270_v18 }
 0x554   :  { %v2176_v46 = vpop.f32.mrb[28].mxu0 }
 0x555   :  { %v2177_v44 = vadd.f32 %v2176_v46, %v4453_v36  ;;  %v2178_v30 = vpop.f32.mrb[29].mxu0  ;;  %2293 = vadd.xlane.f32.xlu1 %v2292_v20 }
 0x556   :  { %v2179_v29 = vadd.f32 %v2178_v30, %v4463_v39  ;;  %v2180_v41 = vpop.f32.mrb[30].mxu0 }
 0x557   :  { %v2222_v47 = vadd.f32 %v2220_v53, %v2177_v44  ;;  %v2181_v17 = vpop.f32.mrb[31].mxu0 }
 0x558   :  { %v2229_v3 = vmul.f32 %v3254_v28, %v2179_v29 }
 0x559   :  { %v2793_v51 = vmul.f32 -1.442695, %v2222_v47 }
 0x55a   :  { %v2232_v43 = vadd.f32 %v2230_v56, %v2229_v3 }
 0x55b   :  { %3255 = vpow2.f32 %v2793_v51 }
 0x565   :  { %v3256_v48 = vpop.eup %3255 }
 0x566   :  { %v2226_v60 = vadd.f32 1.0, %v3256_v48 }
 0x568   :  { %3257 = vrcp.f32 %v2226_v60 }
 0x569   :  { %3259 = vtanh.f32 %v2232_v43 }
 0x572   :  { %v3258_v22 = vpop.eup %3257 }
 0x573   :  { %v2234_v36 = vsub.f32 1.0, %v3258_v22  ;;  %v3260_v32 = vpop.eup %3259  ;;  %v2236_v35 = vmul.f32 %v3258_v22, %v4972_v37  ;;  %v3165_v37 = vld [vmem:[%s5202_s8] sm:$0xff]  }
 0x574   :  { %2832 = vmatpush3.bf16.msra.mxu1 %v3165_v37 }
 0x575   :  { %v2235_v62 = vmul.f32 %v3260_v32, %v2234_v36  ;;  %2833 = vmatprep.subr.bf16.mxu1 %v3394_v12 }
 0x577   :  { %v2237_v39 = vadd.f32 %v2236_v35, %v2235_v62 }
 0x578   :  { %2834 = vmatpush3.bf16.msra.mxu1 %v3166_v16 }
 0x579   :  { %2240 = vst [vmem:[#allocation5] sm:$0x3] %v2237_v39  ;;  %2835 = vmatprep.subr.bf16.mxu1 %v3394_v12 }
 0x580   :  { %v5078_v2 = vld [vmem:[#allocation5] sm:$0x3] }
 0x581   :  { %v2279_v49 = vmul.f32 %v4986_v11, %v5078_v2  ;;  %v3167_v11 = vld [vmem:[%s5202_s8 + $0x10] sm:$0xff]  }
 0x582   :  { %2836 = vmatpush3.bf16.msra.mxu1 %v3167_v11 }
 0x583   :  { %v2283_v6 = vsel %vm886_vm0, %v2279_v49, 0.0  ;;  %2837 = vmatprep.subr.bf16.mxu1 %v3394_v12 }
 0x584   :  { %2284 = vadd.xlane.f32.xlu0 %v2283_v6 }
 0x586   :  { %2838 = vmatpush3.bf16.msra.mxu1 %v3168_v21 }
 0x587   :  { %2839 = vmatprep.subr.bf16.mxu1 %v3394_v12 }
 0x588   :  { %2290 = vadd.xlane.f32.xlu0 %v2289_v58 }
 0x58a   :  { %2840 = vmatpush3.bf16.msra.mxu1 %v3169_v23 }
 0x58b   :  { %2841 = vmatprep.subr.bf16.mxu1 %v3394_v12 }
 0x58e   :  { %2842 = vmatpush3.bf16.msra.mxu1 %v3170_v25 }
 0x58f   :  { %2843 = vmatprep.subr.bf16.mxu1 %v3394_v12 }
 0x592   :  { %2844 = vmatpush3.bf16.msra.mxu1 %v3171_v38  ;;  %v3176_v38 = vld [vmem:[%s5201_s7 + $0x18] sm:$0xff]  }
 0x593   :  { %2845 = vmatprep.subr.bf16.mxu1 %v3394_v12 }
 0x596   :  { %2846 = vmatpush3.bf16.msra.mxu1 %v3172_v15  ;;  %v3366_v15 = vld [vmem:[#allocation4] sm:$0x3] }
 0x597   :  { %2851 = vmatprep.subr.bf16.mxu1 %v3394_v12 }
 0x5de   :  { %v2272_v31 = vpop.xlane.xlu1 %2271 }
 0x5e2   :  { %v2294_v10 = vpop.xlane.xlu1 %2293 }
 0x5e3   :  { %v2298_v42 = vadd.f32 %v2294_v10, %v2272_v31  ;;  %v3178_v10 = vld [vmem:[%s5201_s7 + $0x28] sm:$0xff]  }
 0x5e5   :  { %v2302_v24 = vsel %vm886_vm0, %v2298_v42, -inf }
 0x611   :  { %v2285_v59 = vpop.xlane.xlu0 %2284 }
 0x612   :  { %v2295_v14 = vadd.f32 %v2285_v59, %v2263_v63  ;;  %v3177_v63 = vld [vmem:[%s5201_s7 + $0x20] sm:$0xff]  }
 0x614   :  { %v2299_v7 = vsel %vm886_vm0, %v2295_v14, -inf }
 0x615   :  { %v2291_v5 = vpop.xlane.xlu0 %2290  ;;  %v2303_v19 = vmax.f32 %v2299_v7, %v2300_v13 }
 0x616   :  { %v2297_v9 = vadd.f32 %v2291_v5, %v2269_v55 }
 0x618   :  { %v2301_v34 = vsel %vm886_vm0, %v2297_v9, -inf }
 0x619   :  { %v2304_v40 = vmax.f32 %v2301_v34, %v2302_v24 }
 0x61b   :  { %v2305_v1 = vmax.f32 %v2303_v19, %v2304_v40 }
 0x61d   :  { %v2306_v57 = vsub.f32 %v2295_v14, %v2305_v1  ;;  %v2307_v18 = vsub.f32 %v2296_v27, %v2305_v1  ;;  %v2308_v45 = vsub.f32 %v2297_v9, %v2305_v1  ;;  %v2309_v46 = vsub.f32 %v2298_v42, %v2305_v1  ;;  %v3179_v14 = vld [vmem:[%s5201_s7 + $0x30] sm:$0xff]   ;;  %v2812_v1 = vld [vmem:[%s5203_s9] ss:$0 sm:$0xff] }
 0x61f   :  { %v2310_v20 = vmul.f32 1.442695, %v2306_v57  ;;  %v2312_v44 = vmul.f32 1.442695, %v2307_v18  ;;  %v2314_v53 = vmul.f32 1.442695, %v2308_v45 }
 0x620   :  { %v2316_v30 = vmul.f32 1.442695, %v2309_v46 }
 0x621   :  { %3261 = vpow2.f32 %v2310_v20 }
 0x622   :  { %3263 = vpow2.f32 %v2312_v44 }
 0x623   :  { %3265 = vpow2.f32 %v2314_v53 }
 0x624   :  { %3267 = vpow2.f32 %v2316_v30 }
 0x62b   :  { %v3262_v29 = vpop.eup %3261 }
 0x62c   :  { %v3264_v41 = vpop.eup %3263  ;;  %v2318_v28 = vsel %vm886_vm0, %v3262_v29, 0.0 }
 0x62d   :  { %v3266_v47 = vpop.eup %3265  ;;  %v2319_v17 = vsel %vm886_vm0, %v3264_v41, 0.0 }
 0x62e   :  { %v3268_v3 = vpop.eup %3267  ;;  %v2320_v51 = vadd.f32 %v2319_v17, %v2318_v28  ;;  %v2321_v56 = vsel %vm886_vm0, %v3266_v47, 0.0 }
 0x62f   :  { %v2323_v60 = vsel %vm886_vm0, %v3268_v3, 0.0 }
 0x630   :  { %v2322_v48 = vadd.f32 %v2321_v56, %v2320_v51 }
 0x632   :  { %v2324_v43 = vadd.f32 %v2323_v60, %v2322_v48 }
 0x634   :  { %3269 = vrcp.f32 %v2324_v43 }
 0x63e   :  { %v3270_v22 = vpop.eup %3269 }
 0x63f   :  { %v2328_v36 = vmul.f32 %v3270_v22, %v3266_v47  ;;  %v2326_v32 = vmul.f32 %v3270_v22, %v3262_v29  ;;  %v2327_v35 = vmul.f32 %v3270_v22, %v3264_v41  ;;  %v2329_v62 = vmul.f32 %v3270_v22, %v3268_v3 }
 0x641   :  { %v2341_v39 = vmul.f32 %v2326_v32, %v5078_v2  ;;  %v2342_v49 = vmul.f32 %v2327_v35, %v4981_v33  ;;  %v2343_v6 = vmul.f32 %v2328_v36, %v5080_v4  ;;  %v2344_v8 = vmul.f32 %v2329_v62, %v5067_v54  ;;  %v3173_v2 = vld [vmem:[%s5201_s7] sm:$0xff]   ;;  %v3174_v54 = vld [vmem:[%s5201_s7 + $0x8] sm:$0xff]   ;;  %v3175_v4 = vld [vmem:[%s5201_s7 + $0x10] sm:$0xff]  }
 0x642   :  { %v2330_v55 = vmul.f32 %v3366_v15, %v2326_v32  ;;  %v2331_v61 = vmul.f32 %v2327_v35, %v4706_v52  ;;  %v2332_v59 = vmul.f32 %v2328_v36, %v4964_v0  ;;  %v2333_v27 = vmul.f32 %v2329_v62, %v5065_v50  ;;  %v3180_v0 = vld [vmem:[%s5201_s7 + $0x38] sm:$0xff]   ;;  %s3367_s7 = scalar_lea.vmem %s2579_s2, 32 }
 0x643   :  { %v2345_v58 = vsel %vm886_vm0, %v2341_v39, 0.0  ;;  %v2346_v37 = vsel %vm886_vm0, %v2342_v49, 0.0  ;;  %v2348_v11 = vsel %vm886_vm0, %v2343_v6, 0.0  ;;  %v2350_v23 = vsel %vm886_vm0, %v2344_v8, 0.0  ;;  %p3368_p0 = scmp.ne.s32.totalorder %s2579_s2, %s3367_s7  ;;  %p3373_p2 = scmp.lt.s32.totalorder %s3367_s7, %s3367_s7 }
 0x644   :  { %v2347_v16 = vadd.f32 %v2346_v37, %v2345_v58  ;;  %v2334_v31 = vsel %vm886_vm0, %v2330_v55, 0.0  ;;  %v2335_v26 = vsel %vm886_vm0, %v2331_v61, 0.0  ;;  %v2337_v42 = vsel %vm886_vm0, %v2332_v59, 0.0 }
 0x645   :  { %v2336_v52 = vadd.f32 %v2335_v26, %v2334_v31  ;;  %v2339_v7 = vsel %vm886_vm0, %v2333_v27, 0.0  ;;  %p3374_p3 = por %p3373_p2, %p3372_p1 }
 0x646   :  { %v2349_v21 = vadd.f32 %v2348_v11, %v2347_v16 }
 0x647   :  { %v2338_v5 = vadd.f32 %v2337_v42, %v2336_v52  ;;  %p3375_p4 = pnand %p3374_p3, %p3368_p0 }
 0x648   :  { %v2351_v25 = vadd.f32 %v2350_v23, %v2349_v21 }
 0x649   :  { %v2340_v9 = vadd.f32 %v2339_v7, %v2338_v5 }
 0x64a   :  { %v2369_v33 = vpack.c.bf16 %v2351_v25, %v2351_v25 }
 0x64b   :  { %v2352_v13 = vpack.c.bf16 %v2340_v9, %v2340_v9 }
 0x64c   :  { %2848 = vmatmul.mubr.bf16.vlgmr.msra.gmra.mrb[28].mxu1 %v2369_v33 }
 0x64d   :  { %2852 = vmatpush3.bf16.msra.mxu1 %v3173_v2  ;;  %2867 = vmatprep.mubr.msk.bf16.mxu1 %vm3395_vm1, %v3394_v12 }
 0x64e   :  { %2853 = vmatprep.subr.bf16.mxu1 %v3394_v12 }
 0x651   :  { %2854 = vmatpush3.bf16.msra.mxu1 %v3174_v54 }
 0x652   :  { %2855 = vmatprep.subr.bf16.mxu1 %v3394_v12 }
 0x655   :  { %2856 = vmatpush3.bf16.msra.mxu1 %v3175_v4 }
 0x656   :  { %2857 = vmatprep.subr.bf16.mxu1 %v3394_v12 }
 0x659   :  { %2858 = vmatpush3.bf16.msra.mxu1 %v3176_v38 }
 0x65a   :  { %2859 = vmatprep.subr.bf16.mxu1 %v3394_v12 }
 0x65d   :  { %2860 = vmatpush3.bf16.msra.mxu1 %v3177_v63 }
 0x65e   :  { %2861 = vmatprep.subr.bf16.mxu1 %v3394_v12 }
 0x661   :  { %2862 = vmatpush3.bf16.msra.mxu1 %v3178_v10 }
 0x662   :  { %2863 = vmatprep.subr.bf16.mxu1 %v3394_v12 }
 0x665   :  { %2864 = vmatpush3.bf16.msra.mxu1 %v3179_v14 }
 0x666   :  { %2865 = vmatprep.subr.bf16.mxu1 %v3394_v12 }
 0x669   :  { %2866 = vmatpush3.bf16.msra.mxu1 %v3180_v0 }
 0x66c   :  { %2868 = vmatmul.mubr.bf16.vlgmr.msra.gmra.mrb[32].mxu1 %v2352_v13 }
 0x71f   :  { %v2468_v24 = vpop.f32.mrb[28].mxu1 }
 0x720   :  { %v2849_v50 = vpop.f32.mrb[29].mxu1 }
 0x721   :  { %v2471_v34 = vpop.f32.mrb[30].mxu1 }
 0x722   :  { %v2850_v19 = vpop.f32.mrb[31].mxu1 }
 0x73f   :  { %v2556_v40 = vpop.f32.mrb[32].mxu1 }
 0x740   :  { %v2557_v57 = vadd.f32 %v2556_v40, %v2468_v24  ;;  %v2869_v18 = vpop.f32.mrb[33].mxu1 }
 0x741   :  { %v2559_v45 = vpop.f32.mrb[34].mxu1 }
 0x742   :  { %v2569_v12 = vadd.f32 %v2812_v1, %v2557_v57  ;;  %v2870_v46 = vpop.f32.mrb[35].mxu1 }
 0x744   :  { %2571 = vst.msk [vmem:[#allocation6] sm:$0x3] %vm2570_vm2, %v2569_v12 }
 0x745   :  { %3378 = shalt.err (!%p3375_p4)
}
 0x746   :  { %s3379_s9 = scalar_lea.hbm %s5204_s10, 32 }
 0x747   :  { %p3380_p5 = scmp.ne.s32.totalorder %s5204_s10, %s3379_s9  ;;  %p3383_p6 = scmp.lt.u32.totalorder %s3379_s9, %s5204_s10 }
 0x749   :  { %p3385_p7 = pnand %p3383_p6, %p3380_p5 }
 0x74b   :  { %3388 = shalt.err (!%p3385_p7)
}
 0x74c   :  { %2581 = dma.vmem_to_hbm [thread:$0]  %s2579_s2, 32, %s5204_s10, [#allocation7]  }
 0x74d   :  { %3389 = dma.done.wait [#allocation7], 32  }
 0x74e   :  { %3390 = vsyncadd [#allocation7], 4294967264 }
 0x74f   :  { %2585 = vsyncpa [#allocation7], 1 }

</bundles_post_ra>
